<compile_context>
chip_gen: v7x
topology: tpu7x:2x2x1
jax: 0.10.0
libtpu: 0.0.40
codegen_flags: <defaults>
</compile_context>

<pallas_src>
import jax
import jax.numpy as jnp
import numpy as np
from jax import lax
from jax.experimental import pallas as pl
from jax.experimental.pallas import tpu as pltpu


# ----------------------------- GRU kernel ------------------------------------
def _gru_kernel(x_ref, wih_ref, whh_ref, bih_ref, bhh_ref, h_out_ref, gi_scr):
    T, B, _ = x_ref.shape
    H = whh_ref.shape[0]

    # Input projection for ALL timesteps at once (single fat matmul, off the
    # serial dependency chain).  gi_scr: (T, B, 3H) in VMEM.
    gi_scr[...] = (
        jnp.einsum('tbf,fg->tbg', x_ref[...], wih_ref[...],
                   preferred_element_type=jnp.float32)
        + bih_ref[...]
    )

    def step(t, h):
        gi = gi_scr[t]                                            # (B, 3H)
        gh = jnp.dot(h, whh_ref[...],
                     preferred_element_type=jnp.float32) + bhh_ref[...]
        r = jax.nn.sigmoid(gi[:, :H] + gh[:, :H])
        z = jax.nn.sigmoid(gi[:, H:2 * H] + gh[:, H:2 * H])
        n = jnp.tanh(gi[:, 2 * H:] + r * gh[:, 2 * H:])
        return (1.0 - z) * n + z * h

    h_last = lax.fori_loop(0, T, step, jnp.zeros((B, H), jnp.float32),
                           unroll=True)
    h_out_ref[...] = h_last


def gru_last_hidden(x_tbf, wihT, whhT, bih, bhh):
    T, B, _ = x_tbf.shape
    H = whhT.shape[0]
    return pl.pallas_call(
        _gru_kernel,
        out_shape=jax.ShapeDtypeStruct((B, H), jnp.float32),
        scratch_shapes=[pltpu.VMEM((T, B, 3 * H), jnp.float32)],
    )(x_tbf, wihT, whhT, bih.reshape(1, 1, -1), bhh.reshape(1, -1))


# --------------- fused Conv1d+BN+ReLU x3 + mean + FC head kernel --------------
def _conv_head_kernel(x_ref, h_ref,
                      w1_ref, s1_ref, t1_ref,
                      w2_ref, s2_ref, t2_ref,
                      w3_ref, s3_ref, t3_ref,
                      fw1_ref, fw2_ref, fb_ref,
                      o_ref):
    xv = x_ref[...]                                   # (T, B, F), time-major
    B = xv.shape[1]
    # channels-last (B, L, F) without a 3-D transpose: per-batch slice + stack.
    y = jnp.stack([xv[:, b, :] for b in range(B)], axis=0)

    def conv_block(y, w_ref, s_ref, t_ref):
        # y: (B, L_in, C_in); w_ref: (K, C_in, C_out); scale/shift: (1,1,C_out)
        K = w_ref.shape[0]
        L_out = y.shape[1] - K + 1
        acc = jnp.einsum('blc,cd->bld', y[:, 0:L_out, :], w_ref[0],
                         preferred_element_type=jnp.float32)
        for k in range(1, K):
            acc = acc + jnp.einsum('blc,cd->bld', y[:, k:k + L_out, :],
                                   w_ref[k],
                                   preferred_element_type=jnp.float32)
        # conv bias + BatchNorm(eval) folded into scale/shift, then ReLU.
        return jnp.maximum(acc * s_ref[...] + t_ref[...], 0.0)

    y = conv_block(y, w1_ref, s1_ref, t1_ref)
    y = conv_block(y, w2_ref, s2_ref, t2_ref)
    y = conv_block(y, w3_ref, s3_ref, t3_ref)          # (B, L3, C3)

    conv_mean = jnp.mean(y, axis=1)                    # (B, C3) == torch.mean(x2, 2)
    out = jnp.dot(h_ref[...], fw1_ref[...], preferred_element_type=jnp.float32)
    out = out + jnp.dot(conv_mean, fw2_ref[...],
                        preferred_element_type=jnp.float32)
    o_ref[...] = out + fb_ref[...]


def conv_head(x_tbf, h_last, w1k, s1, t1, w2k, s2, t2, w3k, s3, t3,
              fcW1T, fcW2T, fcb):
    B = x_tbf.shape[1]
    NC = fcW1T.shape[1]
    return pl.pallas_call(
        _conv_head_kernel,
        out_shape=jax.ShapeDtypeStruct((B, NC), jnp.float32),
        compiler_params=pltpu.CompilerParams(vmem_limit_bytes=32 * 1024 * 1024),
    )(x_tbf, h_last, w1k, s1, t1, w2k, s2, t2, w3k, s3, t3,
      fcW1T, fcW2T, fcb.reshape(1, -1))


# -------------------------------- main ----------------------------------------
if __name__ == "__main__":
    B, F, L = 2, 4, 24          # Batch, N_Features, SeqLen
    NC = 5                      # N_ClassesOut
    H = 128                     # N_GRU_Out
    C1, C2, C3 = 128, 256, 128  # Conv filter counts
    K1, K2, K3 = 8, 5, 3
    EPS = 1e-5

    key = jax.random.PRNGKey(0)
    ks = jax.random.split(key, 24)
    f32 = jnp.float32

    # ----- deterministic parameter init (PyTorch shapes) -----
    x = jax.random.normal(ks[0], (B, F, L), f32)

    wih = 0.1 * jax.random.normal(ks[1], (3 * H, F), f32)   # weight_ih_l0
    whh = 0.1 * jax.random.normal(ks[2], (3 * H, H), f32)   # weight_hh_l0
    bih = 0.1 * jax.random.normal(ks[3], (3 * H,), f32)
    bhh = 0.1 * jax.random.normal(ks[4], (3 * H,), f32)

    c1w = 0.1 * jax.random.normal(ks[5], (C1, F, K1), f32)
    c1b = 0.1 * jax.random.normal(ks[6], (C1,), f32)
    c2w = 0.1 * jax.random.normal(ks[7], (C2, C1, K2), f32)
    c2b = 0.1 * jax.random.normal(ks[8], (C2,), f32)
    c3w = 0.1 * jax.random.normal(ks[9], (C3, C2, K3), f32)
    c3b = 0.1 * jax.random.normal(ks[10], (C3,), f32)

    def bn_params(k, c):
        k1, k2, k3, k4 = jax.random.split(k, 4)
        g = 1.0 + 0.1 * jax.random.normal(k1, (c,), f32)
        b = 0.1 * jax.random.normal(k2, (c,), f32)
        m = 0.1 * jax.random.normal(k3, (c,), f32)
        v = 1.0 + 0.1 * jnp.abs(jax.random.normal(k4, (c,), f32))
        return g, b, m, v

    g1, be1, m1, v1 = bn_params(ks[11], C1)
    g2, be2, m2, v2 = bn_params(ks[12], C2)
    g3, be3, m3, v3 = bn_params(ks[13], C3)

    fcw = 0.1 * jax.random.normal(ks[14], (NC, C3 + H), f32)
    fcb = 0.1 * jax.random.normal(ks[15], (NC,), f32)

    # ----- kernel-side parameter layouts (one-time glue, trace-time) -----
    wihT = wih.T                                  # (F, 3H)
    whhT = whh.T                                  # (H, 3H)
    w1k = jnp.transpose(c1w, (2, 1, 0))           # (K, C_in, C_out)
    w2k = jnp.transpose(c2w, (2, 1, 0))
    w3k = jnp.transpose(c3w, (2, 1, 0))

    def fold_bn(conv_b, g, beta, m, v):
        # conv bias + eval-mode BatchNorm folded into per-channel scale/shift
        s = g / jnp.sqrt(v + EPS)
        t = (conv_b - m) * s + beta
        return s.reshape(1, 1, -1), t.reshape(1, 1, -1)

    s1, t1 = fold_bn(c1b, g1, be1, m1, v1)
    s2, t2 = fold_bn(c2b, g2, be2, m2, v2)
    s3, t3 = fold_bn(c3b, g3, be3, m3, v3)

    fcW1T = fcw[:, :H].T                          # GRU part (H, NC)
    fcW2T = fcw[:, H:].T                          # conv-mean part (C3, NC)

    # ----- Pallas forward: 2 kernel launches total -----
    @jax.jit
    def forward_pallas(x):
        x_tbf = jnp.transpose(x, (2, 0, 1))       # (T, B, F), shared by both
        x1 = gru_last_hidden(x_tbf, wihT, whhT, bih, bhh)        # (B, H)
        return conv_head(x_tbf, x1, w1k, s1, t1, w2k, s2, t2,
                         w3k, s3, t3, fcW1T, fcW2T, fcb)         # (B, NC)

    # ----- plain-JAX reference (eval-mode semantics) -----
    def forward_ref(x):
        def gru_ref(x_blf):
            def step(h, x_t):
                gi = x_t @ wih.T + bih
                gh = h @ whh.T + bhh
                r = jax.nn.sigmoid(gi[:, :H] + gh[:, :H])
                z = jax.nn.sigmoid(gi[:, H:2 * H] + gh[:, H:2 * H])
                n = jnp.tanh(gi[:, 2 * H:] + r * gh[:, 2 * H:])
                return (1.0 - z) * n + z * h, None
            h0 = jnp.zeros((B, H), f32)
            h_last, _ = lax.scan(step, h0, jnp.transpose(x_blf, (1, 0, 2)))
            return h_last

        def block(xc, W, b, g, bt, m, v):
            y = lax.conv_general_dilated(xc, W, (1,), 'VALID',
                                         dimension_numbers=('NCH', 'OIH', 'NCH'))
            y = y + b[None, :, None]
            y = (y - m[None, :, None]) / jnp.sqrt(v[None, :, None] + EPS)
            y = y * g[None, :, None] + bt[None, :, None]
            return jnp.maximum(y, 0.0)

        x1 = gru_ref(jnp.transpose(x, (0, 2, 1)))
        y = block(x, c1w, c1b, g1, be1, m1, v1)
        y = block(y, c2w, c2b, g2, be2, m2, v2)
        y = block(y, c3w, c3b, g3, be3, m3, v3)
        x2 = jnp.mean(y, axis=2)
        x_all = jnp.concatenate([x1, x2], axis=1)
        return x_all @ fcw.T + fcb

    out = jax.block_until_ready(forward_pallas(x))
    ref = jax.block_until_ready(forward_ref(x))
    np.testing.assert_allclose(np.asarray(out), np.asarray(ref), rtol=1e-3, atol=1e-4)
    print("KERNEL_OK")
</pallas_src>

<mosaic_0001>
module attributes {stable_mosaic.version = 11 : i64} {
  func.func @_conv_head_kernel(%arg0: memref<24x2x4xf32, #tpu.memory_space<vmem>>, %arg1: memref<2x128xf32, #tpu.memory_space<vmem>>, %arg2: memref<8x4x128xf32, #tpu.memory_space<vmem>>, %arg3: memref<1x1x128xf32, #tpu.memory_space<vmem>>, %arg4: memref<1x1x128xf32, #tpu.memory_space<vmem>>, %arg5: memref<5x128x256xf32, #tpu.memory_space<vmem>>, %arg6: memref<1x1x256xf32, #tpu.memory_space<vmem>>, %arg7: memref<1x1x256xf32, #tpu.memory_space<vmem>>, %arg8: memref<3x256x128xf32, #tpu.memory_space<vmem>>, %arg9: memref<1x1x128xf32, #tpu.memory_space<vmem>>, %arg10: memref<1x1x128xf32, #tpu.memory_space<vmem>>, %arg11: memref<128x5xf32, #tpu.memory_space<vmem>>, %arg12: memref<128x5xf32, #tpu.memory_space<vmem>>, %arg13: memref<1x5xf32, #tpu.memory_space<vmem>>, %arg14: memref<2x5xf32, #tpu.memory_space<vmem>>) attributes {dimension_semantics = [], scalar_prefetch = 0 : i64, scratch_operands = 0 : i64, tpu.core_type = #tpu.core_type<tc>} {
    %c0 = arith.constant 0 : index
    %c0_0 = arith.constant 0 : index
    %c0_1 = arith.constant 0 : index
    %0 = vector.load %arg0[%c0, %c0_0, %c0_1] : memref<24x2x4xf32, #tpu.memory_space<vmem>>, vector<24x2x4xf32>
    %1 = vector.extract_strided_slice %0 {offsets = [0, 0, 0], sizes = [24, 1, 4], strides = [1, 1, 1]} : vector<24x2x4xf32> to vector<24x1x4xf32>
    %2 = vector.shape_cast %1 : vector<24x1x4xf32> to vector<24x4xf32>
    %3 = vector.extract_strided_slice %0 {offsets = [0, 1, 0], sizes = [24, 1, 4], strides = [1, 1, 1]} : vector<24x2x4xf32> to vector<24x1x4xf32>
    %4 = vector.shape_cast %3 : vector<24x1x4xf32> to vector<24x4xf32>
    %5 = vector.shape_cast %2 : vector<24x4xf32> to vector<1x24x4xf32>
    %6 = vector.shape_cast %4 : vector<24x4xf32> to vector<1x24x4xf32>
    %7 = tpu.concatenate %5, %6 in 0 : vector<1x24x4xf32>, vector<1x24x4xf32> -> vector<2x24x4xf32>
    %8 = vector.extract_strided_slice %7 {offsets = [0, 0, 0], sizes = [2, 17, 4], strides = [1, 1, 1]} : vector<2x24x4xf32> to vector<2x17x4xf32>
    %c0_2 = arith.constant 0 : index
    %c0_3 = arith.constant 0 : index
    %c0_4 = arith.constant 0 : index
    %9 = vector.load %arg2[%c0_2, %c0_3, %c0_4] : memref<8x4x128xf32, #tpu.memory_space<vmem>>, vector<1x4x128xf32>
    %10 = vector.shape_cast %9 : vector<1x4x128xf32> to vector<4x128xf32>
    "tpu.trace_start"() <{level = 10 : i32, message = "blc,cd->bld"}> : () -> ()
    %cst = arith.constant dense<0.000000e+00> : vector<2x17x128xf32>
    %11 = tpu.matmul %8, %10, %cst {dimension_numbers = #tpu.dot_dimension_numbers<[2], [0], [0, 1], [1], [0, 0, 0, 1, 1, 1], [], []>} : vector<2x17x4xf32>, vector<4x128xf32>, vector<2x17x128xf32> -> vector<2x17x128xf32>
    "tpu.trace_stop"() : () -> ()
    %12 = vector.extract_strided_slice %7 {offsets = [0, 1, 0], sizes = [2, 17, 4], strides = [1, 1, 1]} : vector<2x24x4xf32> to vector<2x17x4xf32>
    %c1 = arith.constant 1 : index
    %c0_5 = arith.constant 0 : index
    %c0_6 = arith.constant 0 : index
    %13 = vector.load %arg2[%c1, %c0_5, %c0_6] : memref<8x4x128xf32, #tpu.memory_space<vmem>>, vector<1x4x128xf32>
    %14 = vector.shape_cast %13 : vector<1x4x128xf32> to vector<4x128xf32>
    "tpu.trace_start"() <{level = 10 : i32, message = "blc,cd->bld"}> : () -> ()
    %cst_7 = arith.constant dense<0.000000e+00> : vector<2x17x128xf32>
    %15 = tpu.matmul %12, %14, %cst_7 {dimension_numbers = #tpu.dot_dimension_numbers<[2], [0], [0, 1], [1], [0, 0, 0, 1, 1, 1], [], []>} : vector<2x17x4xf32>, vector<4x128xf32>, vector<2x17x128xf32> -> vector<2x17x128xf32>
    "tpu.trace_stop"() : () -> ()
    %16 = arith.addf %11, %15 : vector<2x17x128xf32>
    %17 = vector.extract_strided_slice %7 {offsets = [0, 2, 0], sizes = [2, 17, 4], strides = [1, 1, 1]} : vector<2x24x4xf32> to vector<2x17x4xf32>
    %c2 = arith.constant 2 : index
    %c0_8 = arith.constant 0 : index
    %c0_9 = arith.constant 0 : index
    %18 = vector.load %arg2[%c2, %c0_8, %c0_9] : memref<8x4x128xf32, #tpu.memory_space<vmem>>, vector<1x4x128xf32>
    %19 = vector.shape_cast %18 : vector<1x4x128xf32> to vector<4x128xf32>
    "tpu.trace_start"() <{level = 10 : i32, message = "blc,cd->bld"}> : () -> ()
    %cst_10 = arith.constant dense<0.000000e+00> : vector<2x17x128xf32>
    %20 = tpu.matmul %17, %19, %cst_10 {dimension_numbers = #tpu.dot_dimension_numbers<[2], [0], [0, 1], [1], [0, 0, 0, 1, 1, 1], [], []>} : vector<2x17x4xf32>, vector<4x128xf32>, vector<2x17x128xf32> -> vector<2x17x128xf32>
    "tpu.trace_stop"() : () -> ()
    %21 = arith.addf %16, %20 : vector<2x17x128xf32>
    %22 = vector.extract_strided_slice %7 {offsets = [0, 3, 0], sizes = [2, 17, 4], strides = [1, 1, 1]} : vector<2x24x4xf32> to vector<2x17x4xf32>
    %c3 = arith.constant 3 : index
    %c0_11 = arith.constant 0 : index
    %c0_12 = arith.constant 0 : index
    %23 = vector.load %arg2[%c3, %c0_11, %c0_12] : memref<8x4x128xf32, #tpu.memory_space<vmem>>, vector<1x4x128xf32>
    %24 = vector.shape_cast %23 : vector<1x4x128xf32> to vector<4x128xf32>
    "tpu.trace_start"() <{level = 10 : i32, message = "blc,cd->bld"}> : () -> ()
    %cst_13 = arith.constant dense<0.000000e+00> : vector<2x17x128xf32>
    %25 = tpu.matmul %22, %24, %cst_13 {dimension_numbers = #tpu.dot_dimension_numbers<[2], [0], [0, 1], [1], [0, 0, 0, 1, 1, 1], [], []>} : vector<2x17x4xf32>, vector<4x128xf32>, vector<2x17x128xf32> -> vector<2x17x128xf32>
    "tpu.trace_stop"() : () -> ()
    %26 = arith.addf %21, %25 : vector<2x17x128xf32>
    %27 = vector.extract_strided_slice %7 {offsets = [0, 4, 0], sizes = [2, 17, 4], strides = [1, 1, 1]} : vector<2x24x4xf32> to vector<2x17x4xf32>
    %c4 = arith.constant 4 : index
    %c0_14 = arith.constant 0 : index
    %c0_15 = arith.constant 0 : index
    %28 = vector.load %arg2[%c4, %c0_14, %c0_15] : memref<8x4x128xf32, #tpu.memory_space<vmem>>, vector<1x4x128xf32>
    %29 = vector.shape_cast %28 : vector<1x4x128xf32> to vector<4x128xf32>
    "tpu.trace_start"() <{level = 10 : i32, message = "blc,cd->bld"}> : () -> ()
    %cst_16 = arith.constant dense<0.000000e+00> : vector<2x17x128xf32>
    %30 = tpu.matmul %27, %29, %cst_16 {dimension_numbers = #tpu.dot_dimension_numbers<[2], [0], [0, 1], [1], [0, 0, 0, 1, 1, 1], [], []>} : vector<2x17x4xf32>, vector<4x128xf32>, vector<2x17x128xf32> -> vector<2x17x128xf32>
    "tpu.trace_stop"() : () -> ()
    %31 = arith.addf %26, %30 : vector<2x17x128xf32>
    %32 = vector.extract_strided_slice %7 {offsets = [0, 5, 0], sizes = [2, 17, 4], strides = [1, 1, 1]} : vector<2x24x4xf32> to vector<2x17x4xf32>
    %c5 = arith.constant 5 : index
    %c0_17 = arith.constant 0 : index
    %c0_18 = arith.constant 0 : index
    %33 = vector.load %arg2[%c5, %c0_17, %c0_18] : memref<8x4x128xf32, #tpu.memory_space<vmem>>, vector<1x4x128xf32>
    %34 = vector.shape_cast %33 : vector<1x4x128xf32> to vector<4x128xf32>
    "tpu.trace_start"() <{level = 10 : i32, message = "blc,cd->bld"}> : () -> ()
    %cst_19 = arith.constant dense<0.000000e+00> : vector<2x17x128xf32>
    %35 = tpu.matmul %32, %34, %cst_19 {dimension_numbers = #tpu.dot_dimension_numbers<[2], [0], [0, 1], [1], [0, 0, 0, 1, 1, 1], [], []>} : vector<2x17x4xf32>, vector<4x128xf32>, vector<2x17x128xf32> -> vector<2x17x128xf32>
    "tpu.trace_stop"() : () -> ()
    %36 = arith.addf %31, %35 : vector<2x17x128xf32>
    %37 = vector.extract_strided_slice %7 {offsets = [0, 6, 0], sizes = [2, 17, 4], strides = [1, 1, 1]} : vector<2x24x4xf32> to vector<2x17x4xf32>
    %c6 = arith.constant 6 : index
    %c0_20 = arith.constant 0 : index
    %c0_21 = arith.constant 0 : index
    %38 = vector.load %arg2[%c6, %c0_20, %c0_21] : memref<8x4x128xf32, #tpu.memory_space<vmem>>, vector<1x4x128xf32>
    %39 = vector.shape_cast %38 : vector<1x4x128xf32> to vector<4x128xf32>
    "tpu.trace_start"() <{level = 10 : i32, message = "blc,cd->bld"}> : () -> ()
    %cst_22 = arith.constant dense<0.000000e+00> : vector<2x17x128xf32>
    %40 = tpu.matmul %37, %39, %cst_22 {dimension_numbers = #tpu.dot_dimension_numbers<[2], [0], [0, 1], [1], [0, 0, 0, 1, 1, 1], [], []>} : vector<2x17x4xf32>, vector<4x128xf32>, vector<2x17x128xf32> -> vector<2x17x128xf32>
    "tpu.trace_stop"() : () -> ()
    %41 = arith.addf %36, %40 : vector<2x17x128xf32>
    %42 = vector.extract_strided_slice %7 {offsets = [0, 7, 0], sizes = [2, 17, 4], strides = [1, 1, 1]} : vector<2x24x4xf32> to vector<2x17x4xf32>
    %c7 = arith.constant 7 : index
    %c0_23 = arith.constant 0 : index
    %c0_24 = arith.constant 0 : index
    %43 = vector.load %arg2[%c7, %c0_23, %c0_24] : memref<8x4x128xf32, #tpu.memory_space<vmem>>, vector<1x4x128xf32>
    %44 = vector.shape_cast %43 : vector<1x4x128xf32> to vector<4x128xf32>
    "tpu.trace_start"() <{level = 10 : i32, message = "blc,cd->bld"}> : () -> ()
    %cst_25 = arith.constant dense<0.000000e+00> : vector<2x17x128xf32>
    %45 = tpu.matmul %42, %44, %cst_25 {dimension_numbers = #tpu.dot_dimension_numbers<[2], [0], [0, 1], [1], [0, 0, 0, 1, 1, 1], [], []>} : vector<2x17x4xf32>, vector<4x128xf32>, vector<2x17x128xf32> -> vector<2x17x128xf32>
    "tpu.trace_stop"() : () -> ()
    %46 = arith.addf %41, %45 : vector<2x17x128xf32>
    %c0_26 = arith.constant 0 : index
    %c0_27 = arith.constant 0 : index
    %c0_28 = arith.constant 0 : index
    %47 = vector.load %arg3[%c0_26, %c0_27, %c0_28] : memref<1x1x128xf32, #tpu.memory_space<vmem>>, vector<1x1x128xf32>
    %48 = vector.broadcast %47 : vector<1x1x128xf32> to vector<2x17x128xf32>
    %49 = arith.mulf %46, %48 : vector<2x17x128xf32>
    %c0_29 = arith.constant 0 : index
    %c0_30 = arith.constant 0 : index
    %c0_31 = arith.constant 0 : index
    %50 = vector.load %arg4[%c0_29, %c0_30, %c0_31] : memref<1x1x128xf32, #tpu.memory_space<vmem>>, vector<1x1x128xf32>
    %51 = vector.broadcast %50 : vector<1x1x128xf32> to vector<2x17x128xf32>
    %52 = arith.addf %49, %51 : vector<2x17x128xf32>
    %cst_32 = arith.constant 0.000000e+00 : f32
    %53 = vector.broadcast %cst_32 : f32 to vector<2x17x128xf32>
    %54 = arith.maximumf %52, %53 : vector<2x17x128xf32>
    %55 = vector.extract_strided_slice %54 {offsets = [0, 0, 0], sizes = [2, 13, 128], strides = [1, 1, 1]} : vector<2x17x128xf32> to vector<2x13x128xf32>
    %c0_33 = arith.constant 0 : index
    %c0_34 = arith.constant 0 : index
    %c0_35 = arith.constant 0 : index
    %56 = vector.load %arg5[%c0_33, %c0_34, %c0_35] : memref<5x128x256xf32, #tpu.memory_space<vmem>>, vector<1x128x256xf32>
    %57 = vector.shape_cast %56 : vector<1x128x256xf32> to vector<128x256xf32>
    "tpu.trace_start"() <{level = 10 : i32, message = "blc,cd->bld"}> : () -> ()
    %cst_36 = arith.constant dense<0.000000e+00> : vector<2x13x256xf32>
    %58 = tpu.matmul %55, %57, %cst_36 {dimension_numbers = #tpu.dot_dimension_numbers<[2], [0], [0, 1], [1], [0, 0, 0, 1, 1, 1], [], []>} : vector<2x13x128xf32>, vector<128x256xf32>, vector<2x13x256xf32> -> vector<2x13x256xf32>
    "tpu.trace_stop"() : () -> ()
    %59 = vector.extract_strided_slice %54 {offsets = [0, 1, 0], sizes = [2, 13, 128], strides = [1, 1, 1]} : vector<2x17x128xf32> to vector<2x13x128xf32>
    %c1_37 = arith.constant 1 : index
    %c0_38 = arith.constant 0 : index
    %c0_39 = arith.constant 0 : index
    %60 = vector.load %arg5[%c1_37, %c0_38, %c0_39] : memref<5x128x256xf32, #tpu.memory_space<vmem>>, vector<1x128x256xf32>
    %61 = vector.shape_cast %60 : vector<1x128x256xf32> to vector<128x256xf32>
    "tpu.trace_start"() <{level = 10 : i32, message = "blc,cd->bld"}> : () -> ()
    %cst_40 = arith.constant dense<0.000000e+00> : vector<2x13x256xf32>
    %62 = tpu.matmul %59, %61, %cst_40 {dimension_numbers = #tpu.dot_dimension_numbers<[2], [0], [0, 1], [1], [0, 0, 0, 1, 1, 1], [], []>} : vector<2x13x128xf32>, vector<128x256xf32>, vector<2x13x256xf32> -> vector<2x13x256xf32>
    "tpu.trace_stop"() : () -> ()
    %63 = arith.addf %58, %62 : vector<2x13x256xf32>
    %64 = vector.extract_strided_slice %54 {offsets = [0, 2, 0], sizes = [2, 13, 128], strides = [1, 1, 1]} : vector<2x17x128xf32> to vector<2x13x128xf32>
    %c2_41 = arith.constant 2 : index
    %c0_42 = arith.constant 0 : index
    %c0_43 = arith.constant 0 : index
    %65 = vector.load %arg5[%c2_41, %c0_42, %c0_43] : memref<5x128x256xf32, #tpu.memory_space<vmem>>, vector<1x128x256xf32>
    %66 = vector.shape_cast %65 : vector<1x128x256xf32> to vector<128x256xf32>
    "tpu.trace_start"() <{level = 10 : i32, message = "blc,cd->bld"}> : () -> ()
    %cst_44 = arith.constant dense<0.000000e+00> : vector<2x13x256xf32>
    %67 = tpu.matmul %64, %66, %cst_44 {dimension_numbers = #tpu.dot_dimension_numbers<[2], [0], [0, 1], [1], [0, 0, 0, 1, 1, 1], [], []>} : vector<2x13x128xf32>, vector<128x256xf32>, vector<2x13x256xf32> -> vector<2x13x256xf32>
    "tpu.trace_stop"() : () -> ()
    %68 = arith.addf %63, %67 : vector<2x13x256xf32>
    %69 = vector.extract_strided_slice %54 {offsets = [0, 3, 0], sizes = [2, 13, 128], strides = [1, 1, 1]} : vector<2x17x128xf32> to vector<2x13x128xf32>
    %c3_45 = arith.constant 3 : index
    %c0_46 = arith.constant 0 : index
    %c0_47 = arith.constant 0 : index
    %70 = vector.load %arg5[%c3_45, %c0_46, %c0_47] : memref<5x128x256xf32, #tpu.memory_space<vmem>>, vector<1x128x256xf32>
    %71 = vector.shape_cast %70 : vector<1x128x256xf32> to vector<128x256xf32>
    "tpu.trace_start"() <{level = 10 : i32, message = "blc,cd->bld"}> : () -> ()
    %cst_48 = arith.constant dense<0.000000e+00> : vector<2x13x256xf32>
    %72 = tpu.matmul %69, %71, %cst_48 {dimension_numbers = #tpu.dot_dimension_numbers<[2], [0], [0, 1], [1], [0, 0, 0, 1, 1, 1], [], []>} : vector<2x13x128xf32>, vector<128x256xf32>, vector<2x13x256xf32> -> vector<2x13x256xf32>
    "tpu.trace_stop"() : () -> ()
    %73 = arith.addf %68, %72 : vector<2x13x256xf32>
    %74 = vector.extract_strided_slice %54 {offsets = [0, 4, 0], sizes = [2, 13, 128], strides = [1, 1, 1]} : vector<2x17x128xf32> to vector<2x13x128xf32>
    %c4_49 = arith.constant 4 : index
    %c0_50 = arith.constant 0 : index
    %c0_51 = arith.constant 0 : index
    %75 = vector.load %arg5[%c4_49, %c0_50, %c0_51] : memref<5x128x256xf32, #tpu.memory_space<vmem>>, vector<1x128x256xf32>
    %76 = vector.shape_cast %75 : vector<1x128x256xf32> to vector<128x256xf32>
    "tpu.trace_start"() <{level = 10 : i32, message = "blc,cd->bld"}> : () -> ()
    %cst_52 = arith.constant dense<0.000000e+00> : vector<2x13x256xf32>
    %77 = tpu.matmul %74, %76, %cst_52 {dimension_numbers = #tpu.dot_dimension_numbers<[2], [0], [0, 1], [1], [0, 0, 0, 1, 1, 1], [], []>} : vector<2x13x128xf32>, vector<128x256xf32>, vector<2x13x256xf32> -> vector<2x13x256xf32>
    "tpu.trace_stop"() : () -> ()
    %78 = arith.addf %73, %77 : vector<2x13x256xf32>
    %c0_53 = arith.constant 0 : index
    %c0_54 = arith.constant 0 : index
    %c0_55 = arith.constant 0 : index
    %79 = vector.load %arg6[%c0_53, %c0_54, %c0_55] : memref<1x1x256xf32, #tpu.memory_space<vmem>>, vector<1x1x256xf32>
    %80 = vector.broadcast %79 : vector<1x1x256xf32> to vector<2x13x256xf32>
    %81 = arith.mulf %78, %80 : vector<2x13x256xf32>
    %c0_56 = arith.constant 0 : index
    %c0_57 = arith.constant 0 : index
    %c0_58 = arith.constant 0 : index
    %82 = vector.load %arg7[%c0_56, %c0_57, %c0_58] : memref<1x1x256xf32, #tpu.memory_space<vmem>>, vector<1x1x256xf32>
    %83 = vector.broadcast %82 : vector<1x1x256xf32> to vector<2x13x256xf32>
    %84 = arith.addf %81, %83 : vector<2x13x256xf32>
    %cst_59 = arith.constant 0.000000e+00 : f32
    %85 = vector.broadcast %cst_59 : f32 to vector<2x13x256xf32>
    %86 = arith.maximumf %84, %85 : vector<2x13x256xf32>
    %87 = vector.extract_strided_slice %86 {offsets = [0, 0, 0], sizes = [2, 11, 256], strides = [1, 1, 1]} : vector<2x13x256xf32> to vector<2x11x256xf32>
    %c0_60 = arith.constant 0 : index
    %c0_61 = arith.constant 0 : index
    %c0_62 = arith.constant 0 : index
    %88 = vector.load %arg8[%c0_60, %c0_61, %c0_62] : memref<3x256x128xf32, #tpu.memory_space<vmem>>, vector<1x256x128xf32>
    %89 = vector.shape_cast %88 : vector<1x256x128xf32> to vector<256x128xf32>
    "tpu.trace_start"() <{level = 10 : i32, message = "blc,cd->bld"}> : () -> ()
    %cst_63 = arith.constant dense<0.000000e+00> : vector<2x11x128xf32>
    %90 = tpu.matmul %87, %89, %cst_63 {dimension_numbers = #tpu.dot_dimension_numbers<[2], [0], [0, 1], [1], [0, 0, 0, 1, 1, 1], [], []>} : vector<2x11x256xf32>, vector<256x128xf32>, vector<2x11x128xf32> -> vector<2x11x128xf32>
    "tpu.trace_stop"() : () -> ()
    %91 = vector.extract_strided_slice %86 {offsets = [0, 1, 0], sizes = [2, 11, 256], strides = [1, 1, 1]} : vector<2x13x256xf32> to vector<2x11x256xf32>
    %c1_64 = arith.constant 1 : index
    %c0_65 = arith.constant 0 : index
    %c0_66 = arith.constant 0 : index
    %92 = vector.load %arg8[%c1_64, %c0_65, %c0_66] : memref<3x256x128xf32, #tpu.memory_space<vmem>>, vector<1x256x128xf32>
    %93 = vector.shape_cast %92 : vector<1x256x128xf32> to vector<256x128xf32>
    "tpu.trace_start"() <{level = 10 : i32, message = "blc,cd->bld"}> : () -> ()
    %cst_67 = arith.constant dense<0.000000e+00> : vector<2x11x128xf32>
    %94 = tpu.matmul %91, %93, %cst_67 {dimension_numbers = #tpu.dot_dimension_numbers<[2], [0], [0, 1], [1], [0, 0, 0, 1, 1, 1], [], []>} : vector<2x11x256xf32>, vector<256x128xf32>, vector<2x11x128xf32> -> vector<2x11x128xf32>
    "tpu.trace_stop"() : () -> ()
    %95 = arith.addf %90, %94 : vector<2x11x128xf32>
    %96 = vector.extract_strided_slice %86 {offsets = [0, 2, 0], sizes = [2, 11, 256], strides = [1, 1, 1]} : vector<2x13x256xf32> to vector<2x11x256xf32>
    %c2_68 = arith.constant 2 : index
    %c0_69 = arith.constant 0 : index
    %c0_70 = arith.constant 0 : index
    %97 = vector.load %arg8[%c2_68, %c0_69, %c0_70] : memref<3x256x128xf32, #tpu.memory_space<vmem>>, vector<1x256x128xf32>
    %98 = vector.shape_cast %97 : vector<1x256x128xf32> to vector<256x128xf32>
    "tpu.trace_start"() <{level = 10 : i32, message = "blc,cd->bld"}> : () -> ()
    %cst_71 = arith.constant dense<0.000000e+00> : vector<2x11x128xf32>
    %99 = tpu.matmul %96, %98, %cst_71 {dimension_numbers = #tpu.dot_dimension_numbers<[2], [0], [0, 1], [1], [0, 0, 0, 1, 1, 1], [], []>} : vector<2x11x256xf32>, vector<256x128xf32>, vector<2x11x128xf32> -> vector<2x11x128xf32>
    "tpu.trace_stop"() : () -> ()
    %100 = arith.addf %95, %99 : vector<2x11x128xf32>
    %c0_72 = arith.constant 0 : index
    %c0_73 = arith.constant 0 : index
    %c0_74 = arith.constant 0 : index
    %101 = vector.load %arg9[%c0_72, %c0_73, %c0_74] : memref<1x1x128xf32, #tpu.memory_space<vmem>>, vector<1x1x128xf32>
    %102 = vector.broadcast %101 : vector<1x1x128xf32> to vector<2x11x128xf32>
    %103 = arith.mulf %100, %102 : vector<2x11x128xf32>
    %c0_75 = arith.constant 0 : index
    %c0_76 = arith.constant 0 : index
    %c0_77 = arith.constant 0 : index
    %104 = vector.load %arg10[%c0_75, %c0_76, %c0_77] : memref<1x1x128xf32, #tpu.memory_space<vmem>>, vector<1x1x128xf32>
    %105 = vector.broadcast %104 : vector<1x1x128xf32> to vector<2x11x128xf32>
    %106 = arith.addf %103, %105 : vector<2x11x128xf32>
    %cst_78 = arith.constant 0.000000e+00 : f32
    %107 = vector.broadcast %cst_78 : f32 to vector<2x11x128xf32>
    %108 = arith.maximumf %106, %107 : vector<2x11x128xf32>
    %cst_79 = arith.constant dense<0.000000e+00> : vector<2x128xf32>
    %109 = vector.multi_reduction <add>, %108, %cst_79 [1] : vector<2x11x128xf32> to vector<2x128xf32>
    %cst_80 = arith.constant 1.100000e+01 : f32
    %110 = vector.broadcast %cst_80 : f32 to vector<2x128xf32>
    %111 = arith.divf %109, %110 : vector<2x128xf32>
    %c0_81 = arith.constant 0 : index
    %c0_82 = arith.constant 0 : index
    %112 = vector.load %arg1[%c0_81, %c0_82] : memref<2x128xf32, #tpu.memory_space<vmem>>, vector<2x128xf32>
    %c0_83 = arith.constant 0 : index
    %c0_84 = arith.constant 0 : index
    %113 = vector.load %arg11[%c0_83, %c0_84] : memref<128x5xf32, #tpu.memory_space<vmem>>, vector<128x5xf32>
    %cst_85 = arith.constant dense<0.000000e+00> : vector<2x5xf32>
    %114 = tpu.matmul %112, %113, %cst_85 {dimension_numbers = #tpu.dot_dimension_numbers<[1], [0], [0], [1], [0, 0, 1, 1], [], []>} : vector<2x128xf32>, vector<128x5xf32>, vector<2x5xf32> -> vector<2x5xf32>
    %c0_86 = arith.constant 0 : index
    %c0_87 = arith.constant 0 : index
    %115 = vector.load %arg12[%c0_86, %c0_87] : memref<128x5xf32, #tpu.memory_space<vmem>>, vector<128x5xf32>
    %cst_88 = arith.constant dense<0.000000e+00> : vector<2x5xf32>
    %116 = tpu.matmul %111, %115, %cst_88 {dimension_numbers = #tpu.dot_dimension_numbers<[1], [0], [0], [1], [0, 0, 1, 1], [], []>} : vector<2x128xf32>, vector<128x5xf32>, vector<2x5xf32> -> vector<2x5xf32>
    %117 = arith.addf %114, %116 : vector<2x5xf32>
    %c0_89 = arith.constant 0 : index
    %c0_90 = arith.constant 0 : index
    %118 = vector.load %arg13[%c0_89, %c0_90] : memref<1x5xf32, #tpu.memory_space<vmem>>, vector<1x5xf32>
    %119 = vector.broadcast %118 : vector<1x5xf32> to vector<2x5xf32>
    %120 = arith.addf %117, %119 : vector<2x5xf32>
    %c0_91 = arith.constant 0 : index
    %c0_92 = arith.constant 0 : index
    %121 = vector.load %arg14[%c0_91, %c0_92] : memref<2x5xf32, #tpu.memory_space<vmem>>, vector<2x5xf32>
    tpu.vector_store %arg14[%c0_91, %c0_92], %120 {strides = array<i32>} : memref<2x5xf32, #tpu.memory_space<vmem>>, vector<2x5xf32>,
    return
  }
}

module attributes {stable_mosaic.version = 11 : i64} {
  func.func @_gru_kernel(%arg0: memref<24x2x4xf32, #tpu.memory_space<vmem>>, %arg1: memref<4x384xf32, #tpu.memory_space<vmem>>, %arg2: memref<128x384xf32, #tpu.memory_space<vmem>>, %arg3: memref<1x1x384xf32, #tpu.memory_space<vmem>>, %arg4: memref<1x384xf32, #tpu.memory_space<vmem>>, %arg5: memref<2x128xf32, #tpu.memory_space<vmem>>, %arg6: memref<24x2x384xf32, #tpu.memory_space<vmem>>) attributes {dimension_semantics = [], scalar_prefetch = 0 : i64, scratch_operands = 1 : i64, tpu.core_type = #tpu.core_type<tc>} {
    %c0 = arith.constant 0 : index
    %c0_0 = arith.constant 0 : index
    %c0_1 = arith.constant 0 : index
    %0 = vector.load %arg0[%c0, %c0_0, %c0_1] : memref<24x2x4xf32, #tpu.memory_space<vmem>>, vector<24x2x4xf32>
    %c0_2 = arith.constant 0 : index
    %c0_3 = arith.constant 0 : index
    %1 = vector.load %arg1[%c0_2, %c0_3] : memref<4x384xf32, #tpu.memory_space<vmem>>, vector<4x384xf32>
    "tpu.trace_start"() <{level = 10 : i32, message = "tbf,fg->tbg"}> : () -> ()
    %cst = arith.constant dense<0.000000e+00> : vector<24x2x384xf32>
    %2 = tpu.matmul %0, %1, %cst {dimension_numbers = #tpu.dot_dimension_numbers<[2], [0], [0, 1], [1], [0, 0, 0, 1, 1, 1], [], []>} : vector<24x2x4xf32>, vector<4x384xf32>, vector<24x2x384xf32> -> vector<24x2x384xf32>
    "tpu.trace_stop"() : () -> ()
    %c0_4 = arith.constant 0 : index
    %c0_5 = arith.constant 0 : index
    %c0_6 = arith.constant 0 : index
    %3 = vector.load %arg3[%c0_4, %c0_5, %c0_6] : memref<1x1x384xf32, #tpu.memory_space<vmem>>, vector<1x1x384xf32>
    %4 = vector.broadcast %3 : vector<1x1x384xf32> to vector<24x2x384xf32>
    %5 = arith.addf %2, %4 : vector<24x2x384xf32>
    %c0_7 = arith.constant 0 : index
    %c0_8 = arith.constant 0 : index
    %c0_9 = arith.constant 0 : index
    %6 = vector.load %arg6[%c0_7, %c0_8, %c0_9] : memref<24x2x384xf32, #tpu.memory_space<vmem>>, vector<24x2x384xf32>
    tpu.vector_store %arg6[%c0_7, %c0_8, %c0_9], %5 {strides = array<i32>} : memref<24x2x384xf32, #tpu.memory_space<vmem>>, vector<24x2x384xf32>,
    %cst_10 = arith.constant 0.000000e+00 : f32
    %7 = vector.broadcast %cst_10 : f32 to vector<2x128xf32>
    %c0_i32 = arith.constant 0 : i32
    %8 = arith.index_cast %c0_i32 : i32 to index
    %c0_11 = arith.constant 0 : index
    %c0_12 = arith.constant 0 : index
    %9 = vector.load %arg6[%8, %c0_11, %c0_12] : memref<24x2x384xf32, #tpu.memory_space<vmem>>, vector<1x2x384xf32>
    %10 = vector.shape_cast %9 : vector<1x2x384xf32> to vector<2x384xf32>
    %c0_13 = arith.constant 0 : index
    %c0_14 = arith.constant 0 : index
    %11 = vector.load %arg2[%c0_13, %c0_14] : memref<128x384xf32, #tpu.memory_space<vmem>>, vector<128x384xf32>
    %cst_15 = arith.constant dense<0.000000e+00> : vector<2x384xf32>
    %12 = tpu.matmul %7, %11, %cst_15 {dimension_numbers = #tpu.dot_dimension_numbers<[1], [0], [0], [1], [0, 0, 1, 1], [], []>} : vector<2x128xf32>, vector<128x384xf32>, vector<2x384xf32> -> vector<2x384xf32>
    %c0_16 = arith.constant 0 : index
    %c0_17 = arith.constant 0 : index
    %13 = vector.load %arg4[%c0_16, %c0_17] : memref<1x384xf32, #tpu.memory_space<vmem>>, vector<1x384xf32>
    %14 = vector.broadcast %13 : vector<1x384xf32> to vector<2x384xf32>
    %15 = arith.addf %12, %14 : vector<2x384xf32>
    %16 = vector.extract_strided_slice %10 {offsets = [0, 0], sizes = [2, 128], strides = [1, 1]} : vector<2x384xf32> to vector<2x128xf32>
    %17 = vector.extract_strided_slice %15 {offsets = [0, 0], sizes = [2, 128], strides = [1, 1]} : vector<2x384xf32> to vector<2x128xf32>
    %18 = arith.addf %16, %17 : vector<2x128xf32>
    %19 = arith.negf %18 : vector<2x128xf32>
    %20 = math.exp %19 : vector<2x128xf32>
    %cst_18 = arith.constant 1.000000e+00 : f32
    %21 = vector.broadcast %cst_18 : f32 to vector<2x128xf32>
    %22 = arith.addf %21, %20 : vector<2x128xf32>
    %23 = arith.divf %21, %22 : vector<2x128xf32>
    %24 = vector.extract_strided_slice %10 {offsets = [0, 128], sizes = [2, 128], strides = [1, 1]} : vector<2x384xf32> to vector<2x128xf32>
    %25 = vector.extract_strided_slice %15 {offsets = [0, 128], sizes = [2, 128], strides = [1, 1]} : vector<2x384xf32> to vector<2x128xf32>
    %26 = arith.addf %24, %25 : vector<2x128xf32>
    %27 = arith.negf %26 : vector<2x128xf32>
    %28 = math.exp %27 : vector<2x128xf32>
    %cst_19 = arith.constant 1.000000e+00 : f32
    %29 = vector.broadcast %cst_19 : f32 to vector<2x128xf32>
    %30 = arith.addf %29, %28 : vector<2x128xf32>
    %31 = arith.divf %29, %30 : vector<2x128xf32>
    %32 = vector.extract_strided_slice %10 {offsets = [0, 256], sizes = [2, 128], strides = [1, 1]} : vector<2x384xf32> to vector<2x128xf32>
    %33 = vector.extract_strided_slice %15 {offsets = [0, 256], sizes = [2, 128], strides = [1, 1]} : vector<2x384xf32> to vector<2x128xf32>
    %34 = arith.mulf %23, %33 : vector<2x128xf32>
    %35 = arith.addf %32, %34 : vector<2x128xf32>
    %36 = math.tanh %35 : vector<2x128xf32>
    %cst_20 = arith.constant 1.000000e+00 : f32
    %37 = vector.broadcast %cst_20 : f32 to vector<2x128xf32>
    %38 = arith.subf %37, %31 : vector<2x128xf32>
    %39 = arith.mulf %38, %36 : vector<2x128xf32>
    %40 = arith.mulf %31, %7 : vector<2x128xf32>
    %41 = arith.addf %39, %40 : vector<2x128xf32>
    %c1_i32 = arith.constant 1 : i32
    %42 = arith.index_cast %c1_i32 : i32 to index
    %c0_21 = arith.constant 0 : index
    %c0_22 = arith.constant 0 : index
    %43 = vector.load %arg6[%42, %c0_21, %c0_22] : memref<24x2x384xf32, #tpu.memory_space<vmem>>, vector<1x2x384xf32>
    %44 = vector.shape_cast %43 : vector<1x2x384xf32> to vector<2x384xf32>
    %c0_23 = arith.constant 0 : index
    %c0_24 = arith.constant 0 : index
    %45 = vector.load %arg2[%c0_23, %c0_24] : memref<128x384xf32, #tpu.memory_space<vmem>>, vector<128x384xf32>
    %cst_25 = arith.constant dense<0.000000e+00> : vector<2x384xf32>
    %46 = tpu.matmul %41, %45, %cst_25 {dimension_numbers = #tpu.dot_dimension_numbers<[1], [0], [0], [1], [0, 0, 1, 1], [], []>} : vector<2x128xf32>, vector<128x384xf32>, vector<2x384xf32> -> vector<2x384xf32>
    %c0_26 = arith.constant 0 : index
    %c0_27 = arith.constant 0 : index
    %47 = vector.load %arg4[%c0_26, %c0_27] : memref<1x384xf32, #tpu.memory_space<vmem>>, vector<1x384xf32>
    %48 = vector.broadcast %47 : vector<1x384xf32> to vector<2x384xf32>
    %49 = arith.addf %46, %48 : vector<2x384xf32>
    %50 = vector.extract_strided_slice %44 {offsets = [0, 0], sizes = [2, 128], strides = [1, 1]} : vector<2x384xf32> to vector<2x128xf32>
    %51 = vector.extract_strided_slice %49 {offsets = [0, 0], sizes = [2, 128], strides = [1, 1]} : vector<2x384xf32> to vector<2x128xf32>
    %52 = arith.addf %50, %51 : vector<2x128xf32>
    %53 = arith.negf %52 : vector<2x128xf32>
    %54 = math.exp %53 : vector<2x128xf32>
    %cst_28 = arith.constant 1.000000e+00 : f32
    %55 = vector.broadcast %cst_28 : f32 to vector<2x128xf32>
    %56 = arith.addf %55, %54 : vector<2x128xf32>
    %57 = arith.divf %55, %56 : vector<2x128xf32>
    %58 = vector.extract_strided_slice %44 {offsets = [0, 128], sizes = [2, 128], strides = [1, 1]} : vector<2x384xf32> to vector<2x128xf32>
    %59 = vector.extract_strided_slice %49 {offsets = [0, 128], sizes = [2, 128], strides = [1, 1]} : vector<2x384xf32> to vector<2x128xf32>
    %60 = arith.addf %58, %59 : vector<2x128xf32>
    %61 = arith.negf %60 : vector<2x128xf32>
    %62 = math.exp %61 : vector<2x128xf32>
    %cst_29 = arith.constant 1.000000e+00 : f32
    %63 = vector.broadcast %cst_29 : f32 to vector<2x128xf32>
    %64 = arith.addf %63, %62 : vector<2x128xf32>
    %65 = arith.divf %63, %64 : vector<2x128xf32>
    %66 = vector.extract_strided_slice %44 {offsets = [0, 256], sizes = [2, 128], strides = [1, 1]} : vector<2x384xf32> to vector<2x128xf32>
    %67 = vector.extract_strided_slice %49 {offsets = [0, 256], sizes = [2, 128], strides = [1, 1]} : vector<2x384xf32> to vector<2x128xf32>
    %68 = arith.mulf %57, %67 : vector<2x128xf32>
    %69 = arith.addf %66, %68 : vector<2x128xf32>
    %70 = math.tanh %69 : vector<2x128xf32>
    %cst_30 = arith.constant 1.000000e+00 : f32
    %71 = vector.broadcast %cst_30 : f32 to vector<2x128xf32>
    %72 = arith.subf %71, %65 : vector<2x128xf32>
    %73 = arith.mulf %72, %70 : vector<2x128xf32>
    %74 = arith.mulf %65, %41 : vector<2x128xf32>
    %75 = arith.addf %73, %74 : vector<2x128xf32>
    %c2_i32 = arith.constant 2 : i32
    %76 = arith.index_cast %c2_i32 : i32 to index
    %c0_31 = arith.constant 0 : index
    %c0_32 = arith.constant 0 : index
    %77 = vector.load %arg6[%76, %c0_31, %c0_32] : memref<24x2x384xf32, #tpu.memory_space<vmem>>, vector<1x2x384xf32>
    %78 = vector.shape_cast %77 : vector<1x2x384xf32> to vector<2x384xf32>
    %c0_33 = arith.constant 0 : index
    %c0_34 = arith.constant 0 : index
    %79 = vector.load %arg2[%c0_33, %c0_34] : memref<128x384xf32, #tpu.memory_space<vmem>>, vector<128x384xf32>
    %cst_35 = arith.constant dense<0.000000e+00> : vector<2x384xf32>
    %80 = tpu.matmul %75, %79, %cst_35 {dimension_numbers = #tpu.dot_dimension_numbers<[1], [0], [0], [1], [0, 0, 1, 1], [], []>} : vector<2x128xf32>, vector<128x384xf32>, vector<2x384xf32> -> vector<2x384xf32>
    %c0_36 = arith.constant 0 : index
    %c0_37 = arith.constant 0 : index
    %81 = vector.load %arg4[%c0_36, %c0_37] : memref<1x384xf32, #tpu.memory_space<vmem>>, vector<1x384xf32>
    %82 = vector.broadcast %81 : vector<1x384xf32> to vector<2x384xf32>
    %83 = arith.addf %80, %82 : vector<2x384xf32>
    %84 = vector.extract_strided_slice %78 {offsets = [0, 0], sizes = [2, 128], strides = [1, 1]} : vector<2x384xf32> to vector<2x128xf32>
    %85 = vector.extract_strided_slice %83 {offsets = [0, 0], sizes = [2, 128], strides = [1, 1]} : vector<2x384xf32> to vector<2x128xf32>
    %86 = arith.addf %84, %85 : vector<2x128xf32>
    %87 = arith.negf %86 : vector<2x128xf32>
    %88 = math.exp %87 : vector<2x128xf32>
    %cst_38 = arith.constant 1.000000e+00 : f32
    %89 = vector.broadcast %cst_38 : f32 to vector<2x128xf32>
    %90 = arith.addf %89, %88 : vector<2x128xf32>
    %91 = arith.divf %89, %90 : vector<2x128xf32>
    %92 = vector.extract_strided_slice %78 {offsets = [0, 128], sizes = [2, 128], strides = [1, 1]} : vector<2x384xf32> to vector<2x128xf32>
    %93 = vector.extract_strided_slice %83 {offsets = [0, 128], sizes = [2, 128], strides = [1, 1]} : vector<2x384xf32> to vector<2x128xf32>
    %94 = arith.addf %92, %93 : vector<2x128xf32>
    %95 = arith.negf %94 : vector<2x128xf32>
    %96 = math.exp %95 : vector<2x128xf32>
    %cst_39 = arith.constant 1.000000e+00 : f32
    %97 = vector.broadcast %cst_39 : f32 to vector<2x128xf32>
    %98 = arith.addf %97, %96 : vector<2x128xf32>
    %99 = arith.divf %97, %98 : vector<2x128xf32>
    %100 = vector.extract_strided_slice %78 {offsets = [0, 256], sizes = [2, 128], strides = [1, 1]} : vector<2x384xf32> to vector<2x128xf32>
    %101 = vector.extract_strided_slice %83 {offsets = [0, 256], sizes = [2, 128], strides = [1, 1]} : vector<2x384xf32> to vector<2x128xf32>
    %102 = arith.mulf %91, %101 : vector<2x128xf32>
    %103 = arith.addf %100, %102 : vector<2x128xf32>
    %104 = math.tanh %103 : vector<2x128xf32>
    %cst_40 = arith.constant 1.000000e+00 : f32
    %105 = vector.broadcast %cst_40 : f32 to vector<2x128xf32>
    %106 = arith.subf %105, %99 : vector<2x128xf32>
    %107 = arith.mulf %106, %104 : vector<2x128xf32>
    %108 = arith.mulf %99, %75 : vector<2x128xf32>
    %109 = arith.addf %107, %108 : vector<2x128xf32>
    %c3_i32 = arith.constant 3 : i32
    %110 = arith.index_cast %c3_i32 : i32 to index
    %c0_41 = arith.constant 0 : index
    %c0_42 = arith.constant 0 : index
    %111 = vector.load %arg6[%110, %c0_41, %c0_42] : memref<24x2x384xf32, #tpu.memory_space<vmem>>, vector<1x2x384xf32>
    %112 = vector.shape_cast %111 : vector<1x2x384xf32> to vector<2x384xf32>
    %c0_43 = arith.constant 0 : index
    %c0_44 = arith.constant 0 : index
    %113 = vector.load %arg2[%c0_43, %c0_44] : memref<128x384xf32, #tpu.memory_space<vmem>>, vector<128x384xf32>
    %cst_45 = arith.constant dense<0.000000e+00> : vector<2x384xf32>
    %114 = tpu.matmul %109, %113, %cst_45 {dimension_numbers = #tpu.dot_dimension_numbers<[1], [0], [0], [1], [0, 0, 1, 1], [], []>} : vector<2x128xf32>, vector<128x384xf32>, vector<2x384xf32> -> vector<2x384xf32>
    %c0_46 = arith.constant 0 : index
    %c0_47 = arith.constant 0 : index
    %115 = vector.load %arg4[%c0_46, %c0_47] : memref<1x384xf32, #tpu.memory_space<vmem>>, vector<1x384xf32>
    %116 = vector.broadcast %115 : vector<1x384xf32> to vector<2x384xf32>
    %117 = arith.addf %114, %116 : vector<2x384xf32>
    %118 = vector.extract_strided_slice %112 {offsets = [0, 0], sizes = [2, 128], strides = [1, 1]} : vector<2x384xf32> to vector<2x128xf32>
    %119 = vector.extract_strided_slice %117 {offsets = [0, 0], sizes = [2, 128], strides = [1, 1]} : vector<2x384xf32> to vector<2x128xf32>
    %120 = arith.addf %118, %119 : vector<2x128xf32>
    %121 = arith.negf %120 : vector<2x128xf32>
    %122 = math.exp %121 : vector<2x128xf32>
    %cst_48 = arith.constant 1.000000e+00 : f32
    %123 = vector.broadcast %cst_48 : f32 to vector<2x128xf32>
    %124 = arith.addf %123, %122 : vector<2x128xf32>
    %125 = arith.divf %123, %124 : vector<2x128xf32>
    %126 = vector.extract_strided_slice %112 {offsets = [0, 128], sizes = [2, 128], strides = [1, 1]} : vector<2x384xf32> to vector<2x128xf32>
    %127 = vector.extract_strided_slice %117 {offsets = [0, 128], sizes = [2, 128], strides = [1, 1]} : vector<2x384xf32> to vector<2x128xf32>
    %128 = arith.addf %126, %127 : vector<2x128xf32>
    %129 = arith.negf %128 : vector<2x128xf32>
    %130 = math.exp %129 : vector<2x128xf32>
    %cst_49 = arith.constant 1.000000e+00 : f32
    %131 = vector.broadcast %cst_49 : f32 to vector<2x128xf32>
    %132 = arith.addf %131, %130 : vector<2x128xf32>
    %133 = arith.divf %131, %132 : vector<2x128xf32>
    %134 = vector.extract_strided_slice %112 {offsets = [0, 256], sizes = [2, 128], strides = [1, 1]} : vector<2x384xf32> to vector<2x128xf32>
    %135 = vector.extract_strided_slice %117 {offsets = [0, 256], sizes = [2, 128], strides = [1, 1]} : vector<2x384xf32> to vector<2x128xf32>
    %136 = arith.mulf %125, %135 : vector<2x128xf32>
    %137 = arith.addf %134, %136 : vector<2x128xf32>
    %138 = math.tanh %137 : vector<2x128xf32>
    %cst_50 = arith.constant 1.000000e+00 : f32
    %139 = vector.broadcast %cst_50 : f32 to vector<2x128xf32>
    %140 = arith.subf %139, %133 : vector<2x128xf32>
    %141 = arith.mulf %140, %138 : vector<2x128xf32>
    %142 = arith.mulf %133, %109 : vector<2x128xf32>
    %143 = arith.addf %141, %142 : vector<2x128xf32>
    %c4_i32 = arith.constant 4 : i32
    %144 = arith.index_cast %c4_i32 : i32 to index
    %c0_51 = arith.constant 0 : index
    %c0_52 = arith.constant 0 : index
    %145 = vector.load %arg6[%144, %c0_51, %c0_52] : memref<24x2x384xf32, #tpu.memory_space<vmem>>, vector<1x2x384xf32>
    %146 = vector.shape_cast %145 : vector<1x2x384xf32> to vector<2x384xf32>
    %c0_53 = arith.constant 0 : index
    %c0_54 = arith.constant 0 : index
    %147 = vector.load %arg2[%c0_53, %c0_54] : memref<128x384xf32, #tpu.memory_space<vmem>>, vector<128x384xf32>
    %cst_55 = arith.constant dense<0.000000e+00> : vector<2x384xf32>
    %148 = tpu.matmul %143, %147, %cst_55 {dimension_numbers = #tpu.dot_dimension_numbers<[1], [0], [0], [1], [0, 0, 1, 1], [], []>} : vector<2x128xf32>, vector<128x384xf32>, vector<2x384xf32> -> vector<2x384xf32>
    %c0_56 = arith.constant 0 : index
    %c0_57 = arith.constant 0 : index
    %149 = vector.load %arg4[%c0_56, %c0_57] : memref<1x384xf32, #tpu.memory_space<vmem>>, vector<1x384xf32>
    %150 = vector.broadcast %149 : vector<1x384xf32> to vector<2x384xf32>
    %151 = arith.addf %148, %150 : vector<2x384xf32>
    %152 = vector.extract_strided_slice %146 {offsets = [0, 0], sizes = [2, 128], strides = [1, 1]} : vector<2x384xf32> to vector<2x128xf32>
    %153 = vector.extract_strided_slice %151 {offsets = [0, 0], sizes = [2, 128], strides = [1, 1]} : vector<2x384xf32> to vector<2x128xf32>
    %154 = arith.addf %152, %153 : vector<2x128xf32>
    %155 = arith.negf %154 : vector<2x128xf32>
    %156 = math.exp %155 : vector<2x128xf32>
    %cst_58 = arith.constant 1.000000e+00 : f32
    %157 = vector.broadcast %cst_58 : f32 to vector<2x128xf32>
    %158 = arith.addf %157, %156 : vector<2x128xf32>
    %159 = arith.divf %157, %158 : vector<2x128xf32>
    %160 = vector.extract_strided_slice %146 {offsets = [0, 128], sizes = [2, 128], strides = [1, 1]} : vector<2x384xf32> to vector<2x128xf32>
    %161 = vector.extract_strided_slice %151 {offsets = [0, 128], sizes = [2, 128], strides = [1, 1]} : vector<2x384xf32> to vector<2x128xf32>
    %162 = arith.addf %160, %161 : vector<2x128xf32>
    %163 = arith.negf %162 : vector<2x128xf32>
    %164 = math.exp %163 : vector<2x128xf32>
    %cst_59 = arith.constant 1.000000e+00 : f32
    %165 = vector.broadcast %cst_59 : f32 to vector<2x128xf32>
    %166 = arith.addf %165, %164 : vector<2x128xf32>
    %167 = arith.divf %165, %166 : vector<2x128xf32>
    %168 = vector.extract_strided_slice %146 {offsets = [0, 256], sizes = [2, 128], strides = [1, 1]} : vector<2x384xf32> to vector<2x128xf32>
    %169 = vector.extract_strided_slice %151 {offsets = [0, 256], sizes = [2, 128], strides = [1, 1]} : vector<2x384xf32> to vector<2x128xf32>
    %170 = arith.mulf %159, %169 : vector<2x128xf32>
    %171 = arith.addf %168, %170 : vector<2x128xf32>
    %172 = math.tanh %171 : vector<2x128xf32>
    %cst_60 = arith.constant 1.000000e+00 : f32
    %173 = vector.broadcast %cst_60 : f32 to vector<2x128xf32>
    %174 = arith.subf %173, %167 : vector<2x128xf32>
    %175 = arith.mulf %174, %172 : vector<2x128xf32>
    %176 = arith.mulf %167, %143 : vector<2x128xf32>
    %177 = arith.addf %175, %176 : vector<2x128xf32>
    %c5_i32 = arith.constant 5 : i32
    %178 = arith.index_cast %c5_i32 : i32 to index
    %c0_61 = arith.constant 0 : index
    %c0_62 = arith.constant 0 : index
    %179 = vector.load %arg6[%178, %c0_61, %c0_62] : memref<24x2x384xf32, #tpu.memory_space<vmem>>, vector<1x2x384xf32>
    %180 = vector.shape_cast %179 : vector<1x2x384xf32> to vector<2x384xf32>
    %c0_63 = arith.constant 0 : index
    %c0_64 = arith.constant 0 : index
    %181 = vector.load %arg2[%c0_63, %c0_64] : memref<128x384xf32, #tpu.memory_space<vmem>>, vector<128x384xf32>
    %cst_65 = arith.constant dense<0.000000e+00> : vector<2x384xf32>
    %182 = tpu.matmul %177, %181, %cst_65 {dimension_numbers = #tpu.dot_dimension_numbers<[1], [0], [0], [1], [0, 0, 1, 1], [], []>} : vector<2x128xf32>, vector<128x384xf32>, vector<2x384xf32> -> vector<2x384xf32>
    %c0_66 = arith.constant 0 : index
    %c0_67 = arith.constant 0 : index
    %183 = vector.load %arg4[%c0_66, %c0_67] : memref<1x384xf32, #tpu.memory_space<vmem>>, vector<1x384xf32>
    %184 = vector.broadcast %183 : vector<1x384xf32> to vector<2x384xf32>
    %185 = arith.addf %182, %184 : vector<2x384xf32>
    %186 = vector.extract_strided_slice %180 {offsets = [0, 0], sizes = [2, 128], strides = [1, 1]} : vector<2x384xf32> to vector<2x128xf32>
    %187 = vector.extract_strided_slice %185 {offsets = [0, 0], sizes = [2, 128], strides = [1, 1]} : vector<2x384xf32> to vector<2x128xf32>
    %188 = arith.addf %186, %187 : vector<2x128xf32>
    %189 = arith.negf %188 : vector<2x128xf32>
    %190 = math.exp %189 : vector<2x128xf32>
    %cst_68 = arith.constant 1.000000e+00 : f32
    %191 = vector.broadcast %cst_68 : f32 to vector<2x128xf32>
    %192 = arith.addf %191, %190 : vector<2x128xf32>
    %193 = arith.divf %191, %192 : vector<2x128xf32>
    %194 = vector.extract_strided_slice %180 {offsets = [0, 128], sizes = [2, 128], strides = [1, 1]} : vector<2x384xf32> to vector<2x128xf32>
    %195 = vector.extract_strided_slice %185 {offsets = [0, 128], sizes = [2, 128], strides = [1, 1]} : vector<2x384xf32> to vector<2x128xf32>
    %196 = arith.addf %194, %195 : vector<2x128xf32>
    %197 = arith.negf %196 : vector<2x128xf32>
    %198 = math.exp %197 : vector<2x128xf32>
    %cst_69 = arith.constant 1.000000e+00 : f32
    %199 = vector.broadcast %cst_69 : f32 to vector<2x128xf32>
    %200 = arith.addf %199, %198 : vector<2x128xf32>
    %201 = arith.divf %199, %200 : vector<2x128xf32>
    %202 = vector.extract_strided_slice %180 {offsets = [0, 256], sizes = [2, 128], strides = [1, 1]} : vector<2x384xf32> to vector<2x128xf32>
    %203 = vector.extract_strided_slice %185 {offsets = [0, 256], sizes = [2, 128], strides = [1, 1]} : vector<2x384xf32> to vector<2x128xf32>
    %204 = arith.mulf %193, %203 : vector<2x128xf32>
    %205 = arith.addf %202, %204 : vector<2x128xf32>
    %206 = math.tanh %205 : vector<2x128xf32>
    %cst_70 = arith.constant 1.000000e+00 : f32
    %207 = vector.broadcast %cst_70 : f32 to vector<2x128xf32>
    %208 = arith.subf %207, %201 : vector<2x128xf32>
    %209 = arith.mulf %208, %206 : vector<2x128xf32>
    %210 = arith.mulf %201, %177 : vector<2x128xf32>
    %211 = arith.addf %209, %210 : vector<2x128xf32>
    %c6_i32 = arith.constant 6 : i32
    %212 = arith.index_cast %c6_i32 : i32 to index
    %c0_71 = arith.constant 0 : index
    %c0_72 = arith.constant 0 : index
    %213 = vector.load %arg6[%212, %c0_71, %c0_72] : memref<24x2x384xf32, #tpu.memory_space<vmem>>, vector<1x2x384xf32>
    %214 = vector.shape_cast %213 : vector<1x2x384xf32> to vector<2x384xf32>
    %c0_73 = arith.constant 0 : index
    %c0_74 = arith.constant 0 : index
    %215 = vector.load %arg2[%c0_73, %c0_74] : memref<128x384xf32, #tpu.memory_space<vmem>>, vector<128x384xf32>
    %cst_75 = arith.constant dense<0.000000e+00> : vector<2x384xf32>
    %216 = tpu.matmul %211, %215, %cst_75 {dimension_numbers = #tpu.dot_dimension_numbers<[1], [0], [0], [1], [0, 0, 1, 1], [], []>} : vector<2x128xf32>, vector<128x384xf32>, vector<2x384xf32> -> vector<2x384xf32>
    %c0_76 = arith.constant 0 : index
    %c0_77 = arith.constant 0 : index
    %217 = vector.load %arg4[%c0_76, %c0_77] : memref<1x384xf32, #tpu.memory_space<vmem>>, vector<1x384xf32>
    %218 = vector.broadcast %217 : vector<1x384xf32> to vector<2x384xf32>
    %219 = arith.addf %216, %218 : vector<2x384xf32>
    %220 = vector.extract_strided_slice %214 {offsets = [0, 0], sizes = [2, 128], strides = [1, 1]} : vector<2x384xf32> to vector<2x128xf32>
    %221 = vector.extract_strided_slice %219 {offsets = [0, 0], sizes = [2, 128], strides = [1, 1]} : vector<2x384xf32> to vector<2x128xf32>
    %222 = arith.addf %220, %221 : vector<2x128xf32>
    %223 = arith.negf %222 : vector<2x128xf32>
    %224 = math.exp %223 : vector<2x128xf32>
    %cst_78 = arith.constant 1.000000e+00 : f32
    %225 = vector.broadcast %cst_78 : f32 to vector<2x128xf32>
    %226 = arith.addf %225, %224 : vector<2x128xf32>
    %227 = arith.divf %225, %226 : vector<2x128xf32>
    %228 = vector.extract_strided_slice %214 {offsets = [0, 128], sizes = [2, 128], strides = [1, 1]} : vector<2x384xf32> to vector<2x128xf32>
    %229 = vector.extract_strided_slice %219 {offsets = [0, 128], sizes = [2, 128], strides = [1, 1]} : vector<2x384xf32> to vector<2x128xf32>
    %230 = arith.addf %228, %229 : vector<2x128xf32>
    %231 = arith.negf %230 : vector<2x128xf32>
    %232 = math.exp %231 : vector<2x128xf32>
    %cst_79 = arith.constant 1.000000e+00 : f32
    %233 = vector.broadcast %cst_79 : f32 to vector<2x128xf32>
    %234 = arith.addf %233, %232 : vector<2x128xf32>
    %235 = arith.divf %233, %234 : vector<2x128xf32>
    %236 = vector.extract_strided_slice %214 {offsets = [0, 256], sizes = [2, 128], strides = [1, 1]} : vector<2x384xf32> to vector<2x128xf32>
    %237 = vector.extract_strided_slice %219 {offsets = [0, 256], sizes = [2, 128], strides = [1, 1]} : vector<2x384xf32> to vector<2x128xf32>
    %238 = arith.mulf %227, %237 : vector<2x128xf32>
    %239 = arith.addf %236, %238 : vector<2x128xf32>
    %240 = math.tanh %239 : vector<2x128xf32>
    %cst_80 = arith.constant 1.000000e+00 : f32
    %241 = vector.broadcast %cst_80 : f32 to vector<2x128xf32>
    %242 = arith.subf %241, %235 : vector<2x128xf32>
    %243 = arith.mulf %242, %240 : vector<2x128xf32>
    %244 = arith.mulf %235, %211 : vector<2x128xf32>
    %245 = arith.addf %243, %244 : vector<2x128xf32>
    %c7_i32 = arith.constant 7 : i32
    %246 = arith.index_cast %c7_i32 : i32 to index
    %c0_81 = arith.constant 0 : index
    %c0_82 = arith.constant 0 : index
    %247 = vector.load %arg6[%246, %c0_81, %c0_82] : memref<24x2x384xf32, #tpu.memory_space<vmem>>, vector<1x2x384xf32>
    %248 = vector.shape_cast %247 : vector<1x2x384xf32> to vector<2x384xf32>
    %c0_83 = arith.constant 0 : index
    %c0_84 = arith.constant 0 : index
    %249 = vector.load %arg2[%c0_83, %c0_84] : memref<128x384xf32, #tpu.memory_space<vmem>>, vector<128x384xf32>
    %cst_85 = arith.constant dense<0.000000e+00> : vector<2x384xf32>
    %250 = tpu.matmul %245, %249, %cst_85 {dimension_numbers = #tpu.dot_dimension_numbers<[1], [0], [0], [1], [0, 0, 1, 1], [], []>} : vector<2x128xf32>, vector<128x384xf32>, vector<2x384xf32> -> vector<2x384xf32>
    %c0_86 = arith.constant 0 : index
    %c0_87 = arith.constant 0 : index
    %251 = vector.load %arg4[%c0_86, %c0_87] : memref<1x384xf32, #tpu.memory_space<vmem>>, vector<1x384xf32>
    %252 = vector.broadcast %251 : vector<1x384xf32> to vector<2x384xf32>
    %253 = arith.addf %250, %252 : vector<2x384xf32>
    %254 = vector.extract_strided_slice %248 {offsets = [0, 0], sizes = [2, 128], strides = [1, 1]} : vector<2x384xf32> to vector<2x128xf32>
    %255 = vector.extract_strided_slice %253 {offsets = [0, 0], sizes = [2, 128], strides = [1, 1]} : vector<2x384xf32> to vector<2x128xf32>
    %256 = arith.addf %254, %255 : vector<2x128xf32>
    %257 = arith.negf %256 : vector<2x128xf32>
    %258 = math.exp %257 : vector<2x128xf32>
    %cst_88 = arith.constant 1.000000e+00 : f32
    %259 = vector.broadcast %cst_88 : f32 to vector<2x128xf32>
    %260 = arith.addf %259, %258 : vector<2x128xf32>
    %261 = arith.divf %259, %260 : vector<2x128xf32>
    %262 = vector.extract_strided_slice %248 {offsets = [0, 128], sizes = [2, 128], strides = [1, 1]} : vector<2x384xf32> to vector<2x128xf32>
    %263 = vector.extract_strided_slice %253 {offsets = [0, 128], sizes = [2, 128], strides = [1, 1]} : vector<2x384xf32> to vector<2x128xf32>
    %264 = arith.addf %262, %263 : vector<2x128xf32>
    %265 = arith.negf %264 : vector<2x128xf32>
    %266 = math.exp %265 : vector<2x128xf32>
    %cst_89 = arith.constant 1.000000e+00 : f32
    %267 = vector.broadcast %cst_89 : f32 to vector<2x128xf32>
    %268 = arith.addf %267, %266 : vector<2x128xf32>
    %269 = arith.divf %267, %268 : vector<2x128xf32>
    %270 = vector.extract_strided_slice %248 {offsets = [0, 256], sizes = [2, 128], strides = [1, 1]} : vector<2x384xf32> to vector<2x128xf32>
    %271 = vector.extract_strided_slice %253 {offsets = [0, 256], sizes = [2, 128], strides = [1, 1]} : vector<2x384xf32> to vector<2x128xf32>
    %272 = arith.mulf %261, %271 : vector<2x128xf32>
    %273 = arith.addf %270, %272 : vector<2x128xf32>
    %274 = math.tanh %273 : vector<2x128xf32>
    %cst_90 = arith.constant 1.000000e+00 : f32
    %275 = vector.broadcast %cst_90 : f32 to vector<2x128xf32>
    %276 = arith.subf %275, %269 : vector<2x128xf32>
    %277 = arith.mulf %276, %274 : vector<2x128xf32>
    %278 = arith.mulf %269, %245 : vector<2x128xf32>
    %279 = arith.addf %277, %278 : vector<2x128xf32>
    %c8_i32 = arith.constant 8 : i32
    %280 = arith.index_cast %c8_i32 : i32 to index
    %c0_91 = arith.constant 0 : index
    %c0_92 = arith.constant 0 : index
    %281 = vector.load %arg6[%280, %c0_91, %c0_92] : memref<24x2x384xf32, #tpu.memory_space<vmem>>, vector<1x2x384xf32>
    %282 = vector.shape_cast %281 : vector<1x2x384xf32> to vector<2x384xf32>
    %c0_93 = arith.constant 0 : index
    %c0_94 = arith.constant 0 : index
    %283 = vector.load %arg2[%c0_93, %c0_94] : memref<128x384xf32, #tpu.memory_space<vmem>>, vector<128x384xf32>
    %cst_95 = arith.constant dense<0.000000e+00> : vector<2x384xf32>
    %284 = tpu.matmul %279, %283, %cst_95 {dimension_numbers = #tpu.dot_dimension_numbers<[1], [0], [0], [1], [0, 0, 1, 1], [], []>} : vector<2x128xf32>, vector<128x384xf32>, vector<2x384xf32> -> vector<2x384xf32>
    %c0_96 = arith.constant 0 : index
    %c0_97 = arith.constant 0 : index
    %285 = vector.load %arg4[%c0_96, %c0_97] : memref<1x384xf32, #tpu.memory_space<vmem>>, vector<1x384xf32>
    %286 = vector.broadcast %285 : vector<1x384xf32> to vector<2x384xf32>
    %287 = arith.addf %284, %286 : vector<2x384xf32>
    %288 = vector.extract_strided_slice %282 {offsets = [0, 0], sizes = [2, 128], strides = [1, 1]} : vector<2x384xf32> to vector<2x128xf32>
    %289 = vector.extract_strided_slice %287 {offsets = [0, 0], sizes = [2, 128], strides = [1, 1]} : vector<2x384xf32> to vector<2x128xf32>
    %290 = arith.addf %288, %289 : vector<2x128xf32>
    %291 = arith.negf %290 : vector<2x128xf32>
    %292 = math.exp %291 : vector<2x128xf32>
    %cst_98 = arith.constant 1.000000e+00 : f32
    %293 = vector.broadcast %cst_98 : f32 to vector<2x128xf32>
    %294 = arith.addf %293, %292 : vector<2x128xf32>
    %295 = arith.divf %293, %294 : vector<2x128xf32>
    %296 = vector.extract_strided_slice %282 {offsets = [0, 128], sizes = [2, 128], strides = [1, 1]} : vector<2x384xf32> to vector<2x128xf32>
    %297 = vector.extract_strided_slice %287 {offsets = [0, 128], sizes = [2, 128], strides = [1, 1]} : vector<2x384xf32> to vector<2x128xf32>
    %298 = arith.addf %296, %297 : vector<2x128xf32>
    %299 = arith.negf %298 : vector<2x128xf32>
    %300 = math.exp %299 : vector<2x128xf32>
    %cst_99 = arith.constant 1.000000e+00 : f32
    %301 = vector.broadcast %cst_99 : f32 to vector<2x128xf32>
    %302 = arith.addf %301, %300 : vector<2x128xf32>
    %303 = arith.divf %301, %302 : vector<2x128xf32>
    %304 = vector.extract_strided_slice %282 {offsets = [0, 256], sizes = [2, 128], strides = [1, 1]} : vector<2x384xf32> to vector<2x128xf32>
    %305 = vector.extract_strided_slice %287 {offsets = [0, 256], sizes = [2, 128], strides = [1, 1]} : vector<2x384xf32> to vector<2x128xf32>
    %306 = arith.mulf %295, %305 : vector<2x128xf32>
    %307 = arith.addf %304, %306 : vector<2x128xf32>
    %308 = math.tanh %307 : vector<2x128xf32>
    %cst_100 = arith.constant 1.000000e+00 : f32
    %309 = vector.broadcast %cst_100 : f32 to vector<2x128xf32>
    %310 = arith.subf %309, %303 : vector<2x128xf32>
    %311 = arith.mulf %310, %308 : vector<2x128xf32>
    %312 = arith.mulf %303, %279 : vector<2x128xf32>
    %313 = arith.addf %311, %312 : vector<2x128xf32>
    %c9_i32 = arith.constant 9 : i32
    %314 = arith.index_cast %c9_i32 : i32 to index
    %c0_101 = arith.constant 0 : index
    %c0_102 = arith.constant 0 : index
    %315 = vector.load %arg6[%314, %c0_101, %c0_102] : memref<24x2x384xf32, #tpu.memory_space<vmem>>, vector<1x2x384xf32>
    %316 = vector.shape_cast %315 : vector<1x2x384xf32> to vector<2x384xf32>
    %c0_103 = arith.constant 0 : index
    %c0_104 = arith.constant 0 : index
    %317 = vector.load %arg2[%c0_103, %c0_104] : memref<128x384xf32, #tpu.memory_space<vmem>>, vector<128x384xf32>
    %cst_105 = arith.constant dense<0.000000e+00> : vector<2x384xf32>
    %318 = tpu.matmul %313, %317, %cst_105 {dimension_numbers = #tpu.dot_dimension_numbers<[1], [0], [0], [1], [0, 0, 1, 1], [], []>} : vector<2x128xf32>, vector<128x384xf32>, vector<2x384xf32> -> vector<2x384xf32>
    %c0_106 = arith.constant 0 : index
    %c0_107 = arith.constant 0 : index
    %319 = vector.load %arg4[%c0_106, %c0_107] : memref<1x384xf32, #tpu.memory_space<vmem>>, vector<1x384xf32>
    %320 = vector.broadcast %319 : vector<1x384xf32> to vector<2x384xf32>
    %321 = arith.addf %318, %320 : vector<2x384xf32>
    %322 = vector.extract_strided_slice %316 {offsets = [0, 0], sizes = [2, 128], strides = [1, 1]} : vector<2x384xf32> to vector<2x128xf32>
    %323 = vector.extract_strided_slice %321 {offsets = [0, 0], sizes = [2, 128], strides = [1, 1]} : vector<2x384xf32> to vector<2x128xf32>
    %324 = arith.addf %322, %323 : vector<2x128xf32>
    %325 = arith.negf %324 : vector<2x128xf32>
    %326 = math.exp %325 : vector<2x128xf32>
    %cst_108 = arith.constant 1.000000e+00 : f32
    %327 = vector.broadcast %cst_108 : f32 to vector<2x128xf32>
    %328 = arith.addf %327, %326 : vector<2x128xf32>
    %329 = arith.divf %327, %328 : vector<2x128xf32>
    %330 = vector.extract_strided_slice %316 {offsets = [0, 128], sizes = [2, 128], strides = [1, 1]} : vector<2x384xf32> to vector<2x128xf32>
    %331 = vector.extract_strided_slice %321 {offsets = [0, 128], sizes = [2, 128], strides = [1, 1]} : vector<2x384xf32> to vector<2x128xf32>
    %332 = arith.addf %330, %331 : vector<2x128xf32>
    %333 = arith.negf %332 : vector<2x128xf32>
    %334 = math.exp %333 : vector<2x128xf32>
    %cst_109 = arith.constant 1.000000e+00 : f32
    %335 = vector.broadcast %cst_109 : f32 to vector<2x128xf32>
    %336 = arith.addf %335, %334 : vector<2x128xf32>
    %337 = arith.divf %335, %336 : vector<2x128xf32>
    %338 = vector.extract_strided_slice %316 {offsets = [0, 256], sizes = [2, 128], strides = [1, 1]} : vector<2x384xf32> to vector<2x128xf32>
    %339 = vector.extract_strided_slice %321 {offsets = [0, 256], sizes = [2, 128], strides = [1, 1]} : vector<2x384xf32> to vector<2x128xf32>
    %340 = arith.mulf %329, %339 : vector<2x128xf32>
    %341 = arith.addf %338, %340 : vector<2x128xf32>
    %342 = math.tanh %341 : vector<2x128xf32>
    %cst_110 = arith.constant 1.000000e+00 : f32
    %343 = vector.broadcast %cst_110 : f32 to vector<2x128xf32>
    %344 = arith.subf %343, %337 : vector<2x128xf32>
    %345 = arith.mulf %344, %342 : vector<2x128xf32>
    %346 = arith.mulf %337, %313 : vector<2x128xf32>
    %347 = arith.addf %345, %346 : vector<2x128xf32>
    %c10_i32 = arith.constant 10 : i32
    %348 = arith.index_cast %c10_i32 : i32 to index
    %c0_111 = arith.constant 0 : index
    %c0_112 = arith.constant 0 : index
    %349 = vector.load %arg6[%348, %c0_111, %c0_112] : memref<24x2x384xf32, #tpu.memory_space<vmem>>, vector<1x2x384xf32>
    %350 = vector.shape_cast %349 : vector<1x2x384xf32> to vector<2x384xf32>
    %c0_113 = arith.constant 0 : index
    %c0_114 = arith.constant 0 : index
    %351 = vector.load %arg2[%c0_113, %c0_114] : memref<128x384xf32, #tpu.memory_space<vmem>>, vector<128x384xf32>
    %cst_115 = arith.constant dense<0.000000e+00> : vector<2x384xf32>
    %352 = tpu.matmul %347, %351, %cst_115 {dimension_numbers = #tpu.dot_dimension_numbers<[1], [0], [0], [1], [0, 0, 1, 1], [], []>} : vector<2x128xf32>, vector<128x384xf32>, vector<2x384xf32> -> vector<2x384xf32>
    %c0_116 = arith.constant 0 : index
    %c0_117 = arith.constant 0 : index
    %353 = vector.load %arg4[%c0_116, %c0_117] : memref<1x384xf32, #tpu.memory_space<vmem>>, vector<1x384xf32>
    %354 = vector.broadcast %353 : vector<1x384xf32> to vector<2x384xf32>
    %355 = arith.addf %352, %354 : vector<2x384xf32>
    %356 = vector.extract_strided_slice %350 {offsets = [0, 0], sizes = [2, 128], strides = [1, 1]} : vector<2x384xf32> to vector<2x128xf32>
    %357 = vector.extract_strided_slice %355 {offsets = [0, 0], sizes = [2, 128], strides = [1, 1]} : vector<2x384xf32> to vector<2x128xf32>
    %358 = arith.addf %356, %357 : vector<2x128xf32>
    %359 = arith.negf %358 : vector<2x128xf32>
    %360 = math.exp %359 : vector<2x128xf32>
    %cst_118 = arith.constant 1.000000e+00 : f32
    %361 = vector.broadcast %cst_118 : f32 to vector<2x128xf32>
    %362 = arith.addf %361, %360 : vector<2x128xf32>
    %363 = arith.divf %361, %362 : vector<2x128xf32>
    %364 = vector.extract_strided_slice %350 {offsets = [0, 128], sizes = [2, 128], strides = [1, 1]} : vector<2x384xf32> to vector<2x128xf32>
    %365 = vector.extract_strided_slice %355 {offsets = [0, 128], sizes = [2, 128], strides = [1, 1]} : vector<2x384xf32> to vector<2x128xf32>
    %366 = arith.addf %364, %365 : vector<2x128xf32>
    %367 = arith.negf %366 : vector<2x128xf32>
    %368 = math.exp %367 : vector<2x128xf32>
    %cst_119 = arith.constant 1.000000e+00 : f32
    %369 = vector.broadcast %cst_119 : f32 to vector<2x128xf32>
    %370 = arith.addf %369, %368 : vector<2x128xf32>
    %371 = arith.divf %369, %370 : vector<2x128xf32>
    %372 = vector.extract_strided_slice %350 {offsets = [0, 256], sizes = [2, 128], strides = [1, 1]} : vector<2x384xf32> to vector<2x128xf32>
    %373 = vector.extract_strided_slice %355 {offsets = [0, 256], sizes = [2, 128], strides = [1, 1]} : vector<2x384xf32> to vector<2x128xf32>
    %374 = arith.mulf %363, %373 : vector<2x128xf32>
    %375 = arith.addf %372, %374 : vector<2x128xf32>
    %376 = math.tanh %375 : vector<2x128xf32>
    %cst_120 = arith.constant 1.000000e+00 : f32
    %377 = vector.broadcast %cst_120 : f32 to vector<2x128xf32>
    %378 = arith.subf %377, %371 : vector<2x128xf32>
    %379 = arith.mulf %378, %376 : vector<2x128xf32>
    %380 = arith.mulf %371, %347 : vector<2x128xf32>
    %381 = arith.addf %379, %380 : vector<2x128xf32>
    %c11_i32 = arith.constant 11 : i32
    %382 = arith.index_cast %c11_i32 : i32 to index
    %c0_121 = arith.constant 0 : index
    %c0_122 = arith.constant 0 : index
    %383 = vector.load %arg6[%382, %c0_121, %c0_122] : memref<24x2x384xf32, #tpu.memory_space<vmem>>, vector<1x2x384xf32>
    %384 = vector.shape_cast %383 : vector<1x2x384xf32> to vector<2x384xf32>
    %c0_123 = arith.constant 0 : index
    %c0_124 = arith.constant 0 : index
    %385 = vector.load %arg2[%c0_123, %c0_124] : memref<128x384xf32, #tpu.memory_space<vmem>>, vector<128x384xf32>
    %cst_125 = arith.constant dense<0.000000e+00> : vector<2x384xf32>
    %386 = tpu.matmul %381, %385, %cst_125 {dimension_numbers = #tpu.dot_dimension_numbers<[1], [0], [0], [1], [0, 0, 1, 1], [], []>} : vector<2x128xf32>, vector<128x384xf32>, vector<2x384xf32> -> vector<2x384xf32>
    %c0_126 = arith.constant 0 : index
    %c0_127 = arith.constant 0 : index
    %387 = vector.load %arg4[%c0_126, %c0_127] : memref<1x384xf32, #tpu.memory_space<vmem>>, vector<1x384xf32>
    %388 = vector.broadcast %387 : vector<1x384xf32> to vector<2x384xf32>
    %389 = arith.addf %386, %388 : vector<2x384xf32>
    %390 = vector.extract_strided_slice %384 {offsets = [0, 0], sizes = [2, 128], strides = [1, 1]} : vector<2x384xf32> to vector<2x128xf32>
    %391 = vector.extract_strided_slice %389 {offsets = [0, 0], sizes = [2, 128], strides = [1, 1]} : vector<2x384xf32> to vector<2x128xf32>
    %392 = arith.addf %390, %391 : vector<2x128xf32>
    %393 = arith.negf %392 : vector<2x128xf32>
    %394 = math.exp %393 : vector<2x128xf32>
    %cst_128 = arith.constant 1.000000e+00 : f32
    %395 = vector.broadcast %cst_128 : f32 to vector<2x128xf32>
    %396 = arith.addf %395, %394 : vector<2x128xf32>
    %397 = arith.divf %395, %396 : vector<2x128xf32>
    %398 = vector.extract_strided_slice %384 {offsets = [0, 128], sizes = [2, 128], strides = [1, 1]} : vector<2x384xf32> to vector<2x128xf32>
    %399 = vector.extract_strided_slice %389 {offsets = [0, 128], sizes = [2, 128], strides = [1, 1]} : vector<2x384xf32> to vector<2x128xf32>
    %400 = arith.addf %398, %399 : vector<2x128xf32>
    %401 = arith.negf %400 : vector<2x128xf32>
    %402 = math.exp %401 : vector<2x128xf32>
    %cst_129 = arith.constant 1.000000e+00 : f32
    %403 = vector.broadcast %cst_129 : f32 to vector<2x128xf32>
    %404 = arith.addf %403, %402 : vector<2x128xf32>
    %405 = arith.divf %403, %404 : vector<2x128xf32>
    %406 = vector.extract_strided_slice %384 {offsets = [0, 256], sizes = [2, 128], strides = [1, 1]} : vector<2x384xf32> to vector<2x128xf32>
    %407 = vector.extract_strided_slice %389 {offsets = [0, 256], sizes = [2, 128], strides = [1, 1]} : vector<2x384xf32> to vector<2x128xf32>
    %408 = arith.mulf %397, %407 : vector<2x128xf32>
    %409 = arith.addf %406, %408 : vector<2x128xf32>
    %410 = math.tanh %409 : vector<2x128xf32>
    %cst_130 = arith.constant 1.000000e+00 : f32
    %411 = vector.broadcast %cst_130 : f32 to vector<2x128xf32>
    %412 = arith.subf %411, %405 : vector<2x128xf32>
    %413 = arith.mulf %412, %410 : vector<2x128xf32>
    %414 = arith.mulf %405, %381 : vector<2x128xf32>
    %415 = arith.addf %413, %414 : vector<2x128xf32>
    %c12_i32 = arith.constant 12 : i32
    %416 = arith.index_cast %c12_i32 : i32 to index
    %c0_131 = arith.constant 0 : index
    %c0_132 = arith.constant 0 : index
    %417 = vector.load %arg6[%416, %c0_131, %c0_132] : memref<24x2x384xf32, #tpu.memory_space<vmem>>, vector<1x2x384xf32>
    %418 = vector.shape_cast %417 : vector<1x2x384xf32> to vector<2x384xf32>
    %c0_133 = arith.constant 0 : index
    %c0_134 = arith.constant 0 : index
    %419 = vector.load %arg2[%c0_133, %c0_134] : memref<128x384xf32, #tpu.memory_space<vmem>>, vector<128x384xf32>
    %cst_135 = arith.constant dense<0.000000e+00> : vector<2x384xf32>
    %420 = tpu.matmul %415, %419, %cst_135 {dimension_numbers = #tpu.dot_dimension_numbers<[1], [0], [0], [1], [0, 0, 1, 1], [], []>} : vector<2x128xf32>, vector<128x384xf32>, vector<2x384xf32> -> vector<2x384xf32>
    %c0_136 = arith.constant 0 : index
    %c0_137 = arith.constant 0 : index
    %421 = vector.load %arg4[%c0_136, %c0_137] : memref<1x384xf32, #tpu.memory_space<vmem>>, vector<1x384xf32>
    %422 = vector.broadcast %421 : vector<1x384xf32> to vector<2x384xf32>
    %423 = arith.addf %420, %422 : vector<2x384xf32>
    %424 = vector.extract_strided_slice %418 {offsets = [0, 0], sizes = [2, 128], strides = [1, 1]} : vector<2x384xf32> to vector<2x128xf32>
    %425 = vector.extract_strided_slice %423 {offsets = [0, 0], sizes = [2, 128], strides = [1, 1]} : vector<2x384xf32> to vector<2x128xf32>
    %426 = arith.addf %424, %425 : vector<2x128xf32>
    %427 = arith.negf %426 : vector<2x128xf32>
    %428 = math.exp %427 : vector<2x128xf32>
    %cst_138 = arith.constant 1.000000e+00 : f32
    %429 = vector.broadcast %cst_138 : f32 to vector<2x128xf32>
    %430 = arith.addf %429, %428 : vector<2x128xf32>
    %431 = arith.divf %429, %430 : vector<2x128xf32>
    %432 = vector.extract_strided_slice %418 {offsets = [0, 128], sizes = [2, 128], strides = [1, 1]} : vector<2x384xf32> to vector<2x128xf32>
    %433 = vector.extract_strided_slice %423 {offsets = [0, 128], sizes = [2, 128], strides = [1, 1]} : vector<2x384xf32> to vector<2x128xf32>
    %434 = arith.addf %432, %433 : vector<2x128xf32>
    %435 = arith.negf %434 : vector<2x128xf32>
    %436 = math.exp %435 : vector<2x128xf32>
    %cst_139 = arith.constant 1.000000e+00 : f32
    %437 = vector.broadcast %cst_139 : f32 to vector<2x128xf32>
    %438 = arith.addf %437, %436 : vector<2x128xf32>
    %439 = arith.divf %437, %438 : vector<2x128xf32>
    %440 = vector.extract_strided_slice %418 {offsets = [0, 256], sizes = [2, 128], strides = [1, 1]} : vector<2x384xf32> to vector<2x128xf32>
    %441 = vector.extract_strided_slice %423 {offsets = [0, 256], sizes = [2, 128], strides = [1, 1]} : vector<2x384xf32> to vector<2x128xf32>
    %442 = arith.mulf %431, %441 : vector<2x128xf32>
    %443 = arith.addf %440, %442 : vector<2x128xf32>
    %444 = math.tanh %443 : vector<2x128xf32>
    %cst_140 = arith.constant 1.000000e+00 : f32
    %445 = vector.broadcast %cst_140 : f32 to vector<2x128xf32>
    %446 = arith.subf %445, %439 : vector<2x128xf32>
    %447 = arith.mulf %446, %444 : vector<2x128xf32>
    %448 = arith.mulf %439, %415 : vector<2x128xf32>
    %449 = arith.addf %447, %448 : vector<2x128xf32>
    %c13_i32 = arith.constant 13 : i32
    %450 = arith.index_cast %c13_i32 : i32 to index
    %c0_141 = arith.constant 0 : index
    %c0_142 = arith.constant 0 : index
    %451 = vector.load %arg6[%450, %c0_141, %c0_142] : memref<24x2x384xf32, #tpu.memory_space<vmem>>, vector<1x2x384xf32>
    %452 = vector.shape_cast %451 : vector<1x2x384xf32> to vector<2x384xf32>
    %c0_143 = arith.constant 0 : index
    %c0_144 = arith.constant 0 : index
    %453 = vector.load %arg2[%c0_143, %c0_144] : memref<128x384xf32, #tpu.memory_space<vmem>>, vector<128x384xf32>
    %cst_145 = arith.constant dense<0.000000e+00> : vector<2x384xf32>
    %454 = tpu.matmul %449, %453, %cst_145 {dimension_numbers = #tpu.dot_dimension_numbers<[1], [0], [0], [1], [0, 0, 1, 1], [], []>} : vector<2x128xf32>, vector<128x384xf32>, vector<2x384xf32> -> vector<2x384xf32>
    %c0_146 = arith.constant 0 : index
    %c0_147 = arith.constant 0 : index
    %455 = vector.load %arg4[%c0_146, %c0_147] : memref<1x384xf32, #tpu.memory_space<vmem>>, vector<1x384xf32>
    %456 = vector.broadcast %455 : vector<1x384xf32> to vector<2x384xf32>
    %457 = arith.addf %454, %456 : vector<2x384xf32>
    %458 = vector.extract_strided_slice %452 {offsets = [0, 0], sizes = [2, 128], strides = [1, 1]} : vector<2x384xf32> to vector<2x128xf32>
    %459 = vector.extract_strided_slice %457 {offsets = [0, 0], sizes = [2, 128], strides = [1, 1]} : vector<2x384xf32> to vector<2x128xf32>
    %460 = arith.addf %458, %459 : vector<2x128xf32>
    %461 = arith.negf %460 : vector<2x128xf32>
    %462 = math.exp %461 : vector<2x128xf32>
    %cst_148 = arith.constant 1.000000e+00 : f32
    %463 = vector.broadcast %cst_148 : f32 to vector<2x128xf32>
    %464 = arith.addf %463, %462 : vector<2x128xf32>
    %465 = arith.divf %463, %464 : vector<2x128xf32>
    %466 = vector.extract_strided_slice %452 {offsets = [0, 128], sizes = [2, 128], strides = [1, 1]} : vector<2x384xf32> to vector<2x128xf32>
    %467 = vector.extract_strided_slice %457 {offsets = [0, 128], sizes = [2, 128], strides = [1, 1]} : vector<2x384xf32> to vector<2x128xf32>
    %468 = arith.addf %466, %467 : vector<2x128xf32>
    %469 = arith.negf %468 : vector<2x128xf32>
    %470 = math.exp %469 : vector<2x128xf32>
    %cst_149 = arith.constant 1.000000e+00 : f32
    %471 = vector.broadcast %cst_149 : f32 to vector<2x128xf32>
    %472 = arith.addf %471, %470 : vector<2x128xf32>
    %473 = arith.divf %471, %472 : vector<2x128xf32>
    %474 = vector.extract_strided_slice %452 {offsets = [0, 256], sizes = [2, 128], strides = [1, 1]} : vector<2x384xf32> to vector<2x128xf32>
    %475 = vector.extract_strided_slice %457 {offsets = [0, 256], sizes = [2, 128], strides = [1, 1]} : vector<2x384xf32> to vector<2x128xf32>
    %476 = arith.mulf %465, %475 : vector<2x128xf32>
    %477 = arith.addf %474, %476 : vector<2x128xf32>
    %478 = math.tanh %477 : vector<2x128xf32>
    %cst_150 = arith.constant 1.000000e+00 : f32
    %479 = vector.broadcast %cst_150 : f32 to vector<2x128xf32>
    %480 = arith.subf %479, %473 : vector<2x128xf32>
    %481 = arith.mulf %480, %478 : vector<2x128xf32>
    %482 = arith.mulf %473, %449 : vector<2x128xf32>
    %483 = arith.addf %481, %482 : vector<2x128xf32>
    %c14_i32 = arith.constant 14 : i32
    %484 = arith.index_cast %c14_i32 : i32 to index
    %c0_151 = arith.constant 0 : index
    %c0_152 = arith.constant 0 : index
    %485 = vector.load %arg6[%484, %c0_151, %c0_152] : memref<24x2x384xf32, #tpu.memory_space<vmem>>, vector<1x2x384xf32>
    %486 = vector.shape_cast %485 : vector<1x2x384xf32> to vector<2x384xf32>
    %c0_153 = arith.constant 0 : index
    %c0_154 = arith.constant 0 : index
    %487 = vector.load %arg2[%c0_153, %c0_154] : memref<128x384xf32, #tpu.memory_space<vmem>>, vector<128x384xf32>
    %cst_155 = arith.constant dense<0.000000e+00> : vector<2x384xf32>
    %488 = tpu.matmul %483, %487, %cst_155 {dimension_numbers = #tpu.dot_dimension_numbers<[1], [0], [0], [1], [0, 0, 1, 1], [], []>} : vector<2x128xf32>, vector<128x384xf32>, vector<2x384xf32> -> vector<2x384xf32>
    %c0_156 = arith.constant 0 : index
    %c0_157 = arith.constant 0 : index
    %489 = vector.load %arg4[%c0_156, %c0_157] : memref<1x384xf32, #tpu.memory_space<vmem>>, vector<1x384xf32>
    %490 = vector.broadcast %489 : vector<1x384xf32> to vector<2x384xf32>
    %491 = arith.addf %488, %490 : vector<2x384xf32>
    %492 = vector.extract_strided_slice %486 {offsets = [0, 0], sizes = [2, 128], strides = [1, 1]} : vector<2x384xf32> to vector<2x128xf32>
    %493 = vector.extract_strided_slice %491 {offsets = [0, 0], sizes = [2, 128], strides = [1, 1]} : vector<2x384xf32> to vector<2x128xf32>
    %494 = arith.addf %492, %493 : vector<2x128xf32>
    %495 = arith.negf %494 : vector<2x128xf32>
    %496 = math.exp %495 : vector<2x128xf32>
    %cst_158 = arith.constant 1.000000e+00 : f32
    %497 = vector.broadcast %cst_158 : f32 to vector<2x128xf32>
    %498 = arith.addf %497, %496 : vector<2x128xf32>
    %499 = arith.divf %497, %498 : vector<2x128xf32>
    %500 = vector.extract_strided_slice %486 {offsets = [0, 128], sizes = [2, 128], strides = [1, 1]} : vector<2x384xf32> to vector<2x128xf32>
    %501 = vector.extract_strided_slice %491 {offsets = [0, 128], sizes = [2, 128], strides = [1, 1]} : vector<2x384xf32> to vector<2x128xf32>
    %502 = arith.addf %500, %501 : vector<2x128xf32>
    %503 = arith.negf %502 : vector<2x128xf32>
    %504 = math.exp %503 : vector<2x128xf32>
    %cst_159 = arith.constant 1.000000e+00 : f32
    %505 = vector.broadcast %cst_159 : f32 to vector<2x128xf32>
    %506 = arith.addf %505, %504 : vector<2x128xf32>
    %507 = arith.divf %505, %506 : vector<2x128xf32>
    %508 = vector.extract_strided_slice %486 {offsets = [0, 256], sizes = [2, 128], strides = [1, 1]} : vector<2x384xf32> to vector<2x128xf32>
    %509 = vector.extract_strided_slice %491 {offsets = [0, 256], sizes = [2, 128], strides = [1, 1]} : vector<2x384xf32> to vector<2x128xf32>
    %510 = arith.mulf %499, %509 : vector<2x128xf32>
    %511 = arith.addf %508, %510 : vector<2x128xf32>
    %512 = math.tanh %511 : vector<2x128xf32>
    %cst_160 = arith.constant 1.000000e+00 : f32
    %513 = vector.broadcast %cst_160 : f32 to vector<2x128xf32>
    %514 = arith.subf %513, %507 : vector<2x128xf32>
    %515 = arith.mulf %514, %512 : vector<2x128xf32>
    %516 = arith.mulf %507, %483 : vector<2x128xf32>
    %517 = arith.addf %515, %516 : vector<2x128xf32>
    %c15_i32 = arith.constant 15 : i32
    %518 = arith.index_cast %c15_i32 : i32 to index
    %c0_161 = arith.constant 0 : index
    %c0_162 = arith.constant 0 : index
    %519 = vector.load %arg6[%518, %c0_161, %c0_162] : memref<24x2x384xf32, #tpu.memory_space<vmem>>, vector<1x2x384xf32>
    %520 = vector.shape_cast %519 : vector<1x2x384xf32> to vector<2x384xf32>
    %c0_163 = arith.constant 0 : index
    %c0_164 = arith.constant 0 : index
    %521 = vector.load %arg2[%c0_163, %c0_164] : memref<128x384xf32, #tpu.memory_space<vmem>>, vector<128x384xf32>
    %cst_165 = arith.constant dense<0.000000e+00> : vector<2x384xf32>
    %522 = tpu.matmul %517, %521, %cst_165 {dimension_numbers = #tpu.dot_dimension_numbers<[1], [0], [0], [1], [0, 0, 1, 1], [], []>} : vector<2x128xf32>, vector<128x384xf32>, vector<2x384xf32> -> vector<2x384xf32>
    %c0_166 = arith.constant 0 : index
    %c0_167 = arith.constant 0 : index
    %523 = vector.load %arg4[%c0_166, %c0_167] : memref<1x384xf32, #tpu.memory_space<vmem>>, vector<1x384xf32>
    %524 = vector.broadcast %523 : vector<1x384xf32> to vector<2x384xf32>
    %525 = arith.addf %522, %524 : vector<2x384xf32>
    %526 = vector.extract_strided_slice %520 {offsets = [0, 0], sizes = [2, 128], strides = [1, 1]} : vector<2x384xf32> to vector<2x128xf32>
    %527 = vector.extract_strided_slice %525 {offsets = [0, 0], sizes = [2, 128], strides = [1, 1]} : vector<2x384xf32> to vector<2x128xf32>
    %528 = arith.addf %526, %527 : vector<2x128xf32>
    %529 = arith.negf %528 : vector<2x128xf32>
    %530 = math.exp %529 : vector<2x128xf32>
    %cst_168 = arith.constant 1.000000e+00 : f32
    %531 = vector.broadcast %cst_168 : f32 to vector<2x128xf32>
    %532 = arith.addf %531, %530 : vector<2x128xf32>
    %533 = arith.divf %531, %532 : vector<2x128xf32>
    %534 = vector.extract_strided_slice %520 {offsets = [0, 128], sizes = [2, 128], strides = [1, 1]} : vector<2x384xf32> to vector<2x128xf32>
    %535 = vector.extract_strided_slice %525 {offsets = [0, 128], sizes = [2, 128], strides = [1, 1]} : vector<2x384xf32> to vector<2x128xf32>
    %536 = arith.addf %534, %535 : vector<2x128xf32>
    %537 = arith.negf %536 : vector<2x128xf32>
    %538 = math.exp %537 : vector<2x128xf32>
    %cst_169 = arith.constant 1.000000e+00 : f32
    %539 = vector.broadcast %cst_169 : f32 to vector<2x128xf32>
    %540 = arith.addf %539, %538 : vector<2x128xf32>
    %541 = arith.divf %539, %540 : vector<2x128xf32>
    %542 = vector.extract_strided_slice %520 {offsets = [0, 256], sizes = [2, 128], strides = [1, 1]} : vector<2x384xf32> to vector<2x128xf32>
    %543 = vector.extract_strided_slice %525 {offsets = [0, 256], sizes = [2, 128], strides = [1, 1]} : vector<2x384xf32> to vector<2x128xf32>
    %544 = arith.mulf %533, %543 : vector<2x128xf32>
    %545 = arith.addf %542, %544 : vector<2x128xf32>
    %546 = math.tanh %545 : vector<2x128xf32>
    %cst_170 = arith.constant 1.000000e+00 : f32
    %547 = vector.broadcast %cst_170 : f32 to vector<2x128xf32>
    %548 = arith.subf %547, %541 : vector<2x128xf32>
    %549 = arith.mulf %548, %546 : vector<2x128xf32>
    %550 = arith.mulf %541, %517 : vector<2x128xf32>
    %551 = arith.addf %549, %550 : vector<2x128xf32>
    %c16_i32 = arith.constant 16 : i32
    %552 = arith.index_cast %c16_i32 : i32 to index
    %c0_171 = arith.constant 0 : index
    %c0_172 = arith.constant 0 : index
    %553 = vector.load %arg6[%552, %c0_171, %c0_172] : memref<24x2x384xf32, #tpu.memory_space<vmem>>, vector<1x2x384xf32>
    %554 = vector.shape_cast %553 : vector<1x2x384xf32> to vector<2x384xf32>
    %c0_173 = arith.constant 0 : index
    %c0_174 = arith.constant 0 : index
    %555 = vector.load %arg2[%c0_173, %c0_174] : memref<128x384xf32, #tpu.memory_space<vmem>>, vector<128x384xf32>
    %cst_175 = arith.constant dense<0.000000e+00> : vector<2x384xf32>
    %556 = tpu.matmul %551, %555, %cst_175 {dimension_numbers = #tpu.dot_dimension_numbers<[1], [0], [0], [1], [0, 0, 1, 1], [], []>} : vector<2x128xf32>, vector<128x384xf32>, vector<2x384xf32> -> vector<2x384xf32>
    %c0_176 = arith.constant 0 : index
    %c0_177 = arith.constant 0 : index
    %557 = vector.load %arg4[%c0_176, %c0_177] : memref<1x384xf32, #tpu.memory_space<vmem>>, vector<1x384xf32>
    %558 = vector.broadcast %557 : vector<1x384xf32> to vector<2x384xf32>
    %559 = arith.addf %556, %558 : vector<2x384xf32>
    %560 = vector.extract_strided_slice %554 {offsets = [0, 0], sizes = [2, 128], strides = [1, 1]} : vector<2x384xf32> to vector<2x128xf32>
    %561 = vector.extract_strided_slice %559 {offsets = [0, 0], sizes = [2, 128], strides = [1, 1]} : vector<2x384xf32> to vector<2x128xf32>
    %562 = arith.addf %560, %561 : vector<2x128xf32>
    %563 = arith.negf %562 : vector<2x128xf32>
    %564 = math.exp %563 : vector<2x128xf32>
    %cst_178 = arith.constant 1.000000e+00 : f32
    %565 = vector.broadcast %cst_178 : f32 to vector<2x128xf32>
    %566 = arith.addf %565, %564 : vector<2x128xf32>
    %567 = arith.divf %565, %566 : vector<2x128xf32>
    %568 = vector.extract_strided_slice %554 {offsets = [0, 128], sizes = [2, 128], strides = [1, 1]} : vector<2x384xf32> to vector<2x128xf32>
    %569 = vector.extract_strided_slice %559 {offsets = [0, 128], sizes = [2, 128], strides = [1, 1]} : vector<2x384xf32> to vector<2x128xf32>
    %570 = arith.addf %568, %569 : vector<2x128xf32>
    %571 = arith.negf %570 : vector<2x128xf32>
    %572 = math.exp %571 : vector<2x128xf32>
    %cst_179 = arith.constant 1.000000e+00 : f32
    %573 = vector.broadcast %cst_179 : f32 to vector<2x128xf32>
    %574 = arith.addf %573, %572 : vector<2x128xf32>
    %575 = arith.divf %573, %574 : vector<2x128xf32>
    %576 = vector.extract_strided_slice %554 {offsets = [0, 256], sizes = [2, 128], strides = [1, 1]} : vector<2x384xf32> to vector<2x128xf32>
    %577 = vector.extract_strided_slice %559 {offsets = [0, 256], sizes = [2, 128], strides = [1, 1]} : vector<2x384xf32> to vector<2x128xf32>
    %578 = arith.mulf %567, %577 : vector<2x128xf32>
    %579 = arith.addf %576, %578 : vector<2x128xf32>
    %580 = math.tanh %579 : vector<2x128xf32>
    %cst_180 = arith.constant 1.000000e+00 : f32
    %581 = vector.broadcast %cst_180 : f32 to vector<2x128xf32>
    %582 = arith.subf %581, %575 : vector<2x128xf32>
    %583 = arith.mulf %582, %580 : vector<2x128xf32>
    %584 = arith.mulf %575, %551 : vector<2x128xf32>
    %585 = arith.addf %583, %584 : vector<2x128xf32>
    %c17_i32 = arith.constant 17 : i32
    %586 = arith.index_cast %c17_i32 : i32 to index
    %c0_181 = arith.constant 0 : index
    %c0_182 = arith.constant 0 : index
    %587 = vector.load %arg6[%586, %c0_181, %c0_182] : memref<24x2x384xf32, #tpu.memory_space<vmem>>, vector<1x2x384xf32>
    %588 = vector.shape_cast %587 : vector<1x2x384xf32> to vector<2x384xf32>
    %c0_183 = arith.constant 0 : index
    %c0_184 = arith.constant 0 : index
    %589 = vector.load %arg2[%c0_183, %c0_184] : memref<128x384xf32, #tpu.memory_space<vmem>>, vector<128x384xf32>
    %cst_185 = arith.constant dense<0.000000e+00> : vector<2x384xf32>
    %590 = tpu.matmul %585, %589, %cst_185 {dimension_numbers = #tpu.dot_dimension_numbers<[1], [0], [0], [1], [0, 0, 1, 1], [], []>} : vector<2x128xf32>, vector<128x384xf32>, vector<2x384xf32> -> vector<2x384xf32>
    %c0_186 = arith.constant 0 : index
    %c0_187 = arith.constant 0 : index
    %591 = vector.load %arg4[%c0_186, %c0_187] : memref<1x384xf32, #tpu.memory_space<vmem>>, vector<1x384xf32>
    %592 = vector.broadcast %591 : vector<1x384xf32> to vector<2x384xf32>
    %593 = arith.addf %590, %592 : vector<2x384xf32>
    %594 = vector.extract_strided_slice %588 {offsets = [0, 0], sizes = [2, 128], strides = [1, 1]} : vector<2x384xf32> to vector<2x128xf32>
    %595 = vector.extract_strided_slice %593 {offsets = [0, 0], sizes = [2, 128], strides = [1, 1]} : vector<2x384xf32> to vector<2x128xf32>
    %596 = arith.addf %594, %595 : vector<2x128xf32>
    %597 = arith.negf %596 : vector<2x128xf32>
    %598 = math.exp %597 : vector<2x128xf32>
    %cst_188 = arith.constant 1.000000e+00 : f32
    %599 = vector.broadcast %cst_188 : f32 to vector<2x128xf32>
    %600 = arith.addf %599, %598 : vector<2x128xf32>
    %601 = arith.divf %599, %600 : vector<2x128xf32>
    %602 = vector.extract_strided_slice %588 {offsets = [0, 128], sizes = [2, 128], strides = [1, 1]} : vector<2x384xf32> to vector<2x128xf32>
    %603 = vector.extract_strided_slice %593 {offsets = [0, 128], sizes = [2, 128], strides = [1, 1]} : vector<2x384xf32> to vector<2x128xf32>
    %604 = arith.addf %602, %603 : vector<2x128xf32>
    %605 = arith.negf %604 : vector<2x128xf32>
    %606 = math.exp %605 : vector<2x128xf32>
    %cst_189 = arith.constant 1.000000e+00 : f32
    %607 = vector.broadcast %cst_189 : f32 to vector<2x128xf32>
    %608 = arith.addf %607, %606 : vector<2x128xf32>
    %609 = arith.divf %607, %608 : vector<2x128xf32>
    %610 = vector.extract_strided_slice %588 {offsets = [0, 256], sizes = [2, 128], strides = [1, 1]} : vector<2x384xf32> to vector<2x128xf32>
    %611 = vector.extract_strided_slice %593 {offsets = [0, 256], sizes = [2, 128], strides = [1, 1]} : vector<2x384xf32> to vector<2x128xf32>
    %612 = arith.mulf %601, %611 : vector<2x128xf32>
    %613 = arith.addf %610, %612 : vector<2x128xf32>
    %614 = math.tanh %613 : vector<2x128xf32>
    %cst_190 = arith.constant 1.000000e+00 : f32
    %615 = vector.broadcast %cst_190 : f32 to vector<2x128xf32>
    %616 = arith.subf %615, %609 : vector<2x128xf32>
    %617 = arith.mulf %616, %614 : vector<2x128xf32>
    %618 = arith.mulf %609, %585 : vector<2x128xf32>
    %619 = arith.addf %617, %618 : vector<2x128xf32>
    %c18_i32 = arith.constant 18 : i32
    %620 = arith.index_cast %c18_i32 : i32 to index
    %c0_191 = arith.constant 0 : index
    %c0_192 = arith.constant 0 : index
    %621 = vector.load %arg6[%620, %c0_191, %c0_192] : memref<24x2x384xf32, #tpu.memory_space<vmem>>, vector<1x2x384xf32>
    %622 = vector.shape_cast %621 : vector<1x2x384xf32> to vector<2x384xf32>
    %c0_193 = arith.constant 0 : index
    %c0_194 = arith.constant 0 : index
    %623 = vector.load %arg2[%c0_193, %c0_194] : memref<128x384xf32, #tpu.memory_space<vmem>>, vector<128x384xf32>
    %cst_195 = arith.constant dense<0.000000e+00> : vector<2x384xf32>
    %624 = tpu.matmul %619, %623, %cst_195 {dimension_numbers = #tpu.dot_dimension_numbers<[1], [0], [0], [1], [0, 0, 1, 1], [], []>} : vector<2x128xf32>, vector<128x384xf32>, vector<2x384xf32> -> vector<2x384xf32>
    %c0_196 = arith.constant 0 : index
    %c0_197 = arith.constant 0 : index
    %625 = vector.load %arg4[%c0_196, %c0_197] : memref<1x384xf32, #tpu.memory_space<vmem>>, vector<1x384xf32>
    %626 = vector.broadcast %625 : vector<1x384xf32> to vector<2x384xf32>
    %627 = arith.addf %624, %626 : vector<2x384xf32>
    %628 = vector.extract_strided_slice %622 {offsets = [0, 0], sizes = [2, 128], strides = [1, 1]} : vector<2x384xf32> to vector<2x128xf32>
    %629 = vector.extract_strided_slice %627 {offsets = [0, 0], sizes = [2, 128], strides = [1, 1]} : vector<2x384xf32> to vector<2x128xf32>
    %630 = arith.addf %628, %629 : vector<2x128xf32>
    %631 = arith.negf %630 : vector<2x128xf32>
    %632 = math.exp %631 : vector<2x128xf32>
    %cst_198 = arith.constant 1.000000e+00 : f32
    %633 = vector.broadcast %cst_198 : f32 to vector<2x128xf32>
    %634 = arith.addf %633, %632 : vector<2x128xf32>
    %635 = arith.divf %633, %634 : vector<2x128xf32>
    %636 = vector.extract_strided_slice %622 {offsets = [0, 128], sizes = [2, 128], strides = [1, 1]} : vector<2x384xf32> to vector<2x128xf32>
    %637 = vector.extract_strided_slice %627 {offsets = [0, 128], sizes = [2, 128], strides = [1, 1]} : vector<2x384xf32> to vector<2x128xf32>
    %638 = arith.addf %636, %637 : vector<2x128xf32>
    %639 = arith.negf %638 : vector<2x128xf32>
    %640 = math.exp %639 : vector<2x128xf32>
    %cst_199 = arith.constant 1.000000e+00 : f32
    %641 = vector.broadcast %cst_199 : f32 to vector<2x128xf32>
    %642 = arith.addf %641, %640 : vector<2x128xf32>
    %643 = arith.divf %641, %642 : vector<2x128xf32>
    %644 = vector.extract_strided_slice %622 {offsets = [0, 256], sizes = [2, 128], strides = [1, 1]} : vector<2x384xf32> to vector<2x128xf32>
    %645 = vector.extract_strided_slice %627 {offsets = [0, 256], sizes = [2, 128], strides = [1, 1]} : vector<2x384xf32> to vector<2x128xf32>
    %646 = arith.mulf %635, %645 : vector<2x128xf32>
    %647 = arith.addf %644, %646 : vector<2x128xf32>
    %648 = math.tanh %647 : vector<2x128xf32>
    %cst_200 = arith.constant 1.000000e+00 : f32
    %649 = vector.broadcast %cst_200 : f32 to vector<2x128xf32>
    %650 = arith.subf %649, %643 : vector<2x128xf32>
    %651 = arith.mulf %650, %648 : vector<2x128xf32>
    %652 = arith.mulf %643, %619 : vector<2x128xf32>
    %653 = arith.addf %651, %652 : vector<2x128xf32>
    %c19_i32 = arith.constant 19 : i32
    %654 = arith.index_cast %c19_i32 : i32 to index
    %c0_201 = arith.constant 0 : index
    %c0_202 = arith.constant 0 : index
    %655 = vector.load %arg6[%654, %c0_201, %c0_202] : memref<24x2x384xf32, #tpu.memory_space<vmem>>, vector<1x2x384xf32>
    %656 = vector.shape_cast %655 : vector<1x2x384xf32> to vector<2x384xf32>
    %c0_203 = arith.constant 0 : index
    %c0_204 = arith.constant 0 : index
    %657 = vector.load %arg2[%c0_203, %c0_204] : memref<128x384xf32, #tpu.memory_space<vmem>>, vector<128x384xf32>
    %cst_205 = arith.constant dense<0.000000e+00> : vector<2x384xf32>
    %658 = tpu.matmul %653, %657, %cst_205 {dimension_numbers = #tpu.dot_dimension_numbers<[1], [0], [0], [1], [0, 0, 1, 1], [], []>} : vector<2x128xf32>, vector<128x384xf32>, vector<2x384xf32> -> vector<2x384xf32>
    %c0_206 = arith.constant 0 : index
    %c0_207 = arith.constant 0 : index
    %659 = vector.load %arg4[%c0_206, %c0_207] : memref<1x384xf32, #tpu.memory_space<vmem>>, vector<1x384xf32>
    %660 = vector.broadcast %659 : vector<1x384xf32> to vector<2x384xf32>
    %661 = arith.addf %658, %660 : vector<2x384xf32>
    %662 = vector.extract_strided_slice %656 {offsets = [0, 0], sizes = [2, 128], strides = [1, 1]} : vector<2x384xf32> to vector<2x128xf32>
    %663 = vector.extract_strided_slice %661 {offsets = [0, 0], sizes = [2, 128], strides = [1, 1]} : vector<2x384xf32> to vector<2x128xf32>
    %664 = arith.addf %662, %663 : vector<2x128xf32>
    %665 = arith.negf %664 : vector<2x128xf32>
    %666 = math.exp %665 : vector<2x128xf32>
    %cst_208 = arith.constant 1.000000e+00 : f32
    %667 = vector.broadcast %cst_208 : f32 to vector<2x128xf32>
    %668 = arith.addf %667, %666 : vector<2x128xf32>
    %669 = arith.divf %667, %668 : vector<2x128xf32>
    %670 = vector.extract_strided_slice %656 {offsets = [0, 128], sizes = [2, 128], strides = [1, 1]} : vector<2x384xf32> to vector<2x128xf32>
    %671 = vector.extract_strided_slice %661 {offsets = [0, 128], sizes = [2, 128], strides = [1, 1]} : vector<2x384xf32> to vector<2x128xf32>
    %672 = arith.addf %670, %671 : vector<2x128xf32>
    %673 = arith.negf %672 : vector<2x128xf32>
    %674 = math.exp %673 : vector<2x128xf32>
    %cst_209 = arith.constant 1.000000e+00 : f32
    %675 = vector.broadcast %cst_209 : f32 to vector<2x128xf32>
    %676 = arith.addf %675, %674 : vector<2x128xf32>
    %677 = arith.divf %675, %676 : vector<2x128xf32>
    %678 = vector.extract_strided_slice %656 {offsets = [0, 256], sizes = [2, 128], strides = [1, 1]} : vector<2x384xf32> to vector<2x128xf32>
    %679 = vector.extract_strided_slice %661 {offsets = [0, 256], sizes = [2, 128], strides = [1, 1]} : vector<2x384xf32> to vector<2x128xf32>
    %680 = arith.mulf %669, %679 : vector<2x128xf32>
    %681 = arith.addf %678, %680 : vector<2x128xf32>
    %682 = math.tanh %681 : vector<2x128xf32>
    %cst_210 = arith.constant 1.000000e+00 : f32
    %683 = vector.broadcast %cst_210 : f32 to vector<2x128xf32>
    %684 = arith.subf %683, %677 : vector<2x128xf32>
    %685 = arith.mulf %684, %682 : vector<2x128xf32>
    %686 = arith.mulf %677, %653 : vector<2x128xf32>
    %687 = arith.addf %685, %686 : vector<2x128xf32>
    %c20_i32 = arith.constant 20 : i32
    %688 = arith.index_cast %c20_i32 : i32 to index
    %c0_211 = arith.constant 0 : index
    %c0_212 = arith.constant 0 : index
    %689 = vector.load %arg6[%688, %c0_211, %c0_212] : memref<24x2x384xf32, #tpu.memory_space<vmem>>, vector<1x2x384xf32>
    %690 = vector.shape_cast %689 : vector<1x2x384xf32> to vector<2x384xf32>
    %c0_213 = arith.constant 0 : index
    %c0_214 = arith.constant 0 : index
    %691 = vector.load %arg2[%c0_213, %c0_214] : memref<128x384xf32, #tpu.memory_space<vmem>>, vector<128x384xf32>
    %cst_215 = arith.constant dense<0.000000e+00> : vector<2x384xf32>
    %692 = tpu.matmul %687, %691, %cst_215 {dimension_numbers = #tpu.dot_dimension_numbers<[1], [0], [0], [1], [0, 0, 1, 1], [], []>} : vector<2x128xf32>, vector<128x384xf32>, vector<2x384xf32> -> vector<2x384xf32>
    %c0_216 = arith.constant 0 : index
    %c0_217 = arith.constant 0 : index
    %693 = vector.load %arg4[%c0_216, %c0_217] : memref<1x384xf32, #tpu.memory_space<vmem>>, vector<1x384xf32>
    %694 = vector.broadcast %693 : vector<1x384xf32> to vector<2x384xf32>
    %695 = arith.addf %692, %694 : vector<2x384xf32>
    %696 = vector.extract_strided_slice %690 {offsets = [0, 0], sizes = [2, 128], strides = [1, 1]} : vector<2x384xf32> to vector<2x128xf32>
    %697 = vector.extract_strided_slice %695 {offsets = [0, 0], sizes = [2, 128], strides = [1, 1]} : vector<2x384xf32> to vector<2x128xf32>
    %698 = arith.addf %696, %697 : vector<2x128xf32>
    %699 = arith.negf %698 : vector<2x128xf32>
    %700 = math.exp %699 : vector<2x128xf32>
    %cst_218 = arith.constant 1.000000e+00 : f32
    %701 = vector.broadcast %cst_218 : f32 to vector<2x128xf32>
    %702 = arith.addf %701, %700 : vector<2x128xf32>
    %703 = arith.divf %701, %702 : vector<2x128xf32>
    %704 = vector.extract_strided_slice %690 {offsets = [0, 128], sizes = [2, 128], strides = [1, 1]} : vector<2x384xf32> to vector<2x128xf32>
    %705 = vector.extract_strided_slice %695 {offsets = [0, 128], sizes = [2, 128], strides = [1, 1]} : vector<2x384xf32> to vector<2x128xf32>
    %706 = arith.addf %704, %705 : vector<2x128xf32>
    %707 = arith.negf %706 : vector<2x128xf32>
    %708 = math.exp %707 : vector<2x128xf32>
    %cst_219 = arith.constant 1.000000e+00 : f32
    %709 = vector.broadcast %cst_219 : f32 to vector<2x128xf32>
    %710 = arith.addf %709, %708 : vector<2x128xf32>
    %711 = arith.divf %709, %710 : vector<2x128xf32>
    %712 = vector.extract_strided_slice %690 {offsets = [0, 256], sizes = [2, 128], strides = [1, 1]} : vector<2x384xf32> to vector<2x128xf32>
    %713 = vector.extract_strided_slice %695 {offsets = [0, 256], sizes = [2, 128], strides = [1, 1]} : vector<2x384xf32> to vector<2x128xf32>
    %714 = arith.mulf %703, %713 : vector<2x128xf32>
    %715 = arith.addf %712, %714 : vector<2x128xf32>
    %716 = math.tanh %715 : vector<2x128xf32>
    %cst_220 = arith.constant 1.000000e+00 : f32
    %717 = vector.broadcast %cst_220 : f32 to vector<2x128xf32>
    %718 = arith.subf %717, %711 : vector<2x128xf32>
    %719 = arith.mulf %718, %716 : vector<2x128xf32>
    %720 = arith.mulf %711, %687 : vector<2x128xf32>
    %721 = arith.addf %719, %720 : vector<2x128xf32>
    %c21_i32 = arith.constant 21 : i32
    %722 = arith.index_cast %c21_i32 : i32 to index
    %c0_221 = arith.constant 0 : index
    %c0_222 = arith.constant 0 : index
    %723 = vector.load %arg6[%722, %c0_221, %c0_222] : memref<24x2x384xf32, #tpu.memory_space<vmem>>, vector<1x2x384xf32>
    %724 = vector.shape_cast %723 : vector<1x2x384xf32> to vector<2x384xf32>
    %c0_223 = arith.constant 0 : index
    %c0_224 = arith.constant 0 : index
    %725 = vector.load %arg2[%c0_223, %c0_224] : memref<128x384xf32, #tpu.memory_space<vmem>>, vector<128x384xf32>
    %cst_225 = arith.constant dense<0.000000e+00> : vector<2x384xf32>
    %726 = tpu.matmul %721, %725, %cst_225 {dimension_numbers = #tpu.dot_dimension_numbers<[1], [0], [0], [1], [0, 0, 1, 1], [], []>} : vector<2x128xf32>, vector<128x384xf32>, vector<2x384xf32> -> vector<2x384xf32>
    %c0_226 = arith.constant 0 : index
    %c0_227 = arith.constant 0 : index
    %727 = vector.load %arg4[%c0_226, %c0_227] : memref<1x384xf32, #tpu.memory_space<vmem>>, vector<1x384xf32>
    %728 = vector.broadcast %727 : vector<1x384xf32> to vector<2x384xf32>
    %729 = arith.addf %726, %728 : vector<2x384xf32>
    %730 = vector.extract_strided_slice %724 {offsets = [0, 0], sizes = [2, 128], strides = [1, 1]} : vector<2x384xf32> to vector<2x128xf32>
    %731 = vector.extract_strided_slice %729 {offsets = [0, 0], sizes = [2, 128], strides = [1, 1]} : vector<2x384xf32> to vector<2x128xf32>
    %732 = arith.addf %730, %731 : vector<2x128xf32>
    %733 = arith.negf %732 : vector<2x128xf32>
    %734 = math.exp %733 : vector<2x128xf32>
    %cst_228 = arith.constant 1.000000e+00 : f32
    %735 = vector.broadcast %cst_228 : f32 to vector<2x128xf32>
    %736 = arith.addf %735, %734 : vector<2x128xf32>
    %737 = arith.divf %735, %736 : vector<2x128xf32>
    %738 = vector.extract_strided_slice %724 {offsets = [0, 128], sizes = [2, 128], strides = [1, 1]} : vector<2x384xf32> to vector<2x128xf32>
    %739 = vector.extract_strided_slice %729 {offsets = [0, 128], sizes = [2, 128], strides = [1, 1]} : vector<2x384xf32> to vector<2x128xf32>
    %740 = arith.addf %738, %739 : vector<2x128xf32>
    %741 = arith.negf %740 : vector<2x128xf32>
    %742 = math.exp %741 : vector<2x128xf32>
    %cst_229 = arith.constant 1.000000e+00 : f32
    %743 = vector.broadcast %cst_229 : f32 to vector<2x128xf32>
    %744 = arith.addf %743, %742 : vector<2x128xf32>
    %745 = arith.divf %743, %744 : vector<2x128xf32>
    %746 = vector.extract_strided_slice %724 {offsets = [0, 256], sizes = [2, 128], strides = [1, 1]} : vector<2x384xf32> to vector<2x128xf32>
    %747 = vector.extract_strided_slice %729 {offsets = [0, 256], sizes = [2, 128], strides = [1, 1]} : vector<2x384xf32> to vector<2x128xf32>
    %748 = arith.mulf %737, %747 : vector<2x128xf32>
    %749 = arith.addf %746, %748 : vector<2x128xf32>
    %750 = math.tanh %749 : vector<2x128xf32>
    %cst_230 = arith.constant 1.000000e+00 : f32
    %751 = vector.broadcast %cst_230 : f32 to vector<2x128xf32>
    %752 = arith.subf %751, %745 : vector<2x128xf32>
    %753 = arith.mulf %752, %750 : vector<2x128xf32>
    %754 = arith.mulf %745, %721 : vector<2x128xf32>
    %755 = arith.addf %753, %754 : vector<2x128xf32>
    %c22_i32 = arith.constant 22 : i32
    %756 = arith.index_cast %c22_i32 : i32 to index
    %c0_231 = arith.constant 0 : index
    %c0_232 = arith.constant 0 : index
    %757 = vector.load %arg6[%756, %c0_231, %c0_232] : memref<24x2x384xf32, #tpu.memory_space<vmem>>, vector<1x2x384xf32>
    %758 = vector.shape_cast %757 : vector<1x2x384xf32> to vector<2x384xf32>
    %c0_233 = arith.constant 0 : index
    %c0_234 = arith.constant 0 : index
    %759 = vector.load %arg2[%c0_233, %c0_234] : memref<128x384xf32, #tpu.memory_space<vmem>>, vector<128x384xf32>
    %cst_235 = arith.constant dense<0.000000e+00> : vector<2x384xf32>
    %760 = tpu.matmul %755, %759, %cst_235 {dimension_numbers = #tpu.dot_dimension_numbers<[1], [0], [0], [1], [0, 0, 1, 1], [], []>} : vector<2x128xf32>, vector<128x384xf32>, vector<2x384xf32> -> vector<2x384xf32>
    %c0_236 = arith.constant 0 : index
    %c0_237 = arith.constant 0 : index
    %761 = vector.load %arg4[%c0_236, %c0_237] : memref<1x384xf32, #tpu.memory_space<vmem>>, vector<1x384xf32>
    %762 = vector.broadcast %761 : vector<1x384xf32> to vector<2x384xf32>
    %763 = arith.addf %760, %762 : vector<2x384xf32>
    %764 = vector.extract_strided_slice %758 {offsets = [0, 0], sizes = [2, 128], strides = [1, 1]} : vector<2x384xf32> to vector<2x128xf32>
    %765 = vector.extract_strided_slice %763 {offsets = [0, 0], sizes = [2, 128], strides = [1, 1]} : vector<2x384xf32> to vector<2x128xf32>
    %766 = arith.addf %764, %765 : vector<2x128xf32>
    %767 = arith.negf %766 : vector<2x128xf32>
    %768 = math.exp %767 : vector<2x128xf32>
    %cst_238 = arith.constant 1.000000e+00 : f32
    %769 = vector.broadcast %cst_238 : f32 to vector<2x128xf32>
    %770 = arith.addf %769, %768 : vector<2x128xf32>
    %771 = arith.divf %769, %770 : vector<2x128xf32>
    %772 = vector.extract_strided_slice %758 {offsets = [0, 128], sizes = [2, 128], strides = [1, 1]} : vector<2x384xf32> to vector<2x128xf32>
    %773 = vector.extract_strided_slice %763 {offsets = [0, 128], sizes = [2, 128], strides = [1, 1]} : vector<2x384xf32> to vector<2x128xf32>
    %774 = arith.addf %772, %773 : vector<2x128xf32>
    %775 = arith.negf %774 : vector<2x128xf32>
    %776 = math.exp %775 : vector<2x128xf32>
    %cst_239 = arith.constant 1.000000e+00 : f32
    %777 = vector.broadcast %cst_239 : f32 to vector<2x128xf32>
    %778 = arith.addf %777, %776 : vector<2x128xf32>
    %779 = arith.divf %777, %778 : vector<2x128xf32>
    %780 = vector.extract_strided_slice %758 {offsets = [0, 256], sizes = [2, 128], strides = [1, 1]} : vector<2x384xf32> to vector<2x128xf32>
    %781 = vector.extract_strided_slice %763 {offsets = [0, 256], sizes = [2, 128], strides = [1, 1]} : vector<2x384xf32> to vector<2x128xf32>
    %782 = arith.mulf %771, %781 : vector<2x128xf32>
    %783 = arith.addf %780, %782 : vector<2x128xf32>
    %784 = math.tanh %783 : vector<2x128xf32>
    %cst_240 = arith.constant 1.000000e+00 : f32
    %785 = vector.broadcast %cst_240 : f32 to vector<2x128xf32>
    %786 = arith.subf %785, %779 : vector<2x128xf32>
    %787 = arith.mulf %786, %784 : vector<2x128xf32>
    %788 = arith.mulf %779, %755 : vector<2x128xf32>
    %789 = arith.addf %787, %788 : vector<2x128xf32>
    %c23_i32 = arith.constant 23 : i32
    %790 = arith.index_cast %c23_i32 : i32 to index
    %c0_241 = arith.constant 0 : index
    %c0_242 = arith.constant 0 : index
    %791 = vector.load %arg6[%790, %c0_241, %c0_242] : memref<24x2x384xf32, #tpu.memory_space<vmem>>, vector<1x2x384xf32>
    %792 = vector.shape_cast %791 : vector<1x2x384xf32> to vector<2x384xf32>
    %c0_243 = arith.constant 0 : index
    %c0_244 = arith.constant 0 : index
    %793 = vector.load %arg2[%c0_243, %c0_244] : memref<128x384xf32, #tpu.memory_space<vmem>>, vector<128x384xf32>
    %cst_245 = arith.constant dense<0.000000e+00> : vector<2x384xf32>
    %794 = tpu.matmul %789, %793, %cst_245 {dimension_numbers = #tpu.dot_dimension_numbers<[1], [0], [0], [1], [0, 0, 1, 1], [], []>} : vector<2x128xf32>, vector<128x384xf32>, vector<2x384xf32> -> vector<2x384xf32>
    %c0_246 = arith.constant 0 : index
    %c0_247 = arith.constant 0 : index
    %795 = vector.load %arg4[%c0_246, %c0_247] : memref<1x384xf32, #tpu.memory_space<vmem>>, vector<1x384xf32>
    %796 = vector.broadcast %795 : vector<1x384xf32> to vector<2x384xf32>
    %797 = arith.addf %794, %796 : vector<2x384xf32>
    %798 = vector.extract_strided_slice %792 {offsets = [0, 0], sizes = [2, 128], strides = [1, 1]} : vector<2x384xf32> to vector<2x128xf32>
    %799 = vector.extract_strided_slice %797 {offsets = [0, 0], sizes = [2, 128], strides = [1, 1]} : vector<2x384xf32> to vector<2x128xf32>
    %800 = arith.addf %798, %799 : vector<2x128xf32>
    %801 = arith.negf %800 : vector<2x128xf32>
    %802 = math.exp %801 : vector<2x128xf32>
    %cst_248 = arith.constant 1.000000e+00 : f32
    %803 = vector.broadcast %cst_248 : f32 to vector<2x128xf32>
    %804 = arith.addf %803, %802 : vector<2x128xf32>
    %805 = arith.divf %803, %804 : vector<2x128xf32>
    %806 = vector.extract_strided_slice %792 {offsets = [0, 128], sizes = [2, 128], strides = [1, 1]} : vector<2x384xf32> to vector<2x128xf32>
    %807 = vector.extract_strided_slice %797 {offsets = [0, 128], sizes = [2, 128], strides = [1, 1]} : vector<2x384xf32> to vector<2x128xf32>
    %808 = arith.addf %806, %807 : vector<2x128xf32>
    %809 = arith.negf %808 : vector<2x128xf32>
    %810 = math.exp %809 : vector<2x128xf32>
    %cst_249 = arith.constant 1.000000e+00 : f32
    %811 = vector.broadcast %cst_249 : f32 to vector<2x128xf32>
    %812 = arith.addf %811, %810 : vector<2x128xf32>
    %813 = arith.divf %811, %812 : vector<2x128xf32>
    %814 = vector.extract_strided_slice %792 {offsets = [0, 256], sizes = [2, 128], strides = [1, 1]} : vector<2x384xf32> to vector<2x128xf32>
    %815 = vector.extract_strided_slice %797 {offsets = [0, 256], sizes = [2, 128], strides = [1, 1]} : vector<2x384xf32> to vector<2x128xf32>
    %816 = arith.mulf %805, %815 : vector<2x128xf32>
    %817 = arith.addf %814, %816 : vector<2x128xf32>
    %818 = math.tanh %817 : vector<2x128xf32>
    %cst_250 = arith.constant 1.000000e+00 : f32
    %819 = vector.broadcast %cst_250 : f32 to vector<2x128xf32>
    %820 = arith.subf %819, %813 : vector<2x128xf32>
    %821 = arith.mulf %820, %818 : vector<2x128xf32>
    %822 = arith.mulf %813, %789 : vector<2x128xf32>
    %823 = arith.addf %821, %822 : vector<2x128xf32>
    %c24_i32 = arith.constant 24 : i32
    %c0_251 = arith.constant 0 : index
    %c0_252 = arith.constant 0 : index
    %824 = vector.load %arg5[%c0_251, %c0_252] : memref<2x128xf32, #tpu.memory_space<vmem>>, vector<2x128xf32>
    tpu.vector_store %arg5[%c0_251, %c0_252], %823 {strides = array<i32>} : memref<2x128xf32, #tpu.memory_space<vmem>>, vector<2x128xf32>,
    return
  }
}

</mosaic_0001>

<bundles_post_ra>
// kernel: forward_pallas.2
= control target key start
LH: loop header
LB: loop body
LE: loop exit
PB: predicated region body
PF: predicated region fallthrough
CT: control target
= control target key end

     0   :  { %10 = vsyncpa [#allocation4], 0  ;;  %s7806_s18 = smov [#allocation3]   ;;  %s9126_s0 = inlined_call_operand.vmem [shape: f32[24,2,4], index: 0, kind: input, shape index: {}]   ;;  %s9127_s1 = inlined_call_operand.vmem [shape: f32[4,384], index: 1, kind: input, shape index: {}]   ;;  %s9128_s2 = inlined_call_operand.hbm [shape: f32[128,384], index: 2, kind: input, shape index: {}]   ;;  %s9129_s3 = inlined_call_operand.vmem [shape: f32[1,1,384], index: 3, kind: input, shape index: {}]   ;;  %s9130_s4 = inlined_call_operand.vmem [shape: f32[1,384], index: 4, kind: input, shape index: {}]   ;;  %s9131_s5 = inlined_call_operand.vmem [shape: f32[2,128], index: 5, kind: output, shape index: {}]  }
   0x1   :  { %s20_s19 = sshll.u32 %s7806_s18, 4  ;;  %s7782_s22 = scalar_lea.hbm %s9128_s2, 6144  ;;  %s21_s19 = int_to_ptr.vmem [resolvable:$true] %s20_s19 }
   0x2   :  { %p7783_p0 = scmp.ne.s32.totalorder %s9128_s2, %s7782_s22  ;;  %p7786_p1 = scmp.lt.u32.totalorder %s7782_s22, %s9128_s2 }
   0x4   :  { %p7788_p2 = pnand %p7786_p1, %p7783_p0 }
   0x6   :  { %7791 = shalt.err (!%p7788_p2)
}
   0x7   :  { %s7792_s27 = scalar_lea.vmem %s21_s19, 6144  ;;  %p7797_p4 = scmp.lt.s32.totalorder %s21_s19, %s21_s19 }
   0x8   :  { %p7793_p3 = scmp.ne.s32.totalorder %s21_s19, %s7792_s27  ;;  %p7798_p5 = scmp.lt.s32.totalorder %s7792_s27, %s7792_s27 }
   0xa   :  { %p7799_p6 = por %p7798_p5, %p7797_p4 }
   0xc   :  { %p7800_p7 = pnand %p7799_p6, %p7793_p3 }
   0xe   :  { %7803 = shalt.err (!%p7800_p7)
}
   0xf   :  { %s7807_s28 = smov 384   ;;  %s7808_s29 = smov 24  }
  0x10   :  { %26 = dma.hbm_to_vmem [thread:$0]  %s9128_s2, 6144, %s21_s19, [#allocation4], %s7807_s28, %s7807_s28, %s7808_s29  }
  0x11   :  { %7804 = dma.done.wait [#allocation4], 6144  }
  0x12   :  { %7805 = vsyncadd [#allocation4], 4294961152  ;;  %v62_v0 = vlaneseq  ;;  %v7809_v1 = vmov 0.0   ;;  %v7810_v2 = vmov 1983009808   ;;  %v58_v6 = vld [vmem:[%s9127_s1] sm:$0xff] }
  0x13   :  { %325 = vmatprep.mubr.f32.mxu0 %v7809_v1  ;;  %v76_v3 = vunpack.c.l.s4 %v7810_v2  ;;  %vm254_vm0 = vcmask 1043456   ;;  %v59_v7 = vld [vmem:[%s9127_s1 + $0x8] sm:$0xf]  ;;  %v735_v8 = vld [vmem:[#allocation3 + $0x8] sm:$0xff]  ;;  %v218_v10 = vcombine.high %v58_v6, %v58_v6  ;;  %v738_v11 = vld [vmem:[#allocation3 + $0x20] sm:$0xff]  ;;  %v7811_v23 = vmov 0.0|0.0  }
  0x14   :  { %v7856_v4 = vshrl.u32 %v62_v0, 7  ;;  %5339 = vmatprep.subr.msk.mxu1 %vm254_vm0, %v59_v7  ;;  %v34_v12 = vld [vmem:[%s9126_s0] sm:$0x3]  ;;  %v35_v13 = vld [vmem:[%s9126_s0 + $0x2] sm:$0x3]  ;;  %v7874_v14 = vpack.c.bf16 %v738_v11, %v735_v8  ;;  %v734_v18 = vld [vmem:[#allocation3] sm:$0xff] }
  0x15   :  { %v77_v5 = vunpack.c.0.s8 %v76_v3  ;;  %v36_v15 = vld [vmem:[%s9126_s0 + $0x4] sm:$0x3]  ;;  %v37_v16 = vld [vmem:[%s9126_s0 + $0x6] sm:$0x3]  ;;  %v114_v17 = vcombine.low %v34_v12, %v35_v13  ;;  %5340 = vmatpush3.msk.msra.mxu1 %vm254_vm0, %v59_v7  ;;  %4861 = vmatprep.subr.msk.mxu0 %vm254_vm0, %v218_v10  ;;  %v737_v20 = vld [vmem:[#allocation3 + $0x18] sm:$0xff]  ;;  %vm241_vm1 = vcmask 31744  }
  0x16   :  { %v115_v19 = vcombine.low %v36_v15, %v37_v16  ;;  %v38_v21 = vld [vmem:[%s9126_s0 + $0x8] sm:$0x3]  ;;  %v39_v22 = vld [vmem:[%s9126_s0 + $0xa] sm:$0x3]  ;;  %6222 = vmatprep.subr.bf16.mxu1 %v7811_v23  ;;  %4862 = vmatpush1.msk.msra.mxu0 %vm254_vm0, %v58_v6  ;;  %v40_v25 = vld [vmem:[%s9126_s0 + $0xc] sm:$0x3]  ;;  %v7901_v32 = vpack.c.bf16 %v737_v20, %v734_v18 }
  0x17   :  { %v7865_v9 = vsub.s32 %v77_v5, %v7856_v4  ;;  %v41_v26 = vld [vmem:[%s9126_s0 + $0xe] sm:$0x3]  ;;  %v131_v27 = vcombine.low %v38_v21, %v39_v22  ;;  %6191 = vmatprep.subr.bf16.mxu0 %v7874_v14  ;;  %v744_v31 = vld [vmem:[#allocation3 + $0x50] sm:$0xff]  ;;  %v743_v38 = vld [vmem:[#allocation3 + $0x48] sm:$0xff]  ;;  %vm7812_vm2 = vmmov 0  }
  0x18   :  { %v741_v28 = vld [vmem:[#allocation3 + $0x38] sm:$0xff]  ;;  %v132_v30 = vcombine.low %v40_v25, %v41_v26  ;;  %v740_v37 = vld [vmem:[#allocation3 + $0x30] sm:$0xff]  ;;  %v747_v39 = vld [vmem:[#allocation3 + $0x68] sm:$0xff] }
  0x19   :  { %v122_v24 = vrot.slane %v114_v17, %v7865_v9  ;;  %v129_v29 = vrot.slane %v115_v19, %v7865_v9  ;;  %v139_v33 = vrot.slane %v131_v27, %v7865_v9  ;;  %v7905_v36 = vpack.c.bf16 %v744_v31, %v741_v28  ;;  %v750_v40 = vld [vmem:[#allocation3 + $0x80] sm:$0xff]  ;;  %v46_v49 = vld [vmem:[%s9126_s0 + $0x18] sm:$0x3]  ;;  %v47_v50 = vld [vmem:[%s9126_s0 + $0x1a] sm:$0x3] }
  0x1a   :  { %v146_v35 = vrot.slane %v132_v30, %v7865_v9  ;;  %v42_v41 = vld [vmem:[%s9126_s0 + $0x10] sm:$0x3]  ;;  %v43_v43 = vld [vmem:[%s9126_s0 + $0x12] sm:$0x3]  ;;  %v44_v44 = vld [vmem:[%s9126_s0 + $0x14] sm:$0x3]  ;;  %v7922_v46 = vpack.c.bf16 %v743_v38, %v740_v37  ;;  %v7936_v52 = vpack.c.bf16 %v750_v40, %v747_v39  ;;  %v165_v56 = vcombine.low %v46_v49, %v47_v50 }
  0x1b   :  { %v130_v34 = vcombine.low %v122_v24, %v129_v29  ;;  %v45_v45 = vld [vmem:[%s9126_s0 + $0x16] sm:$0x3]  ;;  %v148_v47 = vcombine.low %v42_v41, %v43_v43  ;;  %v48_v51 = vld [vmem:[%s9126_s0 + $0x1c] sm:$0x3]  ;;  %v749_v54 = vld [vmem:[#allocation3 + $0x78] sm:$0xff] }
  0x1c   :  { %v147_v42 = vcombine.low %v139_v33, %v146_v35  ;;  %v149_v48 = vcombine.low %v44_v44, %v45_v45  ;;  %v746_v53 = vld [vmem:[#allocation3 + $0x60] sm:$0xff]  ;;  %v49_v55 = vld [vmem:[%s9126_s0 + $0x1e] sm:$0x3]  ;;  %v753_v57 = vld [vmem:[#allocation3 + $0x98] sm:$0xff]  ;;  %v173_v0 = vrot.slane %v165_v56, %v7865_v9 }
  0x1d   :  { %4863 = vmatmul.mubr.msk.f32.vlgmr.msra.gmra.mrb[0].mxu0 %vm241_vm1, %v130_v34  ;;  %5341 = vmatprep.mubr.msk.f32.mxu1 %vm241_vm1, %v130_v34  ;;  %v756_v58 = vld [vmem:[#allocation3 + $0xb0] sm:$0xff]  ;;  %v156_v59 = vrot.slane %v148_v47, %v7865_v9  ;;  %v166_v61 = vcombine.low %v48_v51, %v49_v55  ;;  %v755_v63 = vld [vmem:[#allocation3 + $0xa8] sm:$0xff]  ;;  %v7946_v2 = vpack.c.bf16 %v749_v54, %v746_v53  ;;  %v54_v15 = vld [vmem:[%s9126_s0 + $0x28] sm:$0x3] }
  0x1e   :  { %6193 = vmatpush1.bf16.msra.mxu0 %v7901_v32  ;;  %331 = vmatprep.mubr.f32.mxu0 %v7809_v1  ;;  %v163_v60 = vrot.slane %v149_v48, %v7865_v9  ;;  %v752_v62 = vld [vmem:[#allocation3 + $0x90] sm:$0xff]  ;;  %v759_v6 = vld [vmem:[#allocation3 + $0xc8] sm:$0xff]  ;;  %v7960_v11 = vpack.c.bf16 %v756_v58, %v753_v57  ;;  %v55_v16 = vld [vmem:[%s9126_s0 + $0x2a] sm:$0x3] }
  0x1f   :  { %5342 = vmatmul.mubr.msk.f32.vlgmr.msra.gmra.mrb[0].mxu1 %vm241_vm1, %v147_v42  ;;  %6195 = vmatprep.subr.bf16.mxu0 %v7905_v36  ;;  %v180_v5 = vrot.slane %v166_v61, %v7865_v9  ;;  %v50_v7 = vld [vmem:[%s9126_s0 + $0x20] sm:$0x3]  ;;  %v51_v8 = vld [vmem:[%s9126_s0 + $0x22] sm:$0x3]  ;;  %v52_v10 = vld [vmem:[%s9126_s0 + $0x24] sm:$0x3]  ;;  %v199_v22 = vcombine.low %v54_v15, %v55_v16  ;;  %v7981_v26 = vpack.c.bf16 %v755_v63, %v752_v62 }
  0x20   :  { %v164_v3 = vcombine.low %v156_v59, %v163_v60  ;;  %v53_v12 = vld [vmem:[%s9126_s0 + $0x26] sm:$0x3]  ;;  %v182_v13 = vcombine.low %v50_v7, %v51_v8  ;;  %v762_v18 = vld [vmem:[#allocation3 + $0xe0] sm:$0xff]  ;;  %v56_v20 = vld [vmem:[%s9126_s0 + $0x2c] sm:$0x3] }
  0x21   :  { %4864 = vmatmul.mubr.msk.f32.gmra.mrb[2].mxu0 %vm241_vm1, %v147_v42  ;;  %v181_v17 = vcombine.low %v173_v0, %v180_v5  ;;  %v183_v19 = vcombine.low %v52_v10, %v53_v12  ;;  %v57_v21 = vld [vmem:[%s9126_s0 + $0x2e] sm:$0x3]  ;;  %v207_v28 = vrot.slane %v199_v22, %v7865_v9  ;;  %v736_v29 = vld [vmem:[#allocation3 + $0x10] sm:$0xff]  ;;  %v7987_v30 = vpack.c.bf16 %v762_v18, %v759_v6  ;;  %v758_v31 = vld [vmem:[#allocation3 + $0xc0] sm:$0xff] }
  0x22   :  { %6197 = vmatpush1.bf16.msra.mxu0 %v7922_v46  ;;  %337 = vmatprep.mubr.f32.mxu0 %v7809_v1  ;;  %v190_v24 = vrot.slane %v182_v13, %v7865_v9  ;;  %v200_v25 = vcombine.low %v56_v20, %v57_v21  ;;  %v761_v33 = vld [vmem:[#allocation3 + $0xd8] sm:$0xff]  ;;  %v739_v35 = vld [vmem:[#allocation3 + $0x28] sm:$0xff]  ;;  %v768_v38 = vld [vmem:[#allocation3 + $0x110] sm:$0xff] }
  0x23   :  { %6199 = vmatprep.subr.bf16.mxu0 %v7936_v52  ;;  %5344 = vmatprep.mubr.msk.f32.mxu1 %vm241_vm1, %v164_v3  ;;  %v197_v27 = vrot.slane %v183_v19, %v7865_v9  ;;  %v765_v37 = vld [vmem:[#allocation3 + $0xf8] sm:$0xff]  ;;  %v7992_v41 = vpack.c.bf16 %v739_v35, %v736_v29  ;;  %v7995_v42 = vpack.c.bf16 %v761_v33, %v758_v31  ;;  %v742_v43 = vld [vmem:[#allocation3 + $0x40] sm:$0xff]  ;;  %v764_v47 = vld [vmem:[#allocation3 + $0xf0] sm:$0xff]  ;;  %v72_v33 = vsub.s32 2, %v7856_v4 }
  0x24   :  { %5345 = vmatmul.mubr.msk.f32.gmra.mrb[2].mxu1 %vm241_vm1, %v181_v17  ;;  %v214_v34 = vrot.slane %v200_v25, %v7865_v9  ;;  %v745_v44 = vld [vmem:[#allocation3 + $0x58] sm:$0xff]  ;;  %v7999_v45 = vpack.c.bf16 %v768_v38, %v765_v37  ;;  %v767_v48 = vld [vmem:[#allocation3 + $0x108] sm:$0xff]  ;;  %v774_v50 = vld [vmem:[#allocation3 + $0x140] sm:$0xff]  ;;  %v64_v25 = vsub.s32 0, %v7856_v4 }
  0x25   :  { %4865 = vmatmul.mubr.msk.f32.gmra.mrb[4].mxu0 %vm241_vm1, %v164_v3  ;;  %v198_v39 = vcombine.low %v190_v24, %v197_v27  ;;  %v771_v49 = vld [vmem:[#allocation3 + $0x128] sm:$0xff]  ;;  %6224 = vmatpush3.bf16.msra.mxu1 %v7992_v41  ;;  %v8005_v51 = vpack.c.bf16 %v745_v44, %v742_v43  ;;  %v8008_v53 = vpack.c.bf16 %v767_v48, %v764_v47  ;;  %v748_v54 = vld [vmem:[#allocation3 + $0x70] sm:$0xff]  ;;  %v770_v57 = vld [vmem:[#allocation3 + $0x120] sm:$0xff]  ;;  %v68_v27 = vsub.s32 1, %v7856_v4 }
  0x26   :  { %6201 = vmatpush1.bf16.msra.mxu0 %v7946_v2  ;;  %343 = vmatprep.mubr.f32.mxu0 %v7809_v1  ;;  %v215_v40 = vcombine.low %v207_v28, %v214_v34  ;;  %v751_v55 = vld [vmem:[#allocation3 + $0x88] sm:$0xff]  ;;  %v8012_v56 = vpack.c.bf16 %v774_v50, %v771_v49  ;;  %v773_v58 = vld [vmem:[#allocation3 + $0x138] sm:$0xff]  ;;  %v780_v60 = vld [vmem:[#allocation3 + $0x170] sm:$0xff] }
  0x27   :  { %6203 = vmatprep.subr.bf16.mxu0 %v7960_v11  ;;  %5347 = vmatprep.mubr.msk.f32.mxu1 %vm241_vm1, %v198_v39  ;;  %v777_v59 = vld [vmem:[#allocation3 + $0x158] sm:$0xff]  ;;  %v8019_v61 = vpack.c.bf16 %v751_v55, %v748_v54  ;;  %v8022_v62 = vpack.c.bf16 %v773_v58, %v770_v57  ;;  %v754_v63 = vld [vmem:[#allocation3 + $0xa0] sm:$0xff]  ;;  %v776_v5 = vld [vmem:[#allocation3 + $0x150] sm:$0xff] }
  0x28   :  { %5348 = vmatmul.mubr.msk.f32.gmra.mrb[4].mxu1 %vm241_vm1, %v215_v40  ;;  %6225 = vmatprep.subr.bf16.mxu1 %v7811_v23  ;;  %v757_v0 = vld [vmem:[#allocation3 + $0xb8] sm:$0xff]  ;;  %v8026_v3 = vpack.c.bf16 %v780_v60, %v777_v59  ;;  %v779_v6 = vld [vmem:[#allocation3 + $0x168] sm:$0xff]  ;;  %v760_v10 = vld [vmem:[#allocation3 + $0xd0] sm:$0xff] }
  0x29   :  { %4866 = vmatmul.mubr.msk.f32.gmra.mrb[6].mxu0 %vm241_vm1, %v181_v17  ;;  %5382 = vmatprep.mubr.msk.f32.mxu1 %vm7812_vm2, %v7809_v1  ;;  %v8030_v7 = vpack.c.bf16 %v757_v0, %v754_v63  ;;  %v8033_v8 = vpack.c.bf16 %v779_v6, %v776_v5  ;;  %v763_v12 = vld [vmem:[#allocation3 + $0xe8] sm:$0xff]  ;;  %v766_v15 = vld [vmem:[#allocation3 + $0x100] sm:$0xff]  ;;  %v769_v16 = vld [vmem:[#allocation3 + $0x118] sm:$0xff] }
  0x2a   :  { %6205 = vmatpush1.bf16.msra.mxu0 %v7981_v26  ;;  %349 = vmatprep.mubr.f32.mxu0 %v7809_v1  ;;  %v8038_v13 = vpack.c.bf16 %v763_v12, %v760_v10  ;;  %v8045_v17 = vpack.c.bf16 %v769_v16, %v766_v15  ;;  %v772_v18 = vld [vmem:[#allocation3 + $0x130] sm:$0xff]  ;;  %v775_v19 = vld [vmem:[#allocation3 + $0x148] sm:$0xff]  ;;  %v778_v21 = vld [vmem:[#allocation3 + $0x160] sm:$0xff] }
  0x2b   :  { %6207 = vmatprep.subr.bf16.mxu0 %v7987_v30  ;;  %6227 = vmatpush3.bf16.msra.mxu1 %v8005_v51  ;;  %v8052_v20 = vpack.c.bf16 %v775_v19, %v772_v18  ;;  %v781_v22 = vld [vmem:[#allocation3 + $0x178] sm:$0xff]  ;;  %v60_v28 = vld [vmem:[%s9129_s3] sm:$0x7] }
  0x2c   :  { %6228 = vmatprep.subr.bf16.mxu1 %v7811_v23  ;;  %v8058_v24 = vpack.c.bf16 %v781_v22, %v778_v21  ;;  %v65_v29 = vrot.slane %v60_v28, %v64_v25  ;;  %v69_v31 = vrot.slane %v60_v28, %v68_v27  ;;  %v73_v35 = vrot.slane %v60_v28, %v72_v33 }
  0x2d   :  { %4867 = vmatmul.mubr.msk.f32.gmra.mrb[8].mxu0 %vm241_vm1, %v198_v39 }
  0x2e   :  { %6209 = vmatpush1.bf16.msra.mxu0 %v7995_v42  ;;  %355 = vmatprep.mubr.f32.mxu0 %v7809_v1  ;;  %v74_v34 = vcombine.low %v65_v29, %v69_v31  ;;  %v88_v38 = vrot.slane %v73_v35, %v7865_v9 }
  0x2f   :  { %6211 = vmatprep.subr.bf16.mxu0 %v7999_v45  ;;  %6230 = vmatpush3.bf16.msra.mxu1 %v8019_v61 }
  0x30   :  { %6231 = vmatprep.subr.bf16.mxu1 %v7811_v23  ;;  %v81_v37 = vrot.slane %v74_v34, %v7865_v9 }
  0x31   :  { %4868 = vmatmul.mubr.msk.f32.gmra.mrb[10].mxu0 %vm241_vm1, %v215_v40  ;;  %v4860_v40 = vcombine.low %v88_v38, %v88_v38 }
  0x32   :  { %6213 = vmatpush1.bf16.msra.mxu0 %v8008_v53  ;;  %863 = vmatprep.mubr.f32.mxu0 %v7809_v1  ;;  %v4859_v39 = vcombine.low %v81_v37, %v81_v37 }
  0x33   :  { %6215 = vmatprep.subr.bf16.mxu0 %v8012_v56  ;;  %6233 = vmatpush3.bf16.msra.mxu1 %v8030_v7  ;;  %v234_v44 = vrot.slane %v4860_v40, %v7865_v9 }
  0x34   :  { %6234 = vmatprep.subr.bf16.mxu1 %v7811_v23  ;;  %v227_v43 = vrot.slane %v4859_v39, %v7865_v9 }
  0x35   :  { %v8114_v50 = vcombine.low %v234_v44, %v234_v44 }
  0x36   :  { %6217 = vmatpush1.bf16.msra.mxu0 %v8022_v62  ;;  %v8110_v47 = vcombine.low %v227_v43, %v227_v43  ;;  %v8112_v48 = vcombine.high %v227_v43, %v227_v43 }
  0x37   :  { %6219 = vmatprep.subr.bf16.mxu0 %v8026_v3  ;;  %6236 = vmatpush3.bf16.msra.mxu1 %v8038_v13 }
  0x38   :  { %6237 = vmatprep.subr.bf16.mxu1 %v7811_v23 }
  0x3a   :  { %6221 = vmatpush1.bf16.msra.mxu0 %v8033_v8 }
  0x3b   :  { %6247 = vmatprep.subr.bf16.mxu0 %v7874_v14  ;;  %6239 = vmatpush3.bf16.msra.mxu1 %v8045_v17 }
  0x3c   :  { %6240 = vmatprep.subr.bf16.mxu1 %v7811_v23 }
  0x3d   :  { %864 = vmatmul.mubr.f32.vlgmr.msra.gmra.mrb[12].mxu0 %v7809_v1 }
  0x3e   :  { %6249 = vmatpush1.bf16.msra.mxu0 %v7901_v32  ;;  %1032 = vmatprep.mubr.f32.mxu0 %v7809_v1 }
  0x3f   :  { %6251 = vmatprep.subr.bf16.mxu0 %v7905_v36  ;;  %6242 = vmatpush3.bf16.msra.mxu1 %v8052_v20 }
  0x40   :  { %6243 = vmatprep.subr.bf16.mxu1 %v7811_v23 }
  0x42   :  { %6253 = vmatpush1.bf16.msra.mxu0 %v7922_v46 }
  0x43   :  { %6255 = vmatprep.subr.bf16.mxu0 %v7936_v52  ;;  %6245 = vmatpush3.bf16.msra.mxu1 %v8058_v24 }
  0x44   :  { %6278 = vmatprep.subr.bf16.mxu1 %v7811_v23 }
  0x46   :  { %6257 = vmatpush1.bf16.msra.mxu0 %v7946_v2  ;;  %5383 = vmatmul.mubr.f32.vlgmr.msra.gmra.mrb[6].mxu1 %v7809_v1 }
  0x47   :  { %6259 = vmatprep.subr.bf16.mxu0 %v7960_v11  ;;  %6280 = vmatpush3.bf16.msra.mxu1 %v7992_v41 }
  0x48   :  { %5417 = vmatprep.mubr.msk.f32.mxu1 %vm7812_vm2, %v7809_v1  ;;  %6281 = vmatprep.subr.bf16.mxu1 %v7811_v23 }
  0x4a   :  { %6261 = vmatpush1.bf16.msra.mxu0 %v7981_v26 }
  0x4b   :  { %6263 = vmatprep.subr.bf16.mxu0 %v7987_v30  ;;  %6283 = vmatpush3.bf16.msra.mxu1 %v8005_v51 }
  0x4c   :  { %6284 = vmatprep.subr.bf16.mxu1 %v7811_v23 }
  0x4e   :  { %6265 = vmatpush1.bf16.msra.mxu0 %v7995_v42 }
  0x4f   :  { %6267 = vmatprep.subr.bf16.mxu0 %v7999_v45  ;;  %6286 = vmatpush3.bf16.msra.mxu1 %v8019_v61 }
  0x50   :  { %6287 = vmatprep.subr.bf16.mxu1 %v7811_v23 }
  0x52   :  { %6269 = vmatpush1.bf16.msra.mxu0 %v8008_v53 }
  0x53   :  { %6271 = vmatprep.subr.bf16.mxu0 %v8012_v56  ;;  %6289 = vmatpush3.bf16.msra.mxu1 %v8030_v7 }
  0x54   :  { %6290 = vmatprep.subr.bf16.mxu1 %v7811_v23 }
  0x56   :  { %6273 = vmatpush1.bf16.msra.mxu0 %v8022_v62 }
  0x57   :  { %6275 = vmatprep.subr.bf16.mxu0 %v8026_v3  ;;  %6292 = vmatpush3.bf16.msra.mxu1 %v8038_v13 }
  0x58   :  { %6293 = vmatprep.subr.bf16.mxu1 %v7811_v23 }
  0x5a   :  { %6277 = vmatpush1.bf16.msra.mxu0 %v8033_v8 }
  0x5b   :  { %6303 = vmatprep.subr.bf16.mxu0 %v7874_v14  ;;  %6295 = vmatpush3.bf16.msra.mxu1 %v8045_v17 }
  0x5c   :  { %6296 = vmatprep.subr.bf16.mxu1 %v7811_v23 }
  0x5f   :  { %6298 = vmatpush3.bf16.msra.mxu1 %v8052_v20 }
  0x60   :  { %6299 = vmatprep.subr.bf16.mxu1 %v7811_v23 }
  0x63   :  { %6301 = vmatpush3.bf16.msra.mxu1 %v8058_v24 }
  0x64   :  { %6334 = vmatprep.subr.bf16.mxu1 %v7811_v23 }
  0xf0   :  { %v327_v49 = vpop.f32.mrb[0].mxu0 }
  0xf1   :  { %v328_v54 = vadd.f32 %v327_v49, %v8110_v47  ;;  %v329_v55 = vpop.f32.mrb[1].mxu0 }
  0xf2   :  { %v330_v57 = vadd.f32 %v329_v55, %v8112_v48  ;;  %v5343_v58 = vpop.f32.mrb[0].mxu1 }
  0xf3   :  { %v434_v59 = vadd.f32 %v5343_v58, %v8114_v50  ;;  %v428_v60 = vpop.f32.mrb[1].mxu1 }
  0xf4   :  { %v475_v63 = vcombine.low %v328_v54, %v330_v57  ;;  %v476_v0 = vcombine.high %v328_v54, %v330_v57  ;;  %v429_v5 = vadd.f32 %v428_v60, %v8114_v50  ;;  %v333_v6 = vpop.f32.mrb[2].mxu0 }
  0xf5   :  { %v512_v10 = vcombine.high %v434_v59, %v434_v59  ;;  %v334_v12 = vadd.f32 %v333_v6, %v8110_v47  ;;  %v335_v15 = vpop.f32.mrb[3].mxu0  ;;  %v533_v28 = vrot.slane %v434_v59, %v7865_v9 }
  0xf6   :  { %v484_v16 = vrot.slane %v475_v63, %v7865_v9  ;;  %v491_v18 = vrot.slane %v476_v0, %v7865_v9  ;;  %v477_v19 = vcombine.high %v429_v5, %v429_v5  ;;  %v498_v21 = vrot.slane %v429_v5, %v7865_v9 }
  0xf7   :  { %v336_v22 = vadd.f32 %v335_v15, %v8112_v48  ;;  %v540_v37 = vrot.slane %v512_v10, %v7865_v9  ;;  %v5346_v43 = vpop.f32.mrb[2].mxu1 }
  0xf8   :  { %v505_v29 = vrot.slane %v477_v19, %v7865_v9  ;;  %v506_v31 = vcombine.low %v484_v16, %v498_v21  ;;  %v507_v34 = vcombine.high %v484_v16, %v498_v21  ;;  %v339_v35 = vpop.f32.mrb[4].mxu0  ;;  %v444_v55 = vadd.f32 %v5346_v43, %v8114_v50  ;;  %v438_v58 = vpop.f32.mrb[3].mxu1 }
  0xf9   :  { %v510_v38 = vcombine.low %v334_v12, %v336_v22  ;;  %v511_v39 = vcombine.high %v334_v12, %v336_v22  ;;  %v340_v40 = vadd.f32 %v339_v35, %v8110_v47  ;;  %v341_v44 = vpop.f32.mrb[5].mxu0  ;;  %v439_v63 = vadd.f32 %v438_v58, %v8114_v50 }
  0xfa   :  { %v508_v49 = vcombine.low %v491_v18, %v505_v29  ;;  %v509_v54 = vcombine.high %v491_v18, %v505_v29  ;;  %709 = vst [vmem:[#allocation2] sm:$0x3f] %v506_v31  ;;  %710 = vst [vmem:[#allocation2 + $0x6] sm:$0x3f] %v507_v34  ;;  %v342_v57 = vadd.f32 %v341_v44, %v8112_v48 }
  0xfb   :  { %v519_v59 = vrot.slane %v510_v38, %v7865_v9  ;;  %v526_v60 = vrot.slane %v511_v39, %v7865_v9  ;;  %v582_v0 = vcombine.high %v444_v55, %v444_v55  ;;  %v547_v29 = vcombine.high %v439_v63, %v439_v63  ;;  %v5349_v38 = vpop.f32.mrb[4].mxu1 }
  0xfc   :  { %711 = vst [vmem:[#allocation2 + $0xc] sm:$0x3f] %v508_v49  ;;  %712 = vst [vmem:[#allocation2 + $0x12] sm:$0x3f] %v509_v54  ;;  %v545_v5 = vcombine.low %v340_v40, %v342_v57  ;;  %v546_v6 = vcombine.high %v340_v40, %v342_v57  ;;  %v345_v10 = vpop.f32.mrb[6].mxu0  ;;  %v568_v31 = vrot.slane %v439_v63, %v7865_v9  ;;  %v448_v44 = vpop.f32.mrb[5].mxu1 }
  0xfd   :  { %v541_v12 = vcombine.low %v519_v59, %v533_v28  ;;  %v542_v15 = vcombine.high %v519_v59, %v533_v28  ;;  %v543_v16 = vcombine.low %v526_v60, %v540_v37  ;;  %v544_v18 = vcombine.high %v526_v60, %v540_v37  ;;  %v347_v19 = vpop.f32.mrb[7].mxu0 }
  0xfe   :  { %v554_v21 = vrot.slane %v545_v5, %v7865_v9  ;;  %v561_v22 = vrot.slane %v546_v6, %v7865_v9  ;;  %v346_v34 = vadd.f32 %v345_v10, %v8110_v47  ;;  %v348_v35 = vadd.f32 %v347_v19, %v8112_v48 }
  0xff   :  { %713 = vst [vmem:[#allocation2 + $0x18] sm:$0x3f] %v541_v12  ;;  %714 = vst [vmem:[#allocation2 + $0x1e] sm:$0x3f] %v542_v15  ;;  %v603_v28 = vrot.slane %v444_v55, %v7865_v9  ;;  %v610_v37 = vrot.slane %v582_v0, %v7865_v9  ;;  %v575_v39 = vrot.slane %v547_v29, %v7865_v9 }
 0x100   :  { %715 = vst [vmem:[#allocation2 + $0x24] sm:$0x3f] %v543_v16  ;;  %716 = vst [vmem:[#allocation2 + $0x2a] sm:$0x3f] %v544_v18  ;;  %v351_v40 = vpop.f32.mrb[8].mxu0  ;;  %v454_v43 = vadd.f32 %v5349_v38, %v8114_v50  ;;  %v576_v49 = vcombine.low %v554_v21, %v568_v31  ;;  %v577_v54 = vcombine.high %v554_v21, %v568_v31 }
 0x101   :  { %v580_v57 = vcombine.low %v346_v34, %v348_v35  ;;  %v581_v58 = vcombine.high %v346_v34, %v348_v35  ;;  %v353_v59 = vpop.f32.mrb[9].mxu0  ;;  %v578_v60 = vcombine.low %v561_v22, %v575_v39  ;;  %v579_v63 = vcombine.high %v561_v22, %v575_v39 }
 0x102   :  { %v352_v5 = vadd.f32 %v351_v40, %v8110_v47  ;;  %717 = vst [vmem:[#allocation2 + $0x30] sm:$0x3f] %v576_v49  ;;  %718 = vst [vmem:[#allocation2 + $0x36] sm:$0x3f] %v577_v54  ;;  %v354_v6 = vadd.f32 %v353_v59, %v8112_v48  ;;  %v652_v10 = vcombine.high %v454_v43, %v454_v43  ;;  %v782_v40 = vld [vmem:[%s9130_s4] sm:$0x7] }
 0x103   :  { %v589_v55 = vrot.slane %v580_v57, %v7865_v9  ;;  %v596_v0 = vrot.slane %v581_v58, %v7865_v9  ;;  %719 = vst [vmem:[#allocation2 + $0x3c] sm:$0x3f] %v578_v60  ;;  %720 = vst [vmem:[#allocation2 + $0x42] sm:$0x3f] %v579_v63  ;;  %v449_v12 = vadd.f32 %v448_v44, %v8114_v50 }
 0x104   :  { %v357_v15 = vpop.f32.mrb[10].mxu0  ;;  %v615_v29 = vcombine.low %v352_v5, %v354_v6  ;;  %v616_v31 = vcombine.high %v352_v5, %v354_v6  ;;  %v673_v44 = vrot.slane %v454_v43, %v7865_v9  ;;  %v680_v49 = vrot.slane %v652_v10, %v7865_v9 }
 0x105   :  { %v611_v16 = vcombine.low %v589_v55, %v603_v28  ;;  %v612_v18 = vcombine.high %v589_v55, %v603_v28  ;;  %v613_v19 = vcombine.low %v596_v0, %v610_v37  ;;  %v614_v21 = vcombine.high %v596_v0, %v610_v37  ;;  %v359_v22 = vpop.f32.mrb[11].mxu0 }
 0x106   :  { %v617_v34 = vcombine.high %v449_v12, %v449_v12  ;;  %v638_v35 = vrot.slane %v449_v12, %v7865_v9  ;;  %v358_v38 = vadd.f32 %v357_v15, %v8110_v47  ;;  %v360_v39 = vadd.f32 %v359_v22, %v8112_v48  ;;  %v733_v12 = vld [vmem:[#allocation2] sm:$0x3f] }
 0x107   :  { %721 = vst [vmem:[#allocation2 + $0x48] sm:$0x3f] %v611_v16  ;;  %722 = vst [vmem:[#allocation2 + $0x4e] sm:$0x3f] %v612_v18  ;;  %v624_v50 = vrot.slane %v615_v29, %v7865_v9  ;;  %v631_v28 = vrot.slane %v616_v31, %v7865_v9  ;;  %v8163_v5 = vrot.slane %v782_v40, %v64_v25 }
 0x108   :  { %723 = vst [vmem:[#allocation2 + $0x54] sm:$0x3f] %v613_v19  ;;  %724 = vst [vmem:[#allocation2 + $0x5a] sm:$0x3f] %v614_v21  ;;  %v645_v37 = vrot.slane %v617_v34, %v7865_v9  ;;  %v650_v54 = vcombine.low %v358_v38, %v360_v39  ;;  %v651_v57 = vcombine.high %v358_v38, %v360_v39  ;;  %v948_v19 = vrot.slane %v733_v12, 2 }
 0x109   :  { %v646_v58 = vcombine.low %v624_v50, %v638_v35  ;;  %v647_v47 = vcombine.high %v624_v50, %v638_v35  ;;  %v8167_v10 = vrot.slane %v782_v40, %v68_v27  ;;  %v8173_v38 = vrot.slane %v782_v40, %v72_v33  ;;  %v967_v40 = vld [vmem:[#allocation2 + $0x6] sm:$0x3f] }
 0x10a   :  { %v648_v59 = vcombine.low %v631_v28, %v645_v37  ;;  %v649_v48 = vcombine.high %v631_v28, %v645_v37  ;;  %v659_v60 = vrot.slane %v650_v54, %v7865_v9  ;;  %v666_v63 = vrot.slane %v651_v57, %v7865_v9 }
 0x10b   :  { %725 = vst [vmem:[#allocation2 + $0x60] sm:$0x3f] %v646_v58  ;;  %726 = vst [vmem:[#allocation2 + $0x66] sm:$0x3f] %v647_v47 }
 0x10c   :  { %727 = vst [vmem:[#allocation2 + $0x6c] sm:$0x3f] %v648_v59  ;;  %728 = vst [vmem:[#allocation2 + $0x72] sm:$0x3f] %v649_v48  ;;  %v681_v43 = vcombine.low %v659_v60, %v673_v44  ;;  %v682_v55 = vcombine.high %v659_v60, %v673_v44  ;;  %v683_v0 = vcombine.low %v666_v63, %v680_v49 }
 0x10d   :  { %v684_v6 = vcombine.high %v666_v63, %v680_v49  ;;  %v958_v49 = vrot.slane %v733_v12, 4 }
 0x10e   :  { %729 = vst [vmem:[#allocation2 + $0x78] sm:$0x3f] %v681_v43  ;;  %730 = vst [vmem:[#allocation2 + $0x7e] sm:$0x3f] %v682_v55 }
 0x10f   :  { %731 = vst [vmem:[#allocation2 + $0x84] sm:$0x3f] %v683_v0  ;;  %732 = vst [vmem:[#allocation2 + $0x8a] sm:$0x3f] %v684_v6 }
 0x110   :  { %v865_v9 = vpop.f32.mrb[12].mxu0 }
 0x111   :  { %v866_v25 = vadd.f32 %v865_v9, %v8163_v5  ;;  %v867_v15 = vpop.f32.mrb[13].mxu0  ;;  %v1117_v9 = vrot.slane %v967_v40, 2 }
 0x112   :  { %v868_v16 = vadd.f32 %v867_v15, %v8167_v10 }
 0x113   :  { %v940_v18 = vadd.f32 %v866_v25, %v733_v12 }
 0x114   :  { %v950_v22 = vadd.f32 %v948_v19, %v868_v16 }
 0x115   :  { %v4876_v21 = vmul.f32 -1.442695, %v940_v18 }
 0x116   :  { %v4877_v29 = vmul.f32 -1.442695, %v950_v22 }
 0x117   :  { %7542 = vpow2.f32 %v4876_v21 }
 0x118   :  { %7544 = vpow2.f32 %v4877_v29 }
 0x119   :  { %v936_v27 = vpop.f32.mrb[6].mxu1 }
 0x11a   :  { %v5384_v31 = vpop.f32.mrb[7].mxu1  ;;  %v937_v28 = vadd.f32 %v936_v27, %v8173_v38 }
 0x11b   :  { %v1127_v31 = vrot.slane %v967_v40, 4 }
 0x121   :  { %v7543_v34 = vpop.eup %7542 }
 0x122   :  { %v944_v35 = vadd.f32 1.0, %v7543_v34  ;;  %v7545_v39 = vpop.eup %7544 }
 0x123   :  { %v954_v50 = vadd.f32 1.0, %v7545_v39 }
 0x124   :  { %7546 = vrcp.f32 %v944_v35 }
 0x125   :  { %7548 = vrcp.f32 %v954_v50 }
 0x12e   :  { %v7547_v37 = vpop.eup %7546 }
 0x12f   :  { %v957_v44 = vmul.f32 %v7547_v37, %v937_v28  ;;  %v7549_v57 = vpop.eup %7548 }
 0x130   :  { %v962_v58 = vsub.f32 1.0, %v7549_v57  ;;  %v964_v48 = vmul.f32 0.0, %v7549_v57  ;;  %v1136_v57 = vld [vmem:[#allocation2 + $0xc] sm:$0x3f] }
 0x131   :  { %v960_v54 = vadd.f32 %v958_v49, %v957_v44 }
 0x133   :  { %7550 = vtanh.f32 %v960_v54 }
 0x13d   :  { %v7551_v47 = vpop.eup %7550 }
 0x13e   :  { %v963_v59 = vmul.f32 %v7551_v47, %v962_v58 }
 0x140   :  { %v8176_v60 = vadd.f32 %v964_v48, %v963_v59 }
 0x142   :  { %1033 = vmatmul.mubr.f32.vlgmr.msra.gmra.mrb[14].mxu0 %v8176_v60  ;;  %5418 = vmatmul.mubr.f32.vlgmr.msra.gmra.mrb[8].mxu1 %v8176_v60 }
 0x143   :  { %6305 = vmatpush1.bf16.msra.mxu0 %v7901_v32  ;;  %6336 = vmatpush3.bf16.msra.mxu1 %v7992_v41 }
 0x144   :  { %6307 = vmatprep.subr.bf16.mxu0 %v7905_v36  ;;  %6337 = vmatprep.subr.bf16.mxu1 %v7811_v23 }
 0x145   :  { %1201 = vmatprep.mubr.f32.mxu0 %v7809_v1  ;;  %5452 = vmatprep.mubr.msk.f32.mxu1 %vm7812_vm2, %v7809_v1 }
 0x147   :  { %6309 = vmatpush1.bf16.msra.mxu0 %v7922_v46  ;;  %6339 = vmatpush3.bf16.msra.mxu1 %v8005_v51 }
 0x148   :  { %6311 = vmatprep.subr.bf16.mxu0 %v7936_v52  ;;  %6340 = vmatprep.subr.bf16.mxu1 %v7811_v23 }
 0x14b   :  { %6313 = vmatpush1.bf16.msra.mxu0 %v7946_v2  ;;  %6342 = vmatpush3.bf16.msra.mxu1 %v8019_v61 }
 0x14c   :  { %6315 = vmatprep.subr.bf16.mxu0 %v7960_v11  ;;  %6343 = vmatprep.subr.bf16.mxu1 %v7811_v23 }
 0x14f   :  { %6317 = vmatpush1.bf16.msra.mxu0 %v7981_v26  ;;  %6345 = vmatpush3.bf16.msra.mxu1 %v8030_v7 }
 0x150   :  { %6319 = vmatprep.subr.bf16.mxu0 %v7987_v30  ;;  %6346 = vmatprep.subr.bf16.mxu1 %v7811_v23 }
 0x153   :  { %6321 = vmatpush1.bf16.msra.mxu0 %v7995_v42  ;;  %6348 = vmatpush3.bf16.msra.mxu1 %v8038_v13 }
 0x154   :  { %6323 = vmatprep.subr.bf16.mxu0 %v7999_v45  ;;  %6349 = vmatprep.subr.bf16.mxu1 %v7811_v23 }
 0x157   :  { %6325 = vmatpush1.bf16.msra.mxu0 %v8008_v53  ;;  %6351 = vmatpush3.bf16.msra.mxu1 %v8045_v17 }
 0x158   :  { %6327 = vmatprep.subr.bf16.mxu0 %v8012_v56  ;;  %6352 = vmatprep.subr.bf16.mxu1 %v7811_v23 }
 0x15b   :  { %6329 = vmatpush1.bf16.msra.mxu0 %v8022_v62  ;;  %6354 = vmatpush3.bf16.msra.mxu1 %v8052_v20 }
 0x15c   :  { %6331 = vmatprep.subr.bf16.mxu0 %v8026_v3  ;;  %6355 = vmatprep.subr.bf16.mxu1 %v7811_v23 }
 0x15f   :  { %6333 = vmatpush1.bf16.msra.mxu0 %v8033_v8  ;;  %6357 = vmatpush3.bf16.msra.mxu1 %v8058_v24 }
 0x160   :  { %6359 = vmatprep.subr.bf16.mxu0 %v7874_v14  ;;  %6390 = vmatprep.subr.bf16.mxu1 %v7811_v23 }
 0x215   :  { %v1034_v4 = vpop.f32.mrb[14].mxu0  ;;  %v1105_v33 = vpop.f32.mrb[8].mxu1 }
 0x216   :  { %v1035_v63 = vadd.f32 %v1034_v4, %v8163_v5  ;;  %v1036_v43 = vpop.f32.mrb[15].mxu0  ;;  %v5419_v55 = vpop.f32.mrb[9].mxu1  ;;  %v1106_v22 = vadd.f32 %v1105_v33, %v8173_v38  ;;  %v1286_v4 = vrot.slane %v1136_v57, 2 }
 0x217   :  { %v1037_v0 = vadd.f32 %v1036_v43, %v8167_v10 }
 0x218   :  { %v1109_v6 = vadd.f32 %v1035_v63, %v967_v40 }
 0x219   :  { %v1119_v25 = vadd.f32 %v1117_v9, %v1037_v0 }
 0x21a   :  { %v4878_v12 = vmul.f32 -1.442695, %v1109_v6 }
 0x21b   :  { %v4879_v15 = vmul.f32 -1.442695, %v1119_v25 }
 0x21c   :  { %7552 = vpow2.f32 %v4878_v12 }
 0x21d   :  { %7554 = vpow2.f32 %v4879_v15  ;;  %v1296_v15 = vrot.slane %v1136_v57, 4 }
 0x226   :  { %v7553_v16 = vpop.eup %7552 }
 0x227   :  { %v1113_v18 = vadd.f32 1.0, %v7553_v16  ;;  %v7555_v19 = vpop.eup %7554 }
 0x228   :  { %v1123_v21 = vadd.f32 1.0, %v7555_v19 }
 0x229   :  { %7556 = vrcp.f32 %v1113_v18 }
 0x22a   :  { %7558 = vrcp.f32 %v1123_v21 }
 0x233   :  { %v7557_v29 = vpop.eup %7556 }
 0x234   :  { %v1126_v27 = vmul.f32 %v7557_v29, %v1106_v22  ;;  %v7559_v35 = vpop.eup %7558 }
 0x235   :  { %v1131_v39 = vsub.f32 1.0, %v7559_v35  ;;  %v1133_v37 = vmul.f32 %v7559_v35, %v8176_v60  ;;  %v1305_v35 = vld [vmem:[#allocation2 + $0x12] sm:$0x3f] }
 0x236   :  { %v1129_v34 = vadd.f32 %v1127_v31, %v1126_v27 }
 0x238   :  { %7560 = vtanh.f32 %v1129_v34 }
 0x242   :  { %v7561_v50 = vpop.eup %7560 }
 0x243   :  { %v1132_v28 = vmul.f32 %v7561_v50, %v1131_v39 }
 0x245   :  { %v8219_v44 = vadd.f32 %v1133_v37, %v1132_v28 }
 0x247   :  { %1202 = vmatmul.mubr.f32.vlgmr.msra.gmra.mrb[16].mxu0 %v8219_v44  ;;  %5453 = vmatmul.mubr.f32.vlgmr.msra.gmra.mrb[10].mxu1 %v8219_v44 }
 0x248   :  { %6361 = vmatpush1.bf16.msra.mxu0 %v7901_v32  ;;  %6392 = vmatpush3.bf16.msra.mxu1 %v7992_v41 }
 0x249   :  { %6363 = vmatprep.subr.bf16.mxu0 %v7905_v36  ;;  %6393 = vmatprep.subr.bf16.mxu1 %v7811_v23 }
 0x24a   :  { %1370 = vmatprep.mubr.f32.mxu0 %v7809_v1  ;;  %5487 = vmatprep.mubr.msk.f32.mxu1 %vm7812_vm2, %v7809_v1 }
 0x24c   :  { %6365 = vmatpush1.bf16.msra.mxu0 %v7922_v46  ;;  %6395 = vmatpush3.bf16.msra.mxu1 %v8005_v51 }
 0x24d   :  { %6367 = vmatprep.subr.bf16.mxu0 %v7936_v52  ;;  %6396 = vmatprep.subr.bf16.mxu1 %v7811_v23 }
 0x250   :  { %6369 = vmatpush1.bf16.msra.mxu0 %v7946_v2  ;;  %6398 = vmatpush3.bf16.msra.mxu1 %v8019_v61 }
 0x251   :  { %6371 = vmatprep.subr.bf16.mxu0 %v7960_v11  ;;  %6399 = vmatprep.subr.bf16.mxu1 %v7811_v23 }
 0x254   :  { %6373 = vmatpush1.bf16.msra.mxu0 %v7981_v26  ;;  %6401 = vmatpush3.bf16.msra.mxu1 %v8030_v7 }
 0x255   :  { %6375 = vmatprep.subr.bf16.mxu0 %v7987_v30  ;;  %6402 = vmatprep.subr.bf16.mxu1 %v7811_v23 }
 0x258   :  { %6377 = vmatpush1.bf16.msra.mxu0 %v7995_v42  ;;  %6404 = vmatpush3.bf16.msra.mxu1 %v8038_v13 }
 0x259   :  { %6379 = vmatprep.subr.bf16.mxu0 %v7999_v45  ;;  %6405 = vmatprep.subr.bf16.mxu1 %v7811_v23 }
 0x25c   :  { %6381 = vmatpush1.bf16.msra.mxu0 %v8008_v53  ;;  %6407 = vmatpush3.bf16.msra.mxu1 %v8045_v17 }
 0x25d   :  { %6383 = vmatprep.subr.bf16.mxu0 %v8012_v56  ;;  %6408 = vmatprep.subr.bf16.mxu1 %v7811_v23 }
 0x260   :  { %6385 = vmatpush1.bf16.msra.mxu0 %v8022_v62  ;;  %6410 = vmatpush3.bf16.msra.mxu1 %v8052_v20 }
 0x261   :  { %6387 = vmatprep.subr.bf16.mxu0 %v8026_v3  ;;  %6411 = vmatprep.subr.bf16.mxu1 %v7811_v23 }
 0x264   :  { %6389 = vmatpush1.bf16.msra.mxu0 %v8033_v8  ;;  %6413 = vmatpush3.bf16.msra.mxu1 %v8058_v24 }
 0x265   :  { %6415 = vmatprep.subr.bf16.mxu0 %v7874_v14  ;;  %6446 = vmatprep.subr.bf16.mxu1 %v7811_v23 }
 0x31a   :  { %v1203_v49 = vpop.f32.mrb[16].mxu0  ;;  %v1274_v54 = vpop.f32.mrb[10].mxu1 }
 0x31b   :  { %v1204_v58 = vadd.f32 %v1203_v49, %v8163_v5  ;;  %v1205_v47 = vpop.f32.mrb[17].mxu0  ;;  %v5454_v59 = vpop.f32.mrb[11].mxu1  ;;  %v1275_v9 = vadd.f32 %v1274_v54, %v8173_v38  ;;  %v1455_v49 = vrot.slane %v1305_v35, 2 }
 0x31c   :  { %v1206_v48 = vadd.f32 %v1205_v47, %v8167_v10 }
 0x31d   :  { %v1278_v60 = vadd.f32 %v1204_v58, %v1136_v57 }
 0x31e   :  { %v1288_v40 = vadd.f32 %v1286_v4, %v1206_v48 }
 0x31f   :  { %v4880_v33 = vmul.f32 -1.442695, %v1278_v60 }
 0x320   :  { %v4881_v63 = vmul.f32 -1.442695, %v1288_v40 }
 0x321   :  { %7562 = vpow2.f32 %v4880_v33 }
 0x322   :  { %7564 = vpow2.f32 %v4881_v63  ;;  %v1465_v63 = vrot.slane %v1305_v35, 4 }
 0x32b   :  { %v7563_v43 = vpop.eup %7562 }
 0x32c   :  { %v1282_v55 = vadd.f32 1.0, %v7563_v43  ;;  %v7565_v0 = vpop.eup %7564 }
 0x32d   :  { %v1292_v6 = vadd.f32 1.0, %v7565_v0 }
 0x32e   :  { %7566 = vrcp.f32 %v1282_v55 }
 0x32f   :  { %7568 = vrcp.f32 %v1292_v6 }
 0x338   :  { %v7567_v12 = vpop.eup %7566 }
 0x339   :  { %v1295_v25 = vmul.f32 %v7567_v12, %v1275_v9  ;;  %v7569_v18 = vpop.eup %7568 }
 0x33a   :  { %v1300_v19 = vsub.f32 1.0, %v7569_v18  ;;  %v1302_v29 = vmul.f32 %v7569_v18, %v8219_v44  ;;  %v1474_v18 = vld [vmem:[#allocation2 + $0x18] sm:$0x3f] }
 0x33b   :  { %v1298_v16 = vadd.f32 %v1296_v15, %v1295_v25 }
 0x33d   :  { %7570 = vtanh.f32 %v1298_v16 }
 0x347   :  { %v7571_v21 = vpop.eup %7570 }
 0x348   :  { %v1301_v22 = vmul.f32 %v7571_v21, %v1300_v19 }
 0x34a   :  { %v8262_v27 = vadd.f32 %v1302_v29, %v1301_v22 }
 0x34c   :  { %1371 = vmatmul.mubr.f32.vlgmr.msra.gmra.mrb[18].mxu0 %v8262_v27  ;;  %5488 = vmatmul.mubr.f32.vlgmr.msra.gmra.mrb[12].mxu1 %v8262_v27 }
 0x34d   :  { %6417 = vmatpush1.bf16.msra.mxu0 %v7901_v32  ;;  %6448 = vmatpush3.bf16.msra.mxu1 %v7992_v41 }
 0x34e   :  { %6419 = vmatprep.subr.bf16.mxu0 %v7905_v36  ;;  %6449 = vmatprep.subr.bf16.mxu1 %v7811_v23 }
 0x34f   :  { %1539 = vmatprep.mubr.f32.mxu0 %v7809_v1  ;;  %5522 = vmatprep.mubr.msk.f32.mxu1 %vm7812_vm2, %v7809_v1 }
 0x351   :  { %6421 = vmatpush1.bf16.msra.mxu0 %v7922_v46  ;;  %6451 = vmatpush3.bf16.msra.mxu1 %v8005_v51 }
 0x352   :  { %6423 = vmatprep.subr.bf16.mxu0 %v7936_v52  ;;  %6452 = vmatprep.subr.bf16.mxu1 %v7811_v23 }
 0x355   :  { %6425 = vmatpush1.bf16.msra.mxu0 %v7946_v2  ;;  %6454 = vmatpush3.bf16.msra.mxu1 %v8019_v61 }
 0x356   :  { %6427 = vmatprep.subr.bf16.mxu0 %v7960_v11  ;;  %6455 = vmatprep.subr.bf16.mxu1 %v7811_v23 }
 0x359   :  { %6429 = vmatpush1.bf16.msra.mxu0 %v7981_v26  ;;  %6457 = vmatpush3.bf16.msra.mxu1 %v8030_v7 }
 0x35a   :  { %6431 = vmatprep.subr.bf16.mxu0 %v7987_v30  ;;  %6458 = vmatprep.subr.bf16.mxu1 %v7811_v23 }
 0x35d   :  { %6433 = vmatpush1.bf16.msra.mxu0 %v7995_v42  ;;  %6460 = vmatpush3.bf16.msra.mxu1 %v8038_v13 }
 0x35e   :  { %6435 = vmatprep.subr.bf16.mxu0 %v7999_v45  ;;  %6461 = vmatprep.subr.bf16.mxu1 %v7811_v23 }
 0x361   :  { %6437 = vmatpush1.bf16.msra.mxu0 %v8008_v53  ;;  %6463 = vmatpush3.bf16.msra.mxu1 %v8045_v17 }
 0x362   :  { %6439 = vmatprep.subr.bf16.mxu0 %v8012_v56  ;;  %6464 = vmatprep.subr.bf16.mxu1 %v7811_v23 }
 0x365   :  { %6441 = vmatpush1.bf16.msra.mxu0 %v8022_v62  ;;  %6466 = vmatpush3.bf16.msra.mxu1 %v8052_v20 }
 0x366   :  { %6443 = vmatprep.subr.bf16.mxu0 %v8026_v3  ;;  %6467 = vmatprep.subr.bf16.mxu1 %v7811_v23 }
 0x369   :  { %6445 = vmatpush1.bf16.msra.mxu0 %v8033_v8  ;;  %6469 = vmatpush3.bf16.msra.mxu1 %v8058_v24 }
 0x36a   :  { %6471 = vmatprep.subr.bf16.mxu0 %v7874_v14  ;;  %6502 = vmatprep.subr.bf16.mxu1 %v7811_v23 }
 0x41f   :  { %v1372_v31 = vpop.f32.mrb[18].mxu0  ;;  %v1443_v34 = vpop.f32.mrb[12].mxu1 }
 0x420   :  { %v1373_v39 = vadd.f32 %v1372_v31, %v8163_v5  ;;  %v1374_v50 = vpop.f32.mrb[19].mxu0  ;;  %v5489_v28 = vpop.f32.mrb[13].mxu1  ;;  %v1444_v4 = vadd.f32 %v1443_v34, %v8173_v38  ;;  %v1624_v31 = vrot.slane %v1474_v18, 2 }
 0x421   :  { %v1375_v37 = vadd.f32 %v1374_v50, %v8167_v10 }
 0x422   :  { %v1447_v44 = vadd.f32 %v1373_v39, %v1305_v35 }
 0x423   :  { %v1457_v57 = vadd.f32 %v1455_v49, %v1375_v37 }
 0x424   :  { %v4882_v54 = vmul.f32 -1.442695, %v1447_v44 }
 0x425   :  { %v4883_v58 = vmul.f32 -1.442695, %v1457_v57 }
 0x426   :  { %7572 = vpow2.f32 %v4882_v54 }
 0x427   :  { %7574 = vpow2.f32 %v4883_v58  ;;  %v1634_v58 = vrot.slane %v1474_v18, 4 }
 0x430   :  { %v7573_v47 = vpop.eup %7572 }
 0x431   :  { %v1451_v59 = vadd.f32 1.0, %v7573_v47  ;;  %v7575_v48 = vpop.eup %7574 }
 0x432   :  { %v1461_v60 = vadd.f32 1.0, %v7575_v48 }
 0x433   :  { %7576 = vrcp.f32 %v1451_v59 }
 0x434   :  { %7578 = vrcp.f32 %v1461_v60 }
 0x43d   :  { %v7577_v33 = vpop.eup %7576 }
 0x43e   :  { %v1464_v40 = vmul.f32 %v7577_v33, %v1444_v4  ;;  %v7579_v55 = vpop.eup %7578 }
 0x43f   :  { %v1469_v0 = vsub.f32 1.0, %v7579_v55  ;;  %v1471_v12 = vmul.f32 %v7579_v55, %v8262_v27  ;;  %v1643_v55 = vld [vmem:[#allocation2 + $0x1e] sm:$0x3f] }
 0x440   :  { %v1467_v43 = vadd.f32 %v1465_v63, %v1464_v40 }
 0x442   :  { %7580 = vtanh.f32 %v1467_v43 }
 0x44c   :  { %v7581_v6 = vpop.eup %7580 }
 0x44d   :  { %v1470_v9 = vmul.f32 %v7581_v6, %v1469_v0 }
 0x44f   :  { %v8305_v25 = vadd.f32 %v1471_v12, %v1470_v9 }
 0x451   :  { %1540 = vmatmul.mubr.f32.vlgmr.msra.gmra.mrb[20].mxu0 %v8305_v25  ;;  %5523 = vmatmul.mubr.f32.vlgmr.msra.gmra.mrb[14].mxu1 %v8305_v25 }
 0x452   :  { %6473 = vmatpush1.bf16.msra.mxu0 %v7901_v32  ;;  %6504 = vmatpush3.bf16.msra.mxu1 %v7992_v41 }
 0x453   :  { %6475 = vmatprep.subr.bf16.mxu0 %v7905_v36  ;;  %6505 = vmatprep.subr.bf16.mxu1 %v7811_v23 }
 0x454   :  { %1708 = vmatprep.mubr.f32.mxu0 %v7809_v1  ;;  %5557 = vmatprep.mubr.msk.f32.mxu1 %vm7812_vm2, %v7809_v1 }
 0x456   :  { %6477 = vmatpush1.bf16.msra.mxu0 %v7922_v46  ;;  %6507 = vmatpush3.bf16.msra.mxu1 %v8005_v51 }
 0x457   :  { %6479 = vmatprep.subr.bf16.mxu0 %v7936_v52  ;;  %6508 = vmatprep.subr.bf16.mxu1 %v7811_v23 }
 0x45a   :  { %6481 = vmatpush1.bf16.msra.mxu0 %v7946_v2  ;;  %6510 = vmatpush3.bf16.msra.mxu1 %v8019_v61 }
 0x45b   :  { %6483 = vmatprep.subr.bf16.mxu0 %v7960_v11  ;;  %6511 = vmatprep.subr.bf16.mxu1 %v7811_v23 }
 0x45e   :  { %6485 = vmatpush1.bf16.msra.mxu0 %v7981_v26  ;;  %6513 = vmatpush3.bf16.msra.mxu1 %v8030_v7 }
 0x45f   :  { %6487 = vmatprep.subr.bf16.mxu0 %v7987_v30  ;;  %6514 = vmatprep.subr.bf16.mxu1 %v7811_v23 }
 0x462   :  { %6489 = vmatpush1.bf16.msra.mxu0 %v7995_v42  ;;  %6516 = vmatpush3.bf16.msra.mxu1 %v8038_v13 }
 0x463   :  { %6491 = vmatprep.subr.bf16.mxu0 %v7999_v45  ;;  %6517 = vmatprep.subr.bf16.mxu1 %v7811_v23 }
 0x466   :  { %6493 = vmatpush1.bf16.msra.mxu0 %v8008_v53  ;;  %6519 = vmatpush3.bf16.msra.mxu1 %v8045_v17 }
 0x467   :  { %6495 = vmatprep.subr.bf16.mxu0 %v8012_v56  ;;  %6520 = vmatprep.subr.bf16.mxu1 %v7811_v23 }
 0x46a   :  { %6497 = vmatpush1.bf16.msra.mxu0 %v8022_v62  ;;  %6522 = vmatpush3.bf16.msra.mxu1 %v8052_v20 }
 0x46b   :  { %6499 = vmatprep.subr.bf16.mxu0 %v8026_v3  ;;  %6523 = vmatprep.subr.bf16.mxu1 %v7811_v23 }
 0x46e   :  { %6501 = vmatpush1.bf16.msra.mxu0 %v8033_v8  ;;  %6525 = vmatpush3.bf16.msra.mxu1 %v8058_v24 }
 0x46f   :  { %6527 = vmatprep.subr.bf16.mxu0 %v7874_v14  ;;  %6558 = vmatprep.subr.bf16.mxu1 %v7811_v23 }
 0x524   :  { %v1541_v15 = vpop.f32.mrb[20].mxu0  ;;  %v1612_v16 = vpop.f32.mrb[14].mxu1 }
 0x525   :  { %v1542_v19 = vadd.f32 %v1541_v15, %v8163_v5  ;;  %v1543_v21 = vpop.f32.mrb[21].mxu0  ;;  %v5524_v22 = vpop.f32.mrb[15].mxu1  ;;  %v1613_v49 = vadd.f32 %v1612_v16, %v8173_v38  ;;  %v1793_v15 = vrot.slane %v1643_v55, 2 }
 0x526   :  { %v1544_v29 = vadd.f32 %v1543_v21, %v8167_v10 }
 0x527   :  { %v1616_v27 = vadd.f32 %v1542_v19, %v1474_v18 }
 0x528   :  { %v1626_v35 = vadd.f32 %v1624_v31, %v1544_v29 }
 0x529   :  { %v4884_v34 = vmul.f32 -1.442695, %v1616_v27 }
 0x52a   :  { %v4885_v39 = vmul.f32 -1.442695, %v1626_v35 }
 0x52b   :  { %7582 = vpow2.f32 %v4884_v34 }
 0x52c   :  { %7584 = vpow2.f32 %v4885_v39  ;;  %v1803_v39 = vrot.slane %v1643_v55, 4 }
 0x535   :  { %v7583_v50 = vpop.eup %7582 }
 0x536   :  { %v1620_v28 = vadd.f32 1.0, %v7583_v50  ;;  %v7585_v37 = vpop.eup %7584 }
 0x537   :  { %v1630_v44 = vadd.f32 1.0, %v7585_v37 }
 0x538   :  { %7586 = vrcp.f32 %v1620_v28 }
 0x539   :  { %7588 = vrcp.f32 %v1630_v44 }
 0x542   :  { %v7587_v54 = vpop.eup %7586 }
 0x543   :  { %v1633_v57 = vmul.f32 %v7587_v54, %v1613_v49  ;;  %v7589_v59 = vpop.eup %7588 }
 0x544   :  { %v1638_v48 = vsub.f32 1.0, %v7589_v59  ;;  %v1640_v33 = vmul.f32 %v7589_v59, %v8305_v25  ;;  %v1812_v59 = vld [vmem:[#allocation2 + $0x24] sm:$0x3f] }
 0x545   :  { %v1636_v47 = vadd.f32 %v1634_v58, %v1633_v57 }
 0x547   :  { %7590 = vtanh.f32 %v1636_v47 }
 0x551   :  { %v7591_v60 = vpop.eup %7590 }
 0x552   :  { %v1639_v4 = vmul.f32 %v7591_v60, %v1638_v48 }
 0x554   :  { %v8348_v40 = vadd.f32 %v1640_v33, %v1639_v4 }
 0x556   :  { %1709 = vmatmul.mubr.f32.vlgmr.msra.gmra.mrb[22].mxu0 %v8348_v40  ;;  %5558 = vmatmul.mubr.f32.vlgmr.msra.gmra.mrb[16].mxu1 %v8348_v40 }
 0x557   :  { %6529 = vmatpush1.bf16.msra.mxu0 %v7901_v32  ;;  %6560 = vmatpush3.bf16.msra.mxu1 %v7992_v41 }
 0x558   :  { %6531 = vmatprep.subr.bf16.mxu0 %v7905_v36  ;;  %6561 = vmatprep.subr.bf16.mxu1 %v7811_v23 }
 0x559   :  { %1877 = vmatprep.mubr.f32.mxu0 %v7809_v1  ;;  %5592 = vmatprep.mubr.msk.f32.mxu1 %vm7812_vm2, %v7809_v1 }
 0x55b   :  { %6533 = vmatpush1.bf16.msra.mxu0 %v7922_v46  ;;  %6563 = vmatpush3.bf16.msra.mxu1 %v8005_v51 }
 0x55c   :  { %6535 = vmatprep.subr.bf16.mxu0 %v7936_v52  ;;  %6564 = vmatprep.subr.bf16.mxu1 %v7811_v23 }
 0x55f   :  { %6537 = vmatpush1.bf16.msra.mxu0 %v7946_v2  ;;  %6566 = vmatpush3.bf16.msra.mxu1 %v8019_v61 }
 0x560   :  { %6539 = vmatprep.subr.bf16.mxu0 %v7960_v11  ;;  %6567 = vmatprep.subr.bf16.mxu1 %v7811_v23 }
 0x563   :  { %6541 = vmatpush1.bf16.msra.mxu0 %v7981_v26  ;;  %6569 = vmatpush3.bf16.msra.mxu1 %v8030_v7 }
 0x564   :  { %6543 = vmatprep.subr.bf16.mxu0 %v7987_v30  ;;  %6570 = vmatprep.subr.bf16.mxu1 %v7811_v23 }
 0x567   :  { %6545 = vmatpush1.bf16.msra.mxu0 %v7995_v42  ;;  %6572 = vmatpush3.bf16.msra.mxu1 %v8038_v13 }
 0x568   :  { %6547 = vmatprep.subr.bf16.mxu0 %v7999_v45  ;;  %6573 = vmatprep.subr.bf16.mxu1 %v7811_v23 }
 0x56b   :  { %6549 = vmatpush1.bf16.msra.mxu0 %v8008_v53  ;;  %6575 = vmatpush3.bf16.msra.mxu1 %v8045_v17 }
 0x56c   :  { %6551 = vmatprep.subr.bf16.mxu0 %v8012_v56  ;;  %6576 = vmatprep.subr.bf16.mxu1 %v7811_v23 }
 0x56f   :  { %6553 = vmatpush1.bf16.msra.mxu0 %v8022_v62  ;;  %6578 = vmatpush3.bf16.msra.mxu1 %v8052_v20 }
 0x570   :  { %6555 = vmatprep.subr.bf16.mxu0 %v8026_v3  ;;  %6579 = vmatprep.subr.bf16.mxu1 %v7811_v23 }
 0x573   :  { %6557 = vmatpush1.bf16.msra.mxu0 %v8033_v8  ;;  %6581 = vmatpush3.bf16.msra.mxu1 %v8058_v24 }
 0x574   :  { %6583 = vmatprep.subr.bf16.mxu0 %v7874_v14  ;;  %6614 = vmatprep.subr.bf16.mxu1 %v7811_v23 }
 0x629   :  { %v1710_v63 = vpop.f32.mrb[22].mxu0  ;;  %v1781_v43 = vpop.f32.mrb[16].mxu1 }
 0x62a   :  { %v1711_v0 = vadd.f32 %v1710_v63, %v8163_v5  ;;  %v1712_v6 = vpop.f32.mrb[23].mxu0  ;;  %v5559_v9 = vpop.f32.mrb[17].mxu1  ;;  %v1782_v31 = vadd.f32 %v1781_v43, %v8173_v38  ;;  %v1962_v63 = vrot.slane %v1812_v59, 2 }
 0x62b   :  { %v1713_v12 = vadd.f32 %v1712_v6, %v8167_v10 }
 0x62c   :  { %v1785_v25 = vadd.f32 %v1711_v0, %v1643_v55 }
 0x62d   :  { %v1795_v18 = vadd.f32 %v1793_v15, %v1713_v12 }
 0x62e   :  { %v4886_v16 = vmul.f32 -1.442695, %v1785_v25 }
 0x62f   :  { %v4887_v19 = vmul.f32 -1.442695, %v1795_v18 }
 0x630   :  { %7592 = vpow2.f32 %v4886_v16 }
 0x631   :  { %7594 = vpow2.f32 %v4887_v19  ;;  %v1972_v19 = vrot.slane %v1812_v59, 4 }
 0x63a   :  { %v7593_v21 = vpop.eup %7592 }
 0x63b   :  { %v1789_v22 = vadd.f32 1.0, %v7593_v21  ;;  %v7595_v29 = vpop.eup %7594 }
 0x63c   :  { %v1799_v27 = vadd.f32 1.0, %v7595_v29 }
 0x63d   :  { %7596 = vrcp.f32 %v1789_v22 }
 0x63e   :  { %7598 = vrcp.f32 %v1799_v27 }
 0x647   :  { %v7597_v34 = vpop.eup %7596 }
 0x648   :  { %v1802_v35 = vmul.f32 %v7597_v34, %v1782_v31  ;;  %v7599_v28 = vpop.eup %7598 }
 0x649   :  { %v1807_v37 = vsub.f32 1.0, %v7599_v28  ;;  %v1809_v54 = vmul.f32 %v7599_v28, %v8348_v40  ;;  %v1981_v28 = vld [vmem:[#allocation2 + $0x2a] sm:$0x3f] }
 0x64a   :  { %v1805_v50 = vadd.f32 %v1803_v39, %v1802_v35 }
 0x64c   :  { %7600 = vtanh.f32 %v1805_v50 }
 0x656   :  { %v7601_v44 = vpop.eup %7600 }
 0x657   :  { %v1808_v49 = vmul.f32 %v7601_v44, %v1807_v37 }
 0x659   :  { %v8391_v57 = vadd.f32 %v1809_v54, %v1808_v49 }
 0x65b   :  { %1878 = vmatmul.mubr.f32.vlgmr.msra.gmra.mrb[24].mxu0 %v8391_v57  ;;  %5593 = vmatmul.mubr.f32.vlgmr.msra.gmra.mrb[18].mxu1 %v8391_v57 }
 0x65c   :  { %6585 = vmatpush1.bf16.msra.mxu0 %v7901_v32  ;;  %6616 = vmatpush3.bf16.msra.mxu1 %v7992_v41 }
 0x65d   :  { %6587 = vmatprep.subr.bf16.mxu0 %v7905_v36  ;;  %6617 = vmatprep.subr.bf16.mxu1 %v7811_v23 }
 0x65e   :  { %2046 = vmatprep.mubr.f32.mxu0 %v7809_v1  ;;  %5627 = vmatprep.mubr.msk.f32.mxu1 %vm7812_vm2, %v7809_v1 }
 0x660   :  { %6589 = vmatpush1.bf16.msra.mxu0 %v7922_v46  ;;  %6619 = vmatpush3.bf16.msra.mxu1 %v8005_v51 }
 0x661   :  { %6591 = vmatprep.subr.bf16.mxu0 %v7936_v52  ;;  %6620 = vmatprep.subr.bf16.mxu1 %v7811_v23 }
 0x664   :  { %6593 = vmatpush1.bf16.msra.mxu0 %v7946_v2  ;;  %6622 = vmatpush3.bf16.msra.mxu1 %v8019_v61 }
 0x665   :  { %6595 = vmatprep.subr.bf16.mxu0 %v7960_v11  ;;  %6623 = vmatprep.subr.bf16.mxu1 %v7811_v23 }
 0x668   :  { %6597 = vmatpush1.bf16.msra.mxu0 %v7981_v26  ;;  %6625 = vmatpush3.bf16.msra.mxu1 %v8030_v7 }
 0x669   :  { %6599 = vmatprep.subr.bf16.mxu0 %v7987_v30  ;;  %6626 = vmatprep.subr.bf16.mxu1 %v7811_v23 }
 0x66c   :  { %6601 = vmatpush1.bf16.msra.mxu0 %v7995_v42  ;;  %6628 = vmatpush3.bf16.msra.mxu1 %v8038_v13 }
 0x66d   :  { %6603 = vmatprep.subr.bf16.mxu0 %v7999_v45  ;;  %6629 = vmatprep.subr.bf16.mxu1 %v7811_v23 }
 0x670   :  { %6605 = vmatpush1.bf16.msra.mxu0 %v8008_v53  ;;  %6631 = vmatpush3.bf16.msra.mxu1 %v8045_v17 }
 0x671   :  { %6607 = vmatprep.subr.bf16.mxu0 %v8012_v56  ;;  %6632 = vmatprep.subr.bf16.mxu1 %v7811_v23 }
 0x674   :  { %6609 = vmatpush1.bf16.msra.mxu0 %v8022_v62  ;;  %6634 = vmatpush3.bf16.msra.mxu1 %v8052_v20 }
 0x675   :  { %6611 = vmatprep.subr.bf16.mxu0 %v8026_v3  ;;  %6635 = vmatprep.subr.bf16.mxu1 %v7811_v23 }
 0x678   :  { %6613 = vmatpush1.bf16.msra.mxu0 %v8033_v8  ;;  %6637 = vmatpush3.bf16.msra.mxu1 %v8058_v24 }
 0x679   :  { %6639 = vmatprep.subr.bf16.mxu0 %v7874_v14  ;;  %6670 = vmatprep.subr.bf16.mxu1 %v7811_v23 }
 0x72e   :  { %v1879_v58 = vpop.f32.mrb[24].mxu0  ;;  %v1950_v47 = vpop.f32.mrb[18].mxu1 }
 0x72f   :  { %v1880_v48 = vadd.f32 %v1879_v58, %v8163_v5  ;;  %v1881_v60 = vpop.f32.mrb[25].mxu0  ;;  %v5594_v4 = vpop.f32.mrb[19].mxu1  ;;  %v1951_v15 = vadd.f32 %v1950_v47, %v8173_v38  ;;  %v2131_v58 = vrot.slane %v1981_v28, 2 }
 0x730   :  { %v1882_v33 = vadd.f32 %v1881_v60, %v8167_v10 }
 0x731   :  { %v1954_v40 = vadd.f32 %v1880_v48, %v1812_v59 }
 0x732   :  { %v1964_v55 = vadd.f32 %v1962_v63, %v1882_v33 }
 0x733   :  { %v4888_v43 = vmul.f32 -1.442695, %v1954_v40 }
 0x734   :  { %v4889_v0 = vmul.f32 -1.442695, %v1964_v55 }
 0x735   :  { %7602 = vpow2.f32 %v4888_v43 }
 0x736   :  { %7604 = vpow2.f32 %v4889_v0  ;;  %v2141_v0 = vrot.slane %v1981_v28, 4 }
 0x73f   :  { %v7603_v6 = vpop.eup %7602 }
 0x740   :  { %v1958_v9 = vadd.f32 1.0, %v7603_v6  ;;  %v7605_v12 = vpop.eup %7604 }
 0x741   :  { %v1968_v25 = vadd.f32 1.0, %v7605_v12 }
 0x742   :  { %7606 = vrcp.f32 %v1958_v9 }
 0x743   :  { %7608 = vrcp.f32 %v1968_v25 }
 0x74c   :  { %v7607_v16 = vpop.eup %7606 }
 0x74d   :  { %v1971_v18 = vmul.f32 %v7607_v16, %v1951_v15  ;;  %v7609_v22 = vpop.eup %7608 }
 0x74e   :  { %v1976_v29 = vsub.f32 1.0, %v7609_v22  ;;  %v1978_v34 = vmul.f32 %v7609_v22, %v8391_v57  ;;  %v2150_v22 = vld [vmem:[#allocation2 + $0x30] sm:$0x3f] }
 0x74f   :  { %v1974_v21 = vadd.f32 %v1972_v19, %v1971_v18 }
 0x751   :  { %7610 = vtanh.f32 %v1974_v21 }
 0x75b   :  { %v7611_v27 = vpop.eup %7610 }
 0x75c   :  { %v1977_v31 = vmul.f32 %v7611_v27, %v1976_v29 }
 0x75e   :  { %v8434_v35 = vadd.f32 %v1978_v34, %v1977_v31 }
 0x760   :  { %2047 = vmatmul.mubr.f32.vlgmr.msra.gmra.mrb[26].mxu0 %v8434_v35  ;;  %5628 = vmatmul.mubr.f32.vlgmr.msra.gmra.mrb[20].mxu1 %v8434_v35 }
 0x761   :  { %6641 = vmatpush1.bf16.msra.mxu0 %v7901_v32  ;;  %6672 = vmatpush3.bf16.msra.mxu1 %v7992_v41 }
 0x762   :  { %6643 = vmatprep.subr.bf16.mxu0 %v7905_v36  ;;  %6673 = vmatprep.subr.bf16.mxu1 %v7811_v23 }
 0x763   :  { %2215 = vmatprep.mubr.f32.mxu0 %v7809_v1  ;;  %5662 = vmatprep.mubr.msk.f32.mxu1 %vm7812_vm2, %v7809_v1 }
 0x765   :  { %6645 = vmatpush1.bf16.msra.mxu0 %v7922_v46  ;;  %6675 = vmatpush3.bf16.msra.mxu1 %v8005_v51 }
 0x766   :  { %6647 = vmatprep.subr.bf16.mxu0 %v7936_v52  ;;  %6676 = vmatprep.subr.bf16.mxu1 %v7811_v23 }
 0x769   :  { %6649 = vmatpush1.bf16.msra.mxu0 %v7946_v2  ;;  %6678 = vmatpush3.bf16.msra.mxu1 %v8019_v61 }
 0x76a   :  { %6651 = vmatprep.subr.bf16.mxu0 %v7960_v11  ;;  %6679 = vmatprep.subr.bf16.mxu1 %v7811_v23 }
 0x76d   :  { %6653 = vmatpush1.bf16.msra.mxu0 %v7981_v26  ;;  %6681 = vmatpush3.bf16.msra.mxu1 %v8030_v7 }
 0x76e   :  { %6655 = vmatprep.subr.bf16.mxu0 %v7987_v30  ;;  %6682 = vmatprep.subr.bf16.mxu1 %v7811_v23 }
 0x771   :  { %6657 = vmatpush1.bf16.msra.mxu0 %v7995_v42  ;;  %6684 = vmatpush3.bf16.msra.mxu1 %v8038_v13 }
 0x772   :  { %6659 = vmatprep.subr.bf16.mxu0 %v7999_v45  ;;  %6685 = vmatprep.subr.bf16.mxu1 %v7811_v23 }
 0x775   :  { %6661 = vmatpush1.bf16.msra.mxu0 %v8008_v53  ;;  %6687 = vmatpush3.bf16.msra.mxu1 %v8045_v17 }
 0x776   :  { %6663 = vmatprep.subr.bf16.mxu0 %v8012_v56  ;;  %6688 = vmatprep.subr.bf16.mxu1 %v7811_v23 }
 0x779   :  { %6665 = vmatpush1.bf16.msra.mxu0 %v8022_v62  ;;  %6690 = vmatpush3.bf16.msra.mxu1 %v8052_v20 }
 0x77a   :  { %6667 = vmatprep.subr.bf16.mxu0 %v8026_v3  ;;  %6691 = vmatprep.subr.bf16.mxu1 %v7811_v23 }
 0x77d   :  { %6669 = vmatpush1.bf16.msra.mxu0 %v8033_v8  ;;  %6693 = vmatpush3.bf16.msra.mxu1 %v8058_v24 }
 0x77e   :  { %6695 = vmatprep.subr.bf16.mxu0 %v7874_v14  ;;  %6726 = vmatprep.subr.bf16.mxu1 %v7811_v23 }
 0x833   :  { %v2048_v39 = vpop.f32.mrb[26].mxu0  ;;  %v2119_v50 = vpop.f32.mrb[20].mxu1 }
 0x834   :  { %v2049_v37 = vadd.f32 %v2048_v39, %v8163_v5  ;;  %v2050_v44 = vpop.f32.mrb[27].mxu0  ;;  %v5629_v49 = vpop.f32.mrb[21].mxu1  ;;  %v2120_v63 = vadd.f32 %v2119_v50, %v8173_v38  ;;  %v2300_v39 = vrot.slane %v2150_v22, 2 }
 0x835   :  { %v2051_v54 = vadd.f32 %v2050_v44, %v8167_v10 }
 0x836   :  { %v2123_v57 = vadd.f32 %v2049_v37, %v1981_v28 }
 0x837   :  { %v2133_v59 = vadd.f32 %v2131_v58, %v2051_v54 }
 0x838   :  { %v4890_v47 = vmul.f32 -1.442695, %v2123_v57 }
 0x839   :  { %v4891_v48 = vmul.f32 -1.442695, %v2133_v59 }
 0x83a   :  { %7612 = vpow2.f32 %v4890_v47 }
 0x83b   :  { %7614 = vpow2.f32 %v4891_v48  ;;  %v2310_v48 = vrot.slane %v2150_v22, 4 }
 0x844   :  { %v7613_v60 = vpop.eup %7612 }
 0x845   :  { %v2127_v4 = vadd.f32 1.0, %v7613_v60  ;;  %v7615_v33 = vpop.eup %7614 }
 0x846   :  { %v2137_v40 = vadd.f32 1.0, %v7615_v33 }
 0x847   :  { %7616 = vrcp.f32 %v2127_v4 }
 0x848   :  { %7618 = vrcp.f32 %v2137_v40 }
 0x851   :  { %v7617_v43 = vpop.eup %7616 }
 0x852   :  { %v2140_v55 = vmul.f32 %v7617_v43, %v2120_v63  ;;  %v7619_v9 = vpop.eup %7618 }
 0x853   :  { %v2145_v12 = vsub.f32 1.0, %v7619_v9  ;;  %v2147_v16 = vmul.f32 %v7619_v9, %v8434_v35  ;;  %v2319_v9 = vld [vmem:[#allocation2 + $0x36] sm:$0x3f] }
 0x854   :  { %v2143_v6 = vadd.f32 %v2141_v0, %v2140_v55 }
 0x856   :  { %7620 = vtanh.f32 %v2143_v6 }
 0x860   :  { %v7621_v25 = vpop.eup %7620 }
 0x861   :  { %v2146_v15 = vmul.f32 %v7621_v25, %v2145_v12 }
 0x863   :  { %v8477_v18 = vadd.f32 %v2147_v16, %v2146_v15 }
 0x865   :  { %2216 = vmatmul.mubr.f32.vlgmr.msra.gmra.mrb[28].mxu0 %v8477_v18  ;;  %5663 = vmatmul.mubr.f32.vlgmr.msra.gmra.mrb[22].mxu1 %v8477_v18 }
 0x866   :  { %6697 = vmatpush1.bf16.msra.mxu0 %v7901_v32  ;;  %6728 = vmatpush3.bf16.msra.mxu1 %v7992_v41 }
 0x867   :  { %6699 = vmatprep.subr.bf16.mxu0 %v7905_v36  ;;  %6729 = vmatprep.subr.bf16.mxu1 %v7811_v23 }
 0x868   :  { %2384 = vmatprep.mubr.f32.mxu0 %v7809_v1  ;;  %5697 = vmatprep.mubr.msk.f32.mxu1 %vm7812_vm2, %v7809_v1 }
 0x86a   :  { %6701 = vmatpush1.bf16.msra.mxu0 %v7922_v46  ;;  %6731 = vmatpush3.bf16.msra.mxu1 %v8005_v51 }
 0x86b   :  { %6703 = vmatprep.subr.bf16.mxu0 %v7936_v52  ;;  %6732 = vmatprep.subr.bf16.mxu1 %v7811_v23 }
 0x86e   :  { %6705 = vmatpush1.bf16.msra.mxu0 %v7946_v2  ;;  %6734 = vmatpush3.bf16.msra.mxu1 %v8019_v61 }
 0x86f   :  { %6707 = vmatprep.subr.bf16.mxu0 %v7960_v11  ;;  %6735 = vmatprep.subr.bf16.mxu1 %v7811_v23 }
 0x872   :  { %6709 = vmatpush1.bf16.msra.mxu0 %v7981_v26  ;;  %6737 = vmatpush3.bf16.msra.mxu1 %v8030_v7 }
 0x873   :  { %6711 = vmatprep.subr.bf16.mxu0 %v7987_v30  ;;  %6738 = vmatprep.subr.bf16.mxu1 %v7811_v23 }
 0x876   :  { %6713 = vmatpush1.bf16.msra.mxu0 %v7995_v42  ;;  %6740 = vmatpush3.bf16.msra.mxu1 %v8038_v13 }
 0x877   :  { %6715 = vmatprep.subr.bf16.mxu0 %v7999_v45  ;;  %6741 = vmatprep.subr.bf16.mxu1 %v7811_v23 }
 0x87a   :  { %6717 = vmatpush1.bf16.msra.mxu0 %v8008_v53  ;;  %6743 = vmatpush3.bf16.msra.mxu1 %v8045_v17 }
 0x87b   :  { %6719 = vmatprep.subr.bf16.mxu0 %v8012_v56  ;;  %6744 = vmatprep.subr.bf16.mxu1 %v7811_v23 }
 0x87e   :  { %6721 = vmatpush1.bf16.msra.mxu0 %v8022_v62  ;;  %6746 = vmatpush3.bf16.msra.mxu1 %v8052_v20 }
 0x87f   :  { %6723 = vmatprep.subr.bf16.mxu0 %v8026_v3  ;;  %6747 = vmatprep.subr.bf16.mxu1 %v7811_v23 }
 0x882   :  { %6725 = vmatpush1.bf16.msra.mxu0 %v8033_v8  ;;  %6749 = vmatpush3.bf16.msra.mxu1 %v8058_v24 }
 0x883   :  { %6751 = vmatprep.subr.bf16.mxu0 %v7874_v14  ;;  %6782 = vmatprep.subr.bf16.mxu1 %v7811_v23 }
 0x938   :  { %v2217_v19 = vpop.f32.mrb[28].mxu0  ;;  %v2288_v21 = vpop.f32.mrb[22].mxu1 }
 0x939   :  { %v2218_v29 = vadd.f32 %v2217_v19, %v8163_v5  ;;  %v2219_v27 = vpop.f32.mrb[29].mxu0  ;;  %v5664_v31 = vpop.f32.mrb[23].mxu1  ;;  %v2289_v58 = vadd.f32 %v2288_v21, %v8173_v38  ;;  %v2469_v19 = vrot.slane %v2319_v9, 2 }
 0x93a   :  { %v2220_v34 = vadd.f32 %v2219_v27, %v8167_v10 }
 0x93b   :  { %v2292_v35 = vadd.f32 %v2218_v29, %v2150_v22 }
 0x93c   :  { %v2302_v28 = vadd.f32 %v2300_v39, %v2220_v34 }
 0x93d   :  { %v4892_v50 = vmul.f32 -1.442695, %v2292_v35 }
 0x93e   :  { %v4893_v37 = vmul.f32 -1.442695, %v2302_v28 }
 0x93f   :  { %7622 = vpow2.f32 %v4892_v50 }
 0x940   :  { %7624 = vpow2.f32 %v4893_v37  ;;  %v2479_v37 = vrot.slane %v2319_v9, 4 }
 0x949   :  { %v7623_v44 = vpop.eup %7622 }
 0x94a   :  { %v2296_v49 = vadd.f32 1.0, %v7623_v44  ;;  %v7625_v54 = vpop.eup %7624 }
 0x94b   :  { %v2306_v57 = vadd.f32 1.0, %v7625_v54 }
 0x94c   :  { %7626 = vrcp.f32 %v2296_v49 }
 0x94d   :  { %7628 = vrcp.f32 %v2306_v57 }
 0x956   :  { %v7627_v47 = vpop.eup %7626 }
 0x957   :  { %v2309_v59 = vmul.f32 %v7627_v47, %v2289_v58  ;;  %v7629_v4 = vpop.eup %7628 }
 0x958   :  { %v2314_v33 = vsub.f32 1.0, %v7629_v4  ;;  %v2316_v43 = vmul.f32 %v7629_v4, %v8477_v18  ;;  %v2488_v4 = vld [vmem:[#allocation2 + $0x3c] sm:$0x3f] }
 0x959   :  { %v2312_v60 = vadd.f32 %v2310_v48, %v2309_v59 }
 0x95b   :  { %7630 = vtanh.f32 %v2312_v60 }
 0x965   :  { %v7631_v40 = vpop.eup %7630 }
 0x966   :  { %v2315_v63 = vmul.f32 %v7631_v40, %v2314_v33 }
 0x968   :  { %v8520_v55 = vadd.f32 %v2316_v43, %v2315_v63 }
 0x96a   :  { %2385 = vmatmul.mubr.f32.vlgmr.msra.gmra.mrb[30].mxu0 %v8520_v55  ;;  %5698 = vmatmul.mubr.f32.vlgmr.msra.gmra.mrb[24].mxu1 %v8520_v55 }
 0x96b   :  { %6753 = vmatpush1.bf16.msra.mxu0 %v7901_v32  ;;  %6784 = vmatpush3.bf16.msra.mxu1 %v7992_v41 }
 0x96c   :  { %6755 = vmatprep.subr.bf16.mxu0 %v7905_v36  ;;  %6785 = vmatprep.subr.bf16.mxu1 %v7811_v23 }
 0x96d   :  { %2553 = vmatprep.mubr.f32.mxu0 %v7809_v1  ;;  %5732 = vmatprep.mubr.msk.f32.mxu1 %vm7812_vm2, %v7809_v1 }
 0x96f   :  { %6757 = vmatpush1.bf16.msra.mxu0 %v7922_v46  ;;  %6787 = vmatpush3.bf16.msra.mxu1 %v8005_v51 }
 0x970   :  { %6759 = vmatprep.subr.bf16.mxu0 %v7936_v52  ;;  %6788 = vmatprep.subr.bf16.mxu1 %v7811_v23 }
 0x973   :  { %6761 = vmatpush1.bf16.msra.mxu0 %v7946_v2  ;;  %6790 = vmatpush3.bf16.msra.mxu1 %v8019_v61 }
 0x974   :  { %6763 = vmatprep.subr.bf16.mxu0 %v7960_v11  ;;  %6791 = vmatprep.subr.bf16.mxu1 %v7811_v23 }
 0x977   :  { %6765 = vmatpush1.bf16.msra.mxu0 %v7981_v26  ;;  %6793 = vmatpush3.bf16.msra.mxu1 %v8030_v7 }
 0x978   :  { %6767 = vmatprep.subr.bf16.mxu0 %v7987_v30  ;;  %6794 = vmatprep.subr.bf16.mxu1 %v7811_v23 }
 0x97b   :  { %6769 = vmatpush1.bf16.msra.mxu0 %v7995_v42  ;;  %6796 = vmatpush3.bf16.msra.mxu1 %v8038_v13 }
 0x97c   :  { %6771 = vmatprep.subr.bf16.mxu0 %v7999_v45  ;;  %6797 = vmatprep.subr.bf16.mxu1 %v7811_v23 }
 0x97f   :  { %6773 = vmatpush1.bf16.msra.mxu0 %v8008_v53  ;;  %6799 = vmatpush3.bf16.msra.mxu1 %v8045_v17 }
 0x980   :  { %6775 = vmatprep.subr.bf16.mxu0 %v8012_v56  ;;  %6800 = vmatprep.subr.bf16.mxu1 %v7811_v23 }
 0x983   :  { %6777 = vmatpush1.bf16.msra.mxu0 %v8022_v62  ;;  %6802 = vmatpush3.bf16.msra.mxu1 %v8052_v20 }
 0x984   :  { %6779 = vmatprep.subr.bf16.mxu0 %v8026_v3  ;;  %6803 = vmatprep.subr.bf16.mxu1 %v7811_v23 }
 0x987   :  { %6781 = vmatpush1.bf16.msra.mxu0 %v8033_v8  ;;  %6805 = vmatpush3.bf16.msra.mxu1 %v8058_v24 }
 0x988   :  { %6807 = vmatprep.subr.bf16.mxu0 %v7874_v14  ;;  %6838 = vmatprep.subr.bf16.mxu1 %v7811_v23 }
 0xa3d   :  { %v2386_v0 = vpop.f32.mrb[30].mxu0  ;;  %v2457_v6 = vpop.f32.mrb[24].mxu1 }
 0xa3e   :  { %v2387_v12 = vadd.f32 %v2386_v0, %v8163_v5  ;;  %v2388_v25 = vpop.f32.mrb[31].mxu0  ;;  %v5699_v15 = vpop.f32.mrb[25].mxu1  ;;  %v2458_v39 = vadd.f32 %v2457_v6, %v8173_v38  ;;  %v2638_v0 = vrot.slane %v2488_v4, 2 }
 0xa3f   :  { %v2389_v16 = vadd.f32 %v2388_v25, %v8167_v10 }
 0xa40   :  { %v2461_v18 = vadd.f32 %v2387_v12, %v2319_v9 }
 0xa41   :  { %v2471_v22 = vadd.f32 %v2469_v19, %v2389_v16 }
 0xa42   :  { %v4894_v21 = vmul.f32 -1.442695, %v2461_v18 }
 0xa43   :  { %v4895_v29 = vmul.f32 -1.442695, %v2471_v22 }
 0xa44   :  { %7632 = vpow2.f32 %v4894_v21 }
 0xa45   :  { %7634 = vpow2.f32 %v4895_v29  ;;  %v2648_v29 = vrot.slane %v2488_v4, 4 }
 0xa4e   :  { %v7633_v27 = vpop.eup %7632 }
 0xa4f   :  { %v2465_v31 = vadd.f32 1.0, %v7633_v27  ;;  %v7635_v34 = vpop.eup %7634 }
 0xa50   :  { %v2475_v35 = vadd.f32 1.0, %v7635_v34 }
 0xa51   :  { %7636 = vrcp.f32 %v2465_v31 }
 0xa52   :  { %7638 = vrcp.f32 %v2475_v35 }
 0xa5b   :  { %v7637_v50 = vpop.eup %7636 }
 0xa5c   :  { %v2478_v28 = vmul.f32 %v7637_v50, %v2458_v39  ;;  %v7639_v49 = vpop.eup %7638 }
 0xa5d   :  { %v2483_v54 = vsub.f32 1.0, %v7639_v49  ;;  %v2485_v47 = vmul.f32 %v7639_v49, %v8520_v55  ;;  %v2657_v49 = vld [vmem:[#allocation2 + $0x42] sm:$0x3f] }
 0xa5e   :  { %v2481_v44 = vadd.f32 %v2479_v37, %v2478_v28 }
 0xa60   :  { %7640 = vtanh.f32 %v2481_v44 }
 0xa6a   :  { %v7641_v57 = vpop.eup %7640 }
 0xa6b   :  { %v2484_v58 = vmul.f32 %v7641_v57, %v2483_v54 }
 0xa6d   :  { %v8563_v59 = vadd.f32 %v2485_v47, %v2484_v58 }
 0xa6f   :  { %2554 = vmatmul.mubr.f32.vlgmr.msra.gmra.mrb[32].mxu0 %v8563_v59  ;;  %5733 = vmatmul.mubr.f32.vlgmr.msra.gmra.mrb[26].mxu1 %v8563_v59 }
 0xa70   :  { %6809 = vmatpush1.bf16.msra.mxu0 %v7901_v32  ;;  %6840 = vmatpush3.bf16.msra.mxu1 %v7992_v41 }
 0xa71   :  { %6811 = vmatprep.subr.bf16.mxu0 %v7905_v36  ;;  %6841 = vmatprep.subr.bf16.mxu1 %v7811_v23 }
 0xa72   :  { %2722 = vmatprep.mubr.f32.mxu0 %v7809_v1  ;;  %5767 = vmatprep.mubr.msk.f32.mxu1 %vm7812_vm2, %v7809_v1 }
 0xa74   :  { %6813 = vmatpush1.bf16.msra.mxu0 %v7922_v46  ;;  %6843 = vmatpush3.bf16.msra.mxu1 %v8005_v51 }
 0xa75   :  { %6815 = vmatprep.subr.bf16.mxu0 %v7936_v52  ;;  %6844 = vmatprep.subr.bf16.mxu1 %v7811_v23 }
 0xa78   :  { %6817 = vmatpush1.bf16.msra.mxu0 %v7946_v2  ;;  %6846 = vmatpush3.bf16.msra.mxu1 %v8019_v61 }
 0xa79   :  { %6819 = vmatprep.subr.bf16.mxu0 %v7960_v11  ;;  %6847 = vmatprep.subr.bf16.mxu1 %v7811_v23 }
 0xa7c   :  { %6821 = vmatpush1.bf16.msra.mxu0 %v7981_v26  ;;  %6849 = vmatpush3.bf16.msra.mxu1 %v8030_v7 }
 0xa7d   :  { %6823 = vmatprep.subr.bf16.mxu0 %v7987_v30  ;;  %6850 = vmatprep.subr.bf16.mxu1 %v7811_v23 }
 0xa80   :  { %6825 = vmatpush1.bf16.msra.mxu0 %v7995_v42  ;;  %6852 = vmatpush3.bf16.msra.mxu1 %v8038_v13 }
 0xa81   :  { %6827 = vmatprep.subr.bf16.mxu0 %v7999_v45  ;;  %6853 = vmatprep.subr.bf16.mxu1 %v7811_v23 }
 0xa84   :  { %6829 = vmatpush1.bf16.msra.mxu0 %v8008_v53  ;;  %6855 = vmatpush3.bf16.msra.mxu1 %v8045_v17 }
 0xa85   :  { %6831 = vmatprep.subr.bf16.mxu0 %v8012_v56  ;;  %6856 = vmatprep.subr.bf16.mxu1 %v7811_v23 }
 0xa88   :  { %6833 = vmatpush1.bf16.msra.mxu0 %v8022_v62  ;;  %6858 = vmatpush3.bf16.msra.mxu1 %v8052_v20 }
 0xa89   :  { %6835 = vmatprep.subr.bf16.mxu0 %v8026_v3  ;;  %6859 = vmatprep.subr.bf16.mxu1 %v7811_v23 }
 0xa8c   :  { %6837 = vmatpush1.bf16.msra.mxu0 %v8033_v8  ;;  %6861 = vmatpush3.bf16.msra.mxu1 %v8058_v24 }
 0xa8d   :  { %6863 = vmatprep.subr.bf16.mxu0 %v7874_v14  ;;  %6894 = vmatprep.subr.bf16.mxu1 %v7811_v23 }
 0xb42   :  { %v2555_v48 = vpop.f32.mrb[32].mxu0  ;;  %v2626_v60 = vpop.f32.mrb[26].mxu1 }
 0xb43   :  { %v2556_v33 = vadd.f32 %v2555_v48, %v8163_v5  ;;  %v2557_v40 = vpop.f32.mrb[33].mxu0  ;;  %v5734_v63 = vpop.f32.mrb[27].mxu1  ;;  %v2627_v19 = vadd.f32 %v2626_v60, %v8173_v38  ;;  %v2807_v48 = vrot.slane %v2657_v49, 2 }
 0xb44   :  { %v2558_v43 = vadd.f32 %v2557_v40, %v8167_v10 }
 0xb45   :  { %v2630_v55 = vadd.f32 %v2556_v33, %v2488_v4 }
 0xb46   :  { %v2640_v9 = vadd.f32 %v2638_v0, %v2558_v43 }
 0xb47   :  { %v4896_v6 = vmul.f32 -1.442695, %v2630_v55 }
 0xb48   :  { %v4897_v12 = vmul.f32 -1.442695, %v2640_v9 }
 0xb49   :  { %7642 = vpow2.f32 %v4896_v6 }
 0xb4a   :  { %7644 = vpow2.f32 %v4897_v12  ;;  %v2817_v12 = vrot.slane %v2657_v49, 4 }
 0xb53   :  { %v7643_v25 = vpop.eup %7642 }
 0xb54   :  { %v2634_v15 = vadd.f32 1.0, %v7643_v25  ;;  %v7645_v16 = vpop.eup %7644 }
 0xb55   :  { %v2644_v18 = vadd.f32 1.0, %v7645_v16 }
 0xb56   :  { %7646 = vrcp.f32 %v2634_v15 }
 0xb57   :  { %7648 = vrcp.f32 %v2644_v18 }
 0xb60   :  { %v7647_v21 = vpop.eup %7646 }
 0xb61   :  { %v2647_v22 = vmul.f32 %v7647_v21, %v2627_v19  ;;  %v7649_v31 = vpop.eup %7648 }
 0xb62   :  { %v2652_v34 = vsub.f32 1.0, %v7649_v31  ;;  %v2654_v50 = vmul.f32 %v7649_v31, %v8563_v59  ;;  %v2826_v31 = vld [vmem:[#allocation2 + $0x48] sm:$0x3f] }
 0xb63   :  { %v2650_v27 = vadd.f32 %v2648_v29, %v2647_v22 }
 0xb65   :  { %7650 = vtanh.f32 %v2650_v27 }
 0xb6f   :  { %v7651_v35 = vpop.eup %7650 }
 0xb70   :  { %v2653_v39 = vmul.f32 %v7651_v35, %v2652_v34 }
 0xb72   :  { %v8606_v28 = vadd.f32 %v2654_v50, %v2653_v39 }
 0xb74   :  { %2723 = vmatmul.mubr.f32.vlgmr.msra.gmra.mrb[34].mxu0 %v8606_v28  ;;  %5768 = vmatmul.mubr.f32.vlgmr.msra.gmra.mrb[28].mxu1 %v8606_v28 }
 0xb75   :  { %6865 = vmatpush1.bf16.msra.mxu0 %v7901_v32  ;;  %6896 = vmatpush3.bf16.msra.mxu1 %v7992_v41 }
 0xb76   :  { %6867 = vmatprep.subr.bf16.mxu0 %v7905_v36  ;;  %6897 = vmatprep.subr.bf16.mxu1 %v7811_v23 }
 0xb77   :  { %2891 = vmatprep.mubr.f32.mxu0 %v7809_v1  ;;  %5802 = vmatprep.mubr.msk.f32.mxu1 %vm7812_vm2, %v7809_v1 }
 0xb79   :  { %6869 = vmatpush1.bf16.msra.mxu0 %v7922_v46  ;;  %6899 = vmatpush3.bf16.msra.mxu1 %v8005_v51 }
 0xb7a   :  { %6871 = vmatprep.subr.bf16.mxu0 %v7936_v52  ;;  %6900 = vmatprep.subr.bf16.mxu1 %v7811_v23 }
 0xb7d   :  { %6873 = vmatpush1.bf16.msra.mxu0 %v7946_v2  ;;  %6902 = vmatpush3.bf16.msra.mxu1 %v8019_v61 }
 0xb7e   :  { %6875 = vmatprep.subr.bf16.mxu0 %v7960_v11  ;;  %6903 = vmatprep.subr.bf16.mxu1 %v7811_v23 }
 0xb81   :  { %6877 = vmatpush1.bf16.msra.mxu0 %v7981_v26  ;;  %6905 = vmatpush3.bf16.msra.mxu1 %v8030_v7 }
 0xb82   :  { %6879 = vmatprep.subr.bf16.mxu0 %v7987_v30  ;;  %6906 = vmatprep.subr.bf16.mxu1 %v7811_v23 }
 0xb85   :  { %6881 = vmatpush1.bf16.msra.mxu0 %v7995_v42  ;;  %6908 = vmatpush3.bf16.msra.mxu1 %v8038_v13 }
 0xb86   :  { %6883 = vmatprep.subr.bf16.mxu0 %v7999_v45  ;;  %6909 = vmatprep.subr.bf16.mxu1 %v7811_v23 }
 0xb89   :  { %6885 = vmatpush1.bf16.msra.mxu0 %v8008_v53  ;;  %6911 = vmatpush3.bf16.msra.mxu1 %v8045_v17 }
 0xb8a   :  { %6887 = vmatprep.subr.bf16.mxu0 %v8012_v56  ;;  %6912 = vmatprep.subr.bf16.mxu1 %v7811_v23 }
 0xb8d   :  { %6889 = vmatpush1.bf16.msra.mxu0 %v8022_v62  ;;  %6914 = vmatpush3.bf16.msra.mxu1 %v8052_v20 }
 0xb8e   :  { %6891 = vmatprep.subr.bf16.mxu0 %v8026_v3  ;;  %6915 = vmatprep.subr.bf16.mxu1 %v7811_v23 }
 0xb91   :  { %6893 = vmatpush1.bf16.msra.mxu0 %v8033_v8  ;;  %6917 = vmatpush3.bf16.msra.mxu1 %v8058_v24 }
 0xb92   :  { %6919 = vmatprep.subr.bf16.mxu0 %v7874_v14  ;;  %6950 = vmatprep.subr.bf16.mxu1 %v7811_v23 }
 0xc47   :  { %v2724_v37 = vpop.f32.mrb[34].mxu0  ;;  %v2795_v44 = vpop.f32.mrb[28].mxu1 }
 0xc48   :  { %v2725_v54 = vadd.f32 %v2724_v37, %v8163_v5  ;;  %v2726_v57 = vpop.f32.mrb[35].mxu0  ;;  %v5769_v58 = vpop.f32.mrb[29].mxu1  ;;  %v2796_v0 = vadd.f32 %v2795_v44, %v8173_v38  ;;  %v2976_v37 = vrot.slane %v2826_v31, 2 }
 0xc49   :  { %v2727_v47 = vadd.f32 %v2726_v57, %v8167_v10 }
 0xc4a   :  { %v2799_v59 = vadd.f32 %v2725_v54, %v2657_v49 }
 0xc4b   :  { %v2809_v4 = vadd.f32 %v2807_v48, %v2727_v47 }
 0xc4c   :  { %v4898_v60 = vmul.f32 -1.442695, %v2799_v59 }
 0xc4d   :  { %v4899_v33 = vmul.f32 -1.442695, %v2809_v4 }
 0xc4e   :  { %7652 = vpow2.f32 %v4898_v60 }
 0xc4f   :  { %7654 = vpow2.f32 %v4899_v33  ;;  %v2986_v33 = vrot.slane %v2826_v31, 4 }
 0xc58   :  { %v7653_v40 = vpop.eup %7652 }
 0xc59   :  { %v2803_v63 = vadd.f32 1.0, %v7653_v40  ;;  %v7655_v43 = vpop.eup %7654 }
 0xc5a   :  { %v2813_v55 = vadd.f32 1.0, %v7655_v43 }
 0xc5b   :  { %7656 = vrcp.f32 %v2803_v63 }
 0xc5c   :  { %7658 = vrcp.f32 %v2813_v55 }
 0xc65   :  { %v7657_v6 = vpop.eup %7656 }
 0xc66   :  { %v2816_v9 = vmul.f32 %v7657_v6, %v2796_v0  ;;  %v7659_v15 = vpop.eup %7658 }
 0xc67   :  { %v2821_v16 = vsub.f32 1.0, %v7659_v15  ;;  %v2823_v21 = vmul.f32 %v7659_v15, %v8606_v28  ;;  %v2995_v15 = vld [vmem:[#allocation2 + $0x4e] sm:$0x3f] }
 0xc68   :  { %v2819_v25 = vadd.f32 %v2817_v12, %v2816_v9 }
 0xc6a   :  { %7660 = vtanh.f32 %v2819_v25 }
 0xc74   :  { %v7661_v18 = vpop.eup %7660 }
 0xc75   :  { %v2822_v19 = vmul.f32 %v7661_v18, %v2821_v16 }
 0xc77   :  { %v8649_v22 = vadd.f32 %v2823_v21, %v2822_v19 }
 0xc79   :  { %2892 = vmatmul.mubr.f32.vlgmr.msra.gmra.mrb[36].mxu0 %v8649_v22  ;;  %5803 = vmatmul.mubr.f32.vlgmr.msra.gmra.mrb[30].mxu1 %v8649_v22 }
 0xc7a   :  { %6921 = vmatpush1.bf16.msra.mxu0 %v7901_v32  ;;  %6952 = vmatpush3.bf16.msra.mxu1 %v7992_v41 }
 0xc7b   :  { %6923 = vmatprep.subr.bf16.mxu0 %v7905_v36  ;;  %6953 = vmatprep.subr.bf16.mxu1 %v7811_v23 }
 0xc7c   :  { %3060 = vmatprep.mubr.f32.mxu0 %v7809_v1  ;;  %5837 = vmatprep.mubr.msk.f32.mxu1 %vm7812_vm2, %v7809_v1 }
 0xc7e   :  { %6925 = vmatpush1.bf16.msra.mxu0 %v7922_v46  ;;  %6955 = vmatpush3.bf16.msra.mxu1 %v8005_v51 }
 0xc7f   :  { %6927 = vmatprep.subr.bf16.mxu0 %v7936_v52  ;;  %6956 = vmatprep.subr.bf16.mxu1 %v7811_v23 }
 0xc82   :  { %6929 = vmatpush1.bf16.msra.mxu0 %v7946_v2  ;;  %6958 = vmatpush3.bf16.msra.mxu1 %v8019_v61 }
 0xc83   :  { %6931 = vmatprep.subr.bf16.mxu0 %v7960_v11  ;;  %6959 = vmatprep.subr.bf16.mxu1 %v7811_v23 }
 0xc86   :  { %6933 = vmatpush1.bf16.msra.mxu0 %v7981_v26  ;;  %6961 = vmatpush3.bf16.msra.mxu1 %v8030_v7 }
 0xc87   :  { %6935 = vmatprep.subr.bf16.mxu0 %v7987_v30  ;;  %6962 = vmatprep.subr.bf16.mxu1 %v7811_v23 }
 0xc8a   :  { %6937 = vmatpush1.bf16.msra.mxu0 %v7995_v42  ;;  %6964 = vmatpush3.bf16.msra.mxu1 %v8038_v13 }
 0xc8b   :  { %6939 = vmatprep.subr.bf16.mxu0 %v7999_v45  ;;  %6965 = vmatprep.subr.bf16.mxu1 %v7811_v23 }
 0xc8e   :  { %6941 = vmatpush1.bf16.msra.mxu0 %v8008_v53  ;;  %6967 = vmatpush3.bf16.msra.mxu1 %v8045_v17 }
 0xc8f   :  { %6943 = vmatprep.subr.bf16.mxu0 %v8012_v56  ;;  %6968 = vmatprep.subr.bf16.mxu1 %v7811_v23 }
 0xc92   :  { %6945 = vmatpush1.bf16.msra.mxu0 %v8022_v62  ;;  %6970 = vmatpush3.bf16.msra.mxu1 %v8052_v20 }
 0xc93   :  { %6947 = vmatprep.subr.bf16.mxu0 %v8026_v3  ;;  %6971 = vmatprep.subr.bf16.mxu1 %v7811_v23 }
 0xc96   :  { %6949 = vmatpush1.bf16.msra.mxu0 %v8033_v8  ;;  %6973 = vmatpush3.bf16.msra.mxu1 %v8058_v24 }
 0xc97   :  { %6975 = vmatprep.subr.bf16.mxu0 %v7874_v14  ;;  %7006 = vmatprep.subr.bf16.mxu1 %v7811_v23 }
 0xd4c   :  { %v2893_v29 = vpop.f32.mrb[36].mxu0  ;;  %v2964_v27 = vpop.f32.mrb[30].mxu1 }
 0xd4d   :  { %v2894_v34 = vadd.f32 %v2893_v29, %v8163_v5  ;;  %v2895_v35 = vpop.f32.mrb[37].mxu0  ;;  %v5804_v39 = vpop.f32.mrb[31].mxu1  ;;  %v2965_v48 = vadd.f32 %v2964_v27, %v8173_v38  ;;  %v3145_v29 = vrot.slane %v2995_v15, 2 }
 0xd4e   :  { %v2896_v50 = vadd.f32 %v2895_v35, %v8167_v10 }
 0xd4f   :  { %v2968_v28 = vadd.f32 %v2894_v34, %v2826_v31 }
 0xd50   :  { %v2978_v49 = vadd.f32 %v2976_v37, %v2896_v50 }
 0xd51   :  { %v4900_v44 = vmul.f32 -1.442695, %v2968_v28 }
 0xd52   :  { %v4901_v54 = vmul.f32 -1.442695, %v2978_v49 }
 0xd53   :  { %7662 = vpow2.f32 %v4900_v44 }
 0xd54   :  { %7664 = vpow2.f32 %v4901_v54  ;;  %v3155_v54 = vrot.slane %v2995_v15, 4 }
 0xd5d   :  { %v7663_v57 = vpop.eup %7662 }
 0xd5e   :  { %v2972_v58 = vadd.f32 1.0, %v7663_v57  ;;  %v7665_v47 = vpop.eup %7664 }
 0xd5f   :  { %v2982_v59 = vadd.f32 1.0, %v7665_v47 }
 0xd60   :  { %7666 = vrcp.f32 %v2972_v58 }
 0xd61   :  { %7668 = vrcp.f32 %v2982_v59 }
 0xd6a   :  { %v7667_v60 = vpop.eup %7666 }
 0xd6b   :  { %v2985_v4 = vmul.f32 %v7667_v60, %v2965_v48  ;;  %v7669_v63 = vpop.eup %7668 }
 0xd6c   :  { %v2990_v43 = vsub.f32 1.0, %v7669_v63  ;;  %v2992_v6 = vmul.f32 %v7669_v63, %v8649_v22  ;;  %v3164_v63 = vld [vmem:[#allocation2 + $0x54] sm:$0x3f] }
 0xd6d   :  { %v2988_v40 = vadd.f32 %v2986_v33, %v2985_v4 }
 0xd6f   :  { %7670 = vtanh.f32 %v2988_v40 }
 0xd79   :  { %v7671_v55 = vpop.eup %7670 }
 0xd7a   :  { %v2991_v0 = vmul.f32 %v7671_v55, %v2990_v43 }
 0xd7c   :  { %v8692_v9 = vadd.f32 %v2992_v6, %v2991_v0 }
 0xd7e   :  { %3061 = vmatmul.mubr.f32.vlgmr.msra.gmra.mrb[38].mxu0 %v8692_v9  ;;  %5838 = vmatmul.mubr.f32.vlgmr.msra.gmra.mrb[32].mxu1 %v8692_v9 }
 0xd7f   :  { %6977 = vmatpush1.bf16.msra.mxu0 %v7901_v32  ;;  %7008 = vmatpush3.bf16.msra.mxu1 %v7992_v41 }
 0xd80   :  { %6979 = vmatprep.subr.bf16.mxu0 %v7905_v36  ;;  %7009 = vmatprep.subr.bf16.mxu1 %v7811_v23 }
 0xd81   :  { %3229 = vmatprep.mubr.f32.mxu0 %v7809_v1  ;;  %5872 = vmatprep.mubr.msk.f32.mxu1 %vm7812_vm2, %v7809_v1 }
 0xd83   :  { %6981 = vmatpush1.bf16.msra.mxu0 %v7922_v46  ;;  %7011 = vmatpush3.bf16.msra.mxu1 %v8005_v51 }
 0xd84   :  { %6983 = vmatprep.subr.bf16.mxu0 %v7936_v52  ;;  %7012 = vmatprep.subr.bf16.mxu1 %v7811_v23 }
 0xd87   :  { %6985 = vmatpush1.bf16.msra.mxu0 %v7946_v2  ;;  %7014 = vmatpush3.bf16.msra.mxu1 %v8019_v61 }
 0xd88   :  { %6987 = vmatprep.subr.bf16.mxu0 %v7960_v11  ;;  %7015 = vmatprep.subr.bf16.mxu1 %v7811_v23 }
 0xd8b   :  { %6989 = vmatpush1.bf16.msra.mxu0 %v7981_v26  ;;  %7017 = vmatpush3.bf16.msra.mxu1 %v8030_v7 }
 0xd8c   :  { %6991 = vmatprep.subr.bf16.mxu0 %v7987_v30  ;;  %7018 = vmatprep.subr.bf16.mxu1 %v7811_v23 }
 0xd8f   :  { %6993 = vmatpush1.bf16.msra.mxu0 %v7995_v42  ;;  %7020 = vmatpush3.bf16.msra.mxu1 %v8038_v13 }
 0xd90   :  { %6995 = vmatprep.subr.bf16.mxu0 %v7999_v45  ;;  %7021 = vmatprep.subr.bf16.mxu1 %v7811_v23 }
 0xd93   :  { %6997 = vmatpush1.bf16.msra.mxu0 %v8008_v53  ;;  %7023 = vmatpush3.bf16.msra.mxu1 %v8045_v17 }
 0xd94   :  { %6999 = vmatprep.subr.bf16.mxu0 %v8012_v56  ;;  %7024 = vmatprep.subr.bf16.mxu1 %v7811_v23 }
 0xd97   :  { %7001 = vmatpush1.bf16.msra.mxu0 %v8022_v62  ;;  %7026 = vmatpush3.bf16.msra.mxu1 %v8052_v20 }
 0xd98   :  { %7003 = vmatprep.subr.bf16.mxu0 %v8026_v3  ;;  %7027 = vmatprep.subr.bf16.mxu1 %v7811_v23 }
 0xd9b   :  { %7005 = vmatpush1.bf16.msra.mxu0 %v8033_v8  ;;  %7029 = vmatpush3.bf16.msra.mxu1 %v8058_v24 }
 0xd9c   :  { %7031 = vmatprep.subr.bf16.mxu0 %v7874_v14  ;;  %7062 = vmatprep.subr.bf16.mxu1 %v7811_v23 }
 0xe51   :  { %v3062_v12 = vpop.f32.mrb[38].mxu0  ;;  %v3133_v25 = vpop.f32.mrb[32].mxu1 }
 0xe52   :  { %v3063_v16 = vadd.f32 %v3062_v12, %v8163_v5  ;;  %v3064_v18 = vpop.f32.mrb[39].mxu0  ;;  %v5839_v19 = vpop.f32.mrb[33].mxu1  ;;  %v3134_v37 = vadd.f32 %v3133_v25, %v8173_v38  ;;  %v3314_v12 = vrot.slane %v3164_v63, 2 }
 0xe53   :  { %v3065_v21 = vadd.f32 %v3064_v18, %v8167_v10 }
 0xe54   :  { %v3137_v22 = vadd.f32 %v3063_v16, %v2995_v15 }
 0xe55   :  { %v3147_v31 = vadd.f32 %v3145_v29, %v3065_v21 }
 0xe56   :  { %v4902_v27 = vmul.f32 -1.442695, %v3137_v22 }
 0xe57   :  { %v4903_v34 = vmul.f32 -1.442695, %v3147_v31 }
 0xe58   :  { %7672 = vpow2.f32 %v4902_v27 }
 0xe59   :  { %7674 = vpow2.f32 %v4903_v34  ;;  %v3324_v34 = vrot.slane %v3164_v63, 4 }
 0xe62   :  { %v7673_v35 = vpop.eup %7672 }
 0xe63   :  { %v3141_v39 = vadd.f32 1.0, %v7673_v35  ;;  %v7675_v50 = vpop.eup %7674 }
 0xe64   :  { %v3151_v28 = vadd.f32 1.0, %v7675_v50 }
 0xe65   :  { %7676 = vrcp.f32 %v3141_v39 }
 0xe66   :  { %7678 = vrcp.f32 %v3151_v28 }
 0xe6f   :  { %v7677_v44 = vpop.eup %7676 }
 0xe70   :  { %v3154_v49 = vmul.f32 %v7677_v44, %v3134_v37  ;;  %v7679_v58 = vpop.eup %7678 }
 0xe71   :  { %v3159_v47 = vsub.f32 1.0, %v7679_v58  ;;  %v3161_v60 = vmul.f32 %v7679_v58, %v8692_v9  ;;  %v3333_v58 = vld [vmem:[#allocation2 + $0x5a] sm:$0x3f] }
 0xe72   :  { %v3157_v57 = vadd.f32 %v3155_v54, %v3154_v49 }
 0xe74   :  { %7680 = vtanh.f32 %v3157_v57 }
 0xe7e   :  { %v7681_v59 = vpop.eup %7680 }
 0xe7f   :  { %v3160_v48 = vmul.f32 %v7681_v59, %v3159_v47 }
 0xe81   :  { %v8735_v4 = vadd.f32 %v3161_v60, %v3160_v48 }
 0xe83   :  { %3230 = vmatmul.mubr.f32.vlgmr.msra.gmra.mrb[40].mxu0 %v8735_v4  ;;  %5873 = vmatmul.mubr.f32.vlgmr.msra.gmra.mrb[34].mxu1 %v8735_v4 }
 0xe84   :  { %7033 = vmatpush1.bf16.msra.mxu0 %v7901_v32  ;;  %7064 = vmatpush3.bf16.msra.mxu1 %v7992_v41 }
 0xe85   :  { %7035 = vmatprep.subr.bf16.mxu0 %v7905_v36  ;;  %7065 = vmatprep.subr.bf16.mxu1 %v7811_v23 }
 0xe86   :  { %3398 = vmatprep.mubr.f32.mxu0 %v7809_v1  ;;  %5907 = vmatprep.mubr.msk.f32.mxu1 %vm7812_vm2, %v7809_v1 }
 0xe88   :  { %7037 = vmatpush1.bf16.msra.mxu0 %v7922_v46  ;;  %7067 = vmatpush3.bf16.msra.mxu1 %v8005_v51 }
 0xe89   :  { %7039 = vmatprep.subr.bf16.mxu0 %v7936_v52  ;;  %7068 = vmatprep.subr.bf16.mxu1 %v7811_v23 }
 0xe8c   :  { %7041 = vmatpush1.bf16.msra.mxu0 %v7946_v2  ;;  %7070 = vmatpush3.bf16.msra.mxu1 %v8019_v61 }
 0xe8d   :  { %7043 = vmatprep.subr.bf16.mxu0 %v7960_v11  ;;  %7071 = vmatprep.subr.bf16.mxu1 %v7811_v23 }
 0xe90   :  { %7045 = vmatpush1.bf16.msra.mxu0 %v7981_v26  ;;  %7073 = vmatpush3.bf16.msra.mxu1 %v8030_v7 }
 0xe91   :  { %7047 = vmatprep.subr.bf16.mxu0 %v7987_v30  ;;  %7074 = vmatprep.subr.bf16.mxu1 %v7811_v23 }
 0xe94   :  { %7049 = vmatpush1.bf16.msra.mxu0 %v7995_v42  ;;  %7076 = vmatpush3.bf16.msra.mxu1 %v8038_v13 }
 0xe95   :  { %7051 = vmatprep.subr.bf16.mxu0 %v7999_v45  ;;  %7077 = vmatprep.subr.bf16.mxu1 %v7811_v23 }
 0xe98   :  { %7053 = vmatpush1.bf16.msra.mxu0 %v8008_v53  ;;  %7079 = vmatpush3.bf16.msra.mxu1 %v8045_v17 }
 0xe99   :  { %7055 = vmatprep.subr.bf16.mxu0 %v8012_v56  ;;  %7080 = vmatprep.subr.bf16.mxu1 %v7811_v23 }
 0xe9c   :  { %7057 = vmatpush1.bf16.msra.mxu0 %v8022_v62  ;;  %7082 = vmatpush3.bf16.msra.mxu1 %v8052_v20 }
 0xe9d   :  { %7059 = vmatprep.subr.bf16.mxu0 %v8026_v3  ;;  %7083 = vmatprep.subr.bf16.mxu1 %v7811_v23 }
 0xea0   :  { %7061 = vmatpush1.bf16.msra.mxu0 %v8033_v8  ;;  %7085 = vmatpush3.bf16.msra.mxu1 %v8058_v24 }
 0xea1   :  { %7087 = vmatprep.subr.bf16.mxu0 %v7874_v14  ;;  %7118 = vmatprep.subr.bf16.mxu1 %v7811_v23 }
 0xf56   :  { %v3231_v33 = vpop.f32.mrb[40].mxu0  ;;  %v3302_v40 = vpop.f32.mrb[34].mxu1 }
 0xf57   :  { %v3232_v43 = vadd.f32 %v3231_v33, %v8163_v5  ;;  %v3233_v55 = vpop.f32.mrb[41].mxu0  ;;  %v5874_v0 = vpop.f32.mrb[35].mxu1  ;;  %v3303_v29 = vadd.f32 %v3302_v40, %v8173_v38  ;;  %v3483_v33 = vrot.slane %v3333_v58, 2 }
 0xf58   :  { %v3234_v6 = vadd.f32 %v3233_v55, %v8167_v10 }
 0xf59   :  { %v3306_v9 = vadd.f32 %v3232_v43, %v3164_v63 }
 0xf5a   :  { %v3316_v15 = vadd.f32 %v3314_v12, %v3234_v6 }
 0xf5b   :  { %v4904_v25 = vmul.f32 -1.442695, %v3306_v9 }
 0xf5c   :  { %v4905_v16 = vmul.f32 -1.442695, %v3316_v15 }
 0xf5d   :  { %7682 = vpow2.f32 %v4904_v25 }
 0xf5e   :  { %7684 = vpow2.f32 %v4905_v16  ;;  %v3493_v16 = vrot.slane %v3333_v58, 4 }
 0xf67   :  { %v7683_v18 = vpop.eup %7682 }
 0xf68   :  { %v3310_v19 = vadd.f32 1.0, %v7683_v18  ;;  %v7685_v21 = vpop.eup %7684 }
 0xf69   :  { %v3320_v22 = vadd.f32 1.0, %v7685_v21 }
 0xf6a   :  { %7686 = vrcp.f32 %v3310_v19 }
 0xf6b   :  { %7688 = vrcp.f32 %v3320_v22 }
 0xf74   :  { %v7687_v27 = vpop.eup %7686 }
 0xf75   :  { %v3323_v31 = vmul.f32 %v7687_v27, %v3303_v29  ;;  %v7689_v39 = vpop.eup %7688 }
 0xf76   :  { %v3328_v50 = vsub.f32 1.0, %v7689_v39  ;;  %v3330_v44 = vmul.f32 %v7689_v39, %v8735_v4  ;;  %v3502_v39 = vld [vmem:[#allocation2 + $0x60] sm:$0x3f] }
 0xf77   :  { %v3326_v35 = vadd.f32 %v3324_v34, %v3323_v31 }
 0xf79   :  { %7690 = vtanh.f32 %v3326_v35 }
 0xf83   :  { %v7691_v28 = vpop.eup %7690 }
 0xf84   :  { %v3329_v37 = vmul.f32 %v7691_v28, %v3328_v50 }
 0xf86   :  { %v8778_v49 = vadd.f32 %v3330_v44, %v3329_v37 }
 0xf88   :  { %3399 = vmatmul.mubr.f32.vlgmr.msra.gmra.mrb[42].mxu0 %v8778_v49  ;;  %5908 = vmatmul.mubr.f32.vlgmr.msra.gmra.mrb[36].mxu1 %v8778_v49 }
 0xf89   :  { %7089 = vmatpush1.bf16.msra.mxu0 %v7901_v32  ;;  %7120 = vmatpush3.bf16.msra.mxu1 %v7992_v41 }
 0xf8a   :  { %7091 = vmatprep.subr.bf16.mxu0 %v7905_v36  ;;  %7121 = vmatprep.subr.bf16.mxu1 %v7811_v23 }
 0xf8b   :  { %3567 = vmatprep.mubr.f32.mxu0 %v7809_v1  ;;  %5942 = vmatprep.mubr.msk.f32.mxu1 %vm7812_vm2, %v7809_v1 }
 0xf8d   :  { %7093 = vmatpush1.bf16.msra.mxu0 %v7922_v46  ;;  %7123 = vmatpush3.bf16.msra.mxu1 %v8005_v51 }
 0xf8e   :  { %7095 = vmatprep.subr.bf16.mxu0 %v7936_v52  ;;  %7124 = vmatprep.subr.bf16.mxu1 %v7811_v23 }
 0xf91   :  { %7097 = vmatpush1.bf16.msra.mxu0 %v7946_v2  ;;  %7126 = vmatpush3.bf16.msra.mxu1 %v8019_v61 }
 0xf92   :  { %7099 = vmatprep.subr.bf16.mxu0 %v7960_v11  ;;  %7127 = vmatprep.subr.bf16.mxu1 %v7811_v23 }
 0xf95   :  { %7101 = vmatpush1.bf16.msra.mxu0 %v7981_v26  ;;  %7129 = vmatpush3.bf16.msra.mxu1 %v8030_v7 }
 0xf96   :  { %7103 = vmatprep.subr.bf16.mxu0 %v7987_v30  ;;  %7130 = vmatprep.subr.bf16.mxu1 %v7811_v23 }
 0xf99   :  { %7105 = vmatpush1.bf16.msra.mxu0 %v7995_v42  ;;  %7132 = vmatpush3.bf16.msra.mxu1 %v8038_v13 }
 0xf9a   :  { %7107 = vmatprep.subr.bf16.mxu0 %v7999_v45  ;;  %7133 = vmatprep.subr.bf16.mxu1 %v7811_v23 }
 0xf9d   :  { %7109 = vmatpush1.bf16.msra.mxu0 %v8008_v53  ;;  %7135 = vmatpush3.bf16.msra.mxu1 %v8045_v17 }
 0xf9e   :  { %7111 = vmatprep.subr.bf16.mxu0 %v8012_v56  ;;  %7136 = vmatprep.subr.bf16.mxu1 %v7811_v23 }
 0xfa1   :  { %7113 = vmatpush1.bf16.msra.mxu0 %v8022_v62  ;;  %7138 = vmatpush3.bf16.msra.mxu1 %v8052_v20 }
 0xfa2   :  { %7115 = vmatprep.subr.bf16.mxu0 %v8026_v3  ;;  %7139 = vmatprep.subr.bf16.mxu1 %v7811_v23 }
 0xfa5   :  { %7117 = vmatpush1.bf16.msra.mxu0 %v8033_v8  ;;  %7141 = vmatpush3.bf16.msra.mxu1 %v8058_v24 }
 0xfa6   :  { %7143 = vmatprep.subr.bf16.mxu0 %v7874_v14  ;;  %7174 = vmatprep.subr.bf16.mxu1 %v7811_v23 }
0x105b   :  { %v3400_v54 = vpop.f32.mrb[42].mxu0  ;;  %v3471_v57 = vpop.f32.mrb[36].mxu1 }
0x105c   :  { %v3401_v47 = vadd.f32 %v3400_v54, %v8163_v5  ;;  %v3402_v59 = vpop.f32.mrb[43].mxu0  ;;  %v5909_v48 = vpop.f32.mrb[37].mxu1  ;;  %v3472_v12 = vadd.f32 %v3471_v57, %v8173_v38  ;;  %v3652_v54 = vrot.slane %v3502_v39, 2 }
0x105d   :  { %v3403_v60 = vadd.f32 %v3402_v59, %v8167_v10 }
0x105e   :  { %v3475_v4 = vadd.f32 %v3401_v47, %v3333_v58 }
0x105f   :  { %v3485_v63 = vadd.f32 %v3483_v33, %v3403_v60 }
0x1060   :  { %v4906_v40 = vmul.f32 -1.442695, %v3475_v4 }
0x1061   :  { %v4907_v43 = vmul.f32 -1.442695, %v3485_v63 }
0x1062   :  { %7692 = vpow2.f32 %v4906_v40 }
0x1063   :  { %7694 = vpow2.f32 %v4907_v43  ;;  %v3662_v43 = vrot.slane %v3502_v39, 4 }
0x106c   :  { %v7693_v55 = vpop.eup %7692 }
0x106d   :  { %v3479_v0 = vadd.f32 1.0, %v7693_v55  ;;  %v7695_v6 = vpop.eup %7694 }
0x106e   :  { %v3489_v9 = vadd.f32 1.0, %v7695_v6 }
0x106f   :  { %7696 = vrcp.f32 %v3479_v0 }
0x1070   :  { %7698 = vrcp.f32 %v3489_v9 }
0x1079   :  { %v7697_v25 = vpop.eup %7696 }
0x107a   :  { %v3492_v15 = vmul.f32 %v7697_v25, %v3472_v12  ;;  %v7699_v19 = vpop.eup %7698 }
0x107b   :  { %v3497_v21 = vsub.f32 1.0, %v7699_v19  ;;  %v3499_v27 = vmul.f32 %v7699_v19, %v8778_v49  ;;  %v3671_v19 = vld [vmem:[#allocation2 + $0x66] sm:$0x3f] }
0x107c   :  { %v3495_v18 = vadd.f32 %v3493_v16, %v3492_v15 }
0x107e   :  { %7700 = vtanh.f32 %v3495_v18 }
0x1088   :  { %v7701_v22 = vpop.eup %7700 }
0x1089   :  { %v3498_v29 = vmul.f32 %v7701_v22, %v3497_v21 }
0x108b   :  { %v8821_v31 = vadd.f32 %v3499_v27, %v3498_v29 }
0x108d   :  { %3568 = vmatmul.mubr.f32.vlgmr.msra.gmra.mrb[44].mxu0 %v8821_v31  ;;  %5943 = vmatmul.mubr.f32.vlgmr.msra.gmra.mrb[38].mxu1 %v8821_v31 }
0x108e   :  { %7145 = vmatpush1.bf16.msra.mxu0 %v7901_v32  ;;  %7176 = vmatpush3.bf16.msra.mxu1 %v7992_v41 }
0x108f   :  { %7147 = vmatprep.subr.bf16.mxu0 %v7905_v36  ;;  %7177 = vmatprep.subr.bf16.mxu1 %v7811_v23 }
0x1090   :  { %3736 = vmatprep.mubr.f32.mxu0 %v7809_v1  ;;  %5977 = vmatprep.mubr.msk.f32.mxu1 %vm7812_vm2, %v7809_v1 }
0x1092   :  { %7149 = vmatpush1.bf16.msra.mxu0 %v7922_v46  ;;  %7179 = vmatpush3.bf16.msra.mxu1 %v8005_v51 }
0x1093   :  { %7151 = vmatprep.subr.bf16.mxu0 %v7936_v52  ;;  %7180 = vmatprep.subr.bf16.mxu1 %v7811_v23 }
0x1096   :  { %7153 = vmatpush1.bf16.msra.mxu0 %v7946_v2  ;;  %7182 = vmatpush3.bf16.msra.mxu1 %v8019_v61 }
0x1097   :  { %7155 = vmatprep.subr.bf16.mxu0 %v7960_v11  ;;  %7183 = vmatprep.subr.bf16.mxu1 %v7811_v23 }
0x109a   :  { %7157 = vmatpush1.bf16.msra.mxu0 %v7981_v26  ;;  %7185 = vmatpush3.bf16.msra.mxu1 %v8030_v7 }
0x109b   :  { %7159 = vmatprep.subr.bf16.mxu0 %v7987_v30  ;;  %7186 = vmatprep.subr.bf16.mxu1 %v7811_v23 }
0x109e   :  { %7161 = vmatpush1.bf16.msra.mxu0 %v7995_v42  ;;  %7188 = vmatpush3.bf16.msra.mxu1 %v8038_v13 }
0x109f   :  { %7163 = vmatprep.subr.bf16.mxu0 %v7999_v45  ;;  %7189 = vmatprep.subr.bf16.mxu1 %v7811_v23 }
0x10a2   :  { %7165 = vmatpush1.bf16.msra.mxu0 %v8008_v53  ;;  %7191 = vmatpush3.bf16.msra.mxu1 %v8045_v17 }
0x10a3   :  { %7167 = vmatprep.subr.bf16.mxu0 %v8012_v56  ;;  %7192 = vmatprep.subr.bf16.mxu1 %v7811_v23 }
0x10a6   :  { %7169 = vmatpush1.bf16.msra.mxu0 %v8022_v62  ;;  %7194 = vmatpush3.bf16.msra.mxu1 %v8052_v20 }
0x10a7   :  { %7171 = vmatprep.subr.bf16.mxu0 %v8026_v3  ;;  %7195 = vmatprep.subr.bf16.mxu1 %v7811_v23 }
0x10aa   :  { %7173 = vmatpush1.bf16.msra.mxu0 %v8033_v8  ;;  %7197 = vmatpush3.bf16.msra.mxu1 %v8058_v24 }
0x10ab   :  { %7199 = vmatprep.subr.bf16.mxu0 %v7874_v14  ;;  %7230 = vmatprep.subr.bf16.mxu1 %v7811_v23 }
0x1160   :  { %v3569_v34 = vpop.f32.mrb[44].mxu0  ;;  %v3640_v35 = vpop.f32.mrb[38].mxu1 }
0x1161   :  { %v3570_v50 = vadd.f32 %v3569_v34, %v8163_v5  ;;  %v3571_v28 = vpop.f32.mrb[45].mxu0  ;;  %v5944_v37 = vpop.f32.mrb[39].mxu1  ;;  %v3641_v33 = vadd.f32 %v3640_v35, %v8173_v38  ;;  %v3821_v34 = vrot.slane %v3671_v19, 2 }
0x1162   :  { %v3572_v44 = vadd.f32 %v3571_v28, %v8167_v10 }
0x1163   :  { %v3644_v49 = vadd.f32 %v3570_v50, %v3502_v39 }
0x1164   :  { %v3654_v58 = vadd.f32 %v3652_v54, %v3572_v44 }
0x1165   :  { %v4908_v57 = vmul.f32 -1.442695, %v3644_v49 }
0x1166   :  { %v4909_v47 = vmul.f32 -1.442695, %v3654_v58 }
0x1167   :  { %7702 = vpow2.f32 %v4908_v57 }
0x1168   :  { %7704 = vpow2.f32 %v4909_v47  ;;  %v3831_v47 = vrot.slane %v3671_v19, 4 }
0x1171   :  { %v7703_v59 = vpop.eup %7702 }
0x1172   :  { %v3648_v48 = vadd.f32 1.0, %v7703_v59  ;;  %v7705_v60 = vpop.eup %7704 }
0x1173   :  { %v3658_v4 = vadd.f32 1.0, %v7705_v60 }
0x1174   :  { %7706 = vrcp.f32 %v3648_v48 }
0x1175   :  { %7708 = vrcp.f32 %v3658_v4 }
0x117e   :  { %v7707_v40 = vpop.eup %7706 }
0x117f   :  { %v3661_v63 = vmul.f32 %v7707_v40, %v3641_v33  ;;  %v7709_v0 = vpop.eup %7708 }
0x1180   :  { %v3666_v6 = vsub.f32 1.0, %v7709_v0  ;;  %v3668_v25 = vmul.f32 %v7709_v0, %v8821_v31  ;;  %v3840_v0 = vld [vmem:[#allocation2 + $0x6c] sm:$0x3f] }
0x1181   :  { %v3664_v55 = vadd.f32 %v3662_v43, %v3661_v63 }
0x1183   :  { %7710 = vtanh.f32 %v3664_v55 }
0x118d   :  { %v7711_v9 = vpop.eup %7710 }
0x118e   :  { %v3667_v12 = vmul.f32 %v7711_v9, %v3666_v6 }
0x1190   :  { %v8864_v15 = vadd.f32 %v3668_v25, %v3667_v12 }
0x1192   :  { %3737 = vmatmul.mubr.f32.vlgmr.msra.gmra.mrb[46].mxu0 %v8864_v15  ;;  %5978 = vmatmul.mubr.f32.vlgmr.msra.gmra.mrb[40].mxu1 %v8864_v15 }
0x1193   :  { %7201 = vmatpush1.bf16.msra.mxu0 %v7901_v32  ;;  %7232 = vmatpush3.bf16.msra.mxu1 %v7992_v41 }
0x1194   :  { %7203 = vmatprep.subr.bf16.mxu0 %v7905_v36  ;;  %7233 = vmatprep.subr.bf16.mxu1 %v7811_v23 }
0x1195   :  { %3905 = vmatprep.mubr.f32.mxu0 %v7809_v1  ;;  %6012 = vmatprep.mubr.msk.f32.mxu1 %vm7812_vm2, %v7809_v1 }
0x1197   :  { %7205 = vmatpush1.bf16.msra.mxu0 %v7922_v46  ;;  %7235 = vmatpush3.bf16.msra.mxu1 %v8005_v51 }
0x1198   :  { %7207 = vmatprep.subr.bf16.mxu0 %v7936_v52  ;;  %7236 = vmatprep.subr.bf16.mxu1 %v7811_v23 }
0x119b   :  { %7209 = vmatpush1.bf16.msra.mxu0 %v7946_v2  ;;  %7238 = vmatpush3.bf16.msra.mxu1 %v8019_v61 }
0x119c   :  { %7211 = vmatprep.subr.bf16.mxu0 %v7960_v11  ;;  %7239 = vmatprep.subr.bf16.mxu1 %v7811_v23 }
0x119f   :  { %7213 = vmatpush1.bf16.msra.mxu0 %v7981_v26  ;;  %7241 = vmatpush3.bf16.msra.mxu1 %v8030_v7 }
0x11a0   :  { %7215 = vmatprep.subr.bf16.mxu0 %v7987_v30  ;;  %7242 = vmatprep.subr.bf16.mxu1 %v7811_v23 }
0x11a3   :  { %7217 = vmatpush1.bf16.msra.mxu0 %v7995_v42  ;;  %7244 = vmatpush3.bf16.msra.mxu1 %v8038_v13 }
0x11a4   :  { %7219 = vmatprep.subr.bf16.mxu0 %v7999_v45  ;;  %7245 = vmatprep.subr.bf16.mxu1 %v7811_v23 }
0x11a7   :  { %7221 = vmatpush1.bf16.msra.mxu0 %v8008_v53  ;;  %7247 = vmatpush3.bf16.msra.mxu1 %v8045_v17 }
0x11a8   :  { %7223 = vmatprep.subr.bf16.mxu0 %v8012_v56  ;;  %7248 = vmatprep.subr.bf16.mxu1 %v7811_v23 }
0x11ab   :  { %7225 = vmatpush1.bf16.msra.mxu0 %v8022_v62  ;;  %7250 = vmatpush3.bf16.msra.mxu1 %v8052_v20 }
0x11ac   :  { %7227 = vmatprep.subr.bf16.mxu0 %v8026_v3  ;;  %7251 = vmatprep.subr.bf16.mxu1 %v7811_v23 }
0x11af   :  { %7229 = vmatpush1.bf16.msra.mxu0 %v8033_v8  ;;  %7253 = vmatpush3.bf16.msra.mxu1 %v8058_v24 }
0x11b0   :  { %7255 = vmatprep.subr.bf16.mxu0 %v7874_v14  ;;  %7286 = vmatprep.subr.bf16.mxu1 %v7811_v23 }
0x1265   :  { %v3738_v16 = vpop.f32.mrb[46].mxu0  ;;  %v3809_v18 = vpop.f32.mrb[40].mxu1 }
0x1266   :  { %v3739_v21 = vadd.f32 %v3738_v16, %v8163_v5  ;;  %v3740_v22 = vpop.f32.mrb[47].mxu0  ;;  %v5979_v29 = vpop.f32.mrb[41].mxu1  ;;  %v3810_v54 = vadd.f32 %v3809_v18, %v8173_v38  ;;  %v3990_v16 = vrot.slane %v3840_v0, 2 }
0x1267   :  { %v3741_v27 = vadd.f32 %v3740_v22, %v8167_v10 }
0x1268   :  { %v3813_v31 = vadd.f32 %v3739_v21, %v3671_v19 }
0x1269   :  { %v3823_v39 = vadd.f32 %v3821_v34, %v3741_v27 }
0x126a   :  { %v4910_v35 = vmul.f32 -1.442695, %v3813_v31 }
0x126b   :  { %v4911_v50 = vmul.f32 -1.442695, %v3823_v39 }
0x126c   :  { %7712 = vpow2.f32 %v4910_v35 }
0x126d   :  { %7714 = vpow2.f32 %v4911_v50  ;;  %v4000_v50 = vrot.slane %v3840_v0, 4 }
0x1276   :  { %v7713_v28 = vpop.eup %7712 }
0x1277   :  { %v3817_v37 = vadd.f32 1.0, %v7713_v28  ;;  %v7715_v44 = vpop.eup %7714 }
0x1278   :  { %v3827_v49 = vadd.f32 1.0, %v7715_v44 }
0x1279   :  { %7716 = vrcp.f32 %v3817_v37 }
0x127a   :  { %7718 = vrcp.f32 %v3827_v49 }
0x1283   :  { %v7717_v57 = vpop.eup %7716 }
0x1284   :  { %v3830_v58 = vmul.f32 %v7717_v57, %v3810_v54  ;;  %v7719_v48 = vpop.eup %7718 }
0x1285   :  { %v3835_v60 = vsub.f32 1.0, %v7719_v48  ;;  %v3837_v40 = vmul.f32 %v7719_v48, %v8864_v15  ;;  %v4009_v48 = vld [vmem:[#allocation2 + $0x72] sm:$0x3f] }
0x1286   :  { %v3833_v59 = vadd.f32 %v3831_v47, %v3830_v58 }
0x1288   :  { %7720 = vtanh.f32 %v3833_v59 }
0x1292   :  { %v7721_v4 = vpop.eup %7720 }
0x1293   :  { %v3836_v33 = vmul.f32 %v7721_v4, %v3835_v60 }
0x1295   :  { %v8907_v63 = vadd.f32 %v3837_v40, %v3836_v33 }
0x1297   :  { %3906 = vmatmul.mubr.f32.vlgmr.msra.gmra.mrb[48].mxu0 %v8907_v63  ;;  %6013 = vmatmul.mubr.f32.vlgmr.msra.gmra.mrb[42].mxu1 %v8907_v63 }
0x1298   :  { %7257 = vmatpush1.bf16.msra.mxu0 %v7901_v32  ;;  %7288 = vmatpush3.bf16.msra.mxu1 %v7992_v41 }
0x1299   :  { %7259 = vmatprep.subr.bf16.mxu0 %v7905_v36  ;;  %7289 = vmatprep.subr.bf16.mxu1 %v7811_v23 }
0x129a   :  { %4074 = vmatprep.mubr.f32.mxu0 %v7809_v1  ;;  %6047 = vmatprep.mubr.msk.f32.mxu1 %vm7812_vm2, %v7809_v1 }
0x129c   :  { %7261 = vmatpush1.bf16.msra.mxu0 %v7922_v46  ;;  %7291 = vmatpush3.bf16.msra.mxu1 %v8005_v51 }
0x129d   :  { %7263 = vmatprep.subr.bf16.mxu0 %v7936_v52  ;;  %7292 = vmatprep.subr.bf16.mxu1 %v7811_v23 }
0x12a0   :  { %7265 = vmatpush1.bf16.msra.mxu0 %v7946_v2  ;;  %7294 = vmatpush3.bf16.msra.mxu1 %v8019_v61 }
0x12a1   :  { %7267 = vmatprep.subr.bf16.mxu0 %v7960_v11  ;;  %7295 = vmatprep.subr.bf16.mxu1 %v7811_v23 }
0x12a4   :  { %7269 = vmatpush1.bf16.msra.mxu0 %v7981_v26  ;;  %7297 = vmatpush3.bf16.msra.mxu1 %v8030_v7 }
0x12a5   :  { %7271 = vmatprep.subr.bf16.mxu0 %v7987_v30  ;;  %7298 = vmatprep.subr.bf16.mxu1 %v7811_v23 }
0x12a8   :  { %7273 = vmatpush1.bf16.msra.mxu0 %v7995_v42  ;;  %7300 = vmatpush3.bf16.msra.mxu1 %v8038_v13 }
0x12a9   :  { %7275 = vmatprep.subr.bf16.mxu0 %v7999_v45  ;;  %7301 = vmatprep.subr.bf16.mxu1 %v7811_v23 }
0x12ac   :  { %7277 = vmatpush1.bf16.msra.mxu0 %v8008_v53  ;;  %7303 = vmatpush3.bf16.msra.mxu1 %v8045_v17 }
0x12ad   :  { %7279 = vmatprep.subr.bf16.mxu0 %v8012_v56  ;;  %7304 = vmatprep.subr.bf16.mxu1 %v7811_v23 }
0x12b0   :  { %7281 = vmatpush1.bf16.msra.mxu0 %v8022_v62  ;;  %7306 = vmatpush3.bf16.msra.mxu1 %v8052_v20 }
0x12b1   :  { %7283 = vmatprep.subr.bf16.mxu0 %v8026_v3  ;;  %7307 = vmatprep.subr.bf16.mxu1 %v7811_v23 }
0x12b4   :  { %7285 = vmatpush1.bf16.msra.mxu0 %v8033_v8  ;;  %7309 = vmatpush3.bf16.msra.mxu1 %v8058_v24 }
0x12b5   :  { %7311 = vmatprep.subr.bf16.mxu0 %v7874_v14  ;;  %7342 = vmatprep.subr.bf16.mxu1 %v7811_v23 }
0x136a   :  { %v3907_v43 = vpop.f32.mrb[48].mxu0  ;;  %v3978_v55 = vpop.f32.mrb[42].mxu1 }
0x136b   :  { %v3908_v6 = vadd.f32 %v3907_v43, %v8163_v5  ;;  %v3909_v9 = vpop.f32.mrb[49].mxu0  ;;  %v6014_v12 = vpop.f32.mrb[43].mxu1  ;;  %v3979_v34 = vadd.f32 %v3978_v55, %v8173_v38  ;;  %v4159_v43 = vrot.slane %v4009_v48, 2 }
0x136c   :  { %v3910_v25 = vadd.f32 %v3909_v9, %v8167_v10 }
0x136d   :  { %v3982_v15 = vadd.f32 %v3908_v6, %v3840_v0 }
0x136e   :  { %v3992_v19 = vadd.f32 %v3990_v16, %v3910_v25 }
0x136f   :  { %v4912_v18 = vmul.f32 -1.442695, %v3982_v15 }
0x1370   :  { %v4913_v21 = vmul.f32 -1.442695, %v3992_v19 }
0x1371   :  { %7722 = vpow2.f32 %v4912_v18 }
0x1372   :  { %7724 = vpow2.f32 %v4913_v21  ;;  %v4169_v21 = vrot.slane %v4009_v48, 4 }
0x137b   :  { %v7723_v22 = vpop.eup %7722 }
0x137c   :  { %v3986_v29 = vadd.f32 1.0, %v7723_v22  ;;  %v7725_v27 = vpop.eup %7724 }
0x137d   :  { %v3996_v31 = vadd.f32 1.0, %v7725_v27 }
0x137e   :  { %7726 = vrcp.f32 %v3986_v29 }
0x137f   :  { %7728 = vrcp.f32 %v3996_v31 }
0x1388   :  { %v7727_v35 = vpop.eup %7726 }
0x1389   :  { %v3999_v39 = vmul.f32 %v7727_v35, %v3979_v34  ;;  %v7729_v37 = vpop.eup %7728 }
0x138a   :  { %v4004_v44 = vsub.f32 1.0, %v7729_v37  ;;  %v4006_v57 = vmul.f32 %v7729_v37, %v8907_v63  ;;  %v4178_v37 = vld [vmem:[#allocation2 + $0x78] sm:$0x3f] }
0x138b   :  { %v4002_v28 = vadd.f32 %v4000_v50, %v3999_v39 }
0x138d   :  { %7730 = vtanh.f32 %v4002_v28 }
0x1397   :  { %v7731_v49 = vpop.eup %7730 }
0x1398   :  { %v4005_v54 = vmul.f32 %v7731_v49, %v4004_v44 }
0x139a   :  { %v8950_v58 = vadd.f32 %v4006_v57, %v4005_v54 }
0x139c   :  { %4075 = vmatmul.mubr.f32.vlgmr.msra.gmra.mrb[50].mxu0 %v8950_v58  ;;  %6048 = vmatmul.mubr.f32.vlgmr.msra.gmra.mrb[44].mxu1 %v8950_v58 }
0x139d   :  { %7313 = vmatpush1.bf16.msra.mxu0 %v7901_v32  ;;  %7344 = vmatpush3.bf16.msra.mxu1 %v7992_v41 }
0x139e   :  { %7315 = vmatprep.subr.bf16.mxu0 %v7905_v36  ;;  %7345 = vmatprep.subr.bf16.mxu1 %v7811_v23 }
0x139f   :  { %4243 = vmatprep.mubr.f32.mxu0 %v7809_v1  ;;  %6082 = vmatprep.mubr.msk.f32.mxu1 %vm7812_vm2, %v7809_v1 }
0x13a1   :  { %7317 = vmatpush1.bf16.msra.mxu0 %v7922_v46  ;;  %7347 = vmatpush3.bf16.msra.mxu1 %v8005_v51 }
0x13a2   :  { %7319 = vmatprep.subr.bf16.mxu0 %v7936_v52  ;;  %7348 = vmatprep.subr.bf16.mxu1 %v7811_v23 }
0x13a5   :  { %7321 = vmatpush1.bf16.msra.mxu0 %v7946_v2  ;;  %7350 = vmatpush3.bf16.msra.mxu1 %v8019_v61 }
0x13a6   :  { %7323 = vmatprep.subr.bf16.mxu0 %v7960_v11  ;;  %7351 = vmatprep.subr.bf16.mxu1 %v7811_v23 }
0x13a9   :  { %7325 = vmatpush1.bf16.msra.mxu0 %v7981_v26  ;;  %7353 = vmatpush3.bf16.msra.mxu1 %v8030_v7 }
0x13aa   :  { %7327 = vmatprep.subr.bf16.mxu0 %v7987_v30  ;;  %7354 = vmatprep.subr.bf16.mxu1 %v7811_v23 }
0x13ad   :  { %7329 = vmatpush1.bf16.msra.mxu0 %v7995_v42  ;;  %7356 = vmatpush3.bf16.msra.mxu1 %v8038_v13 }
0x13ae   :  { %7331 = vmatprep.subr.bf16.mxu0 %v7999_v45  ;;  %7357 = vmatprep.subr.bf16.mxu1 %v7811_v23 }
0x13b1   :  { %7333 = vmatpush1.bf16.msra.mxu0 %v8008_v53  ;;  %7359 = vmatpush3.bf16.msra.mxu1 %v8045_v17 }
0x13b2   :  { %7335 = vmatprep.subr.bf16.mxu0 %v8012_v56  ;;  %7360 = vmatprep.subr.bf16.mxu1 %v7811_v23 }
0x13b5   :  { %7337 = vmatpush1.bf16.msra.mxu0 %v8022_v62  ;;  %7362 = vmatpush3.bf16.msra.mxu1 %v8052_v20 }
0x13b6   :  { %7339 = vmatprep.subr.bf16.mxu0 %v8026_v3  ;;  %7363 = vmatprep.subr.bf16.mxu1 %v7811_v23 }
0x13b9   :  { %7341 = vmatpush1.bf16.msra.mxu0 %v8033_v8  ;;  %7365 = vmatpush3.bf16.msra.mxu1 %v8058_v24 }
0x13ba   :  { %7367 = vmatprep.subr.bf16.mxu0 %v7874_v14  ;;  %7398 = vmatprep.subr.bf16.mxu1 %v7811_v23 }
0x146f   :  { %v4076_v47 = vpop.f32.mrb[50].mxu0  ;;  %v4147_v59 = vpop.f32.mrb[44].mxu1 }
0x1470   :  { %v4077_v60 = vadd.f32 %v4076_v47, %v8163_v5  ;;  %v4078_v4 = vpop.f32.mrb[51].mxu0  ;;  %v6049_v33 = vpop.f32.mrb[45].mxu1  ;;  %v4148_v16 = vadd.f32 %v4147_v59, %v8173_v38  ;;  %v4328_v47 = vrot.slane %v4178_v37, 2 }
0x1471   :  { %v4079_v40 = vadd.f32 %v4078_v4, %v8167_v10 }
0x1472   :  { %v4151_v63 = vadd.f32 %v4077_v60, %v4009_v48 }
0x1473   :  { %v4161_v0 = vadd.f32 %v4159_v43, %v4079_v40 }
0x1474   :  { %v4914_v55 = vmul.f32 -1.442695, %v4151_v63 }
0x1475   :  { %v4915_v6 = vmul.f32 -1.442695, %v4161_v0 }
0x1476   :  { %7732 = vpow2.f32 %v4914_v55 }
0x1477   :  { %7734 = vpow2.f32 %v4915_v6  ;;  %v4338_v6 = vrot.slane %v4178_v37, 4 }
0x1480   :  { %v7733_v9 = vpop.eup %7732 }
0x1481   :  { %v4155_v12 = vadd.f32 1.0, %v7733_v9  ;;  %v7735_v25 = vpop.eup %7734 }
0x1482   :  { %v4165_v15 = vadd.f32 1.0, %v7735_v25 }
0x1483   :  { %7736 = vrcp.f32 %v4155_v12 }
0x1484   :  { %7738 = vrcp.f32 %v4165_v15 }
0x148d   :  { %v7737_v18 = vpop.eup %7736 }
0x148e   :  { %v4168_v19 = vmul.f32 %v7737_v18, %v4148_v16  ;;  %v7739_v29 = vpop.eup %7738 }
0x148f   :  { %v4173_v27 = vsub.f32 1.0, %v7739_v29  ;;  %v4175_v35 = vmul.f32 %v7739_v29, %v8950_v58  ;;  %v4347_v29 = vld [vmem:[#allocation2 + $0x7e] sm:$0x3f] }
0x1490   :  { %v4171_v22 = vadd.f32 %v4169_v21, %v4168_v19 }
0x1492   :  { %7740 = vtanh.f32 %v4171_v22 }
0x149c   :  { %v7741_v31 = vpop.eup %7740 }
0x149d   :  { %v4174_v34 = vmul.f32 %v7741_v31, %v4173_v27 }
0x149f   :  { %v8993_v39 = vadd.f32 %v4175_v35, %v4174_v34 }
0x14a1   :  { %4244 = vmatmul.mubr.f32.vlgmr.msra.gmra.mrb[52].mxu0 %v8993_v39  ;;  %6083 = vmatmul.mubr.f32.vlgmr.msra.gmra.mrb[46].mxu1 %v8993_v39 }
0x14a2   :  { %7369 = vmatpush1.bf16.msra.mxu0 %v7901_v32  ;;  %7400 = vmatpush3.bf16.msra.mxu1 %v7992_v41 }
0x14a3   :  { %7371 = vmatprep.subr.bf16.mxu0 %v7905_v36  ;;  %7401 = vmatprep.subr.bf16.mxu1 %v7811_v23 }
0x14a4   :  { %4412 = vmatprep.mubr.f32.mxu0 %v7809_v1  ;;  %6117 = vmatprep.mubr.msk.f32.mxu1 %vm7812_vm2, %v7809_v1 }
0x14a6   :  { %7373 = vmatpush1.bf16.msra.mxu0 %v7922_v46  ;;  %7403 = vmatpush3.bf16.msra.mxu1 %v8005_v51 }
0x14a7   :  { %7375 = vmatprep.subr.bf16.mxu0 %v7936_v52  ;;  %7404 = vmatprep.subr.bf16.mxu1 %v7811_v23 }
0x14aa   :  { %7377 = vmatpush1.bf16.msra.mxu0 %v7946_v2  ;;  %7406 = vmatpush3.bf16.msra.mxu1 %v8019_v61 }
0x14ab   :  { %7379 = vmatprep.subr.bf16.mxu0 %v7960_v11  ;;  %7407 = vmatprep.subr.bf16.mxu1 %v7811_v23 }
0x14ae   :  { %7381 = vmatpush1.bf16.msra.mxu0 %v7981_v26  ;;  %7409 = vmatpush3.bf16.msra.mxu1 %v8030_v7 }
0x14af   :  { %7383 = vmatprep.subr.bf16.mxu0 %v7987_v30  ;;  %7410 = vmatprep.subr.bf16.mxu1 %v7811_v23 }
0x14b2   :  { %7385 = vmatpush1.bf16.msra.mxu0 %v7995_v42  ;;  %7412 = vmatpush3.bf16.msra.mxu1 %v8038_v13 }
0x14b3   :  { %7387 = vmatprep.subr.bf16.mxu0 %v7999_v45  ;;  %7413 = vmatprep.subr.bf16.mxu1 %v7811_v23 }
0x14b6   :  { %7389 = vmatpush1.bf16.msra.mxu0 %v8008_v53  ;;  %7415 = vmatpush3.bf16.msra.mxu1 %v8045_v17 }
0x14b7   :  { %7391 = vmatprep.subr.bf16.mxu0 %v8012_v56  ;;  %7416 = vmatprep.subr.bf16.mxu1 %v7811_v23 }
0x14ba   :  { %7393 = vmatpush1.bf16.msra.mxu0 %v8022_v62  ;;  %7418 = vmatpush3.bf16.msra.mxu1 %v8052_v20 }
0x14bb   :  { %7395 = vmatprep.subr.bf16.mxu0 %v8026_v3  ;;  %7419 = vmatprep.subr.bf16.mxu1 %v7811_v23 }
0x14be   :  { %7397 = vmatpush1.bf16.msra.mxu0 %v8033_v8  ;;  %7421 = vmatpush3.bf16.msra.mxu1 %v8058_v24 }
0x14bf   :  { %7423 = vmatprep.subr.bf16.mxu0 %v7874_v14  ;;  %7454 = vmatprep.subr.bf16.mxu1 %v7811_v23 }
0x1574   :  { %v4245_v50 = vpop.f32.mrb[52].mxu0  ;;  %v4316_v28 = vpop.f32.mrb[46].mxu1 }
0x1575   :  { %v4246_v44 = vadd.f32 %v4245_v50, %v8163_v5  ;;  %v4247_v49 = vpop.f32.mrb[53].mxu0  ;;  %v6084_v54 = vpop.f32.mrb[47].mxu1  ;;  %v4317_v43 = vadd.f32 %v4316_v28, %v8173_v38  ;;  %v4497_v50 = vrot.slane %v4347_v29, 2 }
0x1576   :  { %v4248_v57 = vadd.f32 %v4247_v49, %v8167_v10 }
0x1577   :  { %v4320_v58 = vadd.f32 %v4246_v44, %v4178_v37 }
0x1578   :  { %v4330_v48 = vadd.f32 %v4328_v47, %v4248_v57 }
0x1579   :  { %v4916_v59 = vmul.f32 -1.442695, %v4320_v58 }
0x157a   :  { %v4917_v60 = vmul.f32 -1.442695, %v4330_v48  ;;  %v4507_v48 = vrot.slane %v4347_v29, 4 }
0x157b   :  { %7742 = vpow2.f32 %v4916_v59 }
0x157c   :  { %7744 = vpow2.f32 %v4917_v60 }
0x1585   :  { %v7743_v4 = vpop.eup %7742 }
0x1586   :  { %v4324_v33 = vadd.f32 1.0, %v7743_v4  ;;  %v7745_v40 = vpop.eup %7744 }
0x1587   :  { %v4334_v63 = vadd.f32 1.0, %v7745_v40 }
0x1588   :  { %7746 = vrcp.f32 %v4324_v33 }
0x1589   :  { %7748 = vrcp.f32 %v4334_v63 }
0x1592   :  { %v7747_v55 = vpop.eup %7746 }
0x1593   :  { %v4337_v0 = vmul.f32 %v7747_v55, %v4317_v43  ;;  %v7749_v12 = vpop.eup %7748 }
0x1594   :  { %v4342_v25 = vsub.f32 1.0, %v7749_v12  ;;  %v4344_v18 = vmul.f32 %v7749_v12, %v8993_v39 }
0x1595   :  { %v4340_v9 = vadd.f32 %v4338_v6, %v4337_v0 }
0x1597   :  { %7750 = vtanh.f32 %v4340_v9 }
0x15a1   :  { %v7751_v15 = vpop.eup %7750 }
0x15a2   :  { %v4343_v16 = vmul.f32 %v7751_v15, %v4342_v25  ;;  %v4685_v25 = vld [vmem:[#allocation2 + $0x8a] sm:$0x3f] }
0x15a4   :  { %v9036_v19 = vadd.f32 %v4344_v18, %v4343_v16 }
0x15a6   :  { %4413 = vmatmul.mubr.f32.vlgmr.msra.gmra.mrb[54].mxu0 %v9036_v19  ;;  %6118 = vmatmul.mubr.f32.vlgmr.msra.gmra.mrb[48].mxu1 %v9036_v19 }
0x15a7   :  { %7425 = vmatpush1.bf16.msra.mxu0 %v7901_v32  ;;  %7456 = vmatpush3.bf16.msra.mxu1 %v7992_v41 }
0x15a8   :  { %7427 = vmatprep.subr.bf16.mxu0 %v7905_v36  ;;  %7457 = vmatprep.subr.bf16.mxu1 %v7811_v23 }
0x15a9   :  { %4581 = vmatprep.mubr.f32.mxu0 %v7809_v1  ;;  %6152 = vmatprep.mubr.msk.f32.mxu1 %vm7812_vm2, %v7809_v1 }
0x15ab   :  { %7429 = vmatpush1.bf16.msra.mxu0 %v7922_v46  ;;  %7459 = vmatpush3.bf16.msra.mxu1 %v8005_v51 }
0x15ac   :  { %7431 = vmatprep.subr.bf16.mxu0 %v7936_v52  ;;  %7460 = vmatprep.subr.bf16.mxu1 %v7811_v23 }
0x15af   :  { %7433 = vmatpush1.bf16.msra.mxu0 %v7946_v2  ;;  %7462 = vmatpush3.bf16.msra.mxu1 %v8019_v61 }
0x15b0   :  { %7435 = vmatprep.subr.bf16.mxu0 %v7960_v11  ;;  %7463 = vmatprep.subr.bf16.mxu1 %v7811_v23 }
0x15b3   :  { %7437 = vmatpush1.bf16.msra.mxu0 %v7981_v26  ;;  %7465 = vmatpush3.bf16.msra.mxu1 %v8030_v7 }
0x15b4   :  { %7439 = vmatprep.subr.bf16.mxu0 %v7987_v30  ;;  %7466 = vmatprep.subr.bf16.mxu1 %v7811_v23 }
0x15b7   :  { %7441 = vmatpush1.bf16.msra.mxu0 %v7995_v42  ;;  %7468 = vmatpush3.bf16.msra.mxu1 %v8038_v13 }
0x15b8   :  { %7443 = vmatprep.subr.bf16.mxu0 %v7999_v45  ;;  %7469 = vmatprep.subr.bf16.mxu1 %v7811_v23 }
0x15bb   :  { %7445 = vmatpush1.bf16.msra.mxu0 %v8008_v53  ;;  %7471 = vmatpush3.bf16.msra.mxu1 %v8045_v17 }
0x15bc   :  { %7447 = vmatprep.subr.bf16.mxu0 %v8012_v56  ;;  %7472 = vmatprep.subr.bf16.mxu1 %v7811_v23 }
0x15bf   :  { %7449 = vmatpush1.bf16.msra.mxu0 %v8022_v62  ;;  %7474 = vmatpush3.bf16.msra.mxu1 %v8052_v20 }
0x15c0   :  { %7451 = vmatprep.subr.bf16.mxu0 %v8026_v3  ;;  %7475 = vmatprep.subr.bf16.mxu1 %v7811_v23 }
0x15c3   :  { %7453 = vmatpush1.bf16.msra.mxu0 %v8033_v8  ;;  %7477 = vmatpush3.bf16.msra.mxu1 %v8058_v24 }
0x15c4   :  { %7479 = vmatprep.subr.bf16.mxu0 %v7874_v14  ;;  %7510 = vmatprep.subr.bf16.mxu1 %v7811_v23 }
0x1679   :  { %v4414_v21 = vpop.f32.mrb[54].mxu0  ;;  %v4485_v22 = vpop.f32.mrb[48].mxu1 }
0x167a   :  { %v4415_v27 = vadd.f32 %v4414_v21, %v8163_v5  ;;  %v4416_v31 = vpop.f32.mrb[55].mxu0  ;;  %v6119_v34 = vpop.f32.mrb[49].mxu1  ;;  %v4486_v58 = vadd.f32 %v4485_v22, %v8173_v38  ;;  %v4835_v22 = vrot.slane %v4685_v25, 2 }
0x167b   :  { %v4417_v35 = vadd.f32 %v4416_v31, %v8167_v10 }
0x167c   :  { %v4489_v39 = vadd.f32 %v4415_v27, %v4347_v29 }
0x167d   :  { %v4499_v37 = vadd.f32 %v4497_v50, %v4417_v35 }
0x167e   :  { %v4918_v28 = vmul.f32 -1.442695, %v4489_v39 }
0x167f   :  { %v4919_v44 = vmul.f32 -1.442695, %v4499_v37 }
0x1680   :  { %7752 = vpow2.f32 %v4918_v28 }
0x1681   :  { %7754 = vpow2.f32 %v4919_v44  ;;  %v4845_v44 = vrot.slane %v4685_v25, 4 }
0x168a   :  { %v7753_v49 = vpop.eup %7752 }
0x168b   :  { %v4493_v14 = vadd.f32 1.0, %v7753_v49  ;;  %v7755_v54 = vpop.eup %7754 }
0x168c   :  { %v4503_v57 = vadd.f32 1.0, %v7755_v54 }
0x168d   :  { %7756 = vrcp.f32 %v4493_v14 }
0x168e   :  { %7758 = vrcp.f32 %v4503_v57 }
0x1697   :  { %v7757_v47 = vpop.eup %7756 }
0x1698   :  { %v4506_v59 = vmul.f32 %v7757_v47, %v4486_v58  ;;  %v7759_v4 = vpop.eup %7758 }
0x1699   :  { %v4511_v33 = vsub.f32 1.0, %v7759_v4  ;;  %v4513_v43 = vmul.f32 %v7759_v4, %v9036_v19 }
0x169a   :  { %v4509_v60 = vadd.f32 %v4507_v48, %v4506_v59 }
0x169c   :  { %7760 = vtanh.f32 %v4509_v60 }
0x16a6   :  { %v7761_v40 = vpop.eup %7760 }
0x16a7   :  { %v4512_v63 = vmul.f32 %v7761_v40, %v4511_v33 }
0x16a9   :  { %v9079_v55 = vadd.f32 %v4513_v43, %v4512_v63 }
0x16ab   :  { %4582 = vmatmul.mubr.f32.vlgmr.msra.gmra.mrb[56].mxu0 %v9079_v55  ;;  %6153 = vmatmul.mubr.f32.vlgmr.msra.gmra.mrb[50].mxu1 %v9079_v55 }
0x16ac   :  { %7481 = vmatpush1.bf16.msra.mxu0 %v7901_v32  ;;  %7512 = vmatpush3.bf16.msra.mxu1 %v7992_v41 }
0x16ad   :  { %7483 = vmatprep.subr.bf16.mxu0 %v7905_v36  ;;  %7513 = vmatprep.subr.bf16.mxu1 %v7811_v23  ;;  %v4516_v36 = vld [vmem:[#allocation2 + $0x84] sm:$0x3f] }
0x16ae   :  { %4750 = vmatprep.mubr.f32.mxu0 %v7809_v1  ;;  %6187 = vmatprep.mubr.msk.f32.mxu1 %vm7812_vm2, %v7809_v1 }
0x16b0   :  { %7485 = vmatpush1.bf16.msra.mxu0 %v7922_v46  ;;  %7515 = vmatpush3.bf16.msra.mxu1 %v8005_v51 }
0x16b1   :  { %7487 = vmatprep.subr.bf16.mxu0 %v7936_v52  ;;  %7516 = vmatprep.subr.bf16.mxu1 %v7811_v23 }
0x16b4   :  { %7489 = vmatpush1.bf16.msra.mxu0 %v7946_v2  ;;  %7518 = vmatpush3.bf16.msra.mxu1 %v8019_v61 }
0x16b5   :  { %7491 = vmatprep.subr.bf16.mxu0 %v7960_v11  ;;  %7519 = vmatprep.subr.bf16.mxu1 %v7811_v23 }
0x16b8   :  { %7493 = vmatpush1.bf16.msra.mxu0 %v7981_v26  ;;  %7521 = vmatpush3.bf16.msra.mxu1 %v8030_v7  ;;  %v4676_v7 = vrot.slane %v4516_v36, 4 }
0x16b9   :  { %7495 = vmatprep.subr.bf16.mxu0 %v7987_v30  ;;  %7522 = vmatprep.subr.bf16.mxu1 %v7811_v23  ;;  %v4666_v30 = vrot.slane %v4516_v36, 2 }
0x16bc   :  { %7497 = vmatpush1.bf16.msra.mxu0 %v7995_v42  ;;  %7524 = vmatpush3.bf16.msra.mxu1 %v8038_v13 }
0x16bd   :  { %7499 = vmatprep.subr.bf16.mxu0 %v7999_v45  ;;  %7525 = vmatprep.subr.bf16.mxu1 %v7811_v23 }
0x16c0   :  { %7501 = vmatpush1.bf16.msra.mxu0 %v8008_v53  ;;  %7527 = vmatpush3.bf16.msra.mxu1 %v8045_v17 }
0x16c1   :  { %7503 = vmatprep.subr.bf16.mxu0 %v8012_v56  ;;  %7528 = vmatprep.subr.bf16.mxu1 %v7811_v23 }
0x16c4   :  { %7505 = vmatpush1.bf16.msra.mxu0 %v8022_v62  ;;  %7530 = vmatpush3.bf16.msra.mxu1 %v8052_v20 }
0x16c5   :  { %7507 = vmatprep.subr.bf16.mxu0 %v8026_v3  ;;  %7531 = vmatprep.subr.bf16.mxu1 %v7811_v23 }
0x16c8   :  { %7509 = vmatpush1.bf16.msra.mxu0 %v8033_v8  ;;  %7533 = vmatpush3.bf16.msra.mxu1 %v8058_v24 }
0x177e   :  { %v4583_v1 = vpop.f32.mrb[56].mxu0  ;;  %v4654_v32 = vpop.f32.mrb[50].mxu1 }
0x177f   :  { %v4584_v46 = vadd.f32 %v4583_v1, %v8163_v5  ;;  %v4585_v52 = vpop.f32.mrb[57].mxu0  ;;  %v6154_v2 = vpop.f32.mrb[51].mxu1  ;;  %v4655_v61 = vadd.f32 %v4654_v32, %v8173_v38 }
0x1780   :  { %v4586_v11 = vadd.f32 %v4585_v52, %v8167_v10 }
0x1781   :  { %v4658_v26 = vadd.f32 %v4584_v46, %v4516_v36 }
0x1782   :  { %v4668_v42 = vadd.f32 %v4666_v30, %v4586_v11 }
0x1783   :  { %v4920_v41 = vmul.f32 -1.442695, %v4658_v26 }
0x1784   :  { %v4921_v45 = vmul.f32 -1.442695, %v4668_v42 }
0x1785   :  { %7762 = vpow2.f32 %v4920_v41 }
0x1786   :  { %7764 = vpow2.f32 %v4921_v45 }
0x178f   :  { %v7763_v23 = vpop.eup %7762 }
0x1790   :  { %v4662_v51 = vadd.f32 1.0, %v7763_v23  ;;  %v7765_v53 = vpop.eup %7764 }
0x1791   :  { %v4672_v56 = vadd.f32 1.0, %v7765_v53 }
0x1792   :  { %7766 = vrcp.f32 %v4662_v51 }
0x1793   :  { %7768 = vrcp.f32 %v4672_v56 }
0x179c   :  { %v7767_v62 = vpop.eup %7766 }
0x179d   :  { %v4675_v3 = vmul.f32 %v7767_v62, %v4655_v61  ;;  %v7769_v13 = vpop.eup %7768 }
0x179e   :  { %v4680_v17 = vsub.f32 1.0, %v7769_v13  ;;  %v4682_v0 = vmul.f32 %v7769_v13, %v9079_v55 }
0x179f   :  { %v4678_v8 = vadd.f32 %v4676_v7, %v4675_v3 }
0x17a1   :  { %7770 = vtanh.f32 %v4678_v8 }
0x17ab   :  { %v7771_v20 = vpop.eup %7770 }
0x17ac   :  { %v4681_v24 = vmul.f32 %v7771_v20, %v4680_v17 }
0x17ae   :  { %v4683_v6 = vadd.f32 %v4682_v0, %v4681_v24 }
0x17b0   :  { %4751 = vmatmul.mubr.f32.vlgmr.msra.gmra.mrb[58].mxu0 %v4683_v6  ;;  %6188 = vmatmul.mubr.f32.vlgmr.msra.gmra.mrb[52].mxu1 %v4683_v6 }
0x1883   :  { %v4752_v9 = vpop.f32.mrb[58].mxu0  ;;  %v4823_v12 = vpop.f32.mrb[52].mxu1 }
0x1884   :  { %v4753_v15 = vadd.f32 %v4752_v9, %v8163_v5  ;;  %v4754_v16 = vpop.f32.mrb[59].mxu0  ;;  %v6189_v18 = vpop.f32.mrb[53].mxu1  ;;  %v4824_v28 = vadd.f32 %v4823_v12, %v8173_v38 }
0x1885   :  { %v4755_v19 = vadd.f32 %v4754_v16, %v8167_v10 }
0x1886   :  { %v4827_v21 = vadd.f32 %v4753_v15, %v4685_v25 }
0x1887   :  { %v4837_v27 = vadd.f32 %v4835_v22, %v4755_v19 }
0x1888   :  { %v4922_v29 = vmul.f32 -1.442695, %v4827_v21 }
0x1889   :  { %v4923_v31 = vmul.f32 -1.442695, %v4837_v27 }
0x188a   :  { %7772 = vpow2.f32 %v4922_v29 }
0x188b   :  { %7774 = vpow2.f32 %v4923_v31 }
0x1894   :  { %v7773_v34 = vpop.eup %7772 }
0x1895   :  { %v4831_v35 = vadd.f32 1.0, %v7773_v34  ;;  %v7775_v39 = vpop.eup %7774 }
0x1896   :  { %v4841_v50 = vadd.f32 1.0, %v7775_v39 }
0x1897   :  { %7776 = vrcp.f32 %v4831_v35 }
0x1898   :  { %7778 = vrcp.f32 %v4841_v50 }
0x18a1   :  { %v7777_v37 = vpop.eup %7776 }
0x18a2   :  { %v4844_v5 = vmul.f32 %v7777_v37, %v4824_v28  ;;  %v7779_v10 = vpop.eup %7778 }
0x18a3   :  { %v4849_v14 = vsub.f32 1.0, %v7779_v10  ;;  %v4851_v58 = vmul.f32 %v7779_v10, %v4683_v6 }
0x18a4   :  { %v4847_v49 = vadd.f32 %v4845_v44, %v4844_v5 }
0x18a6   :  { %7780 = vtanh.f32 %v4847_v49 }
0x18b0   :  { %v7781_v54 = vpop.eup %7780 }
0x18b1   :  { %v4850_v57 = vmul.f32 %v7781_v54, %v4849_v14 }
0x18b3   :  { %v4852_v47 = vadd.f32 %v4851_v58, %v4850_v57 }
0x18b5   :  { %4853 = vst [vmem:[%s9131_s5] sm:$0x3] %v4852_v47 }
0x18b6   :  { %4858 = vsyncpa [#allocation4], 1 }

// kernel: forward_pallas.3
= control target key start
LH: loop header
LB: loop body
LE: loop exit
PB: predicated region body
PF: predicated region fallthrough
CT: control target
= control target key end

     0   :  { %19 = vsyncpa [#allocation3], 0  ;;  %s11991_s0 = inlined_call_operand.vmem [shape: f32[24,2,4], index: 0, kind: input, shape index: {}]   ;;  %s11992_s1 = inlined_call_operand.vmem [shape: f32[2,128], index: 1, kind: input, shape index: {}]   ;;  %s11993_s2 = inlined_call_operand.vmem [shape: f32[8,4,128], index: 2, kind: input, shape index: {}]   ;;  %s11994_s3 = inlined_call_operand.vmem [shape: f32[1,1,128], index: 3, kind: input, shape index: {}]   ;;  %s11995_s4 = inlined_call_operand.vmem [shape: f32[1,1,128], index: 4, kind: input, shape index: {}]   ;;  %s11996_s5 = inlined_call_operand.hbm [shape: f32[5,128,256], index: 5, kind: input, shape index: {}]   ;;  %s11997_s6 = inlined_call_operand.vmem [shape: f32[1,1,256], index: 6, kind: input, shape index: {}]   ;;  %s11998_s7 = inlined_call_operand.vmem [shape: f32[1,1,256], index: 7, kind: input, shape index: {}]   ;;  %s11999_s8 = inlined_call_operand.hbm [shape: f32[3,256,128], index: 8, kind: input, shape index: {}]   ;;  %s12000_s9 = inlined_call_operand.vmem [shape: f32[1,1,128], index: 9, kind: input, shape index: {}]   ;;  %s12001_s10 = inlined_call_operand.vmem [shape: f32[1,1,128], index: 10, kind: input, shape index: {}]   ;;  %s12002_s11 = inlined_call_operand.vmem [shape: f32[128,5], index: 11, kind: input, shape index: {}]   ;;  %s12003_s12 = inlined_call_operand.vmem [shape: f32[128,5], index: 12, kind: input, shape index: {}]   ;;  %s12004_s13 = inlined_call_operand.vmem [shape: f32[1,5], index: 13, kind: input, shape index: {}]   ;;  %s12005_s14 = inlined_call_operand.hbm [shape: f32[2,5], index: 14, kind: output, shape index: {}]  }
   0x1   :  { %20 = vsyncpa [#allocation6], 0 }
   0x2   :  { %21 = vsyncpa [#allocation4], 0  ;;  %s8714_s29 = smov [#allocation2]   ;;  %s8642_s17 = scalar_lea.hbm %s11996_s5, 20480 }
   0x3   :  { %s37_s30 = sshll.u32 %s8714_s29, 4  ;;  %p8643_p0 = scmp.ne.s32.totalorder %s11996_s5, %s8642_s17  ;;  %s38_s30 = int_to_ptr.vmem [resolvable:$true] %s37_s30 }
   0x4   :  { %p8646_p1 = scmp.lt.u32.totalorder %s8642_s17, %s11996_s5 }
   0x6   :  { %p8648_p2 = pnand %p8646_p1, %p8643_p0 }
   0x8   :  { %8651 = shalt.err (!%p8648_p2)
}
   0x9   :  { %s8652_s22 = scalar_lea.vmem %s38_s30, 20480  ;;  %p8657_p4 = scmp.lt.s32.totalorder %s38_s30, %s38_s30 }
   0xa   :  { %p8653_p3 = scmp.ne.s32.totalorder %s38_s30, %s8652_s22  ;;  %p8658_p5 = scmp.lt.s32.totalorder %s8652_s22, %s8652_s22 }
   0xc   :  { %p8659_p6 = por %p8658_p5, %p8657_p4 }
   0xe   :  { %p8660_p7 = pnand %p8659_p6, %p8653_p3 }
  0x10   :  { %8663 = shalt.err (!%p8660_p7)
}
  0x11   :  { %s8715_s23 = smov 256   ;;  %s8716_s24 = smov 16  }
  0x12   :  { %43 = dma.hbm_to_vmem [thread:$0]  %s11996_s5, 20480, %s38_s30, [#allocation3], %s8715_s23, %s8715_s23, %s8716_s24  }
  0x13   :  { %s8717_s27 = smov [#allocation5]   ;;  %s8664_s16 = scalar_lea.hbm %s11999_s8, 12288 }
  0x14   :  { %s53_s28 = sshll.u32 %s8717_s27, 4  ;;  %p8665_p8 = scmp.ne.s32.totalorder %s11999_s8, %s8664_s16  ;;  %s54_s28 = int_to_ptr.vmem [resolvable:$true] %s53_s28 }
  0x15   :  { %p8668_p9 = scmp.lt.u32.totalorder %s8664_s16, %s11999_s8 }
  0x17   :  { %p8670_p10 = pnand %p8668_p9, %p8665_p8 }
  0x19   :  { %8673 = shalt.err (!%p8670_p10)
}
  0x1a   :  { %s8674_s21 = scalar_lea.vmem %s54_s28, 12288  ;;  %p8679_p12 = scmp.lt.s32.totalorder %s54_s28, %s54_s28 }
  0x1b   :  { %p8675_p11 = scmp.ne.s32.totalorder %s54_s28, %s8674_s21  ;;  %p8680_p13 = scmp.lt.s32.totalorder %s8674_s21, %s8674_s21 }
  0x1d   :  { %p8681_p0 = por %p8680_p13, %p8679_p12 }
  0x1f   :  { %p8682_p1 = pnand %p8681_p0, %p8675_p11 }
  0x21   :  { %8685 = shalt.err (!%p8682_p1)
}
  0x22   :  { %s8718_s5 = smov 128   ;;  %s8719_s30 = smov 8  }
  0x23   :  { %59 = dma.hbm_to_vmem [thread:$0]  %s11999_s8, 12288, %s54_s28, [#allocation6], %s8718_s5, %s8718_s5, %s8719_s30  }
  0x24   :  { %8708 = dma.done.wait [#allocation3], 20480  }
  0x25   :  { %8709 = vsyncadd [#allocation3], 4294946816 }
  0x26   :  { %8710 = dma.done.wait [#allocation6], 12288  }
  0x27   :  { %8711 = vsyncadd [#allocation6], 4294955008  ;;  %v12006_v0 = vmov 0.0   ;;  %vm8721_vm0 = vmmov 0   ;;  %vm225_vm1 = vcmask 1043456   ;;  %vm152_vm2 = vcmask 1041409  }
  0x28   :  { %8103 = vmatprep.subr.mxu0 %v12006_v0  ;;  %8105 = vmatprep.mubr.msk.f32.mxu0 %vm8721_vm0, %v12006_v0  ;;  %vm155_vm3 = vcmask 1042434   ;;  %vm158_vm4 = vcmask 1043459   ;;  %vm161_vm5 = vcmask 1044484   ;;  %v7836_v1 = vld [vmem:[%s11993_s2 + $0x4] sm:$0xf]  ;;  %vm164_vm6 = vcmask 1045509  }
  0x29   :  { %8137 = vmatprep.subr.mxu1 %v12006_v0  ;;  %8139 = vmatprep.mubr.msk.f32.mxu1 %vm8721_vm0, %v12006_v0  ;;  %v8836_v2 = vld [vmem:[%s11991_s0 + $0x4] sm:$0x3]  ;;  %vm167_vm7 = vcmask 1046534   ;;  %v8842_v3 = vld [vmem:[%s11991_s0 + $0x6] sm:$0x3]  ;;  %vm169_vm8 = vcmask 1047559  }
  0x2a   :  { %8104 = vmatpush3.msk.msra.mxu0 %vm225_vm1, %v7836_v1  ;;  %v8847_v4 = vld [vmem:[%s11991_s0 + $0x8] sm:$0x3]  ;;  %v8852_v5 = vld [vmem:[%s11991_s0 + $0xa] sm:$0x3]  ;;  %v8858_v6 = vld [vmem:[%s11991_s0 + $0x2] sm:$0x3] }
  0x2b   :  { %8120 = vmatprep.subr.mxu0 %v12006_v0  ;;  %v8863_v7 = vld [vmem:[%s11991_s0 + $0xc] sm:$0x3]  ;;  %v8868_v8 = vld [vmem:[%s11991_s0 + $0x10] sm:$0x3]  ;;  %v8873_v9 = vld [vmem:[%s11991_s0 + $0xe] sm:$0x3] }
  0x2c   :  { %v125_v10 = vrot.slane %v8858_v6, 1  ;;  %v151_v11 = vrot.slane %v8836_v2, 7  ;;  %vm214_vm9 = vcmask 31744   ;;  %v8878_v12 = vrot.slane %v8873_v9, 1  ;;  %v7850_v16 = vld [vmem:[%s11993_s2 + $0x8] sm:$0xf] }
  0x2d   :  { %v154_v13 = vrot.slane %v8842_v3, 6  ;;  %v157_v14 = vrot.slane %v8847_v4, 5  ;;  %v160_v15 = vrot.slane %v8852_v5, 4  ;;  %v8887_v17 = vrot.slane %v8868_v8, 1  ;;  %8138 = vmatpush3.msk.msra.mxu1 %vm225_vm1, %v7850_v16  ;;  %v8899_v23 = vld [vmem:[%s11991_s0 + $0x12] sm:$0x3] }
  0x2e   :  { %v153_v18 = vsel %vm152_vm2, %v151_v11, %v8858_v6  ;;  %v163_v19 = vrot.slane %v8863_v7, 3  ;;  %v737_v20 = vrot.slane %v8842_v3, 7  ;;  %v166_v22 = vrot.slane %v8873_v9, 2  ;;  %8154 = vmatprep.subr.mxu1 %v12006_v0  ;;  %v148_v32 = vld [vmem:[%s11993_s2] sm:$0xf]  ;;  %s8724_s19 = smov [#allocation7]  }
  0x2f   :  { %v156_v21 = vsel %vm155_vm3, %v154_v13, %v153_v18  ;;  %v739_v24 = vrot.slane %v8847_v4, 6  ;;  %v741_v25 = vrot.slane %v8852_v5, 5  ;;  %v743_v28 = vrot.slane %v8863_v7, 4  ;;  %v8919_v35 = vld [vmem:[%s11991_s0 + $0x14] sm:$0x3] }
  0x30   :  { %v159_v26 = vsel %vm158_vm4, %v157_v14, %v156_v21  ;;  %v738_v27 = vsel %vm152_vm2, %v737_v20, %v8836_v2  ;;  %v745_v29 = vrot.slane %v8873_v9, 3  ;;  %v319_v31 = vrot.slane %v8858_v6, 7  ;;  %v8924_v36 = vld [vmem:[%s11991_s0 + $0x16] sm:$0x3]  ;;  %v8934_v40 = vld [vmem:[%s11991_s0 + $0x18] sm:$0x3] }
  0x31   :  { %v162_v30 = vsel %vm161_vm5, %v160_v15, %v159_v26  ;;  %v740_v33 = vsel %vm155_vm3, %v739_v24, %v738_v27  ;;  %v747_v34 = vrot.slane %v8868_v8, 2  ;;  %v8928_v38 = vrot.slane %v8899_v23, 1  ;;  %v8939_v41 = vld [vmem:[%s11991_s0 + $0x20] sm:$0x3]  ;;  %v8949_v45 = vld [vmem:[%s11991_s0 + $0x1a] sm:$0x3] }
  0x32   :  { %v165_v37 = vsel %vm164_vm6, %v163_v19, %v162_v30  ;;  %v742_v39 = vsel %vm158_vm4, %v741_v25, %v740_v33  ;;  %v8942_v42 = vrot.slane %v8919_v35, 1  ;;  %v8954_v46 = vld [vmem:[%s11991_s0 + $0x1c] sm:$0x3]  ;;  %v8957_v47 = vrot.slane %v8924_v36, 1  ;;  %v8968_v51 = vld [vmem:[%s11991_s0 + $0x1e] sm:$0x3] }
  0x33   :  { %v168_v43 = vsel %vm167_vm7, %v166_v22, %v165_v37  ;;  %v744_v44 = vsel %vm161_vm5, %v743_v28, %v742_v39  ;;  %v8960_v48 = vrot.slane %v8934_v40, 1  ;;  %v8971_v52 = vrot.slane %v8949_v45, 1  ;;  %v8979_v54 = vld [vmem:[%s11991_s0 + $0x22] sm:$0x3]  ;;  %v7857_v56 = vld [vmem:[%s11993_s2 + $0xc] sm:$0xf] }
  0x34   :  { %v170_v49 = vsel %vm169_vm8, %v8887_v17, %v168_v43  ;;  %v746_v50 = vsel %vm164_vm6, %v745_v29, %v744_v44  ;;  %v8974_v53 = vrot.slane %v8954_v46, 1  ;;  %v8987_v57 = vrot.slane %v8968_v51, 1 }
  0x35   :  { %8106 = vmatmul.mubr.msk.f32.vlgmr.msra.gmra.mrb[0].mxu0 %vm214_vm9, %v170_v49  ;;  %v748_v55 = vsel %vm167_vm7, %v747_v34, %v746_v50  ;;  %v8990_v58 = vrot.slane %v8939_v41, 1  ;;  %v171_v59 = vrot.slane %v8919_v35, 7  ;;  %v173_v61 = vrot.slane %v8924_v36, 6 }
  0x36   :  { %8121 = vmatpush3.msk.msra.mxu0 %vm225_vm1, %v148_v32  ;;  %v749_v60 = vsel %vm169_vm8, %v8928_v38, %v748_v55  ;;  %8108 = vmatprep.mubr.msk.f32.mxu0 %vm8721_vm0, %v12006_v0  ;;  %v175_v62 = vrot.slane %v8934_v40, 5  ;;  %v177_v63 = vrot.slane %v8949_v45, 4  ;;  %v179_v11 = vrot.slane %v8954_v46, 3 }
  0x37   :  { %8140 = vmatmul.mubr.msk.f32.vlgmr.msra.gmra.mrb[0].mxu1 %vm214_vm9, %v749_v60  ;;  %v172_v1 = vsel %vm152_vm2, %v171_v59, %v8899_v23  ;;  %v181_v13 = vrot.slane %v8968_v51, 2  ;;  %v9007_v14 = vrot.slane %v8979_v54, 1  ;;  %8171 = vmatprep.subr.mxu0 %v12006_v0  ;;  %v750_v16 = vrot.slane %v8924_v36, 7 }
  0x38   :  { %8155 = vmatpush3.msk.msra.mxu1 %vm225_vm1, %v7857_v56  ;;  %v174_v15 = vsel %vm155_vm3, %v173_v61, %v172_v1  ;;  %8142 = vmatprep.mubr.msk.f32.mxu1 %vm8721_vm0, %v12006_v0  ;;  %v752_v18 = vrot.slane %v8934_v40, 6  ;;  %v754_v19 = vrot.slane %v8949_v45, 5  ;;  %v756_v21 = vrot.slane %v8954_v46, 4 }
  0x39   :  { %v176_v20 = vsel %vm158_vm4, %v175_v62, %v174_v15  ;;  %v758_v22 = vrot.slane %v8968_v51, 3  ;;  %v760_v24 = vrot.slane %v8939_v41, 2  ;;  %8188 = vmatprep.subr.mxu1 %v12006_v0  ;;  %v751_v26 = vsel %vm152_vm2, %v750_v16, %v8919_v35 }
  0x3a   :  { %v178_v25 = vsel %vm161_vm5, %v177_v63, %v176_v20  ;;  %v9026_v27 = vrot.slane %v8836_v2, 1  ;;  %v9029_v28 = vrot.slane %v8842_v3, 1  ;;  %v753_v30 = vsel %vm155_vm3, %v752_v18, %v751_v26 }
  0x3b   :  { %v180_v29 = vsel %vm164_vm6, %v179_v11, %v178_v25  ;;  %v9034_v32 = vrot.slane %v8847_v4, 1  ;;  %v9037_v33 = vrot.slane %v8852_v5, 1  ;;  %v755_v37 = vsel %vm158_vm4, %v754_v19, %v753_v30 }
  0x3c   :  { %v182_v34 = vsel %vm167_vm7, %v181_v13, %v180_v29  ;;  %v9042_v39 = vrot.slane %v8863_v7, 1  ;;  %v184_v43 = vrot.slane %v125_v10, 7  ;;  %v757_v49 = vsel %vm161_vm5, %v756_v21, %v755_v37  ;;  %v9066_v13 = vld [vmem:[%s11991_s0 + $0x24] sm:$0x3] }
  0x3d   :  { %v183_v44 = vsel %vm169_vm8, %v8990_v58, %v182_v34  ;;  %v186_v50 = vrot.slane %v9026_v27, 6  ;;  %v188_v55 = vrot.slane %v9029_v28, 5  ;;  %v759_v56 = vsel %vm164_vm6, %v758_v22, %v757_v49 }
  0x3e   :  { %8109 = vmatmul.mubr.msk.f32.gmra.mrb[2].mxu0 %vm214_vm9, %v183_v44  ;;  %v185_v59 = vsel %vm152_vm2, %v184_v43, %v8979_v54  ;;  %v190_v60 = vrot.slane %v9034_v32, 4  ;;  %v192_v61 = vrot.slane %v9037_v33, 3  ;;  %v761_v62 = vsel %vm167_vm7, %v760_v24, %v759_v56 }
  0x3f   :  { %8111 = vmatprep.mubr.msk.f32.mxu0 %vm8721_vm0, %v12006_v0  ;;  %v187_v63 = vsel %vm155_vm3, %v186_v50, %v185_v59  ;;  %v194_v1 = vrot.slane %v9042_v39, 2  ;;  %v196_v11 = vrot.slane %v8878_v12, 1  ;;  %v762_v15 = vsel %vm169_vm8, %v9007_v14, %v761_v62 }
  0x40   :  { %v189_v16 = vsel %vm158_vm4, %v188_v55, %v187_v63  ;;  %v763_v18 = vrot.slane %v9026_v27, 7  ;;  %v765_v19 = vrot.slane %v9029_v28, 6  ;;  %8143 = vmatmul.mubr.msk.f32.gmra.mrb[2].mxu1 %vm214_vm9, %v762_v15  ;;  %v767_v21 = vrot.slane %v9034_v32, 5 }
  0x41   :  { %v191_v20 = vsel %vm161_vm5, %v190_v60, %v189_v16  ;;  %v769_v22 = vrot.slane %v9037_v33, 4  ;;  %v771_v24 = vrot.slane %v9042_v39, 3  ;;  %8145 = vmatprep.mubr.msk.f32.mxu1 %vm8721_vm0, %v12006_v0  ;;  %v773_v29 = vrot.slane %v8878_v12, 2 }
  0x42   :  { %v193_v25 = vsel %vm164_vm6, %v192_v61, %v191_v20  ;;  %v764_v26 = vsel %vm152_vm2, %v763_v18, %v9066_v13  ;;  %v775_v30 = vrot.slane %v8887_v17, 1  ;;  %v198_v43 = vrot.slane %v8928_v38, 7 }
  0x43   :  { %v195_v34 = vsel %vm167_vm7, %v194_v1, %v193_v25  ;;  %v766_v37 = vsel %vm155_vm3, %v765_v19, %v764_v26  ;;  %v200_v44 = vrot.slane %v8942_v42, 6  ;;  %v202_v55 = vrot.slane %v8957_v47, 5  ;;  %v9117_v26 = vld [vmem:[%s11991_s0] sm:$0x3] }
  0x44   :  { %v197_v49 = vsel %vm169_vm8, %v196_v11, %v195_v34  ;;  %v768_v50 = vsel %vm158_vm4, %v767_v21, %v766_v37  ;;  %v204_v56 = vrot.slane %v8960_v48, 4  ;;  %v199_v60 = vsel %vm152_vm2, %v198_v43, %v8887_v17 }
  0x45   :  { %8112 = vmatmul.mubr.msk.f32.gmra.mrb[4].mxu0 %vm214_vm9, %v197_v49  ;;  %v770_v59 = vsel %vm161_vm5, %v769_v22, %v768_v50  ;;  %v206_v61 = vrot.slane %v8971_v52, 3  ;;  %v208_v62 = vrot.slane %v8974_v53, 2  ;;  %v201_v1 = vsel %vm155_vm3, %v200_v44, %v199_v60 }
  0x46   :  { %v772_v63 = vsel %vm164_vm6, %v771_v24, %v770_v59  ;;  %8114 = vmatprep.mubr.msk.f32.mxu0 %vm8721_vm0, %v12006_v0  ;;  %v210_v11 = vrot.slane %v8987_v57, 1  ;;  %v777_v15 = vrot.slane %v8942_v42, 7  ;;  %v203_v18 = vsel %vm158_vm4, %v202_v55, %v201_v1 }
  0x47   :  { %v774_v16 = vsel %vm167_vm7, %v773_v29, %v772_v63  ;;  %v779_v19 = vrot.slane %v8957_v47, 6  ;;  %v781_v20 = vrot.slane %v8960_v48, 5  ;;  %v205_v22 = vsel %vm161_vm5, %v204_v56, %v203_v18 }
  0x48   :  { %v776_v21 = vsel %vm169_vm8, %v775_v30, %v774_v16  ;;  %v778_v24 = vsel %vm152_vm2, %v777_v15, %v8928_v38  ;;  %v783_v25 = vrot.slane %v8971_v52, 4  ;;  %v207_v29 = vsel %vm164_vm6, %v206_v61, %v205_v22 }
  0x49   :  { %8146 = vmatmul.mubr.msk.f32.gmra.mrb[4].mxu1 %vm214_vm9, %v776_v21  ;;  %v780_v34 = vsel %vm155_vm3, %v779_v19, %v778_v24  ;;  %v785_v30 = vrot.slane %v8974_v53, 3  ;;  %v787_v37 = vrot.slane %v8987_v57, 2  ;;  %v209_v43 = vsel %vm167_vm7, %v208_v62, %v207_v29 }
  0x4a   :  { %8148 = vmatprep.mubr.msk.f32.mxu1 %vm8721_vm0, %v12006_v0  ;;  %v782_v44 = vsel %vm158_vm4, %v781_v20, %v780_v34  ;;  %v789_v49 = vrot.slane %v8990_v58, 1  ;;  %v212_v50 = vrot.slane %v9007_v14, 7  ;;  %v211_v55 = vsel %vm169_vm8, %v210_v11, %v209_v43 }
  0x4b   :  { %v784_v56 = vsel %vm161_vm5, %v783_v25, %v782_v44  ;;  %v9133_v59 = vrot.slane %v9066_v13, 1  ;;  %v320_v60 = vsel %vm152_vm2, %v319_v31, %v9117_v26  ;;  %8115 = vmatmul.mubr.msk.f32.gmra.mrb[6].mxu0 %vm214_vm9, %v211_v55  ;;  %v321_v63 = vrot.slane %v8836_v2, 6 }
  0x4c   :  { %v786_v61 = vsel %vm164_vm6, %v785_v30, %v784_v56  ;;  %v213_v62 = vsel %vm152_vm2, %v212_v50, %v8990_v58  ;;  %v323_v1 = vrot.slane %v8842_v3, 5  ;;  %8117 = vmatprep.mubr.msk.f32.mxu0 %vm8721_vm0, %v12006_v0  ;;  %v325_v31 = vrot.slane %v8847_v4, 4 }
  0x4d   :  { %v788_v11 = vsel %vm167_vm7, %v787_v37, %v786_v61  ;;  %v791_v15 = vrot.slane %v9133_v59, 7  ;;  %v327_v16 = vrot.slane %v8852_v5, 3  ;;  %v322_v19 = vsel %vm155_vm3, %v321_v63, %v320_v60 }
  0x4e   :  { %v790_v18 = vsel %vm169_vm8, %v789_v49, %v788_v11  ;;  %v329_v20 = vrot.slane %v8863_v7, 2  ;;  %v1189_v2 = vrot.slane %v8847_v4, 7  ;;  %v324_v22 = vsel %vm158_vm4, %v323_v1, %v322_v19 }
  0x4f   :  { %8149 = vmatmul.mubr.msk.f32.gmra.mrb[6].mxu1 %vm214_vm9, %v790_v18  ;;  %v792_v21 = vsel %vm152_vm2, %v791_v15, %v9007_v14  ;;  %v1191_v24 = vrot.slane %v8852_v5, 6  ;;  %v1193_v25 = vrot.slane %v8863_v7, 5  ;;  %8118 = vmatmul.mubr.msk.f32.gmra.mrb[8].mxu0 %vm214_vm9, %v213_v62  ;;  %v326_v29 = vsel %vm161_vm5, %v325_v31, %v324_v22 }
  0x50   :  { %8151 = vmatprep.mubr.msk.f32.mxu1 %vm8721_vm0, %v12006_v0  ;;  %v1190_v34 = vsel %vm152_vm2, %v1189_v2, %v8842_v3  ;;  %v1195_v30 = vrot.slane %v8873_v9, 4  ;;  %v1197_v37 = vrot.slane %v8868_v8, 3  ;;  %8122 = vmatprep.mubr.msk.f32.mxu0 %vm8721_vm0, %v12006_v0  ;;  %v328_v43 = vsel %vm164_vm6, %v327_v16, %v326_v29  ;;  %v7864_v3 = vld [vmem:[%s11993_s2 + $0x10] sm:$0xf] }
  0x51   :  { %v1192_v44 = vsel %vm155_vm3, %v1191_v24, %v1190_v34  ;;  %v1199_v49 = vrot.slane %v8899_v23, 2  ;;  %v332_v50 = vrot.slane %v8899_v23, 7  ;;  %v330_v55 = vsel %vm167_vm7, %v329_v20, %v328_v43  ;;  %v7871_v20 = vld [vmem:[%s11993_s2 + $0x14] sm:$0xf] }
  0x52   :  { %v1194_v56 = vsel %vm158_vm4, %v1193_v25, %v1192_v44  ;;  %v334_v60 = vrot.slane %v8919_v35, 6  ;;  %v336_v61 = vrot.slane %v8924_v36, 5  ;;  %v331_v62 = vsel %vm169_vm8, %v8878_v12, %v330_v55 }
  0x53   :  { %8152 = vmatmul.mubr.msk.f32.gmra.mrb[8].mxu1 %vm214_vm9, %v792_v21  ;;  %v1196_v63 = vsel %vm161_vm5, %v1195_v30, %v1194_v56  ;;  %v333_v1 = vsel %vm152_vm2, %v332_v50, %v8868_v8  ;;  %v338_v11 = vrot.slane %v8934_v40, 4  ;;  %8123 = vmatmul.mubr.msk.f32.vlgmr.msra.gmra.mrb[0].mxu0 %vm214_vm9, %v331_v62  ;;  %v340_v16 = vrot.slane %v8949_v45, 3 }
  0x54   :  { %8156 = vmatprep.mubr.msk.f32.mxu1 %vm8721_vm0, %v12006_v0  ;;  %v1198_v15 = vsel %vm164_vm6, %v1197_v37, %v1196_v63  ;;  %v335_v31 = vsel %vm155_vm3, %v334_v60, %v333_v1  ;;  %v342_v18 = vrot.slane %v8954_v46, 2  ;;  %8172 = vmatpush3.msk.msra.mxu0 %vm225_vm1, %v7864_v3  ;;  %v1202_v21 = vrot.slane %v8934_v40, 7  ;;  %v9242_v1 = vld [vmem:[%s11991_s0 + $0x26] sm:$0x3] }
  0x55   :  { %v1200_v19 = vsel %vm167_vm7, %v1199_v49, %v1198_v15  ;;  %8125 = vmatprep.mubr.msk.f32.mxu0 %vm8721_vm0, %v12006_v0  ;;  %v337_v2 = vsel %vm158_vm4, %v336_v61, %v335_v31  ;;  %v1204_v22 = vrot.slane %v8949_v45, 6  ;;  %v1206_v29 = vrot.slane %v8954_v46, 5  ;;  %8205 = vmatprep.subr.mxu0 %v12006_v0 }
  0x56   :  { %v1201_v24 = vsel %vm169_vm8, %v8942_v42, %v1200_v19  ;;  %v339_v25 = vsel %vm161_vm5, %v338_v11, %v337_v2  ;;  %v1208_v34 = vrot.slane %v8968_v51, 4  ;;  %v1203_v37 = vsel %vm152_vm2, %v1202_v21, %v8924_v36 }
  0x57   :  { %8157 = vmatmul.mubr.msk.f32.vlgmr.msra.gmra.mrb[10].mxu1 %vm214_vm9, %v1201_v24  ;;  %v341_v30 = vsel %vm164_vm6, %v340_v16, %v339_v25  ;;  %v1210_v43 = vrot.slane %v8939_v41, 3  ;;  %v1212_v44 = vrot.slane %v8979_v54, 2  ;;  %v1205_v50 = vsel %vm155_vm3, %v1204_v22, %v1203_v37 }
  0x58   :  { %8189 = vmatpush3.msk.msra.mxu1 %vm225_vm1, %v7871_v20  ;;  %v343_v49 = vsel %vm167_vm7, %v342_v18, %v341_v30  ;;  %8159 = vmatprep.mubr.msk.f32.mxu1 %vm8721_vm0, %v12006_v0  ;;  %v346_v55 = vsel %vm152_vm2, %v9117_v26, %v8939_v41  ;;  %v347_v3 = vrot.slane %v125_v10, 6  ;;  %v1207_v60 = vsel %vm158_vm4, %v1206_v29, %v1205_v50 }
  0x59   :  { %v344_v56 = vsel %vm169_vm8, %v8987_v57, %v343_v49  ;;  %v349_v61 = vrot.slane %v9026_v27, 5  ;;  %v351_v62 = vrot.slane %v9029_v28, 4  ;;  %8222 = vmatprep.subr.mxu1 %v12006_v0  ;;  %v1209_v63 = vsel %vm161_vm5, %v1208_v34, %v1207_v60 }
  0x5a   :  { %8126 = vmatmul.mubr.msk.f32.gmra.mrb[2].mxu0 %vm214_vm9, %v344_v56  ;;  %v348_v26 = vsel %vm155_vm3, %v347_v3, %v346_v55  ;;  %v353_v6 = vrot.slane %v9034_v32, 3  ;;  %v355_v10 = vrot.slane %v9037_v33, 2  ;;  %v1211_v27 = vsel %vm164_vm6, %v1210_v43, %v1209_v63 }
  0x5b   :  { %8128 = vmatprep.mubr.msk.f32.mxu0 %vm8721_vm0, %v12006_v0  ;;  %v350_v11 = vsel %vm158_vm4, %v349_v61, %v348_v26  ;;  %v357_v15 = vrot.slane %v9042_v39, 1  ;;  %v1215_v31 = vrot.slane %v9029_v28, 7  ;;  %v1213_v16 = vsel %vm167_vm7, %v1212_v44, %v1211_v27 }
  0x5c   :  { %v352_v18 = vsel %vm161_vm5, %v351_v62, %v350_v11  ;;  %v1217_v19 = vrot.slane %v9034_v32, 6  ;;  %v1219_v20 = vrot.slane %v9037_v33, 5  ;;  %v1214_v2 = vsel %vm169_vm8, %v9133_v59, %v1213_v16 }
  0x5d   :  { %v354_v21 = vsel %vm164_vm6, %v353_v6, %v352_v18  ;;  %v1216_v22 = vsel %vm152_vm2, %v1215_v31, %v9242_v1  ;;  %v1221_v24 = vrot.slane %v9042_v39, 4  ;;  %8160 = vmatmul.mubr.msk.f32.gmra.mrb[12].mxu1 %vm214_vm9, %v1214_v2  ;;  %v1223_v29 = vrot.slane %v8878_v12, 3 }
  0x5e   :  { %v356_v28 = vsel %vm167_vm7, %v355_v10, %v354_v21  ;;  %v1218_v25 = vsel %vm155_vm3, %v1217_v19, %v1216_v22  ;;  %v1225_v34 = vrot.slane %v8887_v17, 2  ;;  %8162 = vmatprep.mubr.msk.f32.mxu1 %vm8721_vm0, %v12006_v0  ;;  %v1227_v43 = vrot.slane %v8928_v38, 1 }
  0x5f   :  { %v358_v30 = vsel %vm169_vm8, %v357_v15, %v356_v28  ;;  %v1220_v37 = vsel %vm158_vm4, %v1219_v20, %v1218_v25  ;;  %v359_v44 = vrot.slane %v8887_v17, 7  ;;  %v361_v50 = vrot.slane %v8928_v38, 6 }
  0x60   :  { %8129 = vmatmul.mubr.msk.f32.gmra.mrb[4].mxu0 %vm214_vm9, %v358_v30  ;;  %v1222_v49 = vsel %vm161_vm5, %v1221_v24, %v1220_v37  ;;  %v363_v55 = vrot.slane %v8942_v42, 5  ;;  %v365_v3 = vrot.slane %v8957_v47, 4  ;;  %v367_v61 = vrot.slane %v8960_v48, 3 }
  0x61   :  { %v1224_v56 = vsel %vm164_vm6, %v1223_v29, %v1222_v49  ;;  %8131 = vmatprep.mubr.msk.f32.mxu0 %vm8721_vm0, %v12006_v0  ;;  %v360_v60 = vsel %vm152_vm2, %v359_v44, %v8878_v12  ;;  %v369_v62 = vrot.slane %v8971_v52, 2  ;;  %v371_v6 = vrot.slane %v8974_v53, 1 }
  0x62   :  { %v1226_v63 = vsel %vm167_vm7, %v1225_v34, %v1224_v56  ;;  %v362_v26 = vsel %vm155_vm3, %v361_v50, %v360_v60  ;;  %v1229_v10 = vrot.slane %v8957_v47, 7  ;;  %v1231_v15 = vrot.slane %v8960_v48, 6 }
  0x63   :  { %v1228_v27 = vsel %vm169_vm8, %v1227_v43, %v1226_v63  ;;  %v364_v11 = vsel %vm158_vm4, %v363_v55, %v362_v26  ;;  %v1233_v31 = vrot.slane %v8971_v52, 5  ;;  %v1235_v19 = vrot.slane %v8974_v53, 4 }
  0x64   :  { %8163 = vmatmul.mubr.msk.f32.gmra.mrb[14].mxu1 %vm214_vm9, %v1228_v27  ;;  %v366_v16 = vsel %vm161_vm5, %v365_v3, %v364_v11  ;;  %v1230_v18 = vsel %vm152_vm2, %v1229_v10, %v8942_v42  ;;  %v1237_v20 = vrot.slane %v8987_v57, 3  ;;  %v1239_v22 = vrot.slane %v8990_v58, 2 }
  0x65   :  { %v368_v2 = vsel %vm164_vm6, %v367_v61, %v366_v16  ;;  %8165 = vmatprep.mubr.msk.f32.mxu1 %vm8721_vm0, %v12006_v0  ;;  %v1232_v21 = vsel %vm155_vm3, %v1231_v15, %v1230_v18  ;;  %v1241_v24 = vrot.slane %v9007_v14, 1  ;;  %v373_v29 = vrot.slane %v8990_v58, 7 }
  0x66   :  { %v370_v28 = vsel %vm167_vm7, %v369_v62, %v368_v2  ;;  %v1234_v25 = vsel %vm158_vm4, %v1233_v31, %v1232_v21  ;;  %v9307_v34 = vrot.slane %v9242_v1, 1  ;;  %v1641_v43 = vrot.slane %v8852_v5, 7 }
  0x67   :  { %v372_v30 = vsel %vm169_vm8, %v371_v6, %v370_v28  ;;  %v1236_v37 = vsel %vm161_vm5, %v1235_v19, %v1234_v25  ;;  %v1643_v44 = vrot.slane %v8863_v7, 6  ;;  %v374_v50 = vsel %vm152_vm2, %v373_v29, %v8987_v57  ;;  %v7878_v25 = vld [vmem:[%s11993_s2 + $0x18] sm:$0xf] }
  0x68   :  { %8132 = vmatmul.mubr.msk.f32.gmra.mrb[6].mxu0 %vm214_vm9, %v372_v30  ;;  %v1238_v49 = vsel %vm164_vm6, %v1237_v20, %v1236_v37  ;;  %v1243_v55 = vrot.slane %v9307_v34, 7  ;;  %v1645_v3 = vrot.slane %v8873_v9, 5  ;;  %v1642_v60 = vsel %vm152_vm2, %v1641_v43, %v8847_v4 }
  0x69   :  { %v1240_v56 = vsel %vm167_vm7, %v1239_v22, %v1238_v49  ;;  %8134 = vmatprep.mubr.msk.f32.mxu0 %vm8721_vm0, %v12006_v0  ;;  %v1647_v61 = vrot.slane %v8868_v8, 4  ;;  %v1649_v62 = vrot.slane %v8899_v23, 3  ;;  %v1644_v6 = vsel %vm155_vm3, %v1643_v44, %v1642_v60 }
  0x6a   :  { %v1242_v63 = vsel %vm169_vm8, %v1241_v24, %v1240_v56  ;;  %v1244_v26 = vsel %vm152_vm2, %v1243_v55, %v9133_v59  ;;  %v1651_v10 = vrot.slane %v8919_v35, 2  ;;  %v1646_v27 = vsel %vm158_vm4, %v1645_v3, %v1644_v6  ;;  %v9353_v24 = vld [vmem:[%s11991_s0 + $0x28] sm:$0x3]  ;;  %v7885_v6 = vld [vmem:[%s11993_s2 + $0x1c] sm:$0xf] }
  0x6b   :  { %8166 = vmatmul.mubr.msk.f32.gmra.mrb[16].mxu1 %vm214_vm9, %v1242_v63  ;;  %v2093_v11 = vrot.slane %v8863_v7, 7  ;;  %v2095_v4 = vrot.slane %v8873_v9, 6  ;;  %v2097_v15 = vrot.slane %v8868_v8, 5  ;;  %v1648_v31 = vsel %vm161_vm5, %v1647_v61, %v1646_v27 }
  0x6c   :  { %8135 = vmatmul.mubr.msk.f32.gmra.mrb[8].mxu0 %vm214_vm9, %v374_v50  ;;  %8168 = vmatprep.mubr.msk.f32.mxu1 %vm8721_vm0, %v12006_v0  ;;  %v2099_v16 = vrot.slane %v8899_v23, 4  ;;  %v2101_v18 = vrot.slane %v8919_v35, 3  ;;  %v2103_v19 = vrot.slane %v8924_v36, 2  ;;  %v1650_v20 = vsel %vm164_vm6, %v1649_v62, %v1648_v31 }
  0x6d   :  { %8173 = vmatprep.mubr.msk.f32.mxu0 %vm8721_vm0, %v12006_v0  ;;  %v2094_v2 = vsel %vm152_vm2, %v2093_v11, %v8852_v5  ;;  %v1654_v21 = vrot.slane %v8949_v45, 7  ;;  %v1656_v22 = vrot.slane %v8954_v46, 6  ;;  %v1652_v28 = vsel %vm167_vm7, %v1651_v10, %v1650_v20 }
  0x6e   :  { %v2096_v29 = vsel %vm155_vm3, %v2095_v4, %v2094_v2  ;;  %v1658_v30 = vrot.slane %v8968_v51, 5  ;;  %v1660_v5 = vrot.slane %v8939_v41, 4  ;;  %v1653_v37 = vsel %vm169_vm8, %v8957_v47, %v1652_v28 }
  0x6f   :  { %8169 = vmatmul.mubr.msk.f32.gmra.mrb[18].mxu1 %vm214_vm9, %v1244_v26  ;;  %v2098_v43 = vsel %vm158_vm4, %v2097_v15, %v2096_v29  ;;  %v1655_v44 = vsel %vm152_vm2, %v1654_v21, %v8934_v40  ;;  %v1662_v49 = vrot.slane %v8979_v54, 3  ;;  %v1664_v3 = vrot.slane %v9066_v13, 2 }
  0x70   :  { %8174 = vmatmul.mubr.msk.f32.vlgmr.msra.gmra.mrb[10].mxu0 %vm214_vm9, %v1653_v37  ;;  %8190 = vmatprep.mubr.msk.f32.mxu1 %vm8721_vm0, %v12006_v0  ;;  %v2100_v50 = vsel %vm161_vm5, %v2099_v16, %v2098_v43  ;;  %v1657_v55 = vsel %vm155_vm3, %v1656_v22, %v1655_v44  ;;  %v9376_v56 = vrot.slane %v9353_v24, 1  ;;  %v2106_v62 = vrot.slane %v8954_v46, 7 }
  0x71   :  { %8206 = vmatpush3.msk.msra.mxu0 %vm225_vm1, %v7878_v25  ;;  %v2102_v60 = vsel %vm164_vm6, %v2101_v18, %v2100_v50  ;;  %8176 = vmatprep.mubr.msk.f32.mxu0 %vm8721_vm0, %v12006_v0  ;;  %v1659_v61 = vsel %vm158_vm4, %v1658_v30, %v1657_v55  ;;  %v2108_v63 = vrot.slane %v8968_v51, 6  ;;  %v2110_v27 = vrot.slane %v8939_v41, 5  ;;  %v9426_v50 = vld [vmem:[%s11991_s0 + $0x2a] sm:$0x3] }
  0x72   :  { %v2104_v26 = vsel %vm167_vm7, %v2103_v19, %v2102_v60  ;;  %v1661_v10 = vsel %vm161_vm5, %v1660_v5, %v1659_v61  ;;  %v2112_v11 = vrot.slane %v8979_v54, 4  ;;  %v2107_v31 = vsel %vm152_vm2, %v2106_v62, %v8949_v45 }
  0x73   :  { %v2105_v4 = vsel %vm169_vm8, %v8960_v48, %v2104_v26  ;;  %v1663_v15 = vsel %vm164_vm6, %v1662_v49, %v1661_v10  ;;  %v2114_v16 = vrot.slane %v9066_v13, 3  ;;  %v2109_v19 = vsel %vm155_vm3, %v2108_v63, %v2107_v31 }
  0x74   :  { %8191 = vmatmul.mubr.msk.f32.vlgmr.msra.gmra.mrb[20].mxu1 %vm214_vm9, %v2105_v4  ;;  %v1665_v18 = vsel %vm167_vm7, %v1664_v3, %v1663_v15  ;;  %v2116_v20 = vrot.slane %v9242_v1, 2  ;;  %v1667_v2 = vrot.slane %v9034_v32, 7  ;;  %v2111_v22 = vsel %vm158_vm4, %v2110_v27, %v2109_v19 }
  0x75   :  { %8223 = vmatpush3.msk.msra.mxu1 %vm225_vm1, %v7885_v6  ;;  %v1666_v21 = vsel %vm169_vm8, %v9307_v34, %v1665_v18  ;;  %8193 = vmatprep.mubr.msk.f32.mxu1 %vm8721_vm0, %v12006_v0  ;;  %v1669_v28 = vrot.slane %v9037_v33, 6  ;;  %v1671_v25 = vrot.slane %v9042_v39, 5  ;;  %v2113_v29 = vsel %vm161_vm5, %v2112_v11, %v2111_v22 }
  0x76   :  { %8177 = vmatmul.mubr.msk.f32.gmra.mrb[12].mxu0 %vm214_vm9, %v1666_v21  ;;  %v1668_v32 = vsel %vm152_vm2, %v1667_v2, %v9353_v24  ;;  %v1673_v30 = vrot.slane %v8878_v12, 4  ;;  %v1675_v5 = vrot.slane %v8887_v17, 3  ;;  %v2115_v37 = vsel %vm164_vm6, %v2114_v16, %v2113_v29 }
  0x77   :  { %8179 = vmatprep.mubr.msk.f32.mxu0 %vm8721_vm0, %v12006_v0  ;;  %v1670_v43 = vsel %vm155_vm3, %v1669_v28, %v1668_v32  ;;  %v1677_v44 = vrot.slane %v8928_v38, 2  ;;  %v1679_v49 = vrot.slane %v8942_v42, 1  ;;  %v2117_v55 = vsel %vm167_vm7, %v2116_v20, %v2115_v37 }
  0x78   :  { %v1672_v3 = vsel %vm158_vm4, %v1671_v25, %v1670_v43  ;;  %v2119_v60 = vrot.slane %v9037_v33, 7  ;;  %v2121_v61 = vrot.slane %v9042_v39, 6  ;;  %v2118_v62 = vsel %vm169_vm8, %v9376_v56, %v2117_v55 }
  0x79   :  { %v1674_v63 = vsel %vm161_vm5, %v1673_v30, %v1672_v3  ;;  %v2123_v26 = vrot.slane %v8878_v12, 5  ;;  %v2125_v6 = vrot.slane %v8887_v17, 4  ;;  %8194 = vmatmul.mubr.msk.f32.gmra.mrb[22].mxu1 %vm214_vm9, %v2118_v62  ;;  %v2127_v33 = vrot.slane %v8928_v38, 3 }
  0x7a   :  { %v1676_v10 = vsel %vm164_vm6, %v1675_v5, %v1674_v63  ;;  %v2120_v27 = vsel %vm152_vm2, %v2119_v60, %v9426_v50  ;;  %v2129_v11 = vrot.slane %v8942_v42, 2  ;;  %8196 = vmatprep.mubr.msk.f32.mxu1 %vm8721_vm0, %v12006_v0  ;;  %v2131_v31 = vrot.slane %v8957_v47, 1 }
  0x7b   :  { %v1678_v4 = vsel %vm167_vm7, %v1677_v44, %v1676_v10  ;;  %v2122_v15 = vsel %vm155_vm3, %v2121_v61, %v2120_v27  ;;  %v1681_v16 = vrot.slane %v8960_v48, 7  ;;  %v1683_v20 = vrot.slane %v8971_v52, 6 }
  0x7c   :  { %v1680_v18 = vsel %vm169_vm8, %v1679_v49, %v1678_v4  ;;  %v2124_v19 = vsel %vm158_vm4, %v2123_v26, %v2122_v15  ;;  %v1685_v2 = vrot.slane %v8974_v53, 5  ;;  %v1687_v28 = vrot.slane %v8987_v57, 4 }
  0x7d   :  { %8180 = vmatmul.mubr.msk.f32.gmra.mrb[14].mxu0 %vm214_vm9, %v1680_v18  ;;  %v2126_v21 = vsel %vm161_vm5, %v2125_v6, %v2124_v19  ;;  %v1682_v22 = vsel %vm152_vm2, %v1681_v16, %v8957_v47  ;;  %v1689_v25 = vrot.slane %v8990_v58, 3  ;;  %v1691_v30 = vrot.slane %v9007_v14, 2 }
  0x7e   :  { %v2128_v29 = vsel %vm164_vm6, %v2127_v33, %v2126_v21  ;;  %8182 = vmatprep.mubr.msk.f32.mxu0 %vm8721_vm0, %v12006_v0  ;;  %v1684_v32 = vsel %vm155_vm3, %v1683_v20, %v1682_v22  ;;  %v1693_v5 = vrot.slane %v9133_v59, 1  ;;  %v2133_v44 = vrot.slane %v8971_v52, 7 }
  0x7f   :  { %v2130_v37 = vsel %vm167_vm7, %v2129_v11, %v2128_v29  ;;  %v1686_v43 = vsel %vm158_vm4, %v1685_v2, %v1684_v32  ;;  %v2135_v49 = vrot.slane %v8974_v53, 6  ;;  %v2137_v60 = vrot.slane %v8987_v57, 5 }
  0x80   :  { %v2132_v55 = vsel %vm169_vm8, %v2131_v31, %v2130_v37  ;;  %v1688_v3 = vsel %vm161_vm5, %v1687_v28, %v1686_v43  ;;  %v2139_v61 = vrot.slane %v8990_v58, 4  ;;  %v2134_v63 = vsel %vm152_vm2, %v2133_v44, %v8960_v48 }
  0x81   :  { %8197 = vmatmul.mubr.msk.f32.gmra.mrb[24].mxu1 %vm214_vm9, %v2132_v55  ;;  %v1690_v62 = vsel %vm164_vm6, %v1689_v25, %v1688_v3  ;;  %v2141_v26 = vrot.slane %v9007_v14, 3  ;;  %v2143_v6 = vrot.slane %v9133_v59, 2  ;;  %v2136_v27 = vsel %vm155_vm3, %v2135_v49, %v2134_v63 }
  0x82   :  { %v1692_v10 = vsel %vm167_vm7, %v1691_v30, %v1690_v62  ;;  %8199 = vmatprep.mubr.msk.f32.mxu1 %vm8721_vm0, %v12006_v0  ;;  %v2145_v33 = vrot.slane %v9307_v34, 1  ;;  %v1695_v11 = vrot.slane %v9376_v56, 7  ;;  %v2138_v15 = vsel %vm158_vm4, %v2137_v60, %v2136_v27 }
  0x83   :  { %v1694_v4 = vsel %vm169_vm8, %v1693_v5, %v1692_v10  ;;  %v9488_v31 = vrot.slane %v9426_v50, 1  ;;  %v2545_v16 = vrot.slane %v8873_v9, 7  ;;  %v2140_v18 = vsel %vm161_vm5, %v2139_v61, %v2138_v15 }
  0x84   :  { %8183 = vmatmul.mubr.msk.f32.gmra.mrb[16].mxu0 %vm214_vm9, %v1694_v4  ;;  %v1696_v19 = vsel %vm152_vm2, %v1695_v11, %v9307_v34  ;;  %v2547_v20 = vrot.slane %v8868_v8, 6  ;;  %v2549_v2 = vrot.slane %v8899_v23, 5  ;;  %v2142_v21 = vsel %vm164_vm6, %v2141_v26, %v2140_v18  ;;  %v98_v4 = vld [vmem:[%s11991_s0 + $0x2c] sm:$0x3] }
  0x85   :  { %8185 = vmatprep.mubr.msk.f32.mxu0 %vm8721_vm0, %v12006_v0  ;;  %v2147_v22 = vrot.slane %v9488_v31, 7  ;;  %v2546_v28 = vsel %vm152_vm2, %v2545_v16, %v8863_v7  ;;  %v2551_v25 = vrot.slane %v8919_v35, 4  ;;  %v2144_v29 = vsel %vm167_vm7, %v2143_v6, %v2142_v21 }
  0x86   :  { %v2548_v32 = vsel %vm155_vm3, %v2547_v20, %v2546_v28  ;;  %v2553_v30 = vrot.slane %v8924_v36, 3  ;;  %v2555_v5 = vrot.slane %v8934_v40, 2  ;;  %v2146_v37 = vsel %vm169_vm8, %v2145_v33, %v2144_v29 }
  0x87   :  { %v2148_v43 = vsel %vm152_vm2, %v2147_v22, %v9376_v56  ;;  %v2550_v44 = vsel %vm158_vm4, %v2549_v2, %v2548_v32  ;;  %v2997_v49 = vrot.slane %v8868_v8, 7  ;;  %8200 = vmatmul.mubr.msk.f32.gmra.mrb[26].mxu1 %vm214_vm9, %v2146_v37  ;;  %v2999_v55 = vrot.slane %v8899_v23, 6 }
  0x88   :  { %8186 = vmatmul.mubr.msk.f32.gmra.mrb[18].mxu0 %vm214_vm9, %v1696_v19  ;;  %v2552_v7 = vsel %vm161_vm5, %v2551_v25, %v2550_v44  ;;  %v3001_v3 = vrot.slane %v8919_v35, 5  ;;  %v3003_v60 = vrot.slane %v8924_v36, 4  ;;  %8202 = vmatprep.mubr.msk.f32.mxu1 %vm8721_vm0, %v12006_v0  ;;  %v3005_v62 = vrot.slane %v8934_v40, 3 }
  0x89   :  { %8207 = vmatprep.mubr.msk.f32.mxu0 %vm8721_vm0, %v12006_v0  ;;  %v2554_v8 = vsel %vm164_vm6, %v2553_v30, %v2552_v7  ;;  %v2998_v61 = vsel %vm152_vm2, %v2997_v49, %v8873_v9  ;;  %v3007_v63 = vrot.slane %v8949_v45, 2  ;;  %v2558_v36 = vrot.slane %v8968_v51, 7 }
  0x8a   :  { %v2556_v23 = vsel %vm167_vm7, %v2555_v5, %v2554_v8  ;;  %v3000_v35 = vsel %vm155_vm3, %v2999_v55, %v2998_v61  ;;  %v2560_v26 = vrot.slane %v8939_v41, 6  ;;  %v2562_v27 = vrot.slane %v8979_v54, 5 }
  0x8b   :  { %v2557_v6 = vsel %vm169_vm8, %v8971_v52, %v2556_v23  ;;  %v3002_v10 = vsel %vm158_vm4, %v3001_v3, %v3000_v35  ;;  %v2564_v9 = vrot.slane %v9066_v13, 4  ;;  %8203 = vmatmul.mubr.msk.f32.gmra.mrb[28].mxu1 %vm214_vm9, %v2148_v43  ;;  %v2559_v45 = vsel %vm152_vm2, %v2558_v36, %v8954_v46 }
  0x8c   :  { %8208 = vmatmul.mubr.msk.f32.vlgmr.msra.gmra.mrb[20].mxu0 %vm214_vm9, %v2557_v6  ;;  %v3004_v40 = vsel %vm161_vm5, %v3003_v60, %v3002_v10  ;;  %v2566_v33 = vrot.slane %v9242_v1, 3  ;;  %v2568_v11 = vrot.slane %v9353_v24, 2  ;;  %8224 = vmatprep.mubr.msk.f32.mxu1 %vm8721_vm0, %v12006_v0  ;;  %v2561_v16 = vsel %vm155_vm3, %v2560_v26, %v2559_v45 }
  0x8d   :  { %v3006_v15 = vsel %vm164_vm6, %v3005_v62, %v3004_v40  ;;  %8210 = vmatprep.mubr.msk.f32.mxu0 %vm8721_vm0, %v12006_v0  ;;  %v9553_v18 = vrot.slane %v98_v4, 1  ;;  %v2571_v46 = vrot.slane %v9042_v39, 7  ;;  %v2563_v20 = vsel %vm158_vm4, %v2562_v27, %v2561_v16 }
  0x8e   :  { %v3008_v19 = vsel %vm167_vm7, %v3007_v63, %v3006_v15  ;;  %v2573_v2 = vrot.slane %v8878_v12, 6  ;;  %v3010_v21 = vrot.slane %v8939_v41, 7  ;;  %v2565_v28 = vsel %vm161_vm5, %v2564_v9, %v2563_v20 }
  0x8f   :  { %v3009_v22 = vsel %vm169_vm8, %v8974_v53, %v3008_v19  ;;  %v2572_v25 = vsel %vm152_vm2, %v2571_v46, %v98_v4  ;;  %v3012_v29 = vrot.slane %v8979_v54, 6  ;;  %v2567_v39 = vsel %vm164_vm6, %v2566_v33, %v2565_v28 }
  0x90   :  { %8225 = vmatmul.mubr.msk.f32.vlgmr.msra.gmra.mrb[30].mxu1 %vm214_vm9, %v3009_v22  ;;  %v2574_v32 = vsel %vm155_vm3, %v2573_v2, %v2572_v25  ;;  %v3011_v30 = vsel %vm152_vm2, %v3010_v21, %v8968_v51  ;;  %v3014_v41 = vrot.slane %v9066_v13, 5  ;;  %v2569_v5 = vsel %vm167_vm7, %v2568_v11, %v2567_v39 }
  0x91   :  { %8227 = vmatprep.mubr.msk.f32.mxu1 %vm8721_vm0, %v12006_v0  ;;  %v3013_v37 = vsel %vm155_vm3, %v3012_v29, %v3011_v30  ;;  %v3016_v54 = vrot.slane %v9242_v1, 4  ;;  %v3018_v43 = vrot.slane %v9353_v24, 3  ;;  %v2570_v44 = vsel %vm169_vm8, %v9488_v31, %v2569_v5  ;;  %v9590_v24 = vld [vmem:[%s11991_s0 + $0x2e] sm:$0x3] }
  0x92   :  { %v3015_v49 = vsel %vm158_vm4, %v3014_v41, %v3013_v37  ;;  %v3020_v51 = vrot.slane %v9426_v50, 2  ;;  %v2575_v13 = vrot.slane %v8887_v17, 5  ;;  %8211 = vmatmul.mubr.msk.f32.gmra.mrb[22].mxu0 %vm214_vm9, %v2570_v44  ;;  %v2577_v55 = vrot.slane %v8928_v38, 4 }
  0x93   :  { %v3017_v7 = vsel %vm161_vm5, %v3016_v54, %v3015_v49  ;;  %v2579_v3 = vrot.slane %v8942_v42, 3  ;;  %v2581_v1 = vrot.slane %v8957_v47, 2  ;;  %8213 = vmatprep.mubr.msk.f32.mxu0 %vm8721_vm0, %v12006_v0  ;;  %v2583_v8 = vrot.slane %v8960_v48, 1 }
  0x94   :  { %v3019_v60 = vsel %vm164_vm6, %v3018_v43, %v3017_v7  ;;  %v2576_v50 = vsel %vm158_vm4, %v2575_v13, %v2574_v32  ;;  %v3023_v61 = vrot.slane %v8878_v12, 7  ;;  %v3025_v23 = vrot.slane %v8887_v17, 6  ;;  %v4487_v13 = vld [vmem:[#allocation2 + $0x208] sm:$0xff] }
  0x95   :  { %v3021_v62 = vsel %vm167_vm7, %v3020_v51, %v3019_v60  ;;  %v2578_v63 = vsel %vm161_vm5, %v2577_v55, %v2576_v50  ;;  %v3027_v35 = vrot.slane %v8928_v38, 5  ;;  %v3029_v10 = vrot.slane %v8942_v42, 4  ;;  %v3711_v51 = vld [vmem:[#allocation2 + $0x118] sm:$0xff] }
  0x96   :  { %v3022_v36 = vsel %vm169_vm8, %v9553_v18, %v3021_v62  ;;  %v2580_v26 = vsel %vm164_vm6, %v2579_v3, %v2578_v63  ;;  %v3024_v6 = vsel %vm152_vm2, %v3023_v61, %v9590_v24  ;;  %v3031_v17 = vrot.slane %v8957_v47, 3  ;;  %v4489_v55 = vld [vmem:[#allocation2 + $0x218] sm:$0xff]  ;;  %v3708_v3 = vld [vmem:[#allocation2 + $0x100] sm:$0xff]  ;;  %v4488_v61 = vld [vmem:[#allocation2 + $0x210] sm:$0xff] }
  0x97   :  { %8228 = vmatmul.mubr.msk.f32.gmra.mrb[32].mxu1 %vm214_vm9, %v3022_v36  ;;  %v2582_v12 = vsel %vm167_vm7, %v2581_v1, %v2580_v26  ;;  %v3026_v27 = vsel %vm155_vm3, %v3025_v23, %v3024_v6  ;;  %v3033_v38 = vrot.slane %v8960_v48, 2  ;;  %v3035_v45 = vrot.slane %v8971_v52, 1  ;;  %v3710_v1 = vld [vmem:[#allocation2 + $0x110] sm:$0xff]  ;;  %v4491_v63 = vld [vmem:[#allocation2 + $0x228] sm:$0xff]  ;;  %v3712_v36 = vld [vmem:[#allocation2 + $0x120] sm:$0xff] }
  0x98   :  { %v2584_v9 = vsel %vm169_vm8, %v2583_v8, %v2582_v12  ;;  %8230 = vmatprep.mubr.msk.f32.mxu1 %vm8721_vm0, %v12006_v0  ;;  %v3028_v40 = vsel %vm158_vm4, %v3027_v35, %v3026_v27  ;;  %v2585_v42 = vrot.slane %v8974_v53, 7  ;;  %v2587_v11 = vrot.slane %v8987_v57, 6  ;;  %v4486_v8 = vld [vmem:[#allocation2 + $0x200] sm:$0xff]  ;;  %v4493_v35 = vld [vmem:[#allocation2 + $0x238] sm:$0xff]  ;;  %v3714_v26 = vld [vmem:[#allocation2 + $0x130] sm:$0xff] }
  0x99   :  { %8214 = vmatmul.mubr.msk.f32.gmra.mrb[24].mxu0 %vm214_vm9, %v2584_v9  ;;  %v3030_v33 = vsel %vm161_vm5, %v3029_v10, %v3028_v40  ;;  %v2589_v47 = vrot.slane %v8990_v58, 5  ;;  %v2591_v48 = vrot.slane %v9007_v14, 4  ;;  %v2593_v16 = vrot.slane %v9133_v59, 3  ;;  %v4492_v9 = vld [vmem:[#allocation2 + $0x230] sm:$0xff] }
  0x9a   :  { %v3032_v4 = vsel %vm164_vm6, %v3031_v17, %v3030_v33  ;;  %8216 = vmatprep.mubr.msk.f32.mxu0 %vm8721_vm0, %v12006_v0  ;;  %v2586_v15 = vsel %vm152_vm2, %v2585_v42, %v8971_v52  ;;  %v2595_v46 = vrot.slane %v9307_v34, 2  ;;  %v2597_v2 = vrot.slane %v9376_v56, 1 }
  0x9b   :  { %v3034_v19 = vsel %vm167_vm7, %v3033_v38, %v3032_v4  ;;  %v2588_v20 = vsel %vm155_vm3, %v2587_v11, %v2586_v15  ;;  %v3037_v21 = vrot.slane %v8987_v57, 7  ;;  %v3039_v25 = vrot.slane %v8990_v58, 6  ;;  %v4490_v38 = vld [vmem:[#allocation2 + $0x220] sm:$0xff] }
  0x9c   :  { %v3036_v22 = vsel %vm169_vm8, %v3035_v45, %v3034_v19  ;;  %v2590_v28 = vsel %vm158_vm4, %v2589_v47, %v2588_v20  ;;  %v3041_v52 = vrot.slane %v9007_v14, 5  ;;  %v3043_v32 = vrot.slane %v9133_v59, 4  ;;  %v7893_v47 = vld [vmem:[%s11994_s3] ss:$0 sm:$0xff]  ;;  %s7826_s3 = sshll.u32 %s8724_s19, 4  ;;  %s7827_s3 = int_to_ptr.vmem [resolvable:$true] %s7826_s3 }
  0x9d   :  { %8231 = vmatmul.mubr.msk.f32.gmra.mrb[34].mxu1 %vm214_vm9, %v3036_v22  ;;  %v2592_v29 = vsel %vm161_vm5, %v2591_v48, %v2590_v28  ;;  %v3038_v39 = vsel %vm152_vm2, %v3037_v21, %v8974_v53  ;;  %v3045_v30 = vrot.slane %v9307_v34, 3  ;;  %v3047_v14 = vrot.slane %v9376_v56, 2  ;;  %v7894_v19 = vld [vmem:[%s11995_s4] ss:$0 sm:$0xff]  ;;  %s8686_s4 = scalar_lea.vmem %s7827_s3, 32  ;;  %p8691_p3 = scmp.lt.s32.totalorder %s7827_s3, %s7827_s3 }
  0x9e   :  { %v2594_v57 = vsel %vm164_vm6, %v2593_v16, %v2592_v29  ;;  %8233 = vmatprep.mubr.msk.f32.mxu1 %vm8721_vm0, %v12006_v0  ;;  %v3040_v58 = vsel %vm155_vm3, %v3039_v25, %v3038_v39  ;;  %v3049_v37 = vrot.slane %v9488_v31, 1  ;;  %v2599_v53 = vrot.slane %v9553_v18, 7  ;;  %p8687_p2 = scmp.ne.s32.totalorder %s7827_s3, %s8686_s4  ;;  %p8692_p4 = scmp.lt.s32.totalorder %s8686_s4, %s8686_s4 }
  0x9f   :  { %v2596_v41 = vsel %vm167_vm7, %v2595_v46, %v2594_v57  ;;  %v3042_v5 = vsel %vm158_vm4, %v3041_v52, %v3040_v58  ;;  %v3052_v49 = vsel %vm152_vm2, %v9590_v24, %v9553_v18  ;;  %v8373_v60 = vpack.c.bf16 %v4489_v55, %v4487_v13  ;;  %v3713_v18 = vld [vmem:[#allocation2 + $0x128] sm:$0xff]  ;;  %v3715_v24 = vld [vmem:[#allocation2 + $0x138] sm:$0xff] }
  0xa0   :  { %v2598_v59 = vsel %vm169_vm8, %v2597_v2, %v2596_v41  ;;  %v3044_v34 = vsel %vm161_vm5, %v3043_v32, %v3042_v5  ;;  %v2600_v56 = vsel %vm152_vm2, %v2599_v53, %v9488_v31  ;;  %v3709_v31 = vld [vmem:[#allocation2 + $0x108] sm:$0xff]  ;;  %v8311_v50 = vpack.c.bf16 %v3710_v1, %v3708_v3  ;;  %v3719_v58 = vld [vmem:[#allocation2 + $0x158] sm:$0xff]  ;;  %p8693_p5 = por %p8692_p4, %p8691_p3 }
  0xa1   :  { %8217 = vmatmul.mubr.msk.f32.gmra.mrb[26].mxu0 %vm214_vm9, %v2598_v59  ;;  %v3046_v54 = vsel %vm164_vm6, %v3045_v30, %v3044_v34  ;;  %v8309_v7 = vpack.c.bf16 %v3711_v51, %v3709_v31  ;;  %v8375_v62 = vpack.c.bf16 %v4488_v61, %v4486_v8  ;;  %8374 = vmatprep.subr.bf16.mxu1 %v8373_v60  ;;  %v8722_v6 = vmov 1966171168   ;;  %v3717_v57 = vld [vmem:[#allocation2 + $0x148] sm:$0xff]  ;;  %v4497_v59 = vld [vmem:[#allocation2 + $0x258] sm:$0xff]  ;;  %v3716_v34 = vld [vmem:[#allocation2 + $0x140] sm:$0xff] }
  0xa2   :  { %v3048_v43 = vsel %vm167_vm7, %v3047_v14, %v3046_v54  ;;  %8219 = vmatprep.mubr.msk.f32.mxu0 %vm8721_vm0, %v12006_v0  ;;  %v8313_v23 = vpack.c.bf16 %v3715_v24, %v3713_v18  ;;  %v485_v10 = vunpack.c.l.s4 %v8722_v6  ;;  %v487_v12 = vlaneseq  ;;  %v4495_v14 = vld [vmem:[#allocation2 + $0x248] sm:$0xff]  ;;  %v3718_v54 = vld [vmem:[#allocation2 + $0x150] sm:$0xff]  ;;  %v4494_v31 = vld [vmem:[#allocation2 + $0x240] sm:$0xff]  ;;  %p8694_p6 = pnand %p8693_p5, %p8687_p2 }
  0xa3   :  { %v3050_v44 = vsel %vm169_vm8, %v3049_v37, %v3048_v43  ;;  %8310 = vmatprep.subr.bf16.mxu0 %v8309_v7  ;;  %8376 = vmatpush1.bf16.msra.mxu1 %v8375_v62  ;;  %v8377_v27 = vpack.c.bf16 %v4493_v35, %v4491_v63  ;;  %v8315_v17 = vpack.c.bf16 %v3714_v26, %v3712_v36  ;;  %v4496_v51 = vld [vmem:[#allocation2 + $0x250] sm:$0xff]  ;;  %vm7613_vm10 = vcmask 1042432  }
  0xa4   :  { %8234 = vmatmul.mubr.msk.f32.gmra.mrb[36].mxu1 %vm214_vm9, %v3050_v44  ;;  %8312 = vmatpush1.bf16.msra.mxu0 %v8311_v50  ;;  %v8379_v40 = vpack.c.bf16 %v4492_v9, %v4490_v38  ;;  %v486_v45 = vunpack.c.0.s8 %v485_v10  ;;  %v9674_v42 = vshrl.u32 %v487_v12, 7  ;;  %v3453_v4 = vcombine.high %v7893_v47, %v7893_v47 }
  0xa5   :  { %8220 = vmatmul.mubr.msk.f32.gmra.mrb[28].mxu0 %vm214_vm9, %v2600_v56  ;;  %8236 = vmatprep.mubr.msk.f32.mxu1 %vm8721_vm0, %v12006_v0  ;;  %v3550_v52 = vcombine.high %v7894_v19, %v7894_v19  ;;  %v8317_v53 = vpack.c.bf16 %v3719_v58, %v3717_v57  ;;  %v8381_v7 = vpack.c.bf16 %v4497_v59, %v4495_v14  ;;  %vm7818_vm11 = vcmask 33792  }
  0xa6   :  { %3996 = vmatprep.mubr.f32.mxu0 %v12006_v0  ;;  %8314 = vmatprep.subr.bf16.mxu0 %v8313_v23  ;;  %12082 = vst [vmem:[#allocation11_spill] sm:$0xff] %v9674_v42  ;;  %v9680_v48 = vsub.s32 %v486_v45, %v9674_v42  ;;  %v8319_v55 = vpack.c.bf16 %v3718_v54, %v3716_v34 }
  0xa7   :  { %8378 = vmatprep.subr.bf16.mxu1 %v8377_v27  ;;  %v8383_v3 = vpack.c.bf16 %v4496_v51, %v4494_v31 }
  0xa8   :  { %8237 = vmatmul.mubr.msk.f32.gmra.mrb[38].mxu1 %vm214_vm9, %v3052_v49  ;;  %8316 = vmatpush1.bf16.msra.mxu0 %v8315_v17  ;;  %v3460_v15 = vrot.slane %v7893_v47, %v9680_v48  ;;  %v3467_v2 = vrot.slane %v3453_v4, %v9680_v48  ;;  %v3557_v30 = vrot.slane %v7894_v19, %v9680_v48 }
  0xa9   :  { %4670 = vmatprep.mubr.f32.mxu1 %v12006_v0  ;;  %8380 = vmatpush1.bf16.msra.mxu1 %v8379_v40  ;;  %v3564_v13 = vrot.slane %v3550_v52, %v9680_v48 }
  0xaa   :  { %v3468_v21 = vcombine.high %v3460_v15, %v3460_v15  ;;  %v9693_v32 = vrot.slane %v3460_v15, %v9680_v48  ;;  %v3469_v41 = vcombine.high %v3467_v2, %v3467_v2  ;;  %v9697_v5 = vrot.slane %v3467_v2, %v9680_v48  ;;  %8318 = vmatprep.subr.bf16.mxu0 %v8317_v53 }
  0xab   :  { %v3565_v18 = vcombine.high %v3557_v30, %v3557_v30  ;;  %8382 = vmatprep.subr.bf16.mxu1 %v8381_v7  ;;  %v3566_v12 = vcombine.high %v3564_v13, %v3564_v13  ;;  %v9736_v38 = vrot.slane %v3557_v30, %v9680_v48  ;;  %v9739_v9 = vrot.slane %v3564_v13, %v9680_v48 }
  0xac   :  { %12083 = vst [vmem:[#allocation12_spill] sm:$0xff] %v9693_v32  ;;  %12084 = vst [vmem:[#allocation13_spill] sm:$0xff] %v9697_v5  ;;  %v9700_v37 = vrot.slane %v3468_v21, %v9680_v48  ;;  %v9715_v50 = vcombine.high %v9693_v32, %v9693_v32  ;;  %v9718_v61 = vrot.slane %v3469_v41, %v9680_v48  ;;  %8320 = vmatpush1.bf16.msra.mxu0 %v8319_v55 }
  0xad   :  { %v9722_v62 = vcombine.high %v9697_v5, %v9697_v5  ;;  %8384 = vmatpush1.bf16.msra.mxu1 %v8383_v3  ;;  %12090 = vst [vmem:[#allocation19_spill] sm:$0xff] %v9736_v38  ;;  %12091 = vst [vmem:[#allocation20_spill] sm:$0xff] %v9739_v9  ;;  %v9770_v21 = vrot.slane %v3566_v12, %v9680_v48  ;;  %v9777_v52 = vcombine.high %v9736_v38, %v9736_v38 }
  0xae   :  { %12085 = vst [vmem:[#allocation14_spill] sm:$0xff] %v9700_v37  ;;  %12086 = vst [vmem:[#allocation15_spill] sm:$0xff] %v9715_v50  ;;  %v9732_v10 = vcombine.high %v9700_v37, %v9700_v37 }
  0xaf   :  { %12087 = vst [vmem:[#allocation16_spill] sm:$0xff] %v9718_v61  ;;  %12088 = vst [vmem:[#allocation17_spill] sm:$0xff] %v9722_v62 }
  0xb0   :  { %12089 = vst [vmem:[#allocation18_spill] sm:$0xff] %v9732_v10  ;;  %12093 = vst [vmem:[#allocation22_spill] sm:$0xff] %v9770_v21 }
  0xb1   :  { %12094 = vst [vmem:[#allocation23_spill] sm:$0xff] %v9777_v52 }
 0x10a   :  { %v872_v33 = vpop.f32.mrb[0].mxu1 }
 0x10b   :  { %v8141_v11 = vpop.f32.mrb[1].mxu1  ;;  %v901_v16 = vcombine.high %v872_v33, %v872_v33  ;;  %v908_v46 = vrot.slane %v872_v33, %v9680_v48 }
 0x10c   :  { %v9750_v11 = vrot.slane %v3565_v18, %v9680_v48 }
 0x10d   :  { %v915_v22 = vrot.slane %v901_v16, %v9680_v48  ;;  %v916_v29 = vcombine.high %v908_v46, %v908_v46  ;;  %v9690_v39 = vrot.slane %v908_v46, %v9680_v48 }
 0x10e   :  { %12092 = vst [vmem:[#allocation21_spill] sm:$0xff] %v9750_v11  ;;  %v9790_v14 = vcombine.high %v9750_v11, %v9750_v11 }
 0x10f   :  { %v917_v43 = vcombine.high %v915_v22, %v915_v22  ;;  %v9703_v56 = vrot.slane %v915_v22, %v9680_v48  ;;  %v9709_v1 = vrot.slane %v916_v29, %v9680_v48  ;;  %v946_v60 = vcombine.high %v9690_v39, %v9690_v39 }
 0x110   :  { %v9781_v29 = vcombine.high %v9739_v9, %v9739_v9  ;;  %12096 = vst [vmem:[#allocation25_spill] sm:$0xff] %v9790_v14 }
 0x111   :  { %v9726_v26 = vrot.slane %v917_v43, %v9680_v48  ;;  %v947_v6 = vcombine.high %v9703_v56, %v9703_v56  ;;  %v948_v40 = vcombine.high %v9709_v1, %v9709_v1 }
 0x112   :  { %12095 = vst [vmem:[#allocation24_spill] sm:$0xff] %v9781_v29 }
 0x113   :  { %v877_v20 = vpop.f32.mrb[2].mxu1  ;;  %v949_v46 = vcombine.high %v9726_v26, %v9726_v26 }
 0x114   :  { %v950_v28 = vcombine.high %v877_v20, %v877_v20  ;;  %v8144_v25 = vpop.f32.mrb[3].mxu1  ;;  %v957_v44 = vrot.slane %v877_v20, %v9680_v48 }
 0x116   :  { %v964_v49 = vrot.slane %v950_v28, %v9680_v48  ;;  %v965_v24 = vcombine.high %v957_v44, %v957_v44  ;;  %v9744_v45 = vrot.slane %v957_v44, %v9680_v48 }
 0x118   :  { %v966_v63 = vcombine.high %v964_v49, %v964_v49  ;;  %v9747_v33 = vrot.slane %v964_v49, %v9680_v48  ;;  %v9753_v47 = vrot.slane %v965_v24, %v9680_v48  ;;  %v995_v30 = vcombine.high %v9744_v45, %v9744_v45 }
 0x11a   :  { %v9756_v4 = vrot.slane %v966_v63, %v9680_v48  ;;  %v996_v57 = vcombine.high %v9747_v33, %v9747_v33  ;;  %v997_v41 = vcombine.high %v9753_v47, %v9753_v47 }
 0x11c   :  { %v882_v8 = vpop.f32.mrb[4].mxu1 }
 0x11d   :  { %v999_v23 = vcombine.high %v882_v8, %v882_v8  ;;  %v1006_v35 = vrot.slane %v882_v8, %v9680_v48  ;;  %v8147_v36 = vpop.f32.mrb[5].mxu1 }
 0x11f   :  { %v1013_v27 = vrot.slane %v999_v23, %v9680_v48  ;;  %v1014_v17 = vcombine.high %v1006_v35, %v1006_v35  ;;  %v9759_v16 = vrot.slane %v1006_v35, %v9680_v48 }
 0x121   :  { %v1015_v15 = vcombine.high %v1013_v27, %v1013_v27  ;;  %v9764_v19 = vrot.slane %v1013_v27, %v9680_v48  ;;  %v9767_v20 = vrot.slane %v1014_v17, %v9680_v48 }
 0x122   :  { %v887_v2 = vpop.f32.mrb[6].mxu1 }
 0x123   :  { %v9773_v22 = vrot.slane %v1015_v15, %v9680_v48  ;;  %v1048_v28 = vcombine.high %v887_v2, %v887_v2  ;;  %v8150_v25 = vpop.f32.mrb[7].mxu1  ;;  %v1055_v58 = vrot.slane %v887_v2, %v9680_v48  ;;  %v12099_v52 = vcombine.high %v9764_v19, %v9764_v19 }
 0x125   :  { %v1062_v34 = vrot.slane %v1048_v28, %v9680_v48  ;;  %v1063_v44 = vcombine.high %v1055_v58, %v1055_v58  ;;  %v9804_v49 = vrot.slane %v1055_v58, %v9680_v48 }
 0x126   :  { %v892_v31 = vpop.f32.mrb[8].mxu1  ;;  %v454_v8 = vpop.f32.mrb[0].mxu0 }
 0x127   :  { %v1064_v13 = vcombine.high %v1062_v34, %v1062_v34  ;;  %v9809_v7 = vrot.slane %v1062_v34, %v9680_v48  ;;  %v9812_v55 = vrot.slane %v892_v31, %v9680_v48  ;;  %v8153_v3 = vpop.f32.mrb[9].mxu1  ;;  %v9815_v18 = vrot.slane %v1063_v44, %v9680_v48  ;;  %v8124_v35 = vpop.f32.mrb[1].mxu0 }
 0x128   :  { %v483_v63 = vcombine.high %v454_v8, %v454_v8  ;;  %v490_v23 = vrot.slane %v454_v8, %v9680_v48 }
 0x129   :  { %v9821_v36 = vrot.slane %v1064_v13, %v9680_v48  ;;  %v1104_v27 = vcombine.high %v9812_v55, %v9812_v55 }
 0x12a   :  { %v497_v2 = vrot.slane %v483_v63, %v9680_v48  ;;  %v498_v28 = vcombine.high %v490_v23, %v490_v23  ;;  %v506_v25 = vrot.slane %v490_v23, %v9680_v48  ;;  %v1324_v58 = vpop.f32.mrb[10].mxu1 }
 0x12b   :  { %v9836_v44 = vrot.slane %v1104_v27, %v9680_v48  ;;  %v1353_v31 = vcombine.high %v1324_v58, %v1324_v58  ;;  %v1360_v13 = vrot.slane %v1324_v58, %v9680_v48  ;;  %v8158_v3 = vpop.f32.mrb[11].mxu1 }
 0x12c   :  { %v499_v8 = vcombine.high %v497_v2, %v497_v2  ;;  %v513_v35 = vrot.slane %v497_v2, %v9680_v48  ;;  %v520_v0 = vrot.slane %v498_v28, %v9680_v48  ;;  %v528_v63 = vcombine.high %v506_v25, %v506_v25 }
 0x12d   :  { %v1153_v17 = vadd.f32 %v9690_v39, %v506_v25  ;;  %v1367_v23 = vrot.slane %v1353_v31, %v9680_v48  ;;  %v1368_v15 = vcombine.high %v1360_v13, %v1360_v13  ;;  %v1376_v34 = vrot.slane %v1360_v13, %v9680_v48  ;;  %v459_v12 = vpop.f32.mrb[2].mxu0 }
 0x12e   :  { %v527_v27 = vrot.slane %v499_v8, %v9680_v48  ;;  %v529_v24 = vcombine.high %v513_v35, %v513_v35  ;;  %v530_v51 = vcombine.high %v520_v0, %v520_v0  ;;  %v1154_v58 = vadd.f32 %v9709_v1, %v520_v0  ;;  %v8127_v3 = vpop.f32.mrb[3].mxu0 }
 0x12f   :  { %v1155_v2 = vadd.f32 %v946_v60, %v528_v63  ;;  %v1157_v28 = vadd.f32 %v9703_v56, %v513_v35  ;;  %v1369_v25 = vcombine.high %v1367_v23, %v1367_v23  ;;  %v1383_v31 = vrot.slane %v1367_v23, %v9680_v48 }
 0x130   :  { %v531_v43 = vcombine.high %v527_v27, %v527_v27  ;;  %v1156_v13 = vadd.f32 %v948_v40, %v530_v51  ;;  %v1158_v8 = vadd.f32 %v9726_v26, %v527_v27  ;;  %v1159_v0 = vadd.f32 %v947_v6, %v529_v24  ;;  %v1329_v63 = vpop.f32.mrb[12].mxu1 }
 0x131   :  { %v1390_v3 = vrot.slane %v1368_v15, %v9680_v48  ;;  %v1397_v39 = vrot.slane %v1369_v25, %v9680_v48  ;;  %v1398_v60 = vcombine.high %v1376_v34, %v1376_v34  ;;  %v1399_v35 = vcombine.high %v1383_v31, %v1383_v31  ;;  %v8161_v51 = vpop.f32.mrb[13].mxu1 }
 0x132   :  { %v1160_v23 = vadd.f32 %v949_v46, %v531_v43  ;;  %v9863_v54 = vadd.f32 %v1376_v34, %v1153_v17  ;;  %v9865_v1 = vadd.f32 %v1383_v31, %v1157_v28  ;;  %v532_v40 = vcombine.high %v459_v12, %v459_v12 }
 0x133   :  { %v1400_v27 = vcombine.high %v1390_v3, %v1390_v3  ;;  %v1401_v56 = vcombine.high %v1397_v39, %v1397_v39  ;;  %v9867_v6 = vadd.f32 %v1390_v3, %v1154_v58  ;;  %v9869_v24 = vadd.f32 %v1398_v60, %v1155_v2  ;;  %v464_v15 = vpop.f32.mrb[4].mxu0 }
 0x134   :  { %v9871_v25 = vadd.f32 %v1397_v39, %v1158_v8  ;;  %v9873_v59 = vadd.f32 %v1399_v35, %v1159_v0  ;;  %v539_v26 = vrot.slane %v459_v12, %v9680_v48  ;;  %v546_v46 = vrot.slane %v532_v40, %v9680_v48  ;;  %v8130_v43 = vpop.f32.mrb[5].mxu0 }
 0x135   :  { %v9877_v17 = vadd.f32 %v1400_v27, %v1156_v13  ;;  %v9879_v34 = vadd.f32 %v1401_v56, %v1160_v23  ;;  %v1402_v28 = vcombine.high %v1329_v63, %v1329_v63  ;;  %v1409_v58 = vrot.slane %v1329_v63, %v9680_v48 }
 0x136   :  { %v547_v31 = vcombine.high %v539_v26, %v539_v26  ;;  %v548_v2 = vcombine.high %v546_v46, %v546_v46  ;;  %v555_v3 = vrot.slane %v539_v26, %v9680_v48  ;;  %v562_v8 = vrot.slane %v546_v46, %v9680_v48 }
 0x137   :  { %v1416_v0 = vrot.slane %v1402_v28, %v9680_v48  ;;  %v1417_v39 = vcombine.high %v1409_v58, %v1409_v58  ;;  %v1425_v12 = vrot.slane %v1409_v58, %v9680_v48  ;;  %v581_v60 = vcombine.high %v464_v15, %v464_v15  ;;  %v1334_v35 = vpop.f32.mrb[14].mxu1 }
 0x138   :  { %v569_v13 = vrot.slane %v547_v31, %v9680_v48  ;;  %v576_v23 = vrot.slane %v548_v2, %v9680_v48  ;;  %v577_v40 = vcombine.high %v555_v3, %v555_v3  ;;  %v578_v51 = vcombine.high %v562_v8, %v562_v8  ;;  %v8164_v63 = vpop.f32.mrb[15].mxu1 }
 0x139   :  { %v1161_v27 = vadd.f32 %v9744_v45, %v555_v3  ;;  %v1165_v56 = vadd.f32 %v9747_v33, %v562_v8  ;;  %v1418_v26 = vcombine.high %v1416_v0, %v1416_v0  ;;  %v1432_v46 = vrot.slane %v1416_v0, %v9680_v48 }
 0x13a   :  { %v579_v43 = vcombine.high %v569_v13, %v569_v13  ;;  %v580_v28 = vcombine.high %v576_v23, %v576_v23  ;;  %v1162_v58 = vadd.f32 %v9753_v47, %v569_v13  ;;  %v1163_v31 = vadd.f32 %v995_v30, %v577_v40 }
 0x13b   :  { %v1166_v2 = vadd.f32 %v9756_v4, %v576_v23  ;;  %v1167_v63 = vadd.f32 %v996_v57, %v578_v51  ;;  %v1439_v3 = vrot.slane %v1417_v39, %v9680_v48  ;;  %v1446_v8 = vrot.slane %v1418_v26, %v9680_v48  ;;  %v469_v53 = vpop.f32.mrb[6].mxu0 }
 0x13c   :  { %v1164_v0 = vadd.f32 %v997_v41, %v579_v43  ;;  %v12097_v13 = vcombine.high %v9756_v4, %v9756_v4  ;;  %v1447_v30 = vcombine.high %v1425_v12, %v1425_v12  ;;  %v1448_v40 = vcombine.high %v1432_v46, %v1432_v46  ;;  %v8133_v23 = vpop.f32.mrb[7].mxu0 }
 0x13d   :  { %v1449_v42 = vcombine.high %v1439_v3, %v1439_v3  ;;  %v1450_v14 = vcombine.high %v1446_v8, %v1446_v8  ;;  %v9907_v33 = vadd.f32 %v1425_v12, %v1161_v27  ;;  %v9909_v57 = vadd.f32 %v1439_v3, %v1162_v58 }
 0x13e   :  { %v1168_v45 = vadd.f32 %v12097_v13, %v580_v28  ;;  %v9911_v39 = vadd.f32 %v1447_v30, %v1163_v31  ;;  %v9913_v51 = vadd.f32 %v1432_v46, %v1165_v56  ;;  %v9915_v26 = vadd.f32 %v1446_v8, %v1166_v2  ;;  %v9919_v41 = vpop.f32.mrb[16].mxu1 }
 0x13f   :  { %v9917_v47 = vadd.f32 %v1448_v40, %v1167_v63  ;;  %v9921_v4 = vadd.f32 %v1449_v42, %v1164_v0  ;;  %v588_v28 = vrot.slane %v464_v15, %v9680_v48  ;;  %v595_v12 = vrot.slane %v581_v60, %v9680_v48  ;;  %v8167_v27 = vpop.f32.mrb[17].mxu1  ;;  %v474_v58 = vpop.f32.mrb[8].mxu0 }
 0x140   :  { %v9923_v43 = vadd.f32 %v1450_v14, %v1168_v45  ;;  %v1451_v31 = vcombine.high %v1334_v35, %v1334_v35  ;;  %v1458_v56 = vrot.slane %v1334_v35, %v9680_v48  ;;  %v630_v46 = vcombine.high %v469_v53, %v469_v53  ;;  %v8136_v63 = vpop.f32.mrb[9].mxu0 }
 0x141   :  { %v637_v2 = vrot.slane %v469_v53, %v9680_v48  ;;  %v596_v3 = vcombine.high %v588_v28, %v588_v28  ;;  %v597_v8 = vcombine.high %v595_v12, %v595_v12  ;;  %v604_v42 = vrot.slane %v588_v28, %v9680_v48 }
 0x142   :  { %v611_v14 = vrot.slane %v595_v12, %v9680_v48  ;;  %v1465_v0 = vrot.slane %v1451_v31, %v9680_v48  ;;  %v1466_v15 = vcombine.high %v1458_v56, %v1458_v56  ;;  %v1474_v60 = vrot.slane %v1458_v56, %v9680_v48  ;;  %v1344_v45 = vpop.f32.mrb[18].mxu1 }
 0x143   :  { %v644_v13 = vrot.slane %v630_v46, %v9680_v48  ;;  %v618_v35 = vrot.slane %v596_v3, %v9680_v48  ;;  %v625_v30 = vrot.slane %v597_v8, %v9680_v48  ;;  %v626_v53 = vcombine.high %v604_v42, %v604_v42  ;;  %v8170_v23 = vpop.f32.mrb[19].mxu1  ;;  %v9936_v27 = vpop.f32.mrb[10].mxu0 }
 0x144   :  { %v627_v40 = vcombine.high %v611_v14, %v611_v14  ;;  %v1169_v28 = vadd.f32 %v9759_v16, %v604_v42  ;;  %v1173_v12 = vadd.f32 %v9764_v19, %v611_v14  ;;  %v1467_v31 = vcombine.high %v1465_v0, %v1465_v0  ;;  %v8175_v56 = vpop.f32.mrb[11].mxu0 }
 0x145   :  { %v1481_v63 = vrot.slane %v1465_v0, %v9680_v48  ;;  %v628_v29 = vcombine.high %v618_v35, %v618_v35  ;;  %v629_v46 = vcombine.high %v625_v30, %v625_v30  ;;  %v1170_v21 = vadd.f32 %v9767_v20, %v618_v35 }
 0x146   :  { %v12098_v3 = vcombine.high %v9759_v16, %v9759_v16  ;;  %v1174_v23 = vadd.f32 %v9773_v22, %v625_v30  ;;  %v1175_v42 = vadd.f32 %v12099_v52, %v627_v40  ;;  %v1488_v14 = vrot.slane %v1466_v15, %v9680_v48 }
 0x147   :  { %v1495_v11 = vrot.slane %v1467_v31, %v9680_v48  ;;  %v12100_v0 = vcombine.high %v9767_v20, %v9767_v20  ;;  %v12101_v35 = vcombine.high %v9773_v22, %v9773_v22  ;;  %v1496_v16 = vcombine.high %v1474_v60, %v1474_v60 }
 0x148   :  { %v1171_v8 = vadd.f32 %v12098_v3, %v626_v53  ;;  %v1497_v53 = vcombine.high %v1481_v63, %v1481_v63  ;;  %v9957_v3 = vpop.f32.mrb[20].mxu1  ;;  %v1498_v30 = vcombine.high %v1488_v14, %v1488_v14  ;;  %v9959_v19 = vadd.f32 %v1474_v60, %v1169_v28 }
 0x149   :  { %v1172_v56 = vadd.f32 %v12100_v0, %v628_v29  ;;  %v1176_v10 = vadd.f32 %v12101_v35, %v629_v46  ;;  %v1499_v9 = vcombine.high %v1495_v11, %v1495_v11  ;;  %v9961_v52 = vadd.f32 %v1488_v14, %v1170_v21  ;;  %v8192_v15 = vpop.f32.mrb[21].mxu1  ;;  %v9971_v22 = vpop.f32.mrb[12].mxu0 }
 0x14a   :  { %v9963_v40 = vadd.f32 %v1496_v16, %v1171_v8  ;;  %v9965_v31 = vadd.f32 %v1481_v63, %v1173_v12  ;;  %v9967_v20 = vadd.f32 %v1495_v11, %v1174_v23  ;;  %v9969_v29 = vadd.f32 %v1497_v53, %v1175_v42  ;;  %v8178_v28 = vpop.f32.mrb[13].mxu0 }
 0x14b   :  { %v9973_v46 = vadd.f32 %v1498_v30, %v1172_v56  ;;  %v9975_v0 = vadd.f32 %v1499_v9, %v1176_v10  ;;  %v645_v35 = vcombine.high %v637_v2, %v637_v2  ;;  %v646_v60 = vcombine.high %v644_v13, %v644_v13 }
 0x14c   :  { %v653_v21 = vrot.slane %v637_v2, %v9680_v48  ;;  %v660_v8 = vrot.slane %v644_v13, %v9680_v48  ;;  %v1500_v12 = vcombine.high %v9919_v41, %v9919_v41  ;;  %v1507_v11 = vrot.slane %v9919_v41, %v9680_v48  ;;  %v9989_v56 = vpop.f32.mrb[22].mxu1 }
 0x14d   :  { %v667_v63 = vrot.slane %v645_v35, %v9680_v48  ;;  %v674_v23 = vrot.slane %v646_v60, %v9680_v48  ;;  %v685_v10 = vrot.slane %v474_v58, %v9680_v48  ;;  %v1555_v9 = vrot.slane %v1344_v45, %v9680_v48  ;;  %v8195_v15 = vpop.f32.mrb[23].mxu1 }
 0x14e   :  { %v675_v42 = vcombine.high %v653_v21, %v653_v21  ;;  %v676_v14 = vcombine.high %v660_v8, %v660_v8  ;;  %v1177_v2 = vadd.f32 %v9804_v49, %v653_v21  ;;  %v1181_v13 = vadd.f32 %v9809_v7, %v660_v8 }
 0x14f   :  { %v677_v16 = vcombine.high %v667_v63, %v667_v63  ;;  %v678_v53 = vcombine.high %v674_v23, %v674_v23  ;;  %v1178_v41 = vadd.f32 %v9815_v18, %v667_v63  ;;  %v1182_v30 = vadd.f32 %v9821_v36, %v674_v23 }
 0x150   :  { %v12102_v58 = vcombine.high %v9804_v49, %v9804_v49  ;;  %v12103_v45 = vcombine.high %v9809_v7, %v9809_v7  ;;  %v1514_v28 = vrot.slane %v1500_v12, %v9680_v48  ;;  %v1515_v21 = vcombine.high %v1507_v11, %v1507_v11  ;;  %v10007_v49 = vpop.f32.mrb[14].mxu0 }
 0x151   :  { %v12104_v8 = vcombine.high %v9815_v18, %v9815_v18  ;;  %v12105_v63 = vcombine.high %v9821_v36, %v9821_v36  ;;  %v1523_v15 = vrot.slane %v1507_v11, %v9680_v48  ;;  %v686_v62 = vcombine.high %v685_v10, %v685_v10 }
 0x152   :  { %v1179_v35 = vadd.f32 %v12102_v58, %v675_v42  ;;  %v1183_v60 = vadd.f32 %v12103_v45, %v676_v14  ;;  %v1516_v42 = vcombine.high %v1514_v28, %v1514_v28  ;;  %v1530_v7 = vrot.slane %v1514_v28, %v9680_v48  ;;  %v8181_v58 = vpop.f32.mrb[15].mxu0 }
 0x153   :  { %v1180_v38 = vadd.f32 %v12104_v8, %v677_v16  ;;  %v1184_v23 = vadd.f32 %v12105_v63, %v678_v53  ;;  %v1537_v14 = vrot.slane %v1515_v21, %v9680_v48  ;;  %v693_v12 = vrot.slane %v685_v10, %v9680_v48 }
 0x154   :  { %v1545_v45 = vcombine.high %v1523_v15, %v1523_v15  ;;  %v10012_v18 = vadd.f32 %v1523_v15, %v1177_v2  ;;  %v700_v16 = vrot.slane %v686_v62, %v9680_v48  ;;  %v1556_v36 = vcombine.high %v1555_v9, %v1555_v9  ;;  %v10026_v15 = vpop.f32.mrb[24].mxu1 }
 0x155   :  { %v1544_v53 = vrot.slane %v1516_v42, %v9680_v48  ;;  %v1546_v11 = vcombine.high %v1530_v7, %v1530_v7  ;;  %v1547_v8 = vcombine.high %v1537_v14, %v1537_v14  ;;  %v10016_v63 = vadd.f32 %v1537_v14, %v1178_v41  ;;  %v8198_v41 = vpop.f32.mrb[25].mxu1 }
 0x156   :  { %v10018_v61 = vadd.f32 %v1545_v45, %v1179_v35  ;;  %v10020_v28 = vadd.f32 %v1530_v7, %v1181_v13  ;;  %v12106_v10 = vrot.slane %v9812_v55, %v9680_v48  ;;  %v1186_v2 = vadd.f32 %v9836_v44, %v700_v16 }
 0x157   :  { %v1548_v62 = vcombine.high %v1544_v53, %v1544_v53  ;;  %v10028_v58 = vadd.f32 %v1547_v8, %v1180_v38  ;;  %v10030_v42 = vadd.f32 %v1544_v53, %v1182_v30  ;;  %v10032_v50 = vadd.f32 %v1546_v11, %v1183_v60 }
 0x158   :  { %v1185_v21 = vadd.f32 %v12106_v10, %v693_v12  ;;  %v1563_v35 = vrot.slane %v1555_v9, %v9680_v48  ;;  %v1570_v13 = vrot.slane %v1556_v36, %v9680_v48  ;;  %v1805_v55 = vcombine.high %v9936_v27, %v9936_v27  ;;  %v10048_v9 = vpop.f32.mrb[16].mxu0 }
 0x159   :  { %v1812_v44 = vrot.slane %v9936_v27, %v9680_v48  ;;  %v10040_v7 = vadd.f32 %v1548_v62, %v1184_v23  ;;  %v2257_v38 = vcombine.high %v9957_v3, %v9957_v3  ;;  %v2264_v30 = vrot.slane %v9957_v3, %v9680_v48  ;;  %v8184_v23 = vpop.f32.mrb[17].mxu0 }
 0x15a   :  { %v1854_v60 = vcombine.high %v9971_v22, %v9971_v22  ;;  %v10050_v14 = vadd.f32 %v1563_v35, %v1185_v21  ;;  %v10052_v12 = vadd.f32 %v1570_v13, %v1186_v2  ;;  %v1819_v45 = vrot.slane %v1805_v55, %v9680_v48  ;;  %v10064_v13 = vpop.f32.mrb[26].mxu1 }
 0x15b   :  { %v1820_v27 = vcombine.high %v1812_v44, %v1812_v44  ;;  %v1828_v16 = vrot.slane %v1812_v44, %v9680_v48  ;;  %v2271_v36 = vrot.slane %v2257_v38, %v9680_v48  ;;  %v2272_v53 = vcombine.high %v2264_v30, %v2264_v30  ;;  %v10066_v55 = vpop.f32.mrb[18].mxu0 }
 0x15c   :  { %12107 = vst [vmem:[#allocation26_spill] sm:$0xff] %v10050_v14  ;;  %12108 = vst [vmem:[#allocation27_spill] sm:$0xff] %v10052_v12  ;;  %v2280_v3 = vrot.slane %v2264_v30, %v9680_v48  ;;  %v1821_v11 = vcombine.high %v1819_v45, %v1819_v45  ;;  %v1835_v8 = vrot.slane %v1819_v45, %v9680_v48  ;;  %v8187_v23 = vpop.f32.mrb[19].mxu0 }
 0x15d   :  { %v1842_v10 = vrot.slane %v1820_v27, %v9680_v48  ;;  %v1861_v21 = vrot.slane %v9971_v22, %v9680_v48  ;;  %v1850_v2 = vcombine.high %v1828_v16, %v1828_v16  ;;  %v2057_v62 = vadd.f32 %v1828_v16, %v9863_v54  ;;  %v8201_v27 = vpop.f32.mrb[27].mxu1 }
 0x15e   :  { %v2273_v41 = vcombine.high %v2271_v36, %v2271_v36  ;;  %v2287_v35 = vrot.slane %v2271_v36, %v9680_v48  ;;  %v1849_v44 = vrot.slane %v1821_v11, %v9680_v48  ;;  %v1851_v38 = vcombine.high %v1835_v8, %v1835_v8  ;;  %v10077_v27 = vpop.f32.mrb[28].mxu1 }
 0x15f   :  { %v1852_v30 = vcombine.high %v1842_v10, %v1842_v10  ;;  %v2058_v45 = vadd.f32 %v1842_v10, %v9867_v6  ;;  %v2059_v22 = vadd.f32 %v1850_v2, %v9869_v24  ;;  %v2061_v37 = vadd.f32 %v1835_v8, %v9865_v1  ;;  %v10079_v24 = vpop.f32.mrb[20].mxu0 }
 0x160   :  { %v2294_v54 = vrot.slane %v2272_v53, %v9680_v48  ;;  %v2301_v16 = vrot.slane %v2273_v41, %v9680_v48  ;;  %v1853_v36 = vcombine.high %v1849_v44, %v1849_v44  ;;  %v2062_v32 = vadd.f32 %v1849_v44, %v9871_v25  ;;  %v8209_v25 = vpop.f32.mrb[21].mxu0 }
 0x161   :  { %v2060_v5 = vadd.f32 %v1852_v30, %v9877_v17  ;;  %v2063_v11 = vadd.f32 %v1851_v38, %v9873_v59  ;;  %v2302_v12 = vcombine.high %v2280_v3, %v2280_v3  ;;  %v2303_v14 = vcombine.high %v2287_v35, %v2287_v35  ;;  %v8204_v17 = vpop.f32.mrb[29].mxu1 }
 0x162   :  { %v2304_v6 = vcombine.high %v2294_v54, %v2294_v54  ;;  %v2305_v10 = vcombine.high %v2301_v16, %v2301_v16  ;;  %v2064_v1 = vadd.f32 %v1853_v36, %v9879_v34  ;;  %v10082_v53 = vadd.f32 %v2280_v3, %v2057_v62 }
 0x163   :  { %v10084_v8 = vadd.f32 %v2294_v54, %v2058_v45  ;;  %v10086_v2 = vadd.f32 %v2287_v35, %v2061_v37  ;;  %v10088_v41 = vadd.f32 %v2302_v12, %v2059_v22  ;;  %v10092_v44 = vadd.f32 %v2301_v16, %v2062_v32 }
 0x164   :  { %v10090_v59 = vadd.f32 %v2304_v6, %v2060_v5  ;;  %v10094_v38 = vadd.f32 %v2303_v14, %v2063_v11  ;;  %v10096_v30 = vadd.f32 %v2305_v10, %v2064_v1  ;;  %v1868_v34 = vrot.slane %v1854_v60, %v9680_v48  ;;  %v10108_v14 = vpop.f32.mrb[30].mxu1 }
 0x165   :  { %v1869_v3 = vcombine.high %v1861_v21, %v1861_v21  ;;  %v1877_v62 = vrot.slane %v1861_v21, %v9680_v48  ;;  %v2306_v37 = vcombine.high %v9989_v56, %v9989_v56  ;;  %v2313_v12 = vrot.slane %v9989_v56, %v9680_v48  ;;  %v8226_v23 = vpop.f32.mrb[31].mxu1  ;;  %v10117_v10 = vpop.f32.mrb[22].mxu0 }
 0x166   :  { %v1903_v5 = vcombine.high %v10007_v49, %v10007_v49  ;;  %v1910_v32 = vrot.slane %v10007_v49, %v9680_v48  ;;  %v1870_v35 = vcombine.high %v1868_v34, %v1868_v34  ;;  %v1884_v60 = vrot.slane %v1868_v34, %v9680_v48  ;;  %v8212_v34 = vpop.f32.mrb[23].mxu0 }
 0x167   :  { %v1891_v45 = vrot.slane %v1869_v3, %v9680_v48  ;;  %v1899_v21 = vcombine.high %v1877_v62, %v1877_v62  ;;  %v2065_v22 = vadd.f32 %v1877_v62, %v9907_v33  ;;  %v2320_v54 = vrot.slane %v2306_v37, %v9680_v48 }
 0x168   :  { %v2321_v56 = vcombine.high %v2313_v12, %v2313_v12  ;;  %v2329_v16 = vrot.slane %v2313_v12, %v9680_v48  ;;  %v1898_v36 = vrot.slane %v1870_v35, %v9680_v48  ;;  %v1900_v11 = vcombine.high %v1884_v60, %v1884_v60 }
 0x169   :  { %v1901_v49 = vcombine.high %v1891_v45, %v1891_v45  ;;  %v2066_v6 = vadd.f32 %v1891_v45, %v9909_v57  ;;  %v2067_v1 = vadd.f32 %v1899_v21, %v9911_v39  ;;  %v2069_v17 = vadd.f32 %v1884_v60, %v9913_v51 }
 0x16a   :  { %v2322_v25 = vcombine.high %v2320_v54, %v2320_v54  ;;  %v2336_v33 = vrot.slane %v2320_v54, %v9680_v48  ;;  %v1902_v3 = vcombine.high %v1898_v36, %v1898_v36  ;;  %v2070_v37 = vadd.f32 %v1898_v36, %v9915_v26  ;;  %v10133_v54 = vpop.f32.mrb[32].mxu1 }
 0x16b   :  { %v2068_v62 = vadd.f32 %v1901_v49, %v9921_v4  ;;  %v2071_v12 = vadd.f32 %v1900_v11, %v9917_v47  ;;  %v2343_v35 = vrot.slane %v2321_v56, %v9680_v48  ;;  %v2351_v45 = vcombine.high %v2329_v16, %v2329_v16  ;;  %v8229_v56 = vpop.f32.mrb[33].mxu1 }
 0x16c   :  { %v2350_v57 = vrot.slane %v2322_v25, %v9680_v48  ;;  %v2352_v23 = vcombine.high %v2336_v33, %v2336_v33  ;;  %v2072_v39 = vadd.f32 %v1902_v3, %v9923_v43  ;;  %v10128_v51 = vadd.f32 %v2329_v16, %v2065_v22  ;;  %v10143_v16 = vpop.f32.mrb[24].mxu0 }
 0x16d   :  { %v10130_v60 = vadd.f32 %v2336_v33, %v2069_v17  ;;  %v1917_v21 = vrot.slane %v1903_v5, %v9680_v48  ;;  %v2353_v4 = vcombine.high %v2343_v35, %v2343_v35  ;;  %v10135_v36 = vadd.f32 %v2343_v35, %v2066_v6  ;;  %v8215_v33 = vpop.f32.mrb[25].mxu0 }
 0x16e   :  { %v2354_v26 = vcombine.high %v2350_v57, %v2350_v57  ;;  %v10137_v47 = vadd.f32 %v2351_v45, %v2067_v1  ;;  %v10139_v11 = vadd.f32 %v2350_v57, %v2070_v37  ;;  %v10141_v49 = vadd.f32 %v2352_v23, %v2071_v12 }
 0x16f   :  { %v1918_v43 = vcombine.high %v1910_v32, %v1910_v32  ;;  %v1919_v22 = vcombine.high %v1917_v21, %v1917_v21  ;;  %v10145_v17 = vadd.f32 %v2353_v4, %v2068_v62  ;;  %v1926_v25 = vrot.slane %v1910_v32, %v9680_v48 }
 0x170   :  { %v10147_v5 = vadd.f32 %v2354_v26, %v2072_v39  ;;  %v1933_v6 = vrot.slane %v1917_v21, %v9680_v48  ;;  %v2355_v3 = vcombine.high %v10026_v15, %v10026_v15  ;;  %v2362_v37 = vrot.slane %v10026_v15, %v9680_v48  ;;  %v10161_v21 = vpop.f32.mrb[34].mxu1 }
 0x171   :  { %v1940_v1 = vrot.slane %v1918_v43, %v9680_v48  ;;  %v1947_v34 = vrot.slane %v1919_v22, %v9680_v48  ;;  %v1948_v12 = vcombine.high %v1926_v25, %v1926_v25  ;;  %v2073_v35 = vadd.f32 %v1926_v25, %v9959_v19  ;;  %v8232_v43 = vpop.f32.mrb[35].mxu1 }
 0x172   :  { %v1949_v62 = vcombine.high %v1933_v6, %v1933_v6  ;;  %v2077_v57 = vadd.f32 %v1933_v6, %v9965_v31  ;;  %v2369_v15 = vrot.slane %v2355_v3, %v9680_v48  ;;  %v2370_v56 = vcombine.high %v2362_v37, %v2362_v37 }
 0x173   :  { %v1950_v32 = vcombine.high %v1940_v1, %v1940_v1  ;;  %v1951_v45 = vcombine.high %v1947_v34, %v1947_v34  ;;  %v2074_v23 = vadd.f32 %v1940_v1, %v9961_v52  ;;  %v2078_v39 = vadd.f32 %v1947_v34, %v9967_v20 }
 0x174   :  { %v2075_v4 = vadd.f32 %v1948_v12, %v9963_v40  ;;  %v2079_v26 = vadd.f32 %v1949_v62, %v9969_v29  ;;  %v2378_v22 = vrot.slane %v2362_v37, %v9680_v48  ;;  %v1952_v52 = vcombine.high %v10048_v9, %v10048_v9  ;;  %v10180_v1 = vpop.f32.mrb[26].mxu0 }
 0x175   :  { %v2076_v19 = vadd.f32 %v1950_v32, %v9973_v46  ;;  %v2080_v31 = vadd.f32 %v1951_v45, %v9975_v0  ;;  %v2371_v20 = vcombine.high %v2369_v15, %v2369_v15  ;;  %v2385_v25 = vrot.slane %v2369_v15, %v9680_v48  ;;  %v8218_v62 = vpop.f32.mrb[27].mxu0 }
 0x176   :  { %v2392_v40 = vrot.slane %v2370_v56, %v9680_v48  ;;  %v1959_v29 = vrot.slane %v10048_v9, %v9680_v48  ;;  %v2400_v6 = vcombine.high %v2378_v22, %v2378_v22  ;;  %v10175_v33 = vadd.f32 %v2378_v22, %v2073_v35 }
 0x177   :  { %v1966_v46 = vrot.slane %v1952_v52, %v9680_v48  ;;  %v2404_v0 = vcombine.high %v10064_v13, %v10064_v13  ;;  %v2399_v34 = vrot.slane %v2371_v20, %v9680_v48  ;;  %v2401_v3 = vcombine.high %v2385_v25, %v2385_v25  ;;  %v10195_v52 = vpop.f32.mrb[36].mxu1 }
 0x178   :  { %v2402_v37 = vcombine.high %v2392_v40, %v2392_v40  ;;  %v10183_v12 = vadd.f32 %v2392_v40, %v2074_v23  ;;  %v10185_v32 = vadd.f32 %v2400_v6, %v2075_v4  ;;  %v10187_v9 = vadd.f32 %v2385_v25, %v2077_v57  ;;  %12109 = vst [vmem:[#allocation28_spill] sm:$0xff] %v10195_v52  ;;  %v10201_v25 = vpop.f32.mrb[28].mxu0  ;;  %v8235_v40 = vpop.f32.mrb[37].mxu1 }
 0x179   :  { %v1967_v35 = vcombine.high %v1959_v29, %v1959_v29  ;;  %v1968_v45 = vcombine.high %v1966_v46, %v1966_v46  ;;  %v2403_v15 = vcombine.high %v2399_v34, %v2399_v34  ;;  %v10191_v43 = vadd.f32 %v2399_v34, %v2078_v39  ;;  %12110 = vst [vmem:[#allocation29_spill] sm:$0xff] %v10201_v25 }
 0x17a   :  { %v10189_v56 = vadd.f32 %v2402_v37, %v2076_v19  ;;  %v10193_v22 = vadd.f32 %v2401_v3, %v2079_v26  ;;  %v1975_v20 = vrot.slane %v1959_v29, %v9680_v48  ;;  %v1982_v23 = vrot.slane %v1966_v46, %v9680_v48  ;;  %v8221_v29 = vpop.f32.mrb[29].mxu0 }
 0x17b   :  { %v1989_v4 = vrot.slane %v1967_v35, %v9680_v48  ;;  %v1996_v57 = vrot.slane %v1968_v45, %v9680_v48  ;;  %v10203_v6 = vadd.f32 %v2403_v15, %v2080_v31  ;;  %v2411_v39 = vrot.slane %v10064_v13, %v9680_v48  ;;  %v10214_v15 = vpop.f32.mrb[38].mxu1 }
 0x17c   :  { %v2418_v26 = vrot.slane %v2404_v0, %v9680_v48  ;;  %v2007_v19 = vrot.slane %v10066_v55, %v9680_v48  ;;  %v1997_v34 = vcombine.high %v1975_v20, %v1975_v20  ;;  %v1998_v46 = vcombine.high %v1982_v23, %v1982_v23  ;;  %12111 = vst [vmem:[#allocation30_spill] sm:$0xff] %v10214_v15  ;;  %v8238_v29 = vpop.f32.mrb[39].mxu1  ;;  %v12125_v15 = vld [vmem:[#allocation15_spill] sm:$0xff] }
 0x17d   :  { %v1999_v3 = vcombine.high %v1989_v4, %v1989_v4  ;;  %v2000_v37 = vcombine.high %v1996_v57, %v1996_v57  ;;  %v2081_v62 = vadd.f32 %v1975_v20, %v10012_v18  ;;  %v2082_v35 = vadd.f32 %v1989_v4, %v10016_v63 }
 0x17e   :  { %v2085_v31 = vadd.f32 %v1982_v23, %v10020_v28  ;;  %v2086_v45 = vadd.f32 %v1996_v57, %v10030_v42  ;;  %v2083_v13 = vadd.f32 %v1997_v34, %v10018_v61  ;;  %v2087_v55 = vadd.f32 %v1998_v46, %v10032_v50 }
 0x17f   :  { %v2084_v0 = vadd.f32 %v1999_v3, %v10028_v58  ;;  %v2088_v40 = vadd.f32 %v2000_v37, %v10040_v7  ;;  %v2419_v25 = vcombine.high %v2411_v39, %v2411_v39  ;;  %v2420_v52 = vcombine.high %v2418_v26, %v2418_v26 }
 0x180   :  { %v2427_v18 = vrot.slane %v2411_v39, %v9680_v48  ;;  %v2434_v63 = vrot.slane %v2418_v26, %v9680_v48  ;;  %v2008_v28 = vcombine.high %v2007_v19, %v2007_v19  ;;  %v2015_v42 = vrot.slane %v2007_v19, %v9680_v48  ;;  %v12113_v26 = vld [vmem:[#allocation26_spill] sm:$0xff] }
 0x181   :  { %v2459_v20 = vrot.slane %v10077_v27, %v9680_v48  ;;  %v2709_v61 = vcombine.high %v10079_v24, %v10079_v24  ;;  %v2441_v50 = vrot.slane %v2419_v25, %v9680_v48  ;;  %v2448_v58 = vrot.slane %v2420_v52, %v9680_v48  ;;  %v12117_v52 = vld [vmem:[#allocation27_spill] sm:$0xff] }
 0x182   :  { %v2449_v7 = vcombine.high %v2427_v18, %v2427_v18  ;;  %v2450_v23 = vcombine.high %v2434_v63, %v2434_v63  ;;  %v10229_v4 = vadd.f32 %v2427_v18, %v2081_v62  ;;  %v10231_v57 = vadd.f32 %v2434_v63, %v2085_v31 }
 0x183   :  { %v2022_v39 = vrot.slane %v2008_v28, %v9680_v48  ;;  %v2089_v19 = vadd.f32 %v2015_v42, %v12113_v26  ;;  %v2451_v34 = vcombine.high %v2441_v50, %v2441_v50  ;;  %v2452_v46 = vcombine.high %v2448_v58, %v2448_v58 }
 0x184   :  { %12112 = vst [vmem:[#allocation31_spill] sm:$0xff] %v10231_v57  ;;  %v10235_v27 = vadd.f32 %v2441_v50, %v2082_v35  ;;  %v10237_v3 = vadd.f32 %v2449_v7, %v2083_v13  ;;  %v10239_v37 = vadd.f32 %v2448_v58, %v2086_v45  ;;  %v10241_v25 = vadd.f32 %v2450_v23, %v2087_v55 }
 0x185   :  { %v2090_v29 = vadd.f32 %v2022_v39, %v12117_v52  ;;  %v2460_v62 = vcombine.high %v2459_v20, %v2459_v20  ;;  %v10244_v18 = vadd.f32 %v2451_v34, %v2084_v0  ;;  %v10246_v31 = vadd.f32 %v2452_v46, %v2088_v40 }
 0x186   :  { %12114 = vst [vmem:[#allocation26_spill] sm:$0xff] %v10237_v3  ;;  %12115 = vst [vmem:[#allocation32_spill] sm:$0xff] %v10239_v37  ;;  %v2467_v63 = vrot.slane %v2459_v20, %v9680_v48  ;;  %v2716_v28 = vrot.slane %v10079_v24, %v9680_v48  ;;  %v2723_v13 = vrot.slane %v2709_v61, %v9680_v48 }
 0x187   :  { %12116 = vst [vmem:[#allocation33_spill] sm:$0xff] %v10241_v25  ;;  %12118 = vst [vmem:[#allocation27_spill] sm:$0xff] %v10244_v18  ;;  %v2474_v35 = vrot.slane %v2460_v62, %v9680_v48  ;;  %v3161_v45 = vcombine.high %v10108_v14, %v10108_v14  ;;  %v3168_v55 = vrot.slane %v10108_v14, %v9680_v48 }
 0x188   :  { %12119 = vst [vmem:[#allocation34_spill] sm:$0xff] %v10246_v31  ;;  %v10257_v42 = vadd.f32 %v2467_v63, %v2089_v19  ;;  %v2724_v0 = vcombine.high %v2716_v28, %v2716_v28  ;;  %v2732_v40 = vrot.slane %v2716_v28, %v9680_v48  ;;  %v2758_v20 = vcombine.high %v10117_v10, %v10117_v10 }
 0x189   :  { %v10262_v50 = vadd.f32 %v2474_v35, %v2090_v29  ;;  %v2725_v24 = vcombine.high %v2723_v13, %v2723_v13  ;;  %v2739_v58 = vrot.slane %v2723_v13, %v9680_v48  ;;  %v3175_v61 = vrot.slane %v3161_v45, %v9680_v48 }
 0x18a   :  { %12120 = vst [vmem:[#allocation35_spill] sm:$0xff] %v10257_v42  ;;  %v2746_v7 = vrot.slane %v2724_v0, %v9680_v48  ;;  %v2754_v23 = vcombine.high %v2732_v40, %v2732_v40  ;;  %v2961_v14 = vadd.f32 %v2732_v40, %v10082_v53  ;;  %v3176_v39 = vcombine.high %v3168_v55, %v3168_v55  ;;  %v12124_v42 = vld [vmem:[#allocation14_spill] sm:$0xff] }
 0x18b   :  { %12121 = vst [vmem:[#allocation36_spill] sm:$0xff] %v10262_v50  ;;  %v2753_v26 = vrot.slane %v2725_v24, %v9680_v48  ;;  %v2755_v19 = vcombine.high %v2739_v58, %v2739_v58  ;;  %v2965_v34 = vadd.f32 %v2739_v58, %v10086_v2  ;;  %v3177_v46 = vcombine.high %v3175_v61, %v3175_v61  ;;  %v12123_v50 = vld [vmem:[#allocation13_spill] sm:$0xff] }
 0x18c   :  { %v2756_v52 = vcombine.high %v2746_v7, %v2746_v7  ;;  %v2962_v29 = vadd.f32 %v2746_v7, %v10084_v8  ;;  %v2963_v62 = vadd.f32 %v2754_v23, %v10088_v41  ;;  %v3184_v63 = vrot.slane %v3168_v55, %v9680_v48 }
 0x18d   :  { %v2757_v28 = vcombine.high %v2753_v26, %v2753_v26  ;;  %v2966_v35 = vadd.f32 %v2753_v26, %v10092_v44  ;;  %v2967_v13 = vadd.f32 %v2755_v19, %v10094_v38  ;;  %v3191_v53 = vrot.slane %v3175_v61, %v9680_v48  ;;  %v12122_v19 = vld [vmem:[#allocation12_spill] sm:$0xff] }
 0x18e   :  { %v2964_v45 = vadd.f32 %v2756_v52, %v10090_v59  ;;  %v3198_v0 = vrot.slane %v3176_v39, %v9680_v48  ;;  %v3205_v2 = vrot.slane %v3177_v46, %v9680_v48  ;;  %v3206_v40 = vcombine.high %v3184_v63, %v3184_v63 }
 0x18f   :  { %v2968_v8 = vadd.f32 %v2757_v28, %v10096_v30  ;;  %v3207_v24 = vcombine.high %v3191_v53, %v3191_v53  ;;  %v3413_v41 = vadd.f32 %v3184_v63, %v2961_v14  ;;  %v3417_v58 = vadd.f32 %v3191_v53, %v2965_v34  ;;  %v12126_v30 = vld [vmem:[#allocation16_spill] sm:$0xff]  ;;  %v12127_v14 = vld [vmem:[#allocation17_spill] sm:$0xff]  ;;  %v12128_v63 = vld [vmem:[#allocation19_spill] sm:$0xff] }
 0x190   :  { %v3208_v55 = vcombine.high %v3198_v0, %v3198_v0  ;;  %v3209_v7 = vcombine.high %v3205_v2, %v3205_v2  ;;  %v3414_v23 = vadd.f32 %v3198_v0, %v2962_v29  ;;  %v3415_v44 = vadd.f32 %v3206_v40, %v2963_v62  ;;  %v12129_v29 = vld [vmem:[#allocation20_spill] sm:$0xff]  ;;  %v12131_v0 = vld [vmem:[#allocation21_spill] sm:$0xff]  ;;  %v12132_v40 = vld [vmem:[#allocation23_spill] sm:$0xff] }
 0x191   :  { %v3418_v26 = vadd.f32 %v3205_v2, %v2966_v35  ;;  %v3419_v38 = vadd.f32 %v3207_v24, %v2967_v13  ;;  %v3510_v61 = vmul.f32 %v12122_v19, %v3413_v41  ;;  %v3514_v59 = vmul.f32 %v12123_v50, %v3417_v58  ;;  %v12130_v35 = vld [vmem:[#allocation18_spill] sm:$0xff]  ;;  %v12134_v58 = vld [vmem:[#allocation24_spill] sm:$0xff] }
 0x192   :  { %v3416_v52 = vadd.f32 %v3208_v55, %v2964_v45  ;;  %v3420_v39 = vadd.f32 %v3209_v7, %v2968_v8  ;;  %v3511_v46 = vmul.f32 %v12124_v42, %v3414_v23  ;;  %v3512_v31 = vmul.f32 %v12125_v15, %v3415_v44  ;;  %v12133_v8 = vld [vmem:[#allocation22_spill] sm:$0xff]  ;;  %v12135_v23 = vld [vmem:[#allocation25_spill] sm:$0xff] }
 0x193   :  { %v3515_v28 = vmul.f32 %v12126_v30, %v3418_v26  ;;  %v3516_v34 = vmul.f32 %v12127_v14, %v3419_v38  ;;  %v3607_v53 = vadd.f32 %v12128_v63, %v3510_v61  ;;  %v3611_v62 = vadd.f32 %v12129_v29, %v3514_v59 }
 0x194   :  { %v3513_v13 = vmul.f32 %v12130_v35, %v3416_v52  ;;  %v3608_v2 = vadd.f32 %v12131_v0, %v3511_v46  ;;  %v3609_v24 = vadd.f32 %v12132_v40, %v3512_v31  ;;  %v10293_v45 = vcombine.high %v12126_v30, %v12126_v30 }
 0x195   :  { %v3612_v41 = vadd.f32 %v12133_v8, %v3515_v28  ;;  %v10297_v55 = vadd.f32 %v12134_v58, %v3516_v34  ;;  %v3641_v7 = vmax.f32 %v3607_v53, 0.0  ;;  %v2765_v61 = vrot.slane %v10117_v10, %v9680_v48 }
 0x196   :  { %v3610_v44 = vadd.f32 %v12135_v23, %v3513_v13  ;;  %v3642_v26 = vmax.f32 %v3608_v2, 0.0  ;;  %v3643_v38 = vmax.f32 %v3609_v24, 0.0  ;;  %v3645_v59 = vmax.f32 %v3611_v62, 0.0 }
 0x197   :  { %v3646_v52 = vmax.f32 %v3612_v41, 0.0  ;;  %v12031_v31 = vmax.f32 %v10297_v55, 0.0  ;;  %v2772_v46 = vrot.slane %v2758_v20, %v9680_v48  ;;  %v2773_v34 = vcombine.high %v2765_v61, %v2765_v61 }
 0x198   :  { %v3644_v25 = vmax.f32 %v3610_v44, 0.0  ;;  %v10304_v37 = vcombine.low %v3642_v26, %v3643_v38  ;;  %v10306_v28 = vcombine.low %v3641_v7, %v3642_v26  ;;  %v2781_v10 = vrot.slane %v2765_v61, %v9680_v48 }
 0x199   :  { %v10310_v53 = vcombine.low %v3646_v52, %v12031_v31  ;;  %v4025_v13 = vcombine.low %v3645_v59, %v3646_v52  ;;  %v2774_v2 = vcombine.high %v2772_v46, %v2772_v46  ;;  %v2788_v41 = vrot.slane %v2772_v46, %v9680_v48 }
 0x19a   :  { %12136 = vst [vmem:[#allocation13_spill] sm:$0xff] %v10306_v28  ;;  %v3767_v62 = vcombine.low %v3644_v25, %v3645_v59  ;;  %v4024_v24 = vcombine.low %v3643_v38, %v3644_v25  ;;  %v2795_v20 = vrot.slane %v2773_v34, %v9680_v48  ;;  %v3210_v7 = vcombine.high %v10133_v54, %v10133_v54 }
 0x19b   :  { %12137 = vst [vmem:[#allocation14_spill] sm:$0xff] %v10310_v53  ;;  %v2802_v44 = vrot.slane %v2774_v2, %v9680_v48  ;;  %v3517_v26 = vmul.f32 %v10293_v45, %v3420_v39  ;;  %v2803_v18 = vcombine.high %v2781_v10, %v2781_v10  ;;  %v2969_v31 = vadd.f32 %v2781_v10, %v10128_v51 }
 0x19c   :  { %v10322_v52 = vcombine.high %v12133_v8, %v12133_v8  ;;  %v2804_v61 = vcombine.high %v2788_v41, %v2788_v41  ;;  %v2805_v25 = vcombine.high %v2795_v20, %v2795_v20  ;;  %v2970_v59 = vadd.f32 %v2795_v20, %v10135_v36 }
 0x19d   :  { %v2806_v38 = vcombine.high %v2802_v44, %v2802_v44  ;;  %v2971_v46 = vadd.f32 %v2803_v18, %v10137_v47  ;;  %v2973_v34 = vadd.f32 %v2788_v41, %v10130_v60  ;;  %v2974_v2 = vadd.f32 %v2802_v44, %v10139_v11 }
 0x19e   :  { %12138 = vst [vmem:[#allocation15_spill] sm:$0xff] %v10322_v52  ;;  %v3217_v39 = vrot.slane %v10133_v54, %v9680_v48  ;;  %v2972_v51 = vadd.f32 %v2805_v25, %v10145_v17  ;;  %v2975_v10 = vadd.f32 %v2804_v61, %v10141_v49  ;;  %v3224_v57 = vrot.slane %v3210_v7, %v9680_v48 }
 0x19f   :  { %v2976_v53 = vadd.f32 %v2806_v38, %v10147_v5  ;;  %v3614_v54 = vadd.f32 %v10322_v52, %v3517_v26  ;;  %v2807_v5 = vcombine.high %v10143_v16, %v10143_v16 }
 0x1a0   :  { %v3225_v3 = vcombine.high %v3217_v39, %v3217_v39  ;;  %v3233_v36 = vrot.slane %v3217_v39, %v9680_v48  ;;  %v3226_v20 = vcombine.high %v3224_v57, %v3224_v57  ;;  %v3240_v47 = vrot.slane %v3224_v57, %v9680_v48 }
 0x1a2   :  { %v3247_v60 = vrot.slane %v3225_v3, %v9680_v48  ;;  %v3255_v11 = vcombine.high %v3233_v36, %v3233_v36  ;;  %v3421_v18 = vadd.f32 %v3233_v36, %v2969_v31  ;;  %v3254_v17 = vrot.slane %v3226_v20, %v9680_v48 }
 0x1a3   :  { %v3256_v41 = vcombine.high %v3240_v47, %v3240_v47  ;;  %v3425_v49 = vadd.f32 %v3240_v47, %v2973_v34  ;;  %v3648_v36 = vmax.f32 %v3614_v54, 0.0  ;;  %v4501_v34 = vld [vmem:[#allocation2 + $0x278] sm:$0xff] }
 0x1a4   :  { %v3257_v44 = vcombine.high %v3247_v60, %v3247_v60  ;;  %v3422_v7 = vadd.f32 %v3247_v60, %v2970_v59  ;;  %v3423_v61 = vadd.f32 %v3255_v11, %v2971_v46  ;;  %v3518_v25 = vmul.f32 %v12122_v19, %v3421_v18 }
 0x1a5   :  { %v3258_v38 = vcombine.high %v3254_v17, %v3254_v17  ;;  %v3426_v57 = vadd.f32 %v3254_v17, %v2974_v2  ;;  %v3427_v39 = vadd.f32 %v3256_v41, %v2975_v10  ;;  %v2814_v59 = vrot.slane %v10143_v16, %v9680_v48 }
 0x1a6   :  { %v3424_v3 = vadd.f32 %v3257_v44, %v2972_v51  ;;  %v3519_v31 = vmul.f32 %v12124_v42, %v3422_v7  ;;  %v3615_v26 = vadd.f32 %v12128_v63, %v3518_v25  ;;  %v3522_v46 = vmul.f32 %v12123_v50, %v3425_v49 }
 0x1a7   :  { %v10346_v20 = vadd.f32 %v3258_v38, %v2976_v53  ;;  %v2821_v51 = vrot.slane %v2807_v5, %v9680_v48  ;;  %v10356_v10 = vrot.slane %v3767_v62, %v9680_v48  ;;  %v10361_v53 = vrot.slane %v4025_v13, %v9680_v48 }
 0x1a8   :  { %v10352_v47 = vadd.f32 %v12131_v0, %v3519_v31  ;;  %v3649_v2 = vmax.f32 %v3615_v26, 0.0  ;;  %v3259_v16 = vcombine.high %v10161_v21, %v10161_v21  ;;  %v10366_v11 = vrot.slane %v4024_v24, %v9680_v48 }
 0x1a9   :  { %v3520_v18 = vmul.f32 %v12125_v15, %v3423_v61  ;;  %v3523_v62 = vmul.f32 %v12126_v30, %v3426_v57  ;;  %v3524_v41 = vmul.f32 %v12127_v14, %v3427_v39  ;;  %v12141_v49 = vmax.f32 %v10297_v55, 0.0 }
 0x1aa   :  { %12139 = vst [vmem:[#allocation16_spill] sm:$0xff] %v10352_v47  ;;  %12140 = vst [vmem:[#allocation20_spill] sm:$0xff] %v10366_v11  ;;  %v12032_v54 = vmax.f32 %v10352_v47, 0.0  ;;  %v10370_v17 = vcombine.low %v3648_v36, %v3649_v2  ;;  %v2822_v5 = vcombine.high %v2814_v59, %v2814_v59  ;;  %v3619_v44 = vadd.f32 %v12129_v29, %v3522_v46 }
 0x1ab   :  { %v10376_v13 = vcombine.low %v12141_v49, %v3648_v36  ;;  %v2823_v7 = vcombine.high %v2821_v51, %v2821_v51  ;;  %v2830_v61 = vrot.slane %v2814_v59, %v9680_v48  ;;  %v2837_v25 = vrot.slane %v2821_v51, %v9680_v48  ;;  %v3721_v49 = vld [vmem:[#allocation2 + $0x168] sm:$0xff] }
 0x1ac   :  { %v10381_v24 = vcombine.low %v3649_v2, %v12032_v54  ;;  %v2844_v38 = vrot.slane %v2822_v5, %v9680_v48  ;;  %v3266_v57 = vrot.slane %v10161_v21, %v9680_v48  ;;  %v3273_v55 = vrot.slane %v3259_v16, %v9680_v48  ;;  %v3723_v5 = vld [vmem:[#allocation2 + $0x178] sm:$0xff] }
 0x1ad   :  { %v3521_v39 = vmul.f32 %v12130_v35, %v3424_v3  ;;  %v2851_v31 = vrot.slane %v2823_v7, %v9680_v48  ;;  %v2852_v26 = vcombine.high %v2830_v61, %v2830_v61  ;;  %v2977_v36 = vadd.f32 %v2830_v61, %v10175_v33  ;;  %v4499_v3 = vld [vmem:[#allocation2 + $0x268] sm:$0xff] }
 0x1ae   :  { %v2853_v46 = vcombine.high %v2837_v25, %v2837_v25  ;;  %v2854_v2 = vcombine.high %v2844_v38, %v2844_v38  ;;  %v2978_v59 = vadd.f32 %v2844_v38, %v10183_v12  ;;  %v2981_v51 = vadd.f32 %v2837_v25, %v10187_v9 }
 0x1af   :  { %v2855_v60 = vcombine.high %v2851_v31, %v2851_v31  ;;  %v2979_v21 = vadd.f32 %v2852_v26, %v10185_v32  ;;  %v2982_v16 = vadd.f32 %v2851_v31, %v10191_v43  ;;  %v3274_v54 = vcombine.high %v3266_v57, %v3266_v57 }
 0x1b0   :  { %v2980_v7 = vadd.f32 %v2854_v2, %v10189_v56  ;;  %v2983_v33 = vadd.f32 %v2853_v46, %v10193_v22  ;;  %v3275_v61 = vcombine.high %v3273_v55, %v3273_v55  ;;  %v3282_v28 = vrot.slane %v3266_v57, %v9680_v48 }
 0x1b1   :  { %v2984_v12 = vadd.f32 %v2855_v60, %v10203_v6  ;;  %v3289_v9 = vrot.slane %v3273_v55, %v9680_v48  ;;  %v3296_v25 = vrot.slane %v3274_v54, %v9680_v48  ;;  %v8321_v38 = vpack.c.bf16 %v3723_v5, %v3721_v49 }
 0x1b2   :  { %v3303_v32 = vrot.slane %v3275_v61, %v9680_v48  ;;  %v3304_v43 = vcombine.high %v3282_v28, %v3282_v28  ;;  %v3429_v31 = vadd.f32 %v3282_v28, %v2977_v36  ;;  %v8385_v26 = vpack.c.bf16 %v4501_v34, %v4499_v3  ;;  %v4500_v3 = vld [vmem:[#allocation2 + $0x270] sm:$0xff] }
 0x1b3   :  { %v3305_v47 = vcombine.high %v3289_v9, %v3289_v9  ;;  %v3306_v11 = vcombine.high %v3296_v25, %v3296_v25  ;;  %v3430_v56 = vadd.f32 %v3296_v25, %v2978_v59  ;;  %v3433_v2 = vadd.f32 %v3289_v9, %v2981_v51  ;;  %8322 = vmatprep.subr.bf16.mxu0 %v8321_v38  ;;  %v3720_v59 = vld [vmem:[#allocation2 + $0x160] sm:$0xff]  ;;  %v3727_v9 = vld [vmem:[#allocation2 + $0x198] sm:$0xff] }
 0x1b4   :  { %v10404_v22 = vadd.f32 %v12132_v40, %v3520_v18  ;;  %v3307_v57 = vcombine.high %v3303_v32, %v3303_v32  ;;  %v3431_v6 = vadd.f32 %v3304_v43, %v2979_v21  ;;  %v3434_v60 = vadd.f32 %v3303_v32, %v2982_v16  ;;  %8386 = vmatprep.subr.bf16.mxu1 %v8385_v26  ;;  %v3722_v21 = vld [vmem:[#allocation2 + $0x170] sm:$0xff]  ;;  %v4498_v16 = vld [vmem:[#allocation2 + $0x260] sm:$0xff]  ;;  %v4505_v25 = vld [vmem:[#allocation2 + $0x298] sm:$0xff] }
 0x1b5   :  { %v3432_v55 = vadd.f32 %v3306_v11, %v2980_v7  ;;  %v3435_v54 = vadd.f32 %v3305_v47, %v2983_v33  ;;  %v3526_v46 = vmul.f32 %v12122_v19, %v3429_v31  ;;  %v3527_v49 = vmul.f32 %v12122_v19, %v3430_v56 }
 0x1b6   :  { %v10410_v28 = vmul.f32 %v10293_v45, %v10346_v20  ;;  %v10412_v34 = vadd.f32 %v3307_v57, %v2984_v12  ;;  %v3528_v36 = vmul.f32 %v12124_v42, %v3431_v6  ;;  %v3530_v18 = vmul.f32 %v12130_v35, %v3433_v2  ;;  %v12145_v2 = vld [vmem:[#allocation28_spill] sm:$0xff]  ;;  %v3724_v6 = vld [vmem:[#allocation2 + $0x180] sm:$0xff] }
 0x1b7   :  { %v3620_v51 = vadd.f32 %v12133_v8, %v3523_v62  ;;  %v3621_v11 = vadd.f32 %v12134_v58, %v3524_v41  ;;  %v10418_v47 = vmax.f32 %v3619_v44, 0.0  ;;  %v3531_v5 = vmul.f32 %v12123_v50, %v3434_v60  ;;  %v3725_v41 = vld [vmem:[#allocation2 + $0x188] sm:$0xff]  ;;  %v3726_v60 = vld [vmem:[#allocation2 + $0x190] sm:$0xff]  ;;  %v12151_v58 = vld [vmem:[#allocation34_spill] sm:$0xff] }
 0x1b8   :  { %12142 = vst [vmem:[#allocation18_spill] sm:$0xff] %v10410_v28  ;;  %v10422_v20 = vadd.f32 %v12135_v23, %v3521_v39  ;;  %v10427_v33 = vrot.slane %v10370_v17, %v9680_v48  ;;  %v10431_v62 = vrot.slane %v10381_v24, %v9680_v48  ;;  %v10434_v44 = vmul.f32 %v12125_v15, %v3432_v55  ;;  %v4503_v17 = vld [vmem:[#allocation2 + $0x288] sm:$0xff] }
 0x1b9   :  { %v10437_v61 = vmul.f32 %v12126_v30, %v3435_v54  ;;  %v10440_v39 = vadd.f32 %v12128_v63, %v3526_v46  ;;  %v10443_v12 = vadd.f32 %v12128_v63, %v3527_v49  ;;  %v10446_v38 = vadd.f32 %v12131_v0, %v3528_v36 }
 0x1ba   :  { %v10449_v24 = vadd.f32 %v12135_v23, %v3530_v18  ;;  %v8323_v32 = vpack.c.bf16 %v3722_v21, %v3720_v59  ;;  %v8387_v43 = vpack.c.bf16 %v4500_v3, %v4498_v16  ;;  %v10452_v31 = vadd.f32 %v12129_v29, %v3531_v5 }
 0x1bb   :  { %12143 = vst [vmem:[#allocation21_spill] sm:$0xff] %v10440_v39  ;;  %12144 = vst [vmem:[#allocation23_spill] sm:$0xff] %v10443_v12  ;;  %v2856_v26 = vcombine.high %v10180_v1, %v10180_v1  ;;  %v2863_v56 = vrot.slane %v10180_v1, %v9680_v48  ;;  %v3308_v57 = vcombine.high %v12145_v2, %v12145_v2  ;;  %v10460_v55 = vmax.f32 %v3620_v51, 0.0 }
 0x1bc   :  { %8324 = vmatpush1.bf16.msra.mxu0 %v8323_v32  ;;  %8388 = vmatpush1.bf16.msra.mxu1 %v8387_v43  ;;  %v3315_v54 = vrot.slane %v12145_v2, %v9680_v48  ;;  %v8325_v46 = vpack.c.bf16 %v3727_v9, %v3725_v41  ;;  %v8389_v49 = vpack.c.bf16 %v4505_v25, %v4503_v17  ;;  %v10467_v5 = vmax.f32 %v3621_v11, 0.0 }
 0x1bd   :  { %v2870_v36 = vrot.slane %v2856_v26, %v9680_v48  ;;  %v2871_v18 = vcombine.high %v2863_v56, %v2863_v56  ;;  %v2879_v59 = vrot.slane %v2863_v56, %v9680_v48  ;;  %v3322_v1 = vrot.slane %v3308_v57, %v9680_v48 }
 0x1be   :  { %v3323_v21 = vcombine.high %v3315_v54, %v3315_v54  ;;  %v3331_v51 = vrot.slane %v3315_v54, %v9680_v48  ;;  %8326 = vmatprep.subr.bf16.mxu0 %v8325_v46  ;;  %8390 = vmatprep.subr.bf16.mxu1 %v8389_v49  ;;  %v8327_v16 = vpack.c.bf16 %v3726_v60, %v3724_v6  ;;  %v12146_v6 = vld [vmem:[#allocation26_spill] sm:$0xff]  ;;  %v12147_v54 = vld [vmem:[#allocation31_spill] sm:$0xff] }
 0x1bf   :  { %v2872_v3 = vcombine.high %v2870_v36, %v2870_v36  ;;  %v2886_v32 = vrot.slane %v2870_v36, %v9680_v48  ;;  %v2893_v41 = vrot.slane %v2871_v18, %v9680_v48  ;;  %v2901_v9 = vcombine.high %v2879_v59, %v2879_v59  ;;  %v12148_v18 = vld [vmem:[#allocation27_spill] sm:$0xff] }
 0x1c0   :  { %v2985_v17 = vadd.f32 %v2879_v59, %v10229_v4  ;;  %v3324_v25 = vcombine.high %v3322_v1, %v3322_v1  ;;  %v3338_v43 = vrot.slane %v3322_v1, %v9680_v48  ;;  %v3345_v11 = vrot.slane %v3323_v21, %v9680_v48  ;;  %8328 = vmatpush1.bf16.msra.mxu0 %v8327_v16  ;;  %v12149_v1 = vld [vmem:[#allocation32_spill] sm:$0xff]  ;;  %v12150_v21 = vld [vmem:[#allocation33_spill] sm:$0xff] }
 0x1c1   :  { %v2900_v26 = vrot.slane %v2872_v3, %v9680_v48  ;;  %v2902_v56 = vcombine.high %v2886_v32, %v2886_v32  ;;  %v2903_v2 = vcombine.high %v2893_v41, %v2893_v41  ;;  %v2986_v57 = vadd.f32 %v2893_v41, %v10235_v27 }
 0x1c2   :  { %v2987_v60 = vadd.f32 %v2901_v9, %v12146_v6  ;;  %v2989_v46 = vadd.f32 %v2886_v32, %v12147_v54  ;;  %v3352_v49 = vrot.slane %v3324_v25, %v9680_v48  ;;  %v3353_v36 = vcombine.high %v3331_v51, %v3331_v51 }
 0x1c3   :  { %v2904_v4 = vcombine.high %v2900_v26, %v2900_v26  ;;  %v2988_v59 = vadd.f32 %v2903_v2, %v12148_v18  ;;  %v2990_v7 = vadd.f32 %v2900_v26, %v12149_v1  ;;  %v2991_v16 = vadd.f32 %v2902_v56, %v12150_v21  ;;  %v4502_v18 = vld [vmem:[#allocation2 + $0x280] sm:$0xff]  ;;  %v4504_v26 = vld [vmem:[#allocation2 + $0x290] sm:$0xff]  ;;  %v3733_v21 = vld [vmem:[#allocation2 + $0x1c8] sm:$0xff] }
 0x1c4   :  { %v3354_v39 = vcombine.high %v3338_v43, %v3338_v43  ;;  %v3355_v3 = vcombine.high %v3345_v11, %v3345_v11  ;;  %v3356_v28 = vcombine.high %v3352_v49, %v3352_v49  ;;  %v3437_v12 = vadd.f32 %v3331_v51, %v2985_v17  ;;  %v3729_v17 = vld [vmem:[#allocation2 + $0x1a8] sm:$0xff] }
 0x1c5   :  { %v2992_v27 = vadd.f32 %v2904_v4, %v12151_v58  ;;  %v3438_v41 = vadd.f32 %v3345_v11, %v2986_v57  ;;  %v3439_v9 = vadd.f32 %v3353_v36, %v2987_v60  ;;  %v3441_v6 = vadd.f32 %v3338_v43, %v2989_v46  ;;  %v3731_v11 = vld [vmem:[#allocation2 + $0x1b8] sm:$0xff]  ;;  %v3728_v60 = vld [vmem:[#allocation2 + $0x1a0] sm:$0xff]  ;;  %v3730_v46 = vld [vmem:[#allocation2 + $0x1b0] sm:$0xff] }
 0x1c6   :  { %v10486_v32 = vmul.f32 %v12127_v14, %v10412_v34  ;;  %v3440_v25 = vadd.f32 %v3355_v3, %v2988_v59  ;;  %v3442_v54 = vadd.f32 %v3352_v49, %v2990_v7  ;;  %v3443_v2 = vadd.f32 %v3354_v39, %v2991_v16  ;;  %v4506_v49 = vld [vmem:[#allocation2 + $0x2a0] sm:$0xff]  ;;  %v4508_v59 = vld [vmem:[#allocation2 + $0x2b0] sm:$0xff]  ;;  %v3739_v34 = vld [vmem:[#allocation2 + $0x1f8] sm:$0xff] }
 0x1c7   :  { %v3626_v56 = vadd.f32 %v12132_v40, %v10434_v44  ;;  %v10490_v1 = vadd.f32 %v3356_v28, %v2992_v27  ;;  %v3534_v51 = vmul.f32 %v10293_v45, %v3437_v12  ;;  %v3538_v58 = vmul.f32 %v12130_v35, %v3441_v6  ;;  %v4507_v44 = vld [vmem:[#allocation2 + $0x2a8] sm:$0xff]  ;;  %v4509_v28 = vld [vmem:[#allocation2 + $0x2b8] sm:$0xff] }
 0x1c8   :  { %v10496_v43 = vadd.f32 %v12133_v8, %v10437_v61  ;;  %v10500_v7 = vmax.f32 %v10449_v24, 0.0  ;;  %v3539_v39 = vmul.f32 %v12123_v50, %v3442_v54  ;;  %v10504_v57 = vmax.f32 %v10452_v31, 0.0  ;;  %v12155_v31 = vld [vmem:[#allocation29_spill] sm:$0xff]  ;;  %v12159_v8 = vld [vmem:[#allocation36_spill] sm:$0xff] }
 0x1c9   :  { %12152 = vst [vmem:[#allocation25_spill] sm:$0xff] %v10490_v1  ;;  %v3535_v35 = vmul.f32 %v12122_v19, %v3438_v41  ;;  %v10508_v12 = vadd.f32 %v12135_v23, %v3538_v58  ;;  %v8391_v61 = vpack.c.bf16 %v4504_v26, %v4502_v18  ;;  %v10511_v24 = vmul.f32 %v12124_v42, %v3439_v9  ;;  %v3735_v23 = vld [vmem:[#allocation2 + $0x1d8] sm:$0xff]  ;;  %v3732_v9 = vld [vmem:[#allocation2 + $0x1c0] sm:$0xff]  ;;  %v4512_v26 = vld [vmem:[#allocation2 + $0x2d0] sm:$0xff] }
 0x1ca   :  { %12153 = vst [vmem:[#allocation28_spill] sm:$0xff] %v10504_v57  ;;  %v10514_v50 = vmul.f32 %v12125_v15, %v3440_v25  ;;  %v10517_v36 = vadd.f32 %v12129_v29, %v3539_v39  ;;  %v2911_v4 = vrot.slane %v12155_v31, %v9680_v48  ;;  %v10522_v16 = vmul.f32 %v12126_v30, %v3443_v2  ;;  %v12157_v15 = vld [vmem:[#allocation30_spill] sm:$0xff]  ;;  %v4511_v29 = vld [vmem:[#allocation2 + $0x2c8] sm:$0xff]  ;;  %v3734_v30 = vld [vmem:[#allocation2 + $0x1d0] sm:$0xff] }
 0x1cb   :  { %v10525_v3 = vadd.f32 %v10322_v52, %v3534_v51  ;;  %v12043_v42 = vmax.f32 %v10508_v12, 0.0  ;;  %8392 = vmatpush1.bf16.msra.mxu1 %v8391_v61  ;;  %v3363_v27 = vrot.slane %v12157_v15, %v9680_v48  ;;  %v4513_v41 = vld [vmem:[#allocation2 + $0x2d8] sm:$0xff]  ;;  %v8329_v18 = vpack.c.bf16 %v3731_v11, %v3729_v17  ;;  %v4510_v2 = vld [vmem:[#allocation2 + $0x2c0] sm:$0xff]  ;;  %v3737_v31 = vld [vmem:[#allocation2 + $0x1e8] sm:$0xff] }
 0x1cc   :  { %12154 = vst [vmem:[#allocation26_spill] sm:$0xff] %v10517_v36  ;;  %12156 = vst [vmem:[#allocation31_spill] sm:$0xff] %v10522_v16  ;;  %v12042_v6 = vmax.f32 %v10517_v36, 0.0  ;;  %v2912_v25 = vcombine.high %v2911_v4, %v2911_v4  ;;  %v2919_v54 = vrot.slane %v2911_v4, %v9680_v48  ;;  %v8393_v39 = vpack.c.bf16 %v4509_v28, %v4507_v44  ;;  %v4515_v15 = vld [vmem:[#allocation2 + $0x2e8] sm:$0xff]  ;;  %v4517_v14 = vld [vmem:[#allocation2 + $0x2f8] sm:$0xff] }
 0x1cd   :  { %v3364_v51 = vcombine.high %v3363_v27, %v3363_v27  ;;  %v3371_v58 = vrot.slane %v3363_v27, %v9680_v48  ;;  %v8331_v61 = vpack.c.bf16 %v3730_v46, %v3728_v60  ;;  %v12158_v17 = vld [vmem:[#allocation35_spill] sm:$0xff]  ;;  %8330 = vmatprep.subr.bf16.mxu0 %v8329_v18  ;;  %v8395_v52 = vpack.c.bf16 %v4508_v59, %v4506_v49  ;;  %v3738_v27 = vld [vmem:[#allocation2 + $0x1f0] sm:$0xff]  ;;  %v3678_v59 = vld [vmem:[#allocation2 + $0x18] sm:$0xff] }
 0x1ce   :  { %v10537_v19 = vcombine.low %v12043_v42, %v12042_v6  ;;  %v2926_v4 = vrot.slane %v2912_v25, %v9680_v48  ;;  %v2993_v11 = vadd.f32 %v2919_v54, %v12158_v17  ;;  %v3736_v1 = vld [vmem:[#allocation2 + $0x1e0] sm:$0xff]  ;;  %v10541_v44 = vmax.f32 %v3626_v56, 0.0  ;;  %8394 = vmatprep.subr.bf16.mxu1 %v8393_v39  ;;  %v4516_v6 = vld [vmem:[#allocation2 + $0x2f0] sm:$0xff]  ;;  %v3676_v42 = vld [vmem:[#allocation2 + $0x8] sm:$0xff] }
 0x1cf   :  { %v3378_v28 = vrot.slane %v3364_v51, %v9680_v48  ;;  %8332 = vmatpush1.bf16.msra.mxu0 %v8331_v61  ;;  %v8333_v60 = vpack.c.bf16 %v3735_v23, %v3733_v21  ;;  %v8397_v46 = vpack.c.bf16 %v4513_v41, %v4511_v29  ;;  %v4514_v36 = vld [vmem:[#allocation2 + $0x2e0] sm:$0xff]  ;;  %8396 = vmatpush1.bf16.msra.mxu1 %v8395_v52  ;;  %v4930_v18 = vld [vmem:[#allocation2 + $0x308] sm:$0xff]  ;;  %v4932_v17 = vld [vmem:[#allocation2 + $0x318] sm:$0xff] }
 0x1d0   :  { %v2994_v25 = vadd.f32 %v2926_v4, %v12159_v8  ;;  %v3445_v16 = vadd.f32 %v3371_v58, %v2993_v11  ;;  %v8335_v54 = vpack.c.bf16 %v3734_v30, %v3732_v9  ;;  %v8399_v49 = vpack.c.bf16 %v4512_v26, %v4510_v2  ;;  %v10548_v23 = vld [vmem:[#allocation2] sm:$0xff]  ;;  %v10550_v29 = vld [vmem:[#allocation2 + $0x10] sm:$0xff]  ;;  %v10567_v30 = vld [vmem:[#allocation2 + $0x28] sm:$0xff] }
 0x1d1   :  { %v10546_v56 = vadd.f32 %v12128_v63, %v3535_v35  ;;  %8334 = vmatprep.subr.bf16.mxu0 %v8333_v60  ;;  %8398 = vmatprep.subr.bf16.mxu1 %v8397_v46  ;;  %v8337_v51 = vpack.c.bf16 %v3739_v34, %v3737_v31  ;;  %v8401_v21 = vpack.c.bf16 %v4517_v14, %v4515_v15  ;;  %v10552_v41 = vld [vmem:[#allocation2 + $0x300] sm:$0xff]  ;;  %v3652_v8 = vmax.f32 %v10422_v20, 0.0  ;;  %v10565_v14 = vld [vmem:[#allocation2 + $0x310] sm:$0xff]  ;;  %v10569_v2 = vld [vmem:[#allocation2 + $0x38] sm:$0xff] }
 0x1d2   :  { %v10557_v52 = vadd.f32 %v12131_v0, %v10511_v24  ;;  %v10561_v35 = vadd.f32 %v12132_v40, %v10514_v50  ;;  %v10563_v9 = vadd.f32 %v3378_v28, %v2994_v25  ;;  %v8339_v34 = vpack.c.bf16 %v3738_v27, %v3736_v1  ;;  %v12161_v0 = vld [vmem:[#allocation14_spill] sm:$0xff]  ;;  %v10582_v50 = vld [vmem:[#allocation2 + $0x328] sm:$0xff]  ;;  %v4951_v63 = vld [vmem:[#allocation2 + $0x3b0] sm:$0xff] }
 0x1d3   :  { %v10572_v26 = vmul.f32 %v10293_v45, %v3445_v16  ;;  %8336 = vmatpush1.bf16.msra.mxu0 %v8335_v54  ;;  %v8403_v20 = vpack.c.bf16 %v4516_v6, %v4514_v36  ;;  %v10576_v24 = vrot.slane %v12161_v0, %v9680_v48  ;;  %v12162_v40 = vrot.slane %v10304_v37, %v9680_v48  ;;  %v10584_v58 = vld [vmem:[#allocation2 + $0x338] sm:$0xff]  ;;  %v10586_v39 = vld [vmem:[#allocation2 + $0x20] sm:$0xff]  ;;  %v10592_v6 = vld [vmem:[#allocation2 + $0x30] sm:$0xff] }
 0x1d4   :  { %12160 = vst [vmem:[#allocation27_spill] sm:$0xff] %v10563_v9  ;;  %8400 = vmatpush1.bf16.msra.mxu1 %v8399_v49  ;;  %8338 = vmatprep.subr.bf16.mxu0 %v8337_v51  ;;  %v8341_v45 = vpack.c.bf16 %v3678_v59, %v3676_v42  ;;  %v8405_v16 = vpack.c.bf16 %v4932_v17, %v4930_v18  ;;  %v10594_v61 = vld [vmem:[#allocation2 + $0x320] sm:$0xff]  ;;  %v10596_v37 = vld [vmem:[#allocation2 + $0x330] sm:$0xff]  ;;  %v3663_v31 = vmax.f32 %v10496_v43, 0.0  ;;  %v3666_v18 = vmax.f32 %v10546_v56, 0.0 }
 0x1d5   :  { %v3798_v1 = vcombine.low %v12162_v40, %v10356_v10  ;;  %v10590_v36 = vrot.slane %v10376_v13, %v9680_v48  ;;  %8402 = vmatprep.subr.bf16.mxu1 %v8401_v21  ;;  %v3799_v15 = vcombine.low %v10576_v24, %v10427_v33  ;;  %v8343_v42 = vpack.c.bf16 %v10550_v29, %v10548_v23  ;;  %v12163_v13 = vld [vmem:[#allocation20_spill] sm:$0xff] }
 0x1d6   :  { %v4520_v11 = vcombine.low %v12163_v13, %v10361_v53  ;;  %v8407_v28 = vpack.c.bf16 %v10565_v14, %v10552_v41  ;;  %v8345_v60 = vpack.c.bf16 %v10569_v2, %v10567_v30  ;;  %v8409_v46 = vpack.c.bf16 %v10584_v58, %v10582_v50  ;;  %v12165_v21 = vld [vmem:[#allocation16_spill] sm:$0xff] }
 0x1d7   :  { %v3806_v4 = vrot.slane %v3798_v1, %v9680_v48  ;;  %v4521_v27 = vcombine.low %v10590_v36, %v10431_v62  ;;  %8340 = vmatpush1.bf16.msra.mxu0 %v8339_v34  ;;  %v3813_v25 = vrot.slane %v3799_v15, %v9680_v48  ;;  %v8347_v49 = vpack.c.bf16 %v10592_v6, %v10586_v39  ;;  %v3684_v39 = vld [vmem:[#allocation2 + $0x48] sm:$0xff]  ;;  %v3689_v56 = vld [vmem:[#allocation2 + $0x70] sm:$0xff] }
 0x1d8   :  { %v4528_v54 = vrot.slane %v4520_v11, %v9680_v48  ;;  %v8411_v59 = vpack.c.bf16 %v10596_v37, %v10594_v61  ;;  %8404 = vmatpush1.bf16.msra.mxu1 %v8403_v20  ;;  %8342 = vmatprep.subr.bf16.mxu0 %v8341_v45  ;;  %v12164_v51 = vmax.f32 %v10404_v22, 0.0  ;;  %v12166_v23 = vmax.f32 %v12165_v21, 0.0  ;;  %v4938_v61 = vld [vmem:[#allocation2 + $0x348] sm:$0xff]  ;;  %v4940_v37 = vld [vmem:[#allocation2 + $0x358] sm:$0xff]  ;;  %v4939_v21 = vld [vmem:[#allocation2 + $0x350] sm:$0xff] }
 0x1d9   :  { %v4535_v17 = vrot.slane %v4521_v27, %v9680_v48  ;;  %v3816_v41 = vcombine.low %v3652_v8, %v10418_v47  ;;  %8406 = vmatprep.subr.bf16.mxu1 %v8405_v16  ;;  %v3814_v34 = vcombine.low %v3806_v4, %v3813_v25  ;;  %v12167_v14 = vmax.f32 %v10446_v38, 0.0  ;;  %v3683_v25 = vld [vmem:[#allocation2 + $0x40] sm:$0xff] }
 0x1da   :  { %v3815_v29 = vcombine.low %v12166_v23, %v12164_v51  ;;  %v3818_v2 = vcombine.low %v10541_v44, %v10500_v7  ;;  %v12168_v20 = vmov %v12164_v51  ;;  %v4121_v58 = vcombine.low %v10500_v7, %v10504_v57 }
 0x1db   :  { %v3817_v30 = vcombine.low %v10460_v55, %v12167_v14  ;;  %v4073_v0 = vcombine.low %v12168_v20, %v3652_v8  ;;  %v4536_v40 = vcombine.low %v4528_v54, %v4535_v17  ;;  %v10638_v50 = vrot.slane %v3816_v41, %v9680_v48  ;;  %3997 = vmatmul.mubr.f32.vlgmr.msra.gmra.mrb[30].mxu0 %v3814_v34  ;;  %v3686_v8 = vld [vmem:[#allocation2 + $0x58] sm:$0xff]  ;;  %v3685_v54 = vld [vmem:[#allocation2 + $0x50] sm:$0xff] }
 0x1dc   :  { %v10635_v1 = vrot.slane %v3815_v29, %v9680_v48  ;;  %v3846_v16 = vrot.slane %v3818_v2, %v9680_v48  ;;  %v4537_v22 = vcombine.low %v10418_v47, %v10460_v55  ;;  %v3667_v15 = vmax.f32 %v10557_v52, 0.0  ;;  %8344 = vmatpush1.bf16.msra.mxu0 %v8343_v42  ;;  %v4937_v42 = vld [vmem:[#allocation2 + $0x340] sm:$0xff]  ;;  %v12171_v20 = vld [vmem:[#allocation24_spill] sm:$0xff] }
 0x1dd   :  { %v3839_v45 = vrot.slane %v3817_v30, %v9680_v48  ;;  %v10645_v6 = vrot.slane %v4073_v0, %v9680_v48  ;;  %4671 = vmatmul.mubr.f32.vlgmr.msra.gmra.mrb[40].mxu1 %v4536_v40  ;;  %v10655_v27 = vrot.slane %v4121_v58, %v9680_v48  ;;  %8346 = vmatprep.subr.bf16.mxu0 %v8345_v60  ;;  %v12170_v23 = vmov 0.0  }
 0x1de   :  { %v3847_v4 = vcombine.low %v10635_v1, %v10638_v50  ;;  %8408 = vmatpush1.bf16.msra.mxu1 %v8407_v28  ;;  %v4538_v51 = vcombine.low %v10467_v5, %v10541_v44  ;;  %v10660_v52 = vrot.slane %v4537_v22, %v9680_v48  ;;  %4002 = vmatprep.mubr.f32.mxu0 %v12170_v23  ;;  %v3668_v14 = vmax.f32 %v10561_v35, 0.0 }
 0x1df   :  { %v3848_v17 = vcombine.low %v3839_v45, %v3846_v16  ;;  %8410 = vmatprep.subr.bf16.mxu1 %v8409_v46  ;;  %v8349_v41 = vpack.c.bf16 %v3686_v8, %v3684_v39  ;;  %v8413_v34 = vpack.c.bf16 %v4940_v37, %v4938_v61  ;;  %4676 = vmatprep.mubr.f32.mxu1 %v12170_v23  ;;  %v3665_v58 = vmax.f32 %v10525_v3, 0.0  ;;  %v3688_v37 = vld [vmem:[#allocation2 + $0x68] sm:$0xff]  ;;  %v3690_v3 = vld [vmem:[#allocation2 + $0x78] sm:$0xff] }
 0x1e0   :  { %12169 = vst [vmem:[#allocation32_spill] sm:$0xff] %v10660_v52  ;;  %v3855_v29 = vrot.slane %v3847_v4, %v9680_v48  ;;  %v4552_v60 = vrot.slane %v4538_v51, %v9680_v48  ;;  %v4553_v30 = vcombine.low %v10645_v6, %v10660_v52  ;;  %v8351_v2 = vpack.c.bf16 %v3685_v54, %v3683_v25  ;;  %v3687_v51 = vld [vmem:[#allocation2 + $0x60] sm:$0xff] }
 0x1e1   :  { %v3862_v28 = vrot.slane %v3848_v17, %v9680_v48  ;;  %8348 = vmatpush1.bf16.msra.mxu0 %v8347_v49  ;;  %v8415_v46 = vpack.c.bf16 %v4939_v21, %v4937_v42  ;;  %v3630_v0 = vadd.f32 %v12171_v20, %v10486_v32  ;;  %v3864_v40 = vcombine.low %v10504_v57, %v3663_v31  ;;  %v4944_v17 = vld [vmem:[#allocation2 + $0x378] sm:$0xff]  ;;  %v4949_v52 = vld [vmem:[#allocation2 + $0x3a0] sm:$0xff] }
 0x1e2   :  { %v3866_v35 = vcombine.low %v3666_v18, %v3667_v15  ;;  %8412 = vmatpush1.bf16.msra.mxu1 %v8411_v59  ;;  %v4554_v45 = vcombine.low %v4552_v60, %v10655_v27  ;;  %v4561_v16 = vrot.slane %v4553_v30, %v9680_v48  ;;  %8350 = vmatprep.subr.bf16.mxu0 %v8349_v41  ;;  %v12172_v32 = vmax.f32 %v10508_v12, 0.0  ;;  %v4942_v12 = vld [vmem:[#allocation2 + $0x368] sm:$0xff]  ;;  %v3694_v60 = vld [vmem:[#allocation2 + $0x98] sm:$0xff] }
 0x1e3   :  { %v3863_v39 = vcombine.low %v3855_v29, %v3862_v28  ;;  %8414 = vmatprep.subr.bf16.mxu1 %v8413_v34  ;;  %v3664_v49 = vmax.f32 %v3630_v0, 0.0  ;;  %v10683_v8 = vrot.slane %v3864_v40, %v9680_v48  ;;  %v4123_v4 = vcombine.low %v3665_v58, %v3666_v18  ;;  %v4941_v18 = vld [vmem:[#allocation2 + $0x360] sm:$0xff]  ;;  %v3692_v28 = vld [vmem:[#allocation2 + $0x88] sm:$0xff]  ;;  %v4948_v0 = vld [vmem:[#allocation2 + $0x398] sm:$0xff] }
 0x1e4   :  { %v3867_v22 = vcombine.low %v3668_v14, %v12172_v32  ;;  %v10686_v61 = vrot.slane %v3866_v35, %v9680_v48  ;;  %v4568_v59 = vrot.slane %v4554_v45, %v9680_v48  ;;  %v4124_v25 = vcombine.low %v3667_v15, %v3668_v14  ;;  %v4943_v15 = vld [vmem:[#allocation2 + $0x370] sm:$0xff]  ;;  %v3691_v40 = vld [vmem:[#allocation2 + $0x80] sm:$0xff] }
 0x1e5   :  { %4003 = vmatmul.mubr.f32.gmra.mrb[32].mxu0 %v3863_v39  ;;  %v10693_v54 = vrot.slane %v10537_v19, %v9680_v48  ;;  %v3865_v42 = vcombine.low %v3664_v49, %v3665_v58  ;;  %v4122_v29 = vcombine.low %v3663_v31, %v3664_v49  ;;  %v10702_v19 = vrot.slane %v4123_v4, %v9680_v48  ;;  %v3693_v45 = vld [vmem:[#allocation2 + $0x90] sm:$0xff]  ;;  %v4950_v4 = vld [vmem:[#allocation2 + $0x3a8] sm:$0xff] }
 0x1e6   :  { %8352 = vmatpush1.bf16.msra.mxu0 %v8351_v2  ;;  %4008 = vmatprep.mubr.f32.mxu0 %v12170_v23  ;;  %v10697_v21 = vrot.slane %v3867_v22, %v9680_v48  ;;  %v4569_v41 = vcombine.low %v4561_v16, %v4568_v59  ;;  %v10705_v34 = vrot.slane %v4124_v25, %v9680_v48  ;;  %v4945_v16 = vld [vmem:[#allocation2 + $0x380] sm:$0xff]  ;;  %v4947_v49 = vld [vmem:[#allocation2 + $0x390] sm:$0xff]  ;;  %v3698_v59 = vld [vmem:[#allocation2 + $0xb8] sm:$0xff] }
 0x1e7   :  { %12173 = vst [vmem:[#allocation33_spill] sm:$0xff] %v10693_v54  ;;  %8416 = vmatpush1.bf16.msra.mxu1 %v8415_v46  ;;  %v8353_v14 = vpack.c.bf16 %v3690_v3, %v3688_v37  ;;  %v10708_v30 = vrot.slane %v3865_v42, %v9680_v48  ;;  %v10713_v31 = vrot.slane %v4122_v29, %v9680_v48  ;;  %v4946_v46 = vld [vmem:[#allocation2 + $0x388] sm:$0xff]  ;;  %v12176_v42 = vld [vmem:[#allocation25_spill] sm:$0xff] }
 0x1e8   :  { %v3897_v43 = vcombine.low %v10686_v61, %v10697_v21  ;;  %v8417_v2 = vpack.c.bf16 %v4944_v17, %v4942_v12  ;;  %4677 = vmatmul.mubr.f32.gmra.mrb[42].mxu1 %v4569_v41  ;;  %v4571_v35 = vcombine.low %v10705_v34, %v10693_v54  ;;  %v8355_v58 = vpack.c.bf16 %v3689_v56, %v3687_v51  ;;  %v3696_v3 = vld [vmem:[#allocation2 + $0xa8] sm:$0xff]  ;;  %v12175_v17 = vld [vmem:[#allocation22_spill] sm:$0xff]  ;;  %v12177_v29 = vld [vmem:[#allocation17_spill] sm:$0xff] }
 0x1e9   :  { %8354 = vmatprep.subr.bf16.mxu0 %v8353_v14  ;;  %v8419_v39 = vpack.c.bf16 %v4943_v15, %v4941_v18  ;;  %4682 = vmatprep.mubr.f32.mxu1 %v12170_v23  ;;  %v3896_v32 = vcombine.low %v10683_v8, %v10708_v30  ;;  %v4570_v37 = vcombine.low %v10713_v31, %v10702_v19  ;;  %v12174_v12 = vld [vmem:[#allocation31_spill] sm:$0xff]  ;;  %v4952_v18 = vld [vmem:[#allocation2 + $0x3b8] sm:$0xff]  ;;  %v3697_v41 = vld [vmem:[#allocation2 + $0xb0] sm:$0xff] }
 0x1ea   :  { %v3911_v22 = vrot.slane %v3897_v43, %v9680_v48  ;;  %8418 = vmatprep.subr.bf16.mxu1 %v8417_v2  ;;  %v4585_v25 = vrot.slane %v4571_v35, %v9680_v48  ;;  %8356 = vmatpush1.bf16.msra.mxu0 %v8355_v58  ;;  %v3637_v51 = vadd.f32 %v12175_v17, %v12174_v12  ;;  %v3695_v15 = vld [vmem:[#allocation2 + $0xa0] sm:$0xff]  ;;  %v3700_v35 = vld [vmem:[#allocation2 + $0xc8] sm:$0xff]  ;;  %v3702_v54 = vld [vmem:[#allocation2 + $0xd8] sm:$0xff] }
 0x1eb   :  { %8420 = vmatpush1.bf16.msra.mxu1 %v8419_v39  ;;  %v3541_v56 = vmul.f32 %v12177_v29, %v12176_v42  ;;  %v3904_v14 = vrot.slane %v3896_v32, %v9680_v48  ;;  %v4578_v43 = vrot.slane %v4570_v37, %v9680_v48  ;;  %v8357_v2 = vpack.c.bf16 %v3694_v60, %v3692_v28  ;;  %v4954_v42 = vld [vmem:[#allocation2 + $0x3c8] sm:$0xff]  ;;  %v4956_v29 = vld [vmem:[#allocation2 + $0x3d8] sm:$0xff]  ;;  %v3699_v37 = vld [vmem:[#allocation2 + $0xc0] sm:$0xff] }
 0x1ec   :  { %v8421_v11 = vpack.c.bf16 %v4948_v0, %v4946_v46  ;;  %v3671_v58 = vmax.f32 %v3637_v51, 0.0  ;;  %v8359_v12 = vpack.c.bf16 %v3693_v45, %v3691_v40  ;;  %v8423_v17 = vpack.c.bf16 %v4947_v49, %v4945_v16  ;;  %v3701_v28 = vld [vmem:[#allocation2 + $0xd0] sm:$0xff]  ;;  %v10733_v60 = vld [vmem:[#allocation2 + $0x3c0] sm:$0xff]  ;;  %v3704_v49 = vld [vmem:[#allocation2 + $0xe8] sm:$0xff] }
 0x1ed   :  { %v10731_v39 = vadd.f32 %v12171_v20, %v3541_v56  ;;  %v3912_v57 = vcombine.low %v3904_v14, %v3911_v22  ;;  %v4586_v9 = vcombine.low %v4578_v43, %v4585_v25  ;;  %8358 = vmatprep.subr.bf16.mxu0 %v8357_v2  ;;  %v8361_v32 = vpack.c.bf16 %v3698_v59, %v3696_v3  ;;  %v12178_v46 = vld [vmem:[#allocation26_spill] sm:$0xff]  ;;  %v4955_v16 = vld [vmem:[#allocation2 + $0x3d0] sm:$0xff]  ;;  %v4958_v25 = vld [vmem:[#allocation2 + $0x3e8] sm:$0xff] }
 0x1ee   :  { %8422 = vmatprep.subr.bf16.mxu1 %v8421_v11  ;;  %v12179_v0 = vmax.f32 %v12178_v46, 0.0  ;;  %8360 = vmatpush1.bf16.msra.mxu0 %v8359_v12  ;;  %v8425_v40 = vpack.c.bf16 %v4952_v18, %v4950_v4  ;;  %v8363_v45 = vpack.c.bf16 %v3697_v41, %v3695_v15  ;;  %v3706_v22 = vld [vmem:[#allocation2 + $0xf8] sm:$0xff]  ;;  %v8427_v11 = vpack.c.bf16 %v4951_v63, %v4949_v52  ;;  %v12180_v14 = vld [vmem:[#allocation15_spill] sm:$0xff]  ;;  %v3705_v63 = vld [vmem:[#allocation2 + $0xf0] sm:$0xff] }
 0x1ef   :  { %v3672_v20 = vmax.f32 %v10731_v39, 0.0  ;;  %8424 = vmatpush1.bf16.msra.mxu1 %v8423_v17  ;;  %4009 = vmatmul.mubr.f32.gmra.mrb[34].mxu0 %v3912_v57  ;;  %v8365_v3 = vpack.c.bf16 %v3702_v54, %v3700_v35  ;;  %v8429_v59 = vpack.c.bf16 %v4956_v29, %v4954_v42  ;;  %v4960_v56 = vld [vmem:[#allocation2 + $0x3f8] sm:$0xff]  ;;  %v10740_v43 = vadd.f32 %v12180_v14, %v10572_v26  ;;  %v12181_v52 = vld [vmem:[#allocation23_spill] sm:$0xff]  ;;  %v4959_v2 = vld [vmem:[#allocation2 + $0x3f0] sm:$0xff] }
 0x1f0   :  { %v3913_v51 = vcombine.low %v12179_v0, %v3671_v58  ;;  %4683 = vmatmul.mubr.f32.gmra.mrb[44].mxu1 %v4586_v9  ;;  %4014 = vmatprep.mubr.f32.mxu0 %v12170_v23  ;;  %v3703_v9 = vld [vmem:[#allocation2 + $0xe0] sm:$0xff]  ;;  %v3658_v54 = vmax.f32 %v12181_v52, 0.0  ;;  %v8367_v18 = vpack.c.bf16 %v3701_v28, %v3699_v37  ;;  %v8431_v26 = vpack.c.bf16 %v4955_v16, %v10733_v60  ;;  %v5373_v17 = vld [vmem:[#allocation2 + $0x408] sm:$0xff]  ;;  %v5375_v42 = vld [vmem:[#allocation2 + $0x418] sm:$0xff] }
 0x1f1   :  { %4688 = vmatprep.mubr.f32.mxu1 %v12170_v23  ;;  %v4587_v57 = vcombine.low %v3671_v58, %v3672_v20  ;;  %8362 = vmatprep.subr.bf16.mxu0 %v8361_v32  ;;  %v8369_v15 = vpack.c.bf16 %v3706_v22, %v3704_v49  ;;  %v4957_v41 = vld [vmem:[#allocation2 + $0x3e0] sm:$0xff]  ;;  %v8433_v58 = vpack.c.bf16 %v4960_v56, %v4958_v25  ;;  %v12182_v32 = vld [vmem:[#allocation13_spill] sm:$0xff] }
 0x1f2   :  { %v10745_v4 = vrot.slane %v3913_v51, %v9680_v48  ;;  %8426 = vmatprep.subr.bf16.mxu1 %v8425_v40  ;;  %8364 = vmatpush1.bf16.msra.mxu0 %v8363_v45  ;;  %v8371_v29 = vpack.c.bf16 %v3705_v63, %v3703_v9  ;;  %v12183_v37 = vrot.slane %v12182_v32, %v9680_v48  ;;  %v12186_v25 = vld [vmem:[#allocation18_spill] sm:$0xff] }
 0x1f3   :  { %v10754_v12 = vrot.slane %v4587_v57, %v9680_v48  ;;  %8428 = vmatpush1.bf16.msra.mxu1 %v8427_v11  ;;  %8366 = vmatprep.subr.bf16.mxu0 %v8365_v3  ;;  %v4056_v60 = vcombine.low %v10361_v53, %v10590_v36  ;;  %v8435_v0 = vpack.c.bf16 %v4959_v2, %v4957_v41  ;;  %v5372_v36 = vld [vmem:[#allocation2 + $0x400] sm:$0xff]  ;;  %v5377_v11 = vld [vmem:[#allocation2 + $0x428] sm:$0xff]  ;;  %v5379_v3 = vld [vmem:[#allocation2 + $0x438] sm:$0xff] }
 0x1f4   :  { %v3927_v35 = vrot.slane %v10745_v4, %v9680_v48  ;;  %8430 = vmatprep.subr.bf16.mxu1 %v8429_v59  ;;  %v4055_v28 = vcombine.low %v12183_v37, %v12163_v13  ;;  %v4963_v51 = vcombine.low %v10356_v10, %v10576_v24  ;;  %v12184_v40 = vcombine.low %v10427_v33, %v10635_v1  ;;  %v5374_v24 = vld [vmem:[#allocation2 + $0x410] sm:$0xff] }
 0x1f5   :  { %v4601_v46 = vrot.slane %v10754_v12, %v9680_v48  ;;  %v10773_v16 = vrot.slane %v4056_v60, %v9680_v48  ;;  %v8437_v53 = vpack.c.bf16 %v5375_v42, %v5373_v17  ;;  %v4074_v49 = vcombine.low %v10418_v47, %v3658_v54  ;;  %v5376_v54 = vld [vmem:[#allocation2 + $0x420] sm:$0xff]  ;;  %v5382_v60 = vld [vmem:[#allocation2 + $0x450] sm:$0xff] }
 0x1f6   :  { %4015 = vmatmul.mubr.f32.gmra.mrb[36].mxu0 %v3927_v35  ;;  %v4978_v45 = vrot.slane %v12184_v40, %v9680_v48  ;;  %v4063_v13 = vrot.slane %v4055_v28, %v9680_v48  ;;  %v4971_v10 = vrot.slane %v4963_v51, %v9680_v48  ;;  %v12185_v33 = vmax.f32 %v10446_v38, 0.0  ;;  %v5380_v28 = vld [vmem:[#allocation2 + $0x440] sm:$0xff]  ;;  %v5387_v51 = vld [vmem:[#allocation2 + $0x478] sm:$0xff] }
 0x1f7   :  { %4253 = vmatprep.mubr.f32.mxu0 %v12170_v23  ;;  %4689 = vmatmul.mubr.f32.gmra.mrb[46].mxu1 %v4601_v46  ;;  %v4104_v22 = vcombine.low %v10431_v62, %v10645_v6  ;;  %v4096_v47 = vrot.slane %v4074_v49, %v9680_v48  ;;  %v10786_v56 = vadd.f32 %v12180_v14, %v12186_v25  ;;  %v12187_v40 = vld [vmem:[#allocation27_spill] sm:$0xff]  ;;  %v12189_v49 = vld [vmem:[#allocation21_spill] sm:$0xff] }
 0x1f8   :  { %8368 = vmatpush1.bf16.msra.mxu0 %v8367_v18  ;;  %v4075_v1 = vcombine.low %v12185_v33, %v10541_v44  ;;  %8432 = vmatpush1.bf16.msra.mxu1 %v8431_v26  ;;  %v4071_v59 = vcombine.low %v4063_v13, %v10773_v16  ;;  %v4979_v38 = vcombine.low %v4971_v10, %v4978_v45  ;;  %v5378_v18 = vld [vmem:[#allocation2 + $0x430] sm:$0xff] }
 0x1f9   :  { %8370 = vmatprep.subr.bf16.mxu0 %v8369_v15  ;;  %8434 = vmatprep.subr.bf16.mxu1 %v8433_v58  ;;  %v10791_v62 = vrot.slane %v4104_v22, %v9680_v48  ;;  %v8439_v6 = vpack.c.bf16 %v5374_v24, %v5372_v36  ;;  %v3656_v57 = vmax.f32 %v10786_v56, 0.0  ;;  %v4980_v9 = vcombine.low %v10460_v55, %v10467_v5  ;;  %v12188_v45 = vld [vmem:[#allocation12_spill] sm:$0xff]  ;;  %v5391_v22 = vld [vmem:[#allocation2 + $0x498] sm:$0xff] }
 0x1fa   :  { %5113 = vmatprep.mubr.f32.mxu1 %v12170_v23  ;;  %v4103_v44 = vrot.slane %v4075_v1, %v9680_v48  ;;  %v8441_v63 = vpack.c.bf16 %v5379_v3, %v5377_v11  ;;  %v4153_v26 = vcombine.low %v10655_v27, %v10713_v31  ;;  %v4154_v15 = vcombine.low %v10702_v19, %v10705_v34  ;;  %v5381_v19 = vld [vmem:[#allocation2 + $0x448] sm:$0xff]  ;;  %v5383_v34 = vld [vmem:[#allocation2 + $0x458] sm:$0xff]  ;;  %v5386_v33 = vld [vmem:[#allocation2 + $0x470] sm:$0xff] }
 0x1fb   :  { %v5406_v14 = vcombine.low %v10773_v16, %v10791_v62  ;;  %v4981_v41 = vcombine.low %v3656_v57, %v10500_v7  ;;  %v4988_v55 = vrot.slane %v4980_v9, %v9680_v48  ;;  %v5013_v2 = vcombine.low %v10708_v30, %v10686_v61  ;;  %v5389_v1 = vld [vmem:[#allocation2 + $0x488] sm:$0xff]  ;;  %v6020_v16 = vld [vmem:[#allocation5 + $0x80] sm:$0xff] }
 0x1fc   :  { %8372 = vmatpush1.bf16.msra.mxu0 %v8371_v29  ;;  %v4105_v52 = vcombine.low %v4096_v47, %v4103_v44  ;;  %8436 = vmatpush1.bf16.msra.mxu1 %v8435_v0  ;;  %v4161_v58 = vrot.slane %v4153_v26, %v9680_v48  ;;  %v10809_v17 = vrot.slane %v4154_v15, %v9680_v48  ;;  %v3673_v30 = vmax.f32 %v10740_v43, 0.0  ;;  %v5385_v0 = vld [vmem:[#allocation2 + $0x468] sm:$0xff]  ;;  %v12191_v47 = vld [vmem:[#allocation33_spill] sm:$0xff] }
 0x1fd   :  { %8438 = vmatprep.subr.bf16.mxu0 %v8437_v53  ;;  %v5014_v27 = vcombine.low %v10697_v21, %v10745_v4  ;;  %v4995_v7 = vrot.slane %v4981_v41, %v9680_v48  ;;  %v4996_v42 = vcombine.low %v10638_v50, %v4988_v55  ;;  %v8443_v29 = vpack.c.bf16 %v5378_v18, %v5376_v54  ;;  %v12190_v3 = vld [vmem:[#allocation28_spill] sm:$0xff]  ;;  %v5395_v15 = vld [vmem:[#allocation2 + $0x4b8] sm:$0xff] }
 0x1fe   :  { %v4119_v35 = vrot.slane %v4105_v52, %v9680_v48  ;;  %v5021_v61 = vrot.slane %v5013_v2, %v9680_v48  ;;  %v4169_v37 = vcombine.low %v4161_v58, %v10809_v17  ;;  %v8445_v50 = vpack.c.bf16 %v5383_v34, %v5381_v19  ;;  %v5388_v52 = vld [vmem:[#allocation2 + $0x480] sm:$0xff]  ;;  %v5390_v54 = vld [vmem:[#allocation2 + $0x490] sm:$0xff]  ;;  %v5393_v26 = vld [vmem:[#allocation2 + $0x4a8] sm:$0xff] }
 0x1ff   :  { %4254 = vmatmul.mubr.f32.vlgmr.msra.gmra.mrb[30].mxu0 %v4071_v59  ;;  %5114 = vmatmul.mubr.f32.vlgmr.msra.gmra.mrb[48].mxu1 %v4979_v38  ;;  %v5028_v21 = vrot.slane %v5014_v27, %v9680_v48  ;;  %v4997_v4 = vcombine.low %v4995_v7, %v10683_v8  ;;  %v5030_v43 = vcombine.low %v3672_v20, %v3673_v30  ;;  %v3657_v8 = vmax.f32 %v12189_v49, 0.0  ;;  %v5384_v20 = vld [vmem:[#allocation2 + $0x460] sm:$0xff]  ;;  %v12193_v41 = vld [vmem:[#allocation32_spill] sm:$0xff] }
 0x200   :  { %8440 = vmatpush1.bf16.msra.mxu0 %v8439_v6  ;;  %v4120_v32 = vcombine.low %v10791_v62, %v4119_v35  ;;  %4259 = vmatprep.mubr.f32.mxu0 %v12170_v23  ;;  %v3543_v13 = vmul.f32 %v12188_v45, %v12187_v40  ;;  %v5004_v53 = vrot.slane %v4996_v42, %v9680_v48  ;;  %v12192_v38 = vld [vmem:[#allocation19_spill] sm:$0xff] }
 0x201   :  { %5119 = vmatprep.mubr.f32.mxu1 %v12170_v23  ;;  %8442 = vmatprep.subr.bf16.mxu0 %v8441_v63  ;;  %v5029_v46 = vcombine.low %v5021_v61, %v5028_v21  ;;  %v5011_v36 = vrot.slane %v4997_v4, %v9680_v48  ;;  %v8447_v10 = vpack.c.bf16 %v5382_v60, %v5380_v28  ;;  %v5394_v61 = vld [vmem:[#allocation2 + $0x4b0] sm:$0xff]  ;;  %v5396_v21 = vld [vmem:[#allocation2 + $0x4c0] sm:$0xff]  ;;  %v5403_v28 = vld [vmem:[#allocation2 + $0x4f8] sm:$0xff] }
 0x202   :  { %v8449_v39 = vpack.c.bf16 %v5387_v51, %v5385_v0  ;;  %v5407_v11 = vcombine.low %v10467_v5, %v3656_v57  ;;  %v5408_v59 = vcombine.low %v3657_v8, %v12190_v3  ;;  %v4184_v25 = vrot.slane %v12191_v47, %v9680_v48  ;;  %v5398_v4 = vld [vmem:[#allocation2 + $0x4d0] sm:$0xff]  ;;  %v6038_v8 = vld [vmem:[#allocation5 + $0x108] sm:$0xff]  ;;  %v6040_v3 = vld [vmem:[#allocation5 + $0x118] sm:$0xff] }
 0x203   :  { %4260 = vmatmul.mubr.f32.gmra.mrb[32].mxu0 %v4120_v32  ;;  %v5012_v24 = vcombine.low %v5004_v53, %v5011_v36  ;;  %v5440_v56 = vcombine.low %v12191_v47, %v10754_v12  ;;  %v3640_v44 = vadd.f32 %v12192_v38, %v3543_v13  ;;  %v8451_v6 = vpack.c.bf16 %v5386_v33, %v5384_v20  ;;  %v5399_v32 = vld [vmem:[#allocation2 + $0x4d8] sm:$0xff]  ;;  %v5402_v0 = vld [vmem:[#allocation2 + $0x4f0] sm:$0xff]  ;;  %v6053_v13 = vld [vmem:[#allocation5 + $0x180] sm:$0xff] }
 0x204   :  { %8444 = vmatpush1.bf16.msra.mxu0 %v8443_v29  ;;  %4265 = vmatprep.mubr.f32.mxu0 %v12170_v23  ;;  %v5415_v9 = vrot.slane %v5407_v11, %v9680_v48  ;;  %v5422_v5 = vrot.slane %v5408_v59, %v9680_v48  ;;  %v5037_v57 = vrot.slane %v5030_v43, %v9680_v48  ;;  %v5392_v29 = vld [vmem:[#allocation2 + $0x4a0] sm:$0xff]  ;;  %v6054_v53 = vld [vmem:[#allocation5 + $0x188] sm:$0xff]  ;;  %v6055_v33 = vld [vmem:[#allocation5 + $0x190] sm:$0xff] }
 0x205   :  { %8446 = vmatprep.subr.bf16.mxu0 %v8445_v50  ;;  %5120 = vmatmul.mubr.f32.gmra.mrb[50].mxu1 %v5012_v24  ;;  %v8453_v63 = vpack.c.bf16 %v5391_v22, %v5389_v1  ;;  %v5447_v12 = vrot.slane %v5440_v56, %v9680_v48  ;;  %v3674_v18 = vmax.f32 %v3640_v44, 0.0  ;;  %v8455_v27 = vpack.c.bf16 %v5390_v54, %v5388_v52  ;;  %v5401_v50 = vld [vmem:[#allocation2 + $0x4e8] sm:$0xff]  ;;  %v5400_v43 = vld [vmem:[#allocation2 + $0x4e0] sm:$0xff]  ;;  %v6056_v1 = vld [vmem:[#allocation5 + $0x198] sm:$0xff] }
 0x206   :  { %5125 = vmatprep.mubr.f32.mxu1 %v12170_v23  ;;  %v5423_v55 = vcombine.low %v12193_v41, %v5415_v9  ;;  %v5424_v2 = vcombine.low %v5422_v5, %v10713_v31  ;;  %v5044_v7 = vrot.slane %v5037_v57, %v9680_v48  ;;  %v8457_v42 = vpack.c.bf16 %v5395_v15, %v5393_v26  ;;  %v5397_v31 = vld [vmem:[#allocation2 + $0x4c8] sm:$0xff]  ;;  %v6037_v36 = vld [vmem:[#allocation5 + $0x100] sm:$0xff]  ;;  %v6039_v22 = vld [vmem:[#allocation5 + $0x110] sm:$0xff] }
 0x207   :  { %4266 = vmatmul.mubr.f32.gmra.mrb[34].mxu0 %v4169_v37  ;;  %v5448_v35 = vcombine.low %v10809_v17, %v5447_v12  ;;  %v5449_v58 = vcombine.low %v3673_v30, %v3674_v18  ;;  %v8459_v30 = vpack.c.bf16 %v5394_v61, %v5392_v29  ;;  %v8461_v37 = vpack.c.bf16 %v5399_v32, %v5397_v31  ;;  %v6021_v62 = vld [vmem:[#allocation5 + $0x88] sm:$0xff]  ;;  %v6004_v24 = vld [vmem:[#allocation5] sm:$0xff]  ;;  %v6022_v59 = vld [vmem:[#allocation5 + $0x90] sm:$0xff] }
 0x208   :  { %8448 = vmatpush1.bf16.msra.mxu0 %v8447_v10  ;;  %4271 = vmatprep.mubr.f32.mxu0 %v12170_v23  ;;  %v5431_v19 = vrot.slane %v5423_v55, %v9680_v48  ;;  %v5438_v34 = vrot.slane %v5424_v2, %v9680_v48  ;;  %v8463_v60 = vpack.c.bf16 %v5398_v4, %v5396_v21  ;;  %v6023_v47 = vld [vmem:[#allocation5 + $0x98] sm:$0xff]  ;;  %v6006_v38 = vld [vmem:[#allocation5 + $0x10] sm:$0xff]  ;;  %v6057_v9 = vld [vmem:[#allocation5 + $0x1a0] sm:$0xff] }
 0x209   :  { %8450 = vmatprep.subr.bf16.mxu0 %v8449_v39  ;;  %5126 = vmatmul.mubr.f32.gmra.mrb[52].mxu1 %v5029_v46  ;;  %v8465_v46 = vpack.c.bf16 %v5403_v28, %v5401_v50  ;;  %v8467_v51 = vpack.c.bf16 %v5402_v0, %v5400_v43  ;;  %v5456_v40 = vrot.slane %v5449_v58, %v9680_v48  ;;  %v6005_v39 = vld [vmem:[#allocation5 + $0x8] sm:$0xff]  ;;  %v6007_v44 = vld [vmem:[#allocation5 + $0x18] sm:$0xff]  ;;  %v6041_v57 = vld [vmem:[#allocation5 + $0x120] sm:$0xff] }
 0x20a   :  { %5131 = vmatprep.mubr.f32.mxu1 %v12170_v23  ;;  %v5439_v17 = vcombine.low %v5431_v19, %v5438_v34  ;;  %v8469_v49 = vpack.c.bf16 %v6054_v53, %v6053_v13  ;;  %v8501_v10 = vpack.c.bf16 %v6021_v62, %v6020_v16  ;;  %v8503_v20 = vpack.c.bf16 %v6005_v39, %v6004_v24  ;;  %v6058_v5 = vld [vmem:[#allocation5 + $0x1a8] sm:$0xff]  ;;  %v6024_v54 = vld [vmem:[#allocation5 + $0xa0] sm:$0xff]  ;;  %v6059_v2 = vld [vmem:[#allocation5 + $0x1b0] sm:$0xff] }
 0x20b   :  { %4272 = vmatmul.mubr.f32.gmra.mrb[36].mxu0 %v4184_v25  ;;  %v5463_v45 = vrot.slane %v5456_v40, %v9680_v48  ;;  %v8473_v11 = vpack.c.bf16 %v6056_v1, %v6055_v33  ;;  %v8475_v25 = vpack.c.bf16 %v6040_v3, %v6039_v22  ;;  %v8505_v56 = vpack.c.bf16 %v6023_v47, %v6022_v59  ;;  %v6042_v52 = vld [vmem:[#allocation5 + $0x128] sm:$0xff]  ;;  %v6008_v15 = vld [vmem:[#allocation5 + $0x20] sm:$0xff]  ;;  %v6043_v58 = vld [vmem:[#allocation5 + $0x130] sm:$0xff] }
 0x20c   :  { %8452 = vmatpush1.bf16.msra.mxu0 %v8451_v6  ;;  %5532 = vmatprep.mubr.f32.mxu0 %v12170_v23  ;;  %v8507_v6 = vpack.c.bf16 %v6007_v44, %v6006_v38  ;;  %v6025_v12 = vld [vmem:[#allocation5 + $0xa8] sm:$0xff]  ;;  %v8479_v18 = vpack.c.bf16 %v6042_v52, %v6041_v57  ;;  %v6044_v19 = vld [vmem:[#allocation5 + $0x138] sm:$0xff]  ;;  %v6026_v34 = vld [vmem:[#allocation5 + $0xb0] sm:$0xff] }
 0x20d   :  { %8454 = vmatprep.subr.bf16.mxu0 %v8453_v63  ;;  %5132 = vmatmul.mubr.f32.gmra.mrb[54].mxu1 %v5044_v7  ;;  %v8477_v63 = vpack.c.bf16 %v6058_v5, %v6057_v9  ;;  %v8509_v26 = vpack.c.bf16 %v6025_v12, %v6024_v54  ;;  %v6009_v41 = vld [vmem:[#allocation5 + $0x28] sm:$0xff]  ;;  %v6027_v7 = vld [vmem:[#allocation5 + $0xb8] sm:$0xff]  ;;  %v6010_v61 = vld [vmem:[#allocation5 + $0x30] sm:$0xff] }
 0x20e   :  { %8470 = vmatprep.subr.bf16.mxu1 %v8469_v49  ;;  %v8511_v55 = vpack.c.bf16 %v6009_v41, %v6008_v15  ;;  %v8513_v29 = vpack.c.bf16 %v6027_v7, %v6026_v34  ;;  %v6011_v31 = vld [vmem:[#allocation5 + $0x38] sm:$0xff]  ;;  %v6046_v4 = vld [vmem:[#allocation5 + $0x148] sm:$0xff]  ;;  %v6028_v50 = vld [vmem:[#allocation5 + $0xc0] sm:$0xff] }
 0x20f   :  { %v8515_v32 = vpack.c.bf16 %v6011_v31, %v6010_v61  ;;  %v6029_v28 = vld [vmem:[#allocation5 + $0xc8] sm:$0xff]  ;;  %v6012_v43 = vld [vmem:[#allocation5 + $0x40] sm:$0xff]  ;;  %v6047_v13 = vld [vmem:[#allocation5 + $0x150] sm:$0xff] }
 0x210   :  { %8456 = vmatpush1.bf16.msra.mxu0 %v8455_v27  ;;  %v6013_v0 = vld [vmem:[#allocation5 + $0x48] sm:$0xff]  ;;  %v6048_v53 = vld [vmem:[#allocation5 + $0x158] sm:$0xff]  ;;  %v6014_v62 = vld [vmem:[#allocation5 + $0x50] sm:$0xff] }
 0x211   :  { %8458 = vmatprep.subr.bf16.mxu0 %v8457_v42  ;;  %v8483_v42 = vpack.c.bf16 %v6044_v19, %v6043_v58  ;;  %v8519_v40 = vpack.c.bf16 %v6013_v0, %v6012_v43  ;;  %v8491_v49 = vpack.c.bf16 %v6048_v53, %v6047_v13  ;;  %v6031_v16 = vld [vmem:[#allocation5 + $0xd8] sm:$0xff]  ;;  %v6065_v24 = vld [vmem:[#allocation5 + $0x1e0] sm:$0xff]  ;;  %v6066_v39 = vld [vmem:[#allocation5 + $0x1e8] sm:$0xff] }
 0x212   :  { %v8493_v33 = vpack.c.bf16 %v6066_v39, %v6065_v24  ;;  %v6049_v1 = vld [vmem:[#allocation5 + $0x160] sm:$0xff]  ;;  %v6050_v22 = vld [vmem:[#allocation5 + $0x168] sm:$0xff]  ;;  %v6067_v38 = vld [vmem:[#allocation5 + $0x1f0] sm:$0xff] }
 0x213   :  { %v6033_v3 = vld [vmem:[#allocation5 + $0xe8] sm:$0xff]  ;;  %v6016_v59 = vld [vmem:[#allocation5 + $0x60] sm:$0xff]  ;;  %v6068_v44 = vld [vmem:[#allocation5 + $0x1f8] sm:$0xff] }
 0x214   :  { %8460 = vmatpush1.bf16.msra.mxu0 %v8459_v30  ;;  %v6062_v30 = vld [vmem:[#allocation5 + $0x1c8] sm:$0xff]  ;;  %v8497_v5 = vpack.c.bf16 %v6068_v44, %v6067_v38  ;;  %v6052_v57 = vld [vmem:[#allocation5 + $0x178] sm:$0xff]  ;;  %v6018_v12 = vld [vmem:[#allocation5 + $0x70] sm:$0xff] }
 0x215   :  { %8462 = vmatprep.subr.bf16.mxu0 %v8461_v37  ;;  %v6045_v37 = vld [vmem:[#allocation5 + $0x140] sm:$0xff]  ;;  %v6017_v47 = vld [vmem:[#allocation5 + $0x68] sm:$0xff]  ;;  %v6035_v52 = vld [vmem:[#allocation5 + $0xf8] sm:$0xff] }
 0x216   :  { %v8527_v9 = vpack.c.bf16 %v6017_v47, %v6016_v59  ;;  %v6831_v15 = vld [vmem:[#allocation5 + $0x288] sm:$0xff]  ;;  %v5790_v7 = vld [vmem:[%s11997_s6] sm:$0x3] }
 0x217   :  { %v12194_v58 = vld [vmem:[#allocation11_spill] sm:$0xff]  ;;  %v5884_v61 = vld [vmem:[%s11998_s7] sm:$0x3] }
 0x218   :  { %8464 = vmatpush1.bf16.msra.mxu0 %v8463_v60  ;;  %v8487_v60 = vpack.c.bf16 %v6046_v4, %v6045_v37  ;;  %v5798_v19 = vsub.s32 1, %v12194_v58 }
 0x219   :  { %8466 = vmatprep.subr.bf16.mxu0 %v8465_v46  ;;  %v8517_v46 = vpack.c.bf16 %v6029_v28, %v6028_v50 }
 0x21c   :  { %8468 = vmatpush1.bf16.msra.mxu0 %v8467_v51  ;;  %v6063_v51 = vld [vmem:[#allocation5 + $0x1d0] sm:$0xff] }
 0x21d   :  { %8502 = vmatprep.subr.bf16.mxu0 %v8501_v10  ;;  %v6015_v10 = vld [vmem:[#allocation5 + $0x58] sm:$0xff] }
 0x21f   :  { %5533 = vmatmul.mubr.f32.vlgmr.msra.gmra.mrb[38].mxu0 %v5406_v14  ;;  %v8471_v14 = vpack.c.bf16 %v6038_v8, %v6037_v36  ;;  %v6030_v8 = vld [vmem:[#allocation5 + $0xd0] sm:$0xff] }
 0x220   :  { %5538 = vmatprep.mubr.f32.mxu0 %v12170_v23  ;;  %8504 = vmatpush3.bf16.msra.mxu0 %v8503_v20  ;;  %v8523_v20 = vpack.c.bf16 %v6015_v10, %v6014_v62 }
 0x221   :  { %8472 = vmatpush3.bf16.msra.mxu1 %v8471_v14  ;;  %8506 = vmatprep.subr.bf16.mxu0 %v8505_v56  ;;  %v8521_v14 = vpack.c.bf16 %v6031_v16, %v6030_v8 }
 0x222   :  { %8474 = vmatprep.subr.bf16.mxu1 %v8473_v11  ;;  %v6032_v11 = vld [vmem:[#allocation5 + $0xe0] sm:$0xff] }
 0x223   :  { %5539 = vmatmul.mubr.f32.gmra.mrb[40].mxu0 %v5439_v17  ;;  %v6061_v17 = vld [vmem:[#allocation5 + $0x1c0] sm:$0xff]  ;;  %v8525_v56 = vpack.c.bf16 %v6033_v3, %v6032_v11 }
 0x224   :  { %5544 = vmatprep.mubr.f32.mxu0 %v12170_v23  ;;  %8508 = vmatpush3.bf16.msra.mxu0 %v8507_v6  ;;  %v8485_v21 = vpack.c.bf16 %v6062_v30, %v6061_v17  ;;  %v6051_v6 = vld [vmem:[#allocation5 + $0x170] sm:$0xff]  ;;  %v5893_v30 = vrot.slane %v5884_v61, %v5798_v19 }
 0x225   :  { %8476 = vmatpush3.bf16.msra.mxu1 %v8475_v25  ;;  %8510 = vmatprep.subr.bf16.mxu0 %v8509_v26  ;;  %v8495_v25 = vpack.c.bf16 %v6050_v22, %v6049_v1  ;;  %v6830_v26 = vld [vmem:[#allocation5 + $0x280] sm:$0xff]  ;;  %v8499_v41 = vpack.c.bf16 %v6052_v57, %v6051_v6 }
 0x226   :  { %8478 = vmatprep.subr.bf16.mxu1 %v8477_v63  ;;  %v6034_v63 = vld [vmem:[#allocation5 + $0xf0] sm:$0xff]  ;;  %v10907_v6 = vld [vmem:[#allocation5 + $0x200] sm:$0xff] }
 0x227   :  { %5545 = vmatmul.mubr.f32.gmra.mrb[42].mxu0 %v5448_v35  ;;  %v6060_v35 = vld [vmem:[#allocation5 + $0x1b8] sm:$0xff]  ;;  %v8529_v54 = vpack.c.bf16 %v6035_v52, %v6034_v63  ;;  %12195 = vst [vmem:[#allocation34_spill] sm:$0xff] %v10907_v6  ;;  %v10921_v52 = vld [vmem:[#allocation5 + $0x208] sm:$0xff] }
 0x228   :  { %5550 = vmatprep.mubr.f32.mxu0 %v12170_v23  ;;  %8512 = vmatpush3.bf16.msra.mxu0 %v8511_v55  ;;  %v8481_v27 = vpack.c.bf16 %v6060_v35, %v6059_v2  ;;  %v8533_v2 = vpack.c.bf16 %v6831_v15, %v6830_v26  ;;  %12196 = vst [vmem:[#allocation29_spill] sm:$0xff] %v10921_v52 }
 0x229   :  { %8480 = vmatpush3.bf16.msra.mxu1 %v8479_v18  ;;  %8514 = vmatprep.subr.bf16.mxu0 %v8513_v29  ;;  %v6019_v18 = vld [vmem:[#allocation5 + $0x78] sm:$0xff] }
 0x22a   :  { %8482 = vmatprep.subr.bf16.mxu1 %v8481_v27  ;;  %v8531_v55 = vpack.c.bf16 %v6019_v18, %v6018_v12  ;;  %v5794_v27 = vsub.s32 0, %v12194_v58  ;;  %v10925_v12 = vld [vmem:[#allocation5 + $0x298] sm:$0xff] }
 0x22b   :  { %5551 = vmatmul.mubr.f32.gmra.mrb[44].mxu0 %v5463_v45  ;;  %v6064_v45 = vld [vmem:[#allocation5 + $0x1d8] sm:$0xff]  ;;  %12198 = vst [vmem:[#allocation35_spill] sm:$0xff] %v10925_v12 }
 0x22c   :  { %8516 = vmatpush3.bf16.msra.mxu0 %v8515_v32  ;;  %v8489_v36 = vpack.c.bf16 %v6064_v45, %v6063_v51  ;;  %v5795_v31 = vrot.slane %v5790_v7, %v5794_v27  ;;  %v5799_v32 = vrot.slane %v5790_v7, %v5798_v19  ;;  %v5889_v17 = vrot.slane %v5884_v61, %v5794_v27  ;;  %v10954_v7 = vld [vmem:[#allocation5 + $0x2a0] sm:$0xff] }
 0x22d   :  { %8484 = vmatpush3.bf16.msra.mxu1 %v8483_v42  ;;  %8518 = vmatprep.subr.bf16.mxu0 %v8517_v46  ;;  %12203 = vst [vmem:[#allocation24_spill] sm:$0xff] %v10954_v7 }
 0x22e   :  { %8486 = vmatprep.subr.bf16.mxu1 %v8485_v21  ;;  %v5800_v37 = vcombine.low %v5795_v31, %v5799_v32  ;;  %v5801_v21 = vcombine.high %v5795_v31, %v5799_v32  ;;  %v5894_v4 = vcombine.low %v5889_v17, %v5893_v30  ;;  %v5895_v50 = vcombine.high %v5889_v17, %v5893_v30  ;;  %v11033_v17 = vld [vmem:[#allocation5 + $0x2e8] sm:$0xff] }
 0x22f   :  { %12221 = vst [vmem:[#allocation37_spill] sm:$0xff] %v11033_v17 }
 0x230   :  { %8520 = vmatpush3.bf16.msra.mxu0 %v8519_v40  ;;  %v5808_v46 = vrot.slane %v5800_v37, %v9680_v48  ;;  %v5815_v51 = vrot.slane %v5801_v21, %v9680_v48  ;;  %v5902_v40 = vrot.slane %v5894_v4, %v9680_v48  ;;  %v5909_v45 = vrot.slane %v5895_v50, %v9680_v48  ;;  %v10968_v37 = vld [vmem:[#allocation5 + $0x228] sm:$0xff]  ;;  %v10970_v21 = vld [vmem:[#allocation5 + $0x2b0] sm:$0xff]  ;;  %v10972_v4 = vld [vmem:[#allocation5 + $0x2b8] sm:$0xff] }
 0x231   :  { %8488 = vmatpush3.bf16.msra.mxu1 %v8487_v60  ;;  %8522 = vmatprep.subr.bf16.mxu0 %v8521_v14  ;;  %12207 = vst [vmem:[#allocation17_spill] sm:$0xff] %v10968_v37  ;;  %12208 = vst [vmem:[#allocation26_spill] sm:$0xff] %v10970_v21 }
 0x232   :  { %8490 = vmatprep.subr.bf16.mxu1 %v8489_v36  ;;  %v5816_v53 = vcombine.high %v5808_v46, %v5808_v46  ;;  %v5910_v8 = vcombine.high %v5902_v40, %v5902_v40  ;;  %v10875_v62 = vrot.slane %v5808_v46, %v9680_v48  ;;  %v10878_v14 = vrot.slane %v5815_v51, %v9680_v48  ;;  %v11019_v46 = vld [vmem:[#allocation5 + $0x258] sm:$0xff] }
 0x233   :  { %v5911_v10 = vcombine.high %v5909_v45, %v5909_v45  ;;  %v10881_v39 = vrot.slane %v5902_v40, %v9680_v48  ;;  %12209 = vst [vmem:[#allocation15_spill] sm:$0xff] %v10972_v4  ;;  %12219 = vst [vmem:[#allocation32_spill] sm:$0xff] %v11019_v46 }
 0x234   :  { %8524 = vmatpush3.bf16.msra.mxu0 %v8523_v20  ;;  %v10884_v20 = vrot.slane %v5909_v45, %v9680_v48  ;;  %v10887_v11 = vrot.slane %v5816_v53, %v9680_v48  ;;  %v10893_v47 = vrot.slane %v5910_v8, %v9680_v48  ;;  %v10902_v38 = vcombine.high %v10878_v14, %v10878_v14  ;;  %v10995_v8 = vld [vmem:[#allocation5 + $0x248] sm:$0xff] }
 0x235   :  { %8492 = vmatpush3.bf16.msra.mxu1 %v8491_v49  ;;  %8526 = vmatprep.subr.bf16.mxu0 %v8525_v56  ;;  %v5817_v49 = vcombine.high %v5815_v51, %v5815_v51  ;;  %v10898_v56 = vcombine.high %v10875_v62, %v10875_v62  ;;  %v10905_v44 = vrot.slane %v5911_v10, %v9680_v48  ;;  %v10982_v51 = vld [vmem:[#allocation5 + $0x2c0] sm:$0xff] }
 0x236   :  { %8494 = vmatprep.subr.bf16.mxu1 %v8493_v33  ;;  %v10915_v57 = vcombine.high %v10881_v39, %v10881_v39  ;;  %v10919_v63 = vcombine.high %v10884_v20, %v10884_v20  ;;  %12212 = vst [vmem:[#allocation18_spill] sm:$0xff] %v10982_v51  ;;  %12215 = vst [vmem:[#allocation21_spill] sm:$0xff] %v10995_v8 }
 0x237   :  { %v10890_v59 = vrot.slane %v5817_v49, %v9680_v48  ;;  %v10962_v32 = vcombine.high %v10905_v44, %v10905_v44  ;;  %v10993_v49 = vld [vmem:[#allocation5 + $0x240] sm:$0xff] }
 0x238   :  { %8528 = vmatpush3.bf16.msra.mxu0 %v8527_v9  ;;  %12214 = vst [vmem:[#allocation12_spill] sm:$0xff] %v10993_v49 }
 0x239   :  { %8496 = vmatpush3.bf16.msra.mxu1 %v8495_v25  ;;  %8530 = vmatprep.subr.bf16.mxu0 %v8529_v54  ;;  %v10923_v54 = vld [vmem:[#allocation5 + $0x290] sm:$0xff]  ;;  %v10948_v19 = vcombine.high %v10890_v59, %v10890_v59  ;;  %12206 = vst [vmem:[#allocation25_spill] sm:$0xff] %v10962_v32 }
 0x23a   :  { %8498 = vmatprep.subr.bf16.mxu1 %v8497_v5  ;;  %12197 = vst [vmem:[#allocation30_spill] sm:$0xff] %v10923_v54 }
 0x23b   :  { %12201 = vst [vmem:[#allocation20_spill] sm:$0xff] %v10948_v19 }
 0x23c   :  { %8532 = vmatpush3.bf16.msra.mxu0 %v8531_v55  ;;  %v10938_v55 = vld [vmem:[#allocation5 + $0x210] sm:$0xff] }
 0x23d   :  { %8500 = vmatpush3.bf16.msra.mxu1 %v8499_v41  ;;  %v10936_v41 = vcombine.high %v10887_v11, %v10887_v11  ;;  %12199 = vst [vmem:[#allocation36_spill] sm:$0xff] %v10938_v55 }
 0x23e   :  { %8534 = vmatprep.subr.bf16.mxu1 %v8533_v2  ;;  %v10940_v2 = vld [vmem:[#allocation5 + $0x218] sm:$0xff] }
 0x23f   :  { %12200 = vst [vmem:[#allocation14_spill] sm:$0xff] %v10940_v2 }
 0x2b0   :  { %v4672_v35 = vpop.f32.mrb[40].mxu1 }
 0x2b1   :  { %v4674_v34 = vpop.f32.mrb[41].mxu1 }
 0x2b2   :  { %v4703_v42 = vcombine.low %v4672_v35, %v4674_v34  ;;  %v4704_v29 = vcombine.high %v4672_v35, %v4674_v34  ;;  %v10952_v34 = vcombine.high %v10893_v47, %v10893_v47 }
 0x2b4   :  { %v4711_v13 = vrot.slane %v4703_v42, %v9680_v48  ;;  %v4718_v36 = vrot.slane %v4704_v29, %v9680_v48  ;;  %12202 = vst [vmem:[#allocation16_spill] sm:$0xff] %v10952_v34  ;;  %v10956_v42 = vld [vmem:[#allocation5 + $0x2a8] sm:$0xff]  ;;  %v10958_v29 = vld [vmem:[#allocation5 + $0x220] sm:$0xff] }
 0x2b5   :  { %12204 = vst [vmem:[#allocation31_spill] sm:$0xff] %v10956_v42  ;;  %12205 = vst [vmem:[#allocation22_spill] sm:$0xff] %v10958_v29 }
 0x2b6   :  { %v4719_v33 = vcombine.high %v4711_v13, %v4711_v13  ;;  %v4720_v3 = vcombine.high %v4718_v36, %v4718_v36  ;;  %v10910_v9 = vrot.slane %v4711_v13, %v9680_v48  ;;  %v10928_v18 = vrot.slane %v4718_v36, %v9680_v48  ;;  %v10991_v36 = vld [vmem:[#allocation5 + $0x2c8] sm:$0xff] }
 0x2b7   :  { %12213 = vst [vmem:[#allocation27_spill] sm:$0xff] %v10991_v36 }
 0x2b8   :  { %v10931_v26 = vrot.slane %v4719_v33, %v9680_v48  ;;  %v10943_v35 = vrot.slane %v4720_v3, %v9680_v48 }
 0x2ba   :  { %v12225_v55 = vcombine.high %v10943_v35, %v10943_v35 }
 0x2bb   :  { %v4678_v28 = vpop.f32.mrb[42].mxu1 }
 0x2bc   :  { %v4680_v60 = vpop.f32.mrb[43].mxu1 }
 0x2bd   :  { %v4753_v43 = vcombine.low %v4678_v28, %v4680_v60  ;;  %v4754_v0 = vcombine.high %v4678_v28, %v4680_v60 }
 0x2bf   :  { %v4761_v25 = vrot.slane %v4753_v43, %v9680_v48  ;;  %v4768_v5 = vrot.slane %v4754_v0, %v9680_v48  ;;  %v10978_v43 = vld [vmem:[#allocation5 + $0x230] sm:$0xff]  ;;  %v10980_v0 = vld [vmem:[#allocation5 + $0x238] sm:$0xff] }
 0x2c0   :  { %12210 = vst [vmem:[#allocation23_spill] sm:$0xff] %v10978_v43  ;;  %12211 = vst [vmem:[#allocation13_spill] sm:$0xff] %v10980_v0 }
 0x2c1   :  { %v4769_v61 = vcombine.high %v4761_v25, %v4761_v25  ;;  %v4770_v28 = vcombine.high %v4768_v5, %v4768_v5  ;;  %v10989_v13 = vrot.slane %v4761_v25, %v9680_v48  ;;  %v11000_v10 = vrot.slane %v4768_v5, %v9680_v48 }
 0x2c3   :  { %v4684_v16 = vpop.f32.mrb[44].mxu1  ;;  %v11009_v3 = vrot.slane %v4769_v61, %v9680_v48  ;;  %v11022_v33 = vrot.slane %v4770_v28, %v9680_v48  ;;  %v12227_v6 = vcombine.high %v11000_v10, %v11000_v10 }
 0x2c4   :  { %v4686_v24 = vpop.f32.mrb[45].mxu1 }
 0x2c5   :  { %v4803_v1 = vcombine.low %v4684_v16, %v4686_v24  ;;  %v4804_v22 = vcombine.high %v4684_v16, %v4686_v24  ;;  %v12229_v32 = vcombine.high %v11022_v33, %v11022_v33 }
 0x2c7   :  { %v4811_v15 = vrot.slane %v4803_v1, %v9680_v48  ;;  %v4818_v58 = vrot.slane %v4804_v22, %v9680_v48  ;;  %v11004_v1 = vld [vmem:[#allocation5 + $0x2d0] sm:$0xff]  ;;  %v11006_v22 = vld [vmem:[#allocation5 + $0x2d8] sm:$0xff] }
 0x2c8   :  { %12216 = vst [vmem:[#allocation28_spill] sm:$0xff] %v11004_v1  ;;  %12217 = vst [vmem:[#allocation33_spill] sm:$0xff] %v11006_v22 }
 0x2c9   :  { %v4819_v53 = vcombine.high %v4811_v15, %v4811_v15  ;;  %v4820_v24 = vcombine.high %v4818_v58, %v4818_v58  ;;  %v11025_v30 = vrot.slane %v4811_v15, %v9680_v48  ;;  %v11038_v16 = vrot.slane %v4818_v58, %v9680_v48 }
 0x2ca   :  { %v4690_v27 = vpop.f32.mrb[46].mxu1 }
 0x2cb   :  { %v4692_v31 = vpop.f32.mrb[47].mxu1  ;;  %v11041_v28 = vrot.slane %v4819_v53, %v9680_v48  ;;  %v11048_v45 = vrot.slane %v4820_v24, %v9680_v48 }
 0x2cc   :  { %v4853_v60 = vcombine.low %v4690_v27, %v4692_v31  ;;  %v11017_v31 = vld [vmem:[#allocation5 + $0x250] sm:$0xff]  ;;  %v11031_v27 = vld [vmem:[#allocation5 + $0x2e0] sm:$0xff] }
 0x2cd   :  { %12218 = vst [vmem:[#allocation19_spill] sm:$0xff] %v11017_v31  ;;  %12220 = vst [vmem:[#allocation11_spill] sm:$0xff] %v11031_v27 }
 0x2ce   :  { %v11051_v40 = vrot.slane %v4853_v60, %v9680_v48 }
 0x2d2   :  { %v4255_v15 = vpop.f32.mrb[30].mxu0  ;;  %v5115_v5 = vpop.f32.mrb[48].mxu1 }
 0x2d3   :  { %v4257_v50 = vpop.f32.mrb[31].mxu0  ;;  %v5117_v61 = vpop.f32.mrb[49].mxu1 }
 0x2d4   :  { %v4286_v23 = vcombine.low %v4255_v15, %v4257_v50  ;;  %v4287_v49 = vcombine.high %v4255_v15, %v4257_v50  ;;  %v5146_v1 = vcombine.low %v5115_v5, %v5117_v61  ;;  %v5147_v22 = vcombine.high %v5115_v5, %v5117_v61 }
 0x2d6   :  { %v4294_v50 = vrot.slane %v4286_v23, %v9680_v48  ;;  %v4301_v15 = vrot.slane %v4287_v49, %v9680_v48  ;;  %v4261_v31 = vpop.f32.mrb[32].mxu0  ;;  %v5154_v60 = vrot.slane %v5146_v1, %v9680_v48  ;;  %v5161_v5 = vrot.slane %v5147_v22, %v9680_v48 }
 0x2d7   :  { %v4263_v61 = vpop.f32.mrb[33].mxu0 }
 0x2d8   :  { %v4302_v58 = vcombine.high %v4294_v50, %v4294_v50  ;;  %v4303_v27 = vcombine.high %v4301_v15, %v4301_v15  ;;  %v4310_v53 = vrot.slane %v4294_v50, %v9680_v48  ;;  %v4317_v23 = vrot.slane %v4301_v15, %v9680_v48  ;;  %v5121_v22 = vpop.f32.mrb[50].mxu1 }
 0x2d9   :  { %v5162_v17 = vcombine.high %v5154_v60, %v5154_v60  ;;  %v5163_v49 = vcombine.high %v5161_v5, %v5161_v5  ;;  %v5170_v46 = vrot.slane %v5154_v60, %v9680_v48  ;;  %v5177_v25 = vrot.slane %v5161_v5, %v9680_v48  ;;  %v5123_v21 = vpop.f32.mrb[51].mxu1 }
 0x2da   :  { %v4324_v8 = vrot.slane %v4302_v58, %v9680_v48  ;;  %v4331_v24 = vrot.slane %v4303_v27, %v9680_v48  ;;  %v4332_v1 = vcombine.high %v4310_v53, %v4310_v53  ;;  %v4333_v51 = vcombine.high %v4317_v23, %v4317_v23  ;;  %v4267_v36 = vpop.f32.mrb[34].mxu0 }
 0x2db   :  { %v4902_v43 = vadd.f32 %v10910_v9, %v4310_v53  ;;  %v4906_v50 = vadd.f32 %v10928_v18, %v4317_v23  ;;  %v5184_v15 = vrot.slane %v5162_v17, %v9680_v48  ;;  %v5191_v0 = vrot.slane %v5163_v49, %v9680_v48  ;;  %v4269_v60 = vpop.f32.mrb[35].mxu0 }
 0x2dc   :  { %v4334_v4 = vcombine.high %v4324_v8, %v4324_v8  ;;  %v4335_v5 = vcombine.high %v4331_v24, %v4331_v24  ;;  %v4903_v58 = vadd.f32 %v10931_v26, %v4324_v8  ;;  %v12222_v27 = vcombine.high %v10910_v9, %v10910_v9  ;;  %v5127_v9 = vpop.f32.mrb[52].mxu1 }
 0x2dd   :  { %v4907_v37 = vadd.f32 %v10943_v35, %v4331_v24  ;;  %v12223_v53 = vcombine.high %v10928_v18, %v10928_v18  ;;  %v5192_v7 = vcombine.high %v5170_v46, %v5170_v46  ;;  %v5193_v17 = vcombine.high %v5177_v25, %v5177_v25 }
 0x2de   :  { %v4904_v29 = vadd.f32 %v12222_v27, %v4332_v1  ;;  %v12224_v49 = vcombine.high %v10931_v26, %v10931_v26  ;;  %v4909_v8 = vadd.f32 %v12225_v55, %v4335_v5  ;;  %v5194_v2 = vcombine.high %v5184_v15, %v5184_v15  ;;  %v11099_v1 = vpop.f32.mrb[36].mxu0 }
 0x2df   :  { %v4908_v23 = vadd.f32 %v12223_v53, %v4333_v51  ;;  %v5195_v54 = vcombine.high %v5191_v0, %v5191_v0  ;;  %v11101_v24 = vadd.f32 %v5170_v46, %v4902_v43  ;;  %v11103_v27 = vadd.f32 %v5184_v15, %v4903_v58  ;;  %v5129_v53 = vpop.f32.mrb[53].mxu1  ;;  %v11109_v26 = vpop.f32.mrb[37].mxu0 }
 0x2e0   :  { %v4905_v42 = vadd.f32 %v12224_v49, %v4334_v4  ;;  %v11105_v18 = vadd.f32 %v5192_v7, %v4904_v29  ;;  %v11107_v51 = vadd.f32 %v5177_v25, %v4906_v50  ;;  %v11113_v35 = vadd.f32 %v5191_v0, %v4907_v37  ;;  %v11119_v50 = vpop.f32.mrb[54].mxu1 }
 0x2e1   :  { %v11115_v55 = vadd.f32 %v5193_v17, %v4908_v23  ;;  %v11117_v5 = vadd.f32 %v5195_v54, %v4909_v8  ;;  %v4336_v49 = vcombine.low %v4261_v31, %v4263_v61  ;;  %v4337_v46 = vcombine.high %v4261_v31, %v4263_v61  ;;  %v11125_v54 = vpop.f32.mrb[55].mxu1 }
 0x2e2   :  { %v11111_v4 = vadd.f32 %v5194_v2, %v4905_v42  ;;  %v5196_v43 = vcombine.low %v5121_v22, %v5123_v21  ;;  %v5197_v15 = vcombine.high %v5121_v22, %v5123_v21  ;;  %v4386_v58 = vcombine.low %v4267_v36, %v4269_v60 }
 0x2e3   :  { %v4387_v7 = vcombine.high %v4267_v36, %v4269_v60  ;;  %v5246_v29 = vcombine.low %v5127_v9, %v5129_v53  ;;  %v5247_v25 = vcombine.high %v5127_v9, %v5129_v53  ;;  %v4344_v12 = vrot.slane %v4336_v49, %v9680_v48 }
 0x2e4   :  { %v4351_v2 = vrot.slane %v4337_v46, %v9680_v48  ;;  %v5204_v42 = vrot.slane %v5196_v43, %v9680_v48  ;;  %v5211_v37 = vrot.slane %v5197_v15, %v9680_v48  ;;  %v4394_v0 = vrot.slane %v4386_v58, %v9680_v48 }
 0x2e5   :  { %v4401_v21 = vrot.slane %v4387_v7, %v9680_v48  ;;  %v5254_v36 = vrot.slane %v5246_v29, %v9680_v48  ;;  %v5261_v31 = vrot.slane %v5247_v25, %v9680_v48  ;;  %v4352_v61 = vcombine.high %v4344_v12, %v4344_v12 }
 0x2e6   :  { %v4353_v22 = vcombine.high %v4351_v2, %v4351_v2  ;;  %v4360_v60 = vrot.slane %v4344_v12, %v9680_v48  ;;  %v4367_v23 = vrot.slane %v4351_v2, %v9680_v48  ;;  %v5212_v17 = vcombine.high %v5204_v42, %v5204_v42 }
 0x2e7   :  { %v5213_v8 = vcombine.high %v5211_v37, %v5211_v37  ;;  %v5220_v9 = vrot.slane %v5204_v42, %v9680_v48  ;;  %v5227_v53 = vrot.slane %v5211_v37, %v9680_v48  ;;  %v4374_v49 = vrot.slane %v4352_v61, %v9680_v48 }
 0x2e8   :  { %v4381_v46 = vrot.slane %v4353_v22, %v9680_v48  ;;  %v4382_v43 = vcombine.high %v4360_v60, %v4360_v60  ;;  %v4383_v15 = vcombine.high %v4367_v23, %v4367_v23  ;;  %v4910_v58 = vadd.f32 %v10989_v13, %v4360_v60 }
 0x2e9   :  { %v4914_v7 = vadd.f32 %v11000_v10, %v4367_v23  ;;  %v5234_v12 = vrot.slane %v5212_v17, %v9680_v48  ;;  %v5241_v29 = vrot.slane %v5213_v8, %v9680_v48  ;;  %v4384_v25 = vcombine.high %v4374_v49, %v4374_v49 }
 0x2ea   :  { %v4385_v2 = vcombine.high %v4381_v46, %v4381_v46  ;;  %v4911_v42 = vadd.f32 %v11009_v3, %v4374_v49  ;;  %v12226_v37 = vcombine.high %v10989_v13, %v10989_v13  ;;  %v4915_v22 = vadd.f32 %v11022_v33, %v4381_v46 }
 0x2eb   :  { %v4916_v60 = vadd.f32 %v12227_v6, %v4383_v15  ;;  %v5242_v52 = vcombine.high %v5220_v9, %v5220_v9  ;;  %v5243_v23 = vcombine.high %v5227_v53, %v5227_v53  ;;  %v12228_v17 = vcombine.high %v11009_v3, %v11009_v3 }
 0x2ec   :  { %v4912_v61 = vadd.f32 %v12226_v37, %v4382_v43  ;;  %v4917_v49 = vadd.f32 %v12229_v32, %v4385_v2  ;;  %v5244_v34 = vcombine.high %v5234_v12, %v5234_v12  ;;  %v5245_v19 = vcombine.high %v5241_v29, %v5241_v29 }
 0x2ed   :  { %v4913_v8 = vadd.f32 %v12228_v17, %v4384_v25  ;;  %v11155_v13 = vadd.f32 %v5220_v9, %v4910_v58  ;;  %v11157_v43 = vadd.f32 %v5234_v12, %v4911_v42  ;;  %v11161_v10 = vadd.f32 %v5227_v53, %v4914_v7 }
 0x2ee   :  { %v11159_v46 = vadd.f32 %v5242_v52, %v4912_v61  ;;  %v11165_v15 = vadd.f32 %v5241_v29, %v4915_v22  ;;  %v11167_v3 = vadd.f32 %v5243_v23, %v4916_v60  ;;  %v11169_v25 = vadd.f32 %v5245_v19, %v4917_v49 }
 0x2ef   :  { %v11163_v6 = vadd.f32 %v5244_v34, %v4913_v8  ;;  %v4402_v33 = vcombine.high %v4394_v0, %v4394_v0  ;;  %v4403_v32 = vcombine.high %v4401_v21, %v4401_v21  ;;  %v4410_v2 = vrot.slane %v4394_v0, %v9680_v48 }
 0x2f0   :  { %12230 = vst [vmem:[#allocation38_spill] sm:$0xff] %v11169_v25  ;;  %v4417_v9 = vrot.slane %v4401_v21, %v9680_v48  ;;  %v5262_v58 = vcombine.high %v5254_v36, %v5254_v36  ;;  %v5263_v12 = vcombine.high %v5261_v31, %v5261_v31  ;;  %v5270_v52 = vrot.slane %v5254_v36, %v9680_v48 }
 0x2f1   :  { %v5277_v53 = vrot.slane %v5261_v31, %v9680_v48  ;;  %v4424_v34 = vrot.slane %v4402_v33, %v9680_v48  ;;  %v4431_v7 = vrot.slane %v4403_v32, %v9680_v48  ;;  %v4432_v29 = vcombine.high %v4410_v2, %v4410_v2 }
 0x2f2   :  { %v4433_v42 = vcombine.high %v4417_v9, %v4417_v9  ;;  %v4918_v19 = vadd.f32 %v11025_v30, %v4410_v2  ;;  %v4922_v37 = vadd.f32 %v11038_v16, %v4417_v9  ;;  %v5284_v0 = vrot.slane %v5262_v58, %v9680_v48  ;;  %v5534_v23 = vpop.f32.mrb[38].mxu0 }
 0x2f3   :  { %v5291_v21 = vrot.slane %v5263_v12, %v9680_v48  ;;  %v4434_v61 = vcombine.high %v4424_v34, %v4424_v34  ;;  %v4435_v22 = vcombine.high %v4431_v7, %v4431_v7  ;;  %v4919_v36 = vadd.f32 %v11041_v28, %v4424_v34  ;;  %v5536_v2 = vpop.f32.mrb[39].mxu0 }
 0x2f4   :  { %v12231_v31 = vcombine.high %v11025_v30, %v11025_v30  ;;  %v4923_v17 = vadd.f32 %v11048_v45, %v4431_v7  ;;  %v12232_v8 = vcombine.high %v11038_v16, %v11038_v16  ;;  %v5292_v33 = vcombine.high %v5270_v52, %v5270_v52 }
 0x2f5   :  { %v5293_v32 = vcombine.high %v5277_v53, %v5277_v53  ;;  %v12233_v9 = vcombine.high %v11041_v28, %v11041_v28  ;;  %v12234_v12 = vcombine.high %v11048_v45, %v11048_v45  ;;  %v5294_v30 = vcombine.high %v5284_v0, %v5284_v0  ;;  %v11207_v28 = vld [vmem:[#allocation5 + $0x2f0] sm:$0xff] }
 0x2f6   :  { %v4920_v60 = vadd.f32 %v12231_v31, %v4432_v29  ;;  %v4924_v49 = vadd.f32 %v12232_v8, %v4433_v42  ;;  %v5295_v29 = vcombine.high %v5291_v21, %v5291_v21  ;;  %v11195_v31 = vld [vmem:[#allocation5 + $0x260] sm:$0xff]  ;;  %v11197_v7 = vadd.f32 %v5270_v52, %v4918_v19  ;;  %v11205_v8 = vld [vmem:[#allocation5 + $0x268] sm:$0xff]  ;;  %12237 = vst [vmem:[#allocation41_spill] sm:$0xff] %v11207_v28  ;;  %v5540_v19 = vpop.f32.mrb[40].mxu0 }
 0x2f7   :  { %v4921_v58 = vadd.f32 %v12233_v9, %v4434_v61  ;;  %v4925_v34 = vadd.f32 %v12234_v12, %v4435_v22  ;;  %12235 = vst [vmem:[#allocation39_spill] sm:$0xff] %v11195_v31  ;;  %v11199_v25 = vadd.f32 %v5284_v0, %v4919_v36  ;;  %v11203_v42 = vadd.f32 %v5277_v53, %v4922_v37  ;;  %v11209_v61 = vld [vmem:[#allocation5 + $0x2f8] sm:$0xff] }
 0x2f8   :  { %v11201_v16 = vadd.f32 %v5292_v33, %v4920_v60  ;;  %12236 = vst [vmem:[#allocation40_spill] sm:$0xff] %v11205_v8  ;;  %12238 = vst [vmem:[#allocation42_spill] sm:$0xff] %v11209_v61  ;;  %v11213_v22 = vadd.f32 %v5291_v21, %v4923_v17  ;;  %v11215_v9 = vadd.f32 %v5293_v32, %v4924_v49  ;;  %v5542_v60 = vpop.f32.mrb[41].mxu0 }
 0x2f9   :  { %v11211_v45 = vadd.f32 %v5294_v30, %v4921_v58  ;;  %v11217_v52 = vadd.f32 %v5295_v29, %v4925_v34  ;;  %v4436_v0 = vcombine.low %v11099_v1, %v11109_v26  ;;  %v5296_v53 = vcombine.low %v11119_v50, %v11125_v54 }
 0x2fa   :  { %v5565_v37 = vcombine.low %v5534_v23, %v5536_v2  ;;  %v5566_v36 = vcombine.high %v5534_v23, %v5536_v2  ;;  %v5615_v33 = vcombine.low %v5540_v19, %v5542_v60  ;;  %v5616_v12 = vcombine.high %v5540_v19, %v5542_v60  ;;  %v11239_v34 = vpop.f32.mrb[42].mxu0 }
 0x2fb   :  { %12239 = vst [vmem:[#allocation43_spill] sm:$0xff] %v11217_v52  ;;  %v4443_v49 = vrot.slane %v4436_v0, %v9680_v48  ;;  %v5303_v32 = vrot.slane %v5296_v53, %v9680_v48  ;;  %v4868_v50 = vrot.slane %v11051_v40, %v9680_v48  ;;  %v12240_v54 = vcombine.high %v11051_v40, %v11051_v40  ;;  %v11243_v53 = vpop.f32.mrb[43].mxu0 }
 0x2fc   :  { %v5573_v1 = vrot.slane %v5565_v37, %v9680_v48  ;;  %v5580_v26 = vrot.slane %v5566_v36, %v9680_v48  ;;  %v5623_v2 = vrot.slane %v5615_v33, %v9680_v48  ;;  %v5630_v58 = vrot.slane %v5616_v12, %v9680_v48 }
 0x2fd   :  { %v4875_v23 = vrot.slane %v12240_v54, %v9680_v48  ;;  %v4444_v30 = vcombine.high %v4443_v49, %v4443_v49  ;;  %v4451_v29 = vrot.slane %v4443_v49, %v9680_v48  ;;  %v5304_v19 = vcombine.high %v5303_v32, %v5303_v32 }
 0x2fe   :  { %v5311_v0 = vrot.slane %v5303_v32, %v9680_v48  ;;  %v5581_v37 = vcombine.high %v5573_v1, %v5573_v1  ;;  %v5582_v36 = vcombine.high %v5580_v26, %v5580_v26  ;;  %v5589_v60 = vrot.slane %v5573_v1, %v9680_v48  ;;  %v11251_v61 = vpop.f32.mrb[44].mxu0 }
 0x2ff   :  { %v5596_v40 = vrot.slane %v5580_v26, %v9680_v48  ;;  %v4458_v33 = vrot.slane %v4444_v30, %v9680_v48  ;;  %v4926_v54 = vadd.f32 %v4868_v50, %v4451_v29  ;;  %v5318_v12 = vrot.slane %v5304_v19, %v9680_v48  ;;  %v11257_v30 = vpop.f32.mrb[45].mxu0 }
 0x300   :  { %v5631_v17 = vcombine.high %v5623_v2, %v5623_v2  ;;  %v5603_v21 = vrot.slane %v5581_v37, %v9680_v48  ;;  %v5610_v49 = vrot.slane %v5582_v36, %v9680_v48  ;;  %v5611_v28 = vcombine.high %v5589_v60, %v5589_v60 }
 0x301   :  { %v5612_v32 = vcombine.high %v5596_v40, %v5596_v40  ;;  %v4927_v31 = vadd.f32 %v4875_v23, %v4458_v33  ;;  %v11253_v8 = vadd.f32 %v5311_v0, %v4926_v54  ;;  %v5764_v1 = vadd.f32 %v5589_v60, %v11101_v24  ;;  %v11266_v33 = vld [vmem:[#allocation5 + $0x270] sm:$0xff]  ;;  %v11268_v24 = vld [vmem:[#allocation5 + $0x278] sm:$0xff] }
 0x302   :  { %v5768_v26 = vadd.f32 %v5596_v40, %v11107_v51  ;;  %v5613_v50 = vcombine.high %v5603_v21, %v5603_v21  ;;  %v5614_v29 = vcombine.high %v5610_v49, %v5610_v49  ;;  %v5765_v19 = vadd.f32 %v5603_v21, %v11103_v27 }
 0x303   :  { %v5766_v37 = vadd.f32 %v5611_v28, %v11105_v18  ;;  %v11261_v36 = vadd.f32 %v5318_v12, %v4927_v31  ;;  %v5769_v52 = vadd.f32 %v5610_v49, %v11113_v35  ;;  %v5770_v23 = vadd.f32 %v5612_v32, %v11115_v55 }
 0x304   :  { %v5858_v0 = vmul.f32 %v10875_v62, %v5764_v1  ;;  %v5767_v51 = vadd.f32 %v5613_v50, %v11111_v4  ;;  %v5771_v60 = vadd.f32 %v5614_v29, %v11117_v5  ;;  %v5859_v27 = vmul.f32 %v10887_v11, %v5765_v19  ;;  %v12241_v5 = vld [vmem:[#allocation38_spill] sm:$0xff] }
 0x305   :  { %v5860_v18 = vmul.f32 %v10898_v56, %v5766_v37  ;;  %v5862_v31 = vmul.f32 %v10878_v14, %v5768_v26  ;;  %v5863_v35 = vmul.f32 %v10890_v59, %v5769_v52  ;;  %v5864_v55 = vmul.f32 %v10902_v38, %v5770_v23 }
 0x306   :  { %v11278_v28 = vadd.f32 %v10881_v39, %v5858_v0  ;;  %v5861_v21 = vmul.f32 %v10936_v41, %v5767_v51  ;;  %v11282_v40 = vadd.f32 %v10893_v47, %v5859_v27  ;;  %v5632_v4 = vcombine.high %v5630_v58, %v5630_v58 }
 0x307   :  { %v11287_v54 = vadd.f32 %v10915_v57, %v5860_v18  ;;  %v11290_v12 = vadd.f32 %v10884_v20, %v5862_v31  ;;  %v11293_v52 = vadd.f32 %v10905_v44, %v5863_v35  ;;  %v11296_v49 = vadd.f32 %v10919_v63, %v5864_v55 }
 0x308   :  { %v5639_v32 = vrot.slane %v5623_v2, %v9680_v48  ;;  %v5646_v1 = vrot.slane %v5630_v58, %v9680_v48  ;;  %v5653_v26 = vrot.slane %v5631_v17, %v9680_v48  ;;  %v5660_v50 = vrot.slane %v5632_v4, %v9680_v48 }
 0x309   :  { %v5978_v29 = vmax.f32 %v11278_v28, 0.0  ;;  %v5665_v37 = vcombine.low %v11239_v34, %v11243_v53  ;;  %v5666_v23 = vcombine.high %v11239_v34, %v11243_v53 }
 0x30a   :  { %v5661_v0 = vcombine.high %v5639_v32, %v5639_v32  ;;  %v5662_v51 = vcombine.high %v5646_v1, %v5646_v1  ;;  %v5663_v27 = vcombine.high %v5653_v26, %v5653_v26  ;;  %v5664_v2 = vcombine.high %v5660_v50, %v5660_v50 }
 0x30b   :  { %v5772_v58 = vadd.f32 %v5639_v32, %v11155_v13  ;;  %v5773_v17 = vadd.f32 %v5653_v26, %v11157_v43  ;;  %v5776_v18 = vadd.f32 %v5646_v1, %v11161_v10  ;;  %v5777_v31 = vadd.f32 %v5660_v50, %v11165_v15  ;;  %v12242_v32 = vld [vmem:[#allocation20_spill] sm:$0xff] }
 0x30c   :  { %v5774_v35 = vadd.f32 %v5661_v0, %v11159_v46  ;;  %v5775_v55 = vadd.f32 %v5663_v27, %v11163_v6  ;;  %v5778_v4 = vadd.f32 %v5662_v51, %v11167_v3  ;;  %v5779_v34 = vadd.f32 %v5664_v2, %v12241_v5 }
 0x30d   :  { %v5866_v53 = vmul.f32 %v10875_v62, %v5772_v58  ;;  %v5867_v19 = vmul.f32 %v10887_v11, %v5773_v17  ;;  %v5870_v13 = vmul.f32 %v10878_v14, %v5776_v18  ;;  %v5871_v43 = vmul.f32 %v10875_v62, %v5777_v31 }
 0x30e   :  { %v5868_v10 = vmul.f32 %v10898_v56, %v5774_v35  ;;  %v5872_v15 = vmul.f32 %v10887_v11, %v5778_v4  ;;  %v5873_v46 = vmul.f32 %v10898_v56, %v5779_v34  ;;  %v5865_v6 = vmul.f32 %v12242_v32, %v5771_v60 }
 0x30f   :  { %v11325_v3 = vmul.f32 %v10936_v41, %v5775_v55  ;;  %v11328_v5 = vadd.f32 %v10881_v39, %v5866_v53  ;;  %v11331_v1 = vadd.f32 %v10893_v47, %v5867_v19  ;;  %v11334_v26 = vadd.f32 %v10884_v20, %v5870_v13 }
 0x310   :  { %v5962_v50 = vadd.f32 %v10915_v57, %v5868_v10  ;;  %v11338_v0 = vadd.f32 %v10881_v39, %v5871_v43  ;;  %v5967_v51 = vadd.f32 %v10915_v57, %v5873_v46  ;;  %v5673_v60 = vrot.slane %v5665_v37, %v9680_v48 }
 0x311   :  { %v11343_v27 = vadd.f32 %v10893_v47, %v5872_v15  ;;  %v5986_v2 = vmax.f32 %v11328_v5, 0.0  ;;  %v5680_v19 = vrot.slane %v5666_v23, %v9680_v48  ;;  %v5715_v58 = vcombine.low %v11251_v61, %v11257_v30  ;;  %v12243_v61 = vld [vmem:[#allocation16_spill] sm:$0xff] }
 0x312   :  { %v11349_v17 = vmax.f32 %v5962_v50, 0.0  ;;  %v5990_v18 = vmax.f32 %v11334_v26, 0.0  ;;  %v5681_v31 = vcombine.high %v5673_v60, %v5673_v60  ;;  %v5689_v35 = vrot.slane %v5673_v60, %v9680_v48 }
 0x313   :  { %v11353_v55 = vmax.f32 %v5967_v51, 0.0  ;;  %v5682_v37 = vcombine.high %v5680_v19, %v5680_v19  ;;  %v5696_v4 = vrot.slane %v5680_v19, %v9680_v48  ;;  %v5722_v34 = vrot.slane %v5715_v58, %v9680_v48 }
 0x314   :  { %v5703_v53 = vrot.slane %v5681_v31, %v9680_v48  ;;  %v5711_v23 = vcombine.high %v5689_v35, %v5689_v35  ;;  %v5780_v13 = vadd.f32 %v5689_v35, %v11197_v7  ;;  %v5955_v30 = vadd.f32 %v12243_v61, %v5861_v21 }
 0x315   :  { %v5710_v43 = vrot.slane %v5682_v37, %v9680_v48  ;;  %v5712_v10 = vcombine.high %v5696_v4, %v5696_v4  ;;  %v5784_v15 = vadd.f32 %v5696_v4, %v11203_v42  ;;  %v5723_v46 = vcombine.high %v5722_v34, %v5722_v34 }
 0x316   :  { %v5713_v50 = vcombine.high %v5703_v53, %v5703_v53  ;;  %v5781_v51 = vadd.f32 %v5703_v53, %v11199_v25  ;;  %v5782_v60 = vadd.f32 %v5711_v23, %v11201_v16  ;;  %v5874_v19 = vmul.f32 %v10936_v41, %v5780_v13  ;;  %v12244_v25 = vld [vmem:[#allocation43_spill] sm:$0xff] }
 0x317   :  { %v5714_v58 = vcombine.high %v5710_v43, %v5710_v43  ;;  %v5785_v31 = vadd.f32 %v5710_v43, %v11213_v22  ;;  %v5786_v7 = vadd.f32 %v5712_v10, %v11215_v9  ;;  %v5878_v21 = vmul.f32 %v12242_v32, %v5784_v15  ;;  %v12245_v22 = vld [vmem:[#allocation25_spill] sm:$0xff] }
 0x318   :  { %v5783_v35 = vadd.f32 %v5713_v50, %v11211_v45  ;;  %v5875_v37 = vmul.f32 %v10878_v14, %v5781_v51  ;;  %v5876_v42 = vmul.f32 %v10890_v59, %v5782_v60  ;;  %v11372_v4 = vadd.f32 %v12243_v61, %v5874_v19 }
 0x319   :  { %v5787_v16 = vadd.f32 %v5714_v58, %v12244_v25  ;;  %v5879_v53 = vmul.f32 %v10875_v62, %v5785_v31  ;;  %v5880_v23 = vmul.f32 %v10887_v11, %v5786_v7  ;;  %v5959_v13 = vadd.f32 %v12245_v22, %v5865_v6 }
 0x31a   :  { %v11379_v9 = vmul.f32 %v10902_v38, %v5783_v35  ;;  %v11382_v45 = vadd.f32 %v10884_v20, %v5875_v37  ;;  %v11385_v32 = vadd.f32 %v10905_v44, %v5876_v42  ;;  %v11388_v59 = vadd.f32 %v12245_v22, %v5878_v21 }
 0x31b   :  { %v11391_v43 = vmul.f32 %v10898_v56, %v5787_v16  ;;  %v11394_v62 = vadd.f32 %v10881_v39, %v5879_v53  ;;  %v11397_v11 = vadd.f32 %v10893_v47, %v5880_v23  ;;  %v5994_v38 = vmax.f32 %v11372_v4, 0.0 }
 0x31c   :  { %v5730_v6 = vrot.slane %v5722_v34, %v9680_v48  ;;  %v5737_v10 = vrot.slane %v5723_v46, %v9680_v48  ;;  %v5979_v44 = vmax.f32 %v11282_v40, 0.0  ;;  %v5980_v15 = vmax.f32 %v11287_v54, 0.0 }
 0x31d   :  { %v5981_v50 = vmax.f32 %v5955_v30, 0.0  ;;  %v5983_v56 = vmax.f32 %v11293_v52, 0.0  ;;  %v5984_v51 = vmax.f32 %v11296_v49, 0.0  ;;  %v5985_v39 = vmax.f32 %v5959_v13, 0.0 }
 0x31e   :  { %v5788_v60 = vadd.f32 %v5730_v6, %v11253_v8  ;;  %v5789_v47 = vadd.f32 %v5737_v10, %v11261_v36  ;;  %v6091_v19 = vcombine.low %v5979_v44, %v5980_v15  ;;  %v6368_v34 = vcombine.low %v5978_v29, %v5979_v44 }
 0x31f   :  { %v12246_v46 = vmax.f32 %v11290_v12, 0.0  ;;  %v6093_v40 = vcombine.low %v5983_v56, %v5984_v51  ;;  %v6094_v54 = vcombine.low %v5985_v39, %v5986_v2  ;;  %v6369_v30 = vcombine.low %v5980_v15, %v5981_v50 }
 0x320   :  { %v5882_v52 = vmul.f32 %v10936_v41, %v5788_v60  ;;  %v5883_v49 = vmul.f32 %v10878_v14, %v5789_v47  ;;  %v6101_v8 = vrot.slane %v6091_v19, %v9680_v48  ;;  %v6371_v21 = vcombine.low %v5984_v51, %v5985_v39 }
 0x321   :  { %v6092_v58 = vcombine.low %v5981_v50, %v12246_v46  ;;  %v12247_v36 = vmov %v12246_v46  ;;  %v6115_v29 = vrot.slane %v6093_v40, %v9680_v48  ;;  %v6122_v7 = vrot.slane %v6094_v54, %v9680_v48 }
 0x322   :  { %v6370_v31 = vcombine.low %v12247_v36, %v5983_v56  ;;  %v5998_v35 = vmax.f32 %v11388_v59, 0.0  ;;  %v11424_v37 = vadd.f32 %v12243_v61, %v5882_v52  ;;  %v6378_v41 = vrot.slane %v6368_v34, %v9680_v48  ;;  %v12266_v59 = vld [vmem:[#allocation13_spill] sm:$0xff] }
 0x323   :  { %v6108_v28 = vrot.slane %v6092_v58, %v9680_v48  ;;  %v11428_v14 = vrot.slane %v6369_v30, %v9680_v48  ;;  %v6125_v25 = vcombine.low %v6115_v29, %v6122_v7  ;;  %v6126_v16 = vcombine.high %v6115_v29, %v6122_v7  ;;  %v12251_v7 = vld [vmem:[#allocation35_spill] sm:$0xff] }
 0x324   :  { %v11431_v53 = vadd.f32 %v10884_v20, %v5883_v49  ;;  %v6002_v23 = vmax.f32 %v11424_v37, 0.0  ;;  %v11435_v22 = vrot.slane %v6370_v31, %v9680_v48  ;;  %v11438_v13 = vrot.slane %v6371_v21, %v9680_v48  ;;  %v12248_v31 = vld [vmem:[#allocation29_spill] sm:$0xff]  ;;  %v12252_v21 = vld [vmem:[#allocation30_spill] sm:$0xff] }
 0x325   :  { %v6123_v42 = vcombine.low %v6101_v8, %v6108_v28  ;;  %v6124_v12 = vcombine.high %v6101_v8, %v6108_v28  ;;  %v6154_v10 = vrot.slane %v6126_v16, %v9680_v48  ;;  %v6400_v44 = vcombine.low %v6378_v41, %v11428_v14  ;;  %v12288_v37 = vld [vmem:[#allocation42_spill] sm:$0xff] }
 0x326   :  { %v6401_v15 = vcombine.high %v6378_v41, %v11428_v14  ;;  %v6403_v20 = vcombine.high %v11435_v22, %v11438_v13  ;;  %v6147_v56 = vrot.slane %v6125_v25, %v9680_v48  ;;  %v6402_v51 = vcombine.low %v11435_v22, %v11438_v13 }
 0x327   :  { %v6140_v6 = vrot.slane %v6124_v12, %v9680_v48  ;;  %v6133_v50 = vrot.slane %v6123_v42, %v9680_v48  ;;  %v6410_v47 = vrot.slane %v6400_v44, %v9680_v48  ;;  %v11454_v19 = vadd.f32 %v12243_v61, %v11325_v3 }
 0x328   :  { %v6417_v60 = vrot.slane %v6401_v15, %v9680_v48  ;;  %v6431_v34 = vrot.slane %v6403_v20, %v9680_v48  ;;  %v6424_v58 = vrot.slane %v6402_v51, %v9680_v48  ;;  %v5987_v40 = vmax.f32 %v11331_v1, 0.0  ;;  %v12249_v1 = vld [vmem:[#allocation34_spill] sm:$0xff]  ;;  %v12255_v20 = vld [vmem:[#allocation36_spill] sm:$0xff] }
 0x329   :  { %v6156_v39 = vcombine.low %v6140_v6, %v6154_v10  ;;  %v6155_v46 = vcombine.low %v6133_v50, %v6147_v56  ;;  %v5989_v54 = vmax.f32 %v11454_v19, 0.0  ;;  %v5992_v30 = vmax.f32 %v11343_v27, 0.0  ;;  %v12254_v15 = vld [vmem:[#allocation14_spill] sm:$0xff]  ;;  %v12282_v19 = vld [vmem:[#allocation11_spill] sm:$0xff] }
 0x32a   :  { %v5995_v52 = vmax.f32 %v11382_v45, 0.0  ;;  %v5996_v49 = vmax.f32 %v11385_v32, 0.0  ;;  %v6433_v8 = vcombine.low %v6417_v60, %v6431_v34  ;;  %v6432_v3 = vcombine.low %v6410_v47, %v6424_v58 }
 0x32b   :  { %6350 = vmatprep.mubr.f32.mxu1 %v6156_v39  ;;  %v6157_v61 = vcombine.low %v5987_v40, %v11349_v17  ;;  %v6159_v36 = vcombine.low %v11353_v55, %v5994_v38  ;;  %v12250_v28 = vpack.c.bf16 %v12248_v31, %v12249_v1  ;;  %v6158_v27 = vcombine.low %v5989_v54, %v5992_v30 }
 0x32c   :  { %6351 = vmatmul.mubr.f32.vlgmr.msra.gmra.mrb[56].mxu1 %v6155_v46  ;;  %v6160_v29 = vcombine.low %v5995_v52, %v5996_v49  ;;  %v6434_v45 = vcombine.low %v5986_v2, %v5987_v40  ;;  %v6437_v32 = vcombine.low %v5994_v38, %v5995_v52  ;;  %6627 = vmatprep.mubr.f32.mxu0 %v6433_v8  ;;  %v5991_v25 = vmax.f32 %v11338_v0, 0.0  ;;  %v12257_v40 = vld [vmem:[#allocation31_spill] sm:$0xff] }
 0x32d   :  { %8536 = vmatpush3.bf16.msra.mxu1 %v12250_v28  ;;  %v12253_v41 = vpack.c.bf16 %v12251_v7, %v12252_v21  ;;  %v6167_v42 = vrot.slane %v6157_v61, %v9680_v48  ;;  %v6181_v12 = vrot.slane %v6159_v36, %v9680_v48  ;;  %v6436_v16 = vcombine.low %v5992_v30, %v11353_v55 }
 0x32e   :  { %6628 = vmatmul.mubr.f32.vlgmr.msra.gmra.mrb[46].mxu0 %v6432_v3  ;;  %v6174_v5 = vrot.slane %v6158_v27, %v9680_v48  ;;  %v6188_v2 = vrot.slane %v6160_v29, %v9680_v48  ;;  %v11486_v4 = vrot.slane %v6434_v45, %v9680_v48  ;;  %v11489_v38 = vrot.slane %v6437_v32, %v9680_v48  ;;  %v12260_v29 = vld [vmem:[#allocation17_spill] sm:$0xff]  ;;  %v12261_v45 = vld [vmem:[#allocation22_spill] sm:$0xff] }
 0x32f   :  { %8538 = vmatprep.subr.bf16.mxu1 %v12253_v41  ;;  %v6435_v6 = vcombine.low %v11349_v17, %v5991_v25  ;;  %v6458_v10 = vrot.slane %v6436_v16, %v9680_v48  ;;  %v5971_v0 = vadd.f32 %v10919_v63, %v11379_v9  ;;  %v5975_v44 = vadd.f32 %v10915_v57, %v11391_v43  ;;  %v12258_v63 = vld [vmem:[#allocation24_spill] sm:$0xff]  ;;  %v12264_v25 = vld [vmem:[#allocation26_spill] sm:$0xff] }
 0x330   :  { %v12256_v50 = vpack.c.bf16 %v12254_v15, %v12255_v20  ;;  %v6190_v56 = vcombine.high %v6167_v42, %v6174_v5  ;;  %v6192_v51 = vcombine.high %v6181_v12, %v6188_v2  ;;  %v6189_v39 = vcombine.low %v6167_v42, %v6174_v5 }
 0x331   :  { %v6191_v60 = vcombine.low %v6181_v12, %v6188_v2  ;;  %v6451_v47 = vrot.slane %v6435_v6, %v9680_v48  ;;  %v6469_v34 = vcombine.high %v6458_v10, %v11489_v38  ;;  %v6468_v46 = vcombine.low %v6458_v10, %v11489_v38  ;;  %v12263_v12 = vld [vmem:[#allocation15_spill] sm:$0xff] }
 0x332   :  { %8540 = vmatpush3.bf16.msra.mxu1 %v12256_v50  ;;  %v5997_v58 = vmax.f32 %v5971_v0, 0.0  ;;  %v12259_v9 = vpack.c.bf16 %v12257_v40, %v12258_v63  ;;  %v6206_v57 = vrot.slane %v6190_v56, %v9680_v48  ;;  %v6220_v43 = vrot.slane %v6192_v51, %v9680_v48 }
 0x333   :  { %v6199_v30 = vrot.slane %v6189_v39, %v9680_v48  ;;  %v6213_v52 = vrot.slane %v6191_v60, %v9680_v48  ;;  %v6467_v8 = vcombine.high %v11486_v4, %v6451_v47  ;;  %v6497_v3 = vrot.slane %v6469_v34, %v9680_v48  ;;  %v12269_v34 = vld [vmem:[#allocation27_spill] sm:$0xff] }
 0x334   :  { %8542 = vmatprep.subr.bf16.mxu1 %v12259_v9  ;;  %v6466_v61 = vcombine.low %v11486_v4, %v6451_v47  ;;  %v6490_v36 = vrot.slane %v6468_v46, %v9680_v48  ;;  %v6222_v31 = vcombine.low %v6206_v57, %v6220_v43  ;;  %v5999_v28 = vmax.f32 %v11394_v62, 0.0  ;;  %v12270_v46 = vld [vmem:[#allocation18_spill] sm:$0xff] }
 0x335   :  { %v6221_v1 = vcombine.low %v6199_v30, %v6213_v52  ;;  %v6000_v27 = vmax.f32 %v11397_v11, 0.0  ;;  %v12262_v32 = vpack.c.bf16 %v12260_v29, %v12261_v45  ;;  %v6483_v7 = vrot.slane %v6467_v8, %v9680_v48 }
 0x336   :  { %v6476_v21 = vrot.slane %v6466_v61, %v9680_v48  ;;  %v6001_v41 = vmax.f32 %v5975_v44, 0.0  ;;  %v6223_v42 = vcombine.low %v5997_v58, %v5998_v35  ;;  %v12265_v16 = vpack.c.bf16 %v12263_v12, %v12264_v25  ;;  %6355 = vmatprep.mubr.f32.mxu1 %v6222_v31  ;;  %v12272_v31 = vld [vmem:[#allocation21_spill] sm:$0xff] }
 0x337   :  { %8544 = vmatpush3.bf16.msra.mxu1 %v12262_v32  ;;  %v6224_v62 = vcombine.low %v5999_v28, %v6000_v27  ;;  %v6500_v5 = vcombine.low %v5996_v49, %v5997_v58  ;;  %v6501_v11 = vcombine.low %v5998_v35, %v5999_v28  ;;  %v6849_v2 = vcombine.high %v11428_v14, %v11435_v22  ;;  %v12267_v35 = vld [vmem:[#allocation23_spill] sm:$0xff] }
 0x338   :  { %8546 = vmatprep.subr.bf16.mxu1 %v12265_v16  ;;  %v6499_v6 = vcombine.low %v6483_v7, %v6497_v3  ;;  %6356 = vmatmul.mubr.f32.gmra.mrb[58].mxu1 %v6221_v1  ;;  %v6498_v10 = vcombine.low %v6476_v21, %v6490_v36  ;;  %v6225_v0 = vcombine.low %v6001_v41, %v6002_v23  ;;  %v6003_v51 = vmax.f32 %v11431_v53, 0.0  ;;  %v12273_v1 = vld [vmem:[#allocation12_spill] sm:$0xff]  ;;  %v12275_v7 = vld [vmem:[#allocation33_spill] sm:$0xff] }
 0x339   :  { %v6232_v44 = vrot.slane %v6223_v42, %v9680_v48  ;;  %v6239_v15 = vrot.slane %v6224_v62, %v9680_v48  ;;  %v6502_v20 = vcombine.low %v6000_v27, %v6001_v41  ;;  %v6509_v50 = vrot.slane %v6500_v5, %v9680_v48  ;;  %v12276_v21 = vld [vmem:[#allocation28_spill] sm:$0xff] }
 0x33a   :  { %v11536_v49 = vrot.slane %v6501_v11, %v9680_v48  ;;  %v12268_v56 = vpack.c.bf16 %v12266_v59, %v12267_v35  ;;  %6632 = vmatprep.mubr.f32.mxu0 %v6499_v6  ;;  %v6246_v39 = vrot.slane %v6225_v0, %v9680_v48  ;;  %v6851_v60 = vcombine.high %v11438_v13, %v11486_v4  ;;  %v12279_v0 = vld [vmem:[#allocation19_spill] sm:$0xff] }
 0x33b   :  { %v6865_v47 = vrot.slane %v6849_v2, %v9680_v48  ;;  %v12271_v58 = vpack.c.bf16 %v12269_v34, %v12270_v46  ;;  %6633 = vmatmul.mubr.f32.gmra.mrb[48].mxu0 %v6498_v10  ;;  %v6248_v40 = vcombine.high %v6232_v44, %v6239_v15  ;;  %v6523_v63 = vrot.slane %v6502_v20, %v9680_v48  ;;  %v12278_v10 = vld [vmem:[#allocation32_spill] sm:$0xff] }
 0x33c   :  { %8548 = vmatpush3.bf16.msra.mxu1 %v12268_v56  ;;  %v6525_v9 = vcombine.high %v6509_v50, %v11536_v49  ;;  %v6247_v57 = vcombine.low %v6232_v44, %v6239_v15  ;;  %v6249_v53 = vcombine.high %v6246_v39, %v6246_v39  ;;  %v6270_v43 = vrot.slane %v6246_v39, %v9680_v48  ;;  %v12284_v39 = vld [vmem:[#allocation40_spill] sm:$0xff] }
 0x33d   :  { %8550 = vmatprep.subr.bf16.mxu1 %v12271_v58  ;;  %v6524_v30 = vcombine.low %v6509_v50, %v11536_v49  ;;  %v6879_v52 = vrot.slane %v6851_v60, %v9680_v48  ;;  %v6263_v8 = vrot.slane %v6248_v40, %v9680_v48  ;;  %v6526_v3 = vcombine.high %v6523_v63, %v6523_v63  ;;  %v12285_v60 = vld [vmem:[#allocation39_spill] sm:$0xff] }
 0x33e   :  { %v6540_v61 = vrot.slane %v6525_v9, %v9680_v48  ;;  %v6256_v36 = vrot.slane %v6247_v57, %v9680_v48  ;;  %v12274_v28 = vpack.c.bf16 %v12272_v31, %v12273_v1  ;;  %v6277_v27 = vrot.slane %v6249_v53, %v9680_v48  ;;  %v7651_v31 = vld [vmem:[%s12003_s12 + $0x8] sm:$0xff] }
 0x33f   :  { %v6533_v29 = vrot.slane %v6524_v30, %v9680_v48  ;;  %v6547_v45 = vrot.slane %v6523_v63, %v9680_v48  ;;  %v6881_v32 = vcombine.low %v6865_v47, %v6879_v52  ;;  %v12277_v41 = vpack.c.bf16 %v12275_v7, %v12276_v21  ;;  %v7653_v7 = vld [vmem:[%s12003_s12 + $0x18] sm:$0xff] }
 0x340   :  { %8552 = vmatpush3.bf16.msra.mxu1 %v12274_v28  ;;  %v6554_v42 = vrot.slane %v6526_v3, %v9680_v48  ;;  %v6278_v12 = vcombine.low %v6256_v36, %v6270_v43  ;;  %v6848_v25 = vcombine.low %v11428_v14, %v11435_v22  ;;  %v6850_v16 = vcombine.low %v11438_v13, %v11486_v4  ;;  %v12281_v4 = vld [vmem:[#allocation37_spill] sm:$0xff]  ;;  %v7650_v36 = vld [vmem:[%s12003_s12] sm:$0xff] }
 0x341   :  { %8554 = vmatprep.subr.bf16.mxu1 %v12277_v41  ;;  %v6279_v62 = vcombine.low %v6263_v8, %v6277_v27  ;;  %v6555_v5 = vcombine.low %v6533_v29, %v6547_v45  ;;  %v6882_v11 = vcombine.low %v11349_v17, %v5989_v54  ;;  %v6883_v2 = vcombine.low %v5990_v18, %v11353_v55  ;;  %v7636_v27 = vld [vmem:[%s12002_s11 + $0x10] sm:$0xff]  ;;  %v7637_v29 = vld [vmem:[%s12002_s11 + $0x18] sm:$0xff]  ;;  %v7638_v41 = vld [vmem:[%s12002_s11 + $0x20] sm:$0xff] }
 0x342   :  { %v6556_v6 = vcombine.low %v6540_v61, %v6554_v42  ;;  %v12280_v44 = vpack.c.bf16 %v12278_v10, %v12279_v0  ;;  %v6858_v14 = vrot.slane %v6848_v25, %v9680_v48  ;;  %v6872_v22 = vrot.slane %v6850_v16, %v9680_v48  ;;  %v7634_v61 = vld [vmem:[%s12002_s11] sm:$0xff]  ;;  %v7639_v42 = vld [vmem:[%s12002_s11 + $0x28] sm:$0xff] }
 0x343   :  { %v6901_v13 = vcombine.high %v11489_v38, %v6509_v50  ;;  %6360 = vmatprep.mubr.f32.mxu1 %v6279_v62  ;;  %v12283_v15 = vpack.c.bf16 %v12281_v4, %v12282_v19  ;;  %v6890_v17 = vrot.slane %v6882_v11, %v9680_v48  ;;  %v6897_v26 = vrot.slane %v6883_v2, %v9680_v48  ;;  %v7655_v16 = vld [vmem:[%s12003_s12 + $0x28] sm:$0xff]  ;;  %v7640_v62 = vld [vmem:[%s12002_s11 + $0x30] sm:$0xff] }
 0x344   :  { %8556 = vmatpush3.bf16.msra.mxu1 %v12280_v44  ;;  %v6900_v18 = vcombine.low %v11489_v38, %v6509_v50  ;;  %6637 = vmatprep.mubr.f32.mxu0 %v6556_v6  ;;  %v6880_v55 = vcombine.low %v6858_v14, %v6872_v22  ;;  %v6932_v20 = vcombine.low %v6002_v23, %v6003_v51  ;;  %v12287_v46 = vmov 0.0   ;;  %v12289_v23 = vld [vmem:[#allocation41_spill] sm:$0xff]  ;;  %v7642_v44 = vld [vmem:[%s12002_s11 + $0x40] sm:$0xff]  ;;  %v7643_v14 = vld [vmem:[%s12002_s11 + $0x48] sm:$0xff] }
 0x345   :  { %8558 = vmatprep.subr.bf16.mxu1 %v12283_v15  ;;  %6361 = vmatmul.mubr.f32.gmra.mrb[60].mxu1 %v6278_v12  ;;  %v6929_v54 = vrot.slane %v6901_v13, %v9680_v48  ;;  %v6899_v59 = vcombine.high %v6890_v17, %v6897_v26  ;;  %v6898_v35 = vcombine.low %v6890_v17, %v6897_v26  ;;  %v8723_v1 = vmov 0.0|0.0   ;;  %v7654_v12 = vld [vmem:[%s12003_s12 + $0x20] sm:$0xff]  ;;  %v7656_v2 = vld [vmem:[%s12003_s12 + $0x30] sm:$0xff]  ;;  %v7657_v6 = vld [vmem:[%s12003_s12 + $0x38] sm:$0xff] }
 0x346   :  { %6638 = vmatmul.mubr.f32.gmra.mrb[50].mxu0 %v6555_v5  ;;  %7043 = vmatprep.mubr.f32.mxu1 %v6881_v32  ;;  %v6922_v56 = vrot.slane %v6900_v18, %v9680_v48  ;;  %v12286_v47 = vpack.c.bf16 %v12284_v39, %v12285_v60  ;;  %v6939_v38 = vrot.slane %v6932_v20, %v9680_v48  ;;  %v7652_v32 = vld [vmem:[%s12003_s12 + $0x10] sm:$0xff]  ;;  %v7641_v5 = vld [vmem:[%s12002_s11 + $0x38] sm:$0xff]  ;;  %v7658_v22 = vld [vmem:[%s12003_s12 + $0x40] sm:$0xff] }
 0x347   :  { %v6941_v50 = vcombine.high %v11536_v49, %v6523_v63  ;;  %v6940_v34 = vcombine.low %v11536_v49, %v6523_v63  ;;  %8271 = vmatprep.mubr.msk.f32.mxu0 %vm8721_vm0, %v12287_v46  ;;  %v12290_v51 = vpack.c.bf16 %v12288_v37, %v12289_v23  ;;  %v6915_v58 = vrot.slane %v6899_v59, %v9680_v48  ;;  %v7659_v13 = vld [vmem:[%s12003_s12 + $0x48] sm:$0xff]  ;;  %v7644_v15 = vld [vmem:[%s12002_s11 + $0x50] sm:$0xff]  ;;  %v7645_v17 = vld [vmem:[%s12002_s11 + $0x58] sm:$0xff] }
 0x348   :  { %8560 = vmatpush3.bf16.msra.mxu1 %v12286_v47  ;;  %v6908_v40 = vrot.slane %v6898_v35, %v9680_v48  ;;  %v6942_v9 = vcombine.high %v6939_v38, %v6939_v38  ;;  %v6963_v53 = vrot.slane %v6939_v38, %v9680_v48  ;;  %v12291_v49 = vpack.c.bf16 %v11268_v24, %v11266_v33  ;;  %v7635_v33 = vld [vmem:[%s12002_s11 + $0x8] sm:$0xff]  ;;  %v7660_v26 = vld [vmem:[%s12003_s12 + $0x50] sm:$0xff]  ;;  %v7661_v18 = vld [vmem:[%s12003_s12 + $0x58] sm:$0xff] }
 0x349   :  { %8562 = vmatprep.subr.bf16.mxu1 %v12290_v51  ;;  %v6949_v57 = vrot.slane %v6940_v34, %v9680_v48  ;;  %v6931_v43 = vcombine.low %v6915_v58, %v6929_v54  ;;  %v6956_v63 = vrot.slane %v6941_v50, %v9680_v48  ;;  %v8590_v24 = vpack.c.bf16 %v7635_v33, %v7634_v61  ;;  %v7646_v20 = vld [vmem:[%s12002_s11 + $0x60] sm:$0xff]  ;;  %v7647_v59 = vld [vmem:[%s12002_s11 + $0x68] sm:$0xff]  ;;  %v7648_v47 = vld [vmem:[%s12002_s11 + $0x70] sm:$0xff] }
 0x34a   :  { %v6930_v30 = vcombine.low %v6908_v40, %v6922_v56  ;;  %v6970_v52 = vrot.slane %v6942_v9, %v9680_v48  ;;  %8565 = vmatprep.subr.bf16.mxu0 %v8723_v1  ;;  %v8566_v28 = vpack.c.bf16 %v7651_v31, %v7650_v36  ;;  %v8593_v45 = vpack.c.bf16 %v7637_v29, %v7636_v27  ;;  %v7662_v35 = vld [vmem:[%s12003_s12 + $0x60] sm:$0xff]  ;;  %v7663_v56 = vld [vmem:[%s12003_s12 + $0x68] sm:$0xff]  ;;  %v7649_v38 = vld [vmem:[%s12002_s11 + $0x78] sm:$0xff] }
 0x34b   :  { %v6971_v8 = vcombine.low %v6949_v57, %v6963_v53  ;;  %v8569_v21 = vpack.c.bf16 %v7653_v7, %v7652_v32  ;;  %v8596_v25 = vpack.c.bf16 %v7639_v42, %v7638_v41  ;;  %v8572_v11 = vpack.c.bf16 %v7655_v16, %v7654_v12  ;;  %v7664_v50 = vld [vmem:[%s12003_s12 + $0x70] sm:$0xff]  ;;  %v7665_v34 = vld [vmem:[%s12003_s12 + $0x78] sm:$0xff]  ;;  %v7633_v23 = vld [vmem:[%s11992_s1] sm:$0x3] }
 0x34c   :  { %8564 = vmatpush3.bf16.msra.mxu1 %v12291_v49  ;;  %v6972_v3 = vcombine.low %v6956_v63, %v6970_v52  ;;  %8567 = vmatpush3.bf16.msra.mxu0 %v8566_v28  ;;  %v8599_v10 = vpack.c.bf16 %v7641_v5, %v7640_v62  ;;  %v8575_v0 = vpack.c.bf16 %v7657_v6, %v7656_v2  ;;  %v7896_v61 = vld [vmem:[%s12001_s10] ss:$0 sm:$0xff] }
 0x34d   :  { %8589 = vmatprep.subr.bf16.mxu1 %v8723_v1  ;;  %8568 = vmatprep.subr.bf16.mxu0 %v8723_v1  ;;  %v8602_v4 = vpack.c.bf16 %v7643_v14, %v7642_v44  ;;  %v8578_v19 = vpack.c.bf16 %v7659_v13, %v7658_v22  ;;  %v8581_v54 = vpack.c.bf16 %v7661_v18, %v7660_v26 }
 0x34e   :  { %v8608_v39 = vpack.c.bf16 %v7647_v59, %v7646_v20  ;;  %v8584_v60 = vpack.c.bf16 %v7663_v56, %v7662_v35  ;;  %v8587_v37 = vpack.c.bf16 %v7665_v34, %v7664_v50  ;;  %v7342_v31 = vcombine.high %v7896_v61, %v7896_v61 }
 0x34f   :  { %7044 = vmatmul.mubr.f32.vlgmr.msra.gmra.mrb[62].mxu1 %v6880_v55  ;;  %v8605_v55 = vpack.c.bf16 %v7645_v17, %v7644_v15  ;;  %v7349_v27 = vrot.slane %v7896_v61, %v9680_v48 }
 0x350   :  { %7048 = vmatprep.mubr.f32.mxu1 %v6931_v43  ;;  %8591 = vmatpush3.bf16.msra.mxu1 %v8590_v24  ;;  %v7356_v7 = vrot.slane %v7342_v31, %v9680_v48 }
 0x351   :  { %8592 = vmatprep.subr.bf16.mxu1 %v8723_v1  ;;  %8570 = vmatpush3.bf16.msra.mxu0 %v8569_v21  ;;  %v7357_v5 = vcombine.high %v7349_v27, %v7349_v27 }
 0x352   :  { %8571 = vmatprep.subr.bf16.mxu0 %v8723_v1  ;;  %v7358_v22 = vcombine.high %v7356_v7, %v7356_v7  ;;  %v11761_v26 = vrot.slane %v7356_v7, %v9680_v48 }
 0x353   :  { %7049 = vmatmul.mubr.f32.gmra.mrb[64].mxu1 %v6930_v30  ;;  %v11764_v18 = vrot.slane %v7357_v5, %v9680_v48 }
 0x354   :  { %7053 = vmatprep.mubr.f32.mxu1 %v6972_v3  ;;  %8594 = vmatpush3.bf16.msra.mxu1 %v8593_v45 }
 0x355   :  { %8595 = vmatprep.subr.bf16.mxu1 %v8723_v1  ;;  %8573 = vmatpush3.bf16.msra.mxu0 %v8572_v11  ;;  %v11746_v11 = vrot.slane %v7349_v27, %v9680_v48 }
 0x356   :  { %8574 = vmatprep.subr.bf16.mxu0 %v8723_v1 }
 0x357   :  { %7054 = vmatmul.mubr.f32.gmra.mrb[66].mxu1 %v6971_v8  ;;  %v7895_v8 = vld [vmem:[%s12000_s9] ss:$0 sm:$0xff] }
 0x358   :  { %8306 = vmatprep.mubr.msk.f32.mxu1 %vm8721_vm0, %v12287_v46  ;;  %8597 = vmatpush3.bf16.msra.mxu1 %v8596_v25  ;;  %v8611_v46 = vpack.c.bf16 %v7649_v38, %v7648_v47  ;;  %v7257_v24 = vcombine.high %v7895_v8, %v7895_v8  ;;  %v7264_v28 = vrot.slane %v7895_v8, %v9680_v48 }
 0x359   :  { %8598 = vmatprep.subr.bf16.mxu1 %v8723_v1  ;;  %8576 = vmatpush3.bf16.msra.mxu0 %v8575_v0  ;;  %v11780_v47 = vrot.slane %v7358_v22, %v9680_v48 }
 0x35a   :  { %8577 = vmatprep.subr.bf16.mxu0 %v8723_v1  ;;  %v7271_v29 = vrot.slane %v7257_v24, %v9680_v48  ;;  %v7272_v25 = vcombine.high %v7264_v28, %v7264_v28  ;;  %v11743_v62 = vrot.slane %v7264_v28, %v9680_v48 }
 0x35b   :  { %v11820_v8 = vcombine.high %v11780_v47, %v11780_v47 }
 0x35c   :  { %8600 = vmatpush3.bf16.msra.mxu1 %v8599_v10  ;;  %v7273_v0 = vcombine.high %v7271_v29, %v7271_v29  ;;  %v11751_v14 = vrot.slane %v7271_v29, %v9680_v48  ;;  %v11754_v15 = vrot.slane %v7272_v25, %v9680_v48  ;;  %v11758_v17 = vcombine.high %v11743_v62, %v11743_v62 }
 0x35d   :  { %8601 = vmatprep.subr.bf16.mxu1 %v8723_v1  ;;  %8579 = vmatpush3.bf16.msra.mxu0 %v8578_v19 }
 0x35e   :  { %8580 = vmatprep.subr.bf16.mxu0 %v8723_v1  ;;  %v11772_v35 = vrot.slane %v7273_v0, %v9680_v48 }
 0x360   :  { %8603 = vmatpush3.bf16.msra.mxu1 %v8602_v4 }
 0x361   :  { %8604 = vmatprep.subr.bf16.mxu1 %v8723_v1  ;;  %8582 = vmatpush3.bf16.msra.mxu0 %v8581_v54 }
 0x362   :  { %8583 = vmatprep.subr.bf16.mxu0 %v8723_v1 }
 0x364   :  { %8606 = vmatpush3.bf16.msra.mxu1 %v8605_v55  ;;  %v11768_v55 = vcombine.high %v11746_v11, %v11746_v11 }
 0x365   :  { %8607 = vmatprep.subr.bf16.mxu1 %v8723_v1  ;;  %8585 = vmatpush3.bf16.msra.mxu0 %v8584_v60  ;;  %v11777_v60 = vcombine.high %v11751_v14, %v11751_v14 }
 0x366   :  { %8586 = vmatprep.subr.bf16.mxu0 %v8723_v1 }
 0x368   :  { %8609 = vmatpush3.bf16.msra.mxu1 %v8608_v39 }
 0x369   :  { %8610 = vmatprep.subr.bf16.mxu1 %v8723_v1  ;;  %8588 = vmatpush3.bf16.msra.mxu0 %v8587_v37  ;;  %v11789_v37 = vcombine.high %v11754_v15, %v11754_v15 }
 0x36c   :  { %8612 = vmatpush3.bf16.msra.mxu1 %v8611_v46 }
 0x36f   :  { %8307 = vmatmul.mubr.f32.vlgmr.msra.gmra.mrb[68].mxu1 %v7633_v23 }
 0x3ff   :  { %v7978_v51 = vpop.f32.mrb[56].mxu1 }
 0x400   :  { %v7979_v58 = vpop.f32.mrb[57].mxu1 }
 0x401   :  { %v7980_v40 = vadd.f32 %v7979_v58, %v7978_v51  ;;  %v8019_v9 = vpop.f32.mrb[46].mxu0 }
 0x402   :  { %v8020_v57 = vpop.f32.mrb[47].mxu0 }
 0x403   :  { %v8021_v53 = vadd.f32 %v8020_v57, %v8019_v9  ;;  %v11803_v9 = vcombine.high %v11764_v18, %v11764_v18 }
 0x405   :  { %v6630_v43 = vadd.f32 %v8021_v53, %v7980_v40  ;;  %v11799_v40 = vcombine.high %v11761_v26, %v11761_v26 }
 0x407   :  { %v6646_v1 = vcombine.high %v6630_v43, %v6630_v43  ;;  %v6653_v21 = vrot.slane %v6630_v43, %v9680_v48 }
 0x409   :  { %v6660_v41 = vrot.slane %v6646_v1, %v9680_v48  ;;  %v6661_v13 = vcombine.high %v6653_v21, %v6653_v21  ;;  %v6669_v56 = vrot.slane %v6653_v21, %v9680_v48 }
 0x40b   :  { %v7981_v30 = vpop.f32.mrb[58].mxu1  ;;  %v6662_v4 = vcombine.high %v6660_v41, %v6660_v41  ;;  %v6676_v38 = vrot.slane %v6660_v41, %v9680_v48  ;;  %v6683_v50 = vrot.slane %v6661_v13, %v9680_v48 }
 0x40c   :  { %v7982_v49 = vpop.f32.mrb[59].mxu1 }
 0x40d   :  { %v7983_v63 = vadd.f32 %v7982_v49, %v7981_v30  ;;  %v11785_v34 = vrot.slane %v6662_v4, %v9680_v48  ;;  %v11813_v30 = vcombine.high %v11772_v35, %v11772_v35  ;;  %v6691_v49 = vcombine.high %v6669_v56, %v6669_v56 }
 0x40e   :  { %v8022_v52 = vpop.f32.mrb[48].mxu0  ;;  %v6693_v61 = vcombine.high %v6683_v50, %v6683_v50 }
 0x40f   :  { %v8023_v3 = vpop.f32.mrb[49].mxu0 }
 0x410   :  { %v8024_v33 = vadd.f32 %v8023_v3, %v8022_v52  ;;  %v6692_v3 = vcombine.high %v6676_v38, %v6676_v38 }
 0x412   :  { %v6635_v36 = vadd.f32 %v8024_v33, %v7983_v63  ;;  %v6694_v33 = vcombine.high %v11785_v34, %v11785_v34 }
 0x414   :  { %v6695_v45 = vcombine.high %v6635_v36, %v6635_v36  ;;  %v6702_v2 = vrot.slane %v6635_v36, %v9680_v48 }
 0x416   :  { %v6709_v44 = vrot.slane %v6695_v45, %v9680_v48  ;;  %v6710_v54 = vcombine.high %v6702_v2, %v6702_v2  ;;  %v11792_v23 = vrot.slane %v6702_v2, %v9680_v48 }
 0x418   :  { %v7984_v32 = vpop.f32.mrb[60].mxu1  ;;  %v6711_v39 = vcombine.high %v6709_v44, %v6709_v44  ;;  %v11795_v51 = vrot.slane %v6709_v44, %v9680_v48  ;;  %v11806_v57 = vrot.slane %v6710_v54, %v9680_v48  ;;  %v6740_v31 = vcombine.high %v11792_v23, %v11792_v23 }
 0x419   :  { %v8025_v42 = vpop.f32.mrb[50].mxu0  ;;  %v7985_v12 = vpop.f32.mrb[61].mxu1 }
 0x41a   :  { %v8026_v16 = vpop.f32.mrb[51].mxu0  ;;  %v7986_v6 = vadd.f32 %v7985_v12, %v7984_v32  ;;  %v11816_v63 = vrot.slane %v6711_v39, %v9680_v48  ;;  %v6741_v1 = vcombine.high %v11795_v51, %v11795_v51  ;;  %v6742_v45 = vcombine.high %v11806_v57, %v11806_v57 }
 0x41b   :  { %v8027_v10 = vadd.f32 %v8026_v16, %v8025_v42 }
 0x41c   :  { %v6743_v41 = vcombine.high %v11816_v63, %v11816_v63 }
 0x41d   :  { %v6640_v19 = vadd.f32 %v8027_v10, %v7986_v6 }
 0x41f   :  { %v6744_v20 = vcombine.high %v6640_v19, %v6640_v19  ;;  %v6751_v59 = vrot.slane %v6640_v19, %v9680_v48 }
 0x421   :  { %v11809_v53 = vrot.slane %v6744_v20, %v9680_v48  ;;  %v6759_v43 = vcombine.high %v6751_v59, %v6751_v59  ;;  %v11825_v24 = vrot.slane %v6751_v59, %v9680_v48 }
 0x422   :  { %v8060_v46 = vpop.f32.mrb[62].mxu1 }
 0x423   :  { %v8061_v58 = vpop.f32.mrb[63].mxu1  ;;  %v6760_v32 = vcombine.high %v11809_v53, %v11809_v53  ;;  %v11837_v7 = vrot.slane %v6759_v43, %v9680_v48  ;;  %v6774_v16 = vrot.slane %v11809_v53, %v9680_v48  ;;  %v6789_v5 = vcombine.high %v11825_v24, %v11825_v24 }
 0x424   :  { %v8062_v52 = vadd.f32 %v8061_v58, %v8060_v46 }
 0x425   :  { %v11855_v19 = vrot.slane %v6760_v32, %v9680_v48  ;;  %v6790_v54 = vcombine.high %v11837_v7, %v11837_v7 }
 0x426   :  { %v8063_v36 = vpop.f32.mrb[64].mxu1  ;;  %v7062_v28 = vcombine.high %v8062_v52, %v8062_v52  ;;  %v7069_v27 = vrot.slane %v8062_v52, %v9680_v48 }
 0x427   :  { %v8064_v29 = vpop.f32.mrb[65].mxu1 }
 0x428   :  { %v8065_v21 = vadd.f32 %v8064_v29, %v8063_v36  ;;  %v7076_v42 = vrot.slane %v7062_v28, %v9680_v48  ;;  %v7077_v12 = vcombine.high %v7069_v27, %v7069_v27  ;;  %v7085_v25 = vrot.slane %v7069_v27, %v9680_v48 }
 0x42a   :  { %v7111_v2 = vcombine.high %v8065_v21, %v8065_v21  ;;  %v7118_v6 = vrot.slane %v8065_v21, %v9680_v48  ;;  %v11848_v10 = vpop.f32.mrb[66].mxu1  ;;  %v7078_v0 = vcombine.high %v7076_v42, %v7076_v42  ;;  %v7092_v44 = vrot.slane %v7076_v42, %v9680_v48 }
 0x42b   :  { %v7099_v22 = vrot.slane %v7077_v12, %v9680_v48  ;;  %v7107_v13 = vcombine.high %v7085_v25, %v7085_v25  ;;  %v11852_v4 = vpop.f32.mrb[67].mxu1  ;;  %v7229_v20 = vadd.f32 %v7085_v25, %v6669_v56 }
 0x42c   :  { %v7125_v59 = vrot.slane %v7111_v2, %v9680_v48  ;;  %v7106_v39 = vrot.slane %v7078_v0, %v9680_v48  ;;  %v7108_v46 = vcombine.high %v7092_v44, %v7092_v44  ;;  %v7233_v36 = vadd.f32 %v7092_v44, %v6676_v38 }
 0x42d   :  { %v7109_v58 = vcombine.high %v7099_v22, %v7099_v22  ;;  %v7230_v43 = vadd.f32 %v7099_v22, %v6683_v50  ;;  %v7231_v52 = vadd.f32 %v7107_v13, %v6691_v49  ;;  %v7314_v28 = vmul.f32 %v11743_v62, %v7229_v20 }
 0x42e   :  { %v7126_v27 = vcombine.high %v7118_v6, %v7118_v6  ;;  %v7110_v29 = vcombine.high %v7106_v39, %v7106_v39  ;;  %v7234_v32 = vadd.f32 %v7106_v39, %v11785_v34  ;;  %v7235_v42 = vadd.f32 %v7108_v46, %v6692_v3 }
 0x42f   :  { %v7232_v21 = vadd.f32 %v7109_v58, %v6693_v61  ;;  %v7315_v12 = vmul.f32 %v11754_v15, %v7230_v43  ;;  %v7316_v56 = vmul.f32 %v11758_v17, %v7231_v52  ;;  %v7318_v25 = vmul.f32 %v11751_v14, %v7233_v36 }
 0x430   :  { %v7399_v2 = vadd.f32 %v11746_v11, %v7314_v28  ;;  %v11867_v0 = vadd.f32 %v7110_v29, %v6694_v33  ;;  %v7319_v50 = vmul.f32 %v11772_v35, %v7234_v32  ;;  %v7127_v49 = vcombine.high %v7125_v59, %v7125_v59 }
 0x431   :  { %v7317_v38 = vmul.f32 %v11789_v37, %v7232_v21  ;;  %v7400_v61 = vadd.f32 %v11764_v18, %v7315_v12  ;;  %v7401_v34 = vadd.f32 %v11768_v55, %v7316_v56  ;;  %v7403_v3 = vadd.f32 %v11761_v26, %v7318_v25 }
 0x432   :  { %v7134_v44 = vrot.slane %v7118_v6, %v9680_v48  ;;  %v7320_v22 = vmul.f32 %v11777_v60, %v7235_v42  ;;  %v7404_v33 = vadd.f32 %v11780_v47, %v7319_v50  ;;  %v7141_v20 = vrot.slane %v7125_v59, %v9680_v48 }
 0x433   :  { %v7402_v13 = vadd.f32 %v11803_v9, %v7317_v38  ;;  %v7421_v39 = vmax.f32 %v7399_v2, 0.0  ;;  %v7422_v46 = vmax.f32 %v7400_v61, 0.0  ;;  %v7423_v58 = vmax.f32 %v7401_v34, 0.0 }
 0x434   :  { %v7148_v43 = vrot.slane %v7126_v27, %v9680_v48  ;;  %v7425_v36 = vmax.f32 %v7403_v3, 0.0  ;;  %v7426_v28 = vmax.f32 %v7404_v33, 0.0  ;;  %v7155_v29 = vrot.slane %v7127_v49, %v9680_v48 }
 0x435   :  { %v7424_v52 = vmax.f32 %v7402_v13, 0.0  ;;  %v7465_v21 = vcombine.low %v7421_v39, %v7422_v46  ;;  %v7156_v6 = vcombine.high %v7134_v44, %v7134_v44  ;;  %v7157_v32 = vcombine.high %v7141_v20, %v7141_v20 }
 0x436   :  { %v7158_v42 = vcombine.high %v7148_v43, %v7148_v43  ;;  %v11881_v56 = vcombine.low %v7425_v36, %v7426_v28  ;;  %v7159_v25 = vcombine.high %v7155_v29, %v7155_v29  ;;  %v7237_v59 = vadd.f32 %v7134_v44, %v11792_v23 }
 0x437   :  { %v7466_v12 = vcombine.low %v7423_v58, %v7424_v52  ;;  %v7405_v2 = vadd.f32 %v11799_v40, %v7320_v22  ;;  %v7238_v38 = vadd.f32 %v7148_v43, %v11806_v57  ;;  %v7239_v27 = vadd.f32 %v7156_v6, %v6740_v31 }
 0x438   :  { %v7240_v50 = vadd.f32 %v7158_v42, %v6742_v45  ;;  %v7475_v49 = vrot.slane %v7465_v21, %v9680_v48  ;;  %v7241_v34 = vadd.f32 %v7141_v20, %v11795_v51  ;;  %v7242_v3 = vadd.f32 %v7155_v29, %v11816_v63 }
 0x439   :  { %v7482_v61 = vrot.slane %v7466_v12, %v9680_v48  ;;  %v7243_v44 = vadd.f32 %v7157_v32, %v6741_v1  ;;  %v7244_v23 = vadd.f32 %v7159_v25, %v6743_v41  ;;  %v7322_v31 = vmul.f32 %v11743_v62, %v7237_v59 }
 0x43a   :  { %v7323_v57 = vmul.f32 %v11754_v15, %v7238_v38  ;;  %v7324_v22 = vmul.f32 %v11758_v17, %v7239_v27  ;;  %v7325_v13 = vmul.f32 %v11743_v62, %v7240_v50  ;;  %v7326_v33 = vmul.f32 %v11754_v15, %v7241_v34 }
 0x43b   :  { %v11904_v45 = vcombine.low %v7475_v49, %v7482_v61  ;;  %v7427_v20 = vmax.f32 %v7405_v2, 0.0  ;;  %v7327_v51 = vmul.f32 %v11758_v17, %v7242_v3  ;;  %v7328_v1 = vmul.f32 %v11789_v37, %v7243_v44 }
 0x43c   :  { %v7407_v63 = vadd.f32 %v11746_v11, %v7322_v31  ;;  %v7329_v41 = vmul.f32 %v11751_v14, %v7244_v23  ;;  %v7408_v39 = vadd.f32 %v11764_v18, %v7323_v57  ;;  %v7409_v46 = vadd.f32 %v11768_v55, %v7324_v22 }
 0x43d   :  { %v7410_v58 = vadd.f32 %v11746_v11, %v7325_v13  ;;  %v7411_v43 = vadd.f32 %v11764_v18, %v7326_v33  ;;  %v7412_v52 = vadd.f32 %v11768_v55, %v7327_v51  ;;  %v7413_v36 = vadd.f32 %v11803_v9, %v7328_v1 }
 0x43e   :  { %v7429_v28 = vmax.f32 %v7407_v63, 0.0  ;;  %v7430_v29 = vmax.f32 %v7408_v39, 0.0  ;;  %v7431_v21 = vmax.f32 %v7409_v46, 0.0  ;;  %v8068_v6 = vadd.f32 %v11852_v4, %v11848_v10 }
 0x43f   :  { %v7432_v37 = vmax.f32 %v7410_v58, 0.0  ;;  %v7433_v14 = vmax.f32 %v7411_v43, 0.0  ;;  %v7434_v32 = vmax.f32 %v7412_v52, 0.0  ;;  %v7435_v42 = vmax.f32 %v7413_v36, 0.0 }
 0x440   :  { %v7321_v12 = vmul.f32 %v11813_v30, %v11867_v0  ;;  %v7514_v25 = vcombine.low %v7429_v28, %v7430_v29  ;;  %v7528_v59 = vrot.slane %v7431_v21, %v9680_v48  ;;  %v7160_v2 = vcombine.high %v8068_v6, %v8068_v6 }
 0x441   :  { %v7167_v38 = vrot.slane %v8068_v6, %v9680_v48  ;;  %v7537_v9 = vcombine.low %v7432_v37, %v7433_v14  ;;  %v7538_v27 = vcombine.low %v7434_v32, %v7435_v42  ;;  %v7414_v49 = vadd.f32 %v11761_v26, %v7329_v41 }
 0x442   :  { %v7406_v50 = vadd.f32 %v11820_v8, %v7321_v12  ;;  %v7521_v10 = vrot.slane %v7514_v25, %v9680_v48  ;;  %v7174_v4 = vrot.slane %v7160_v2, %v9680_v48  ;;  %v7489_v34 = vrot.slane %v11881_v56, %v9680_v48 }
 0x443   :  { %v7175_v61 = vcombine.high %v7167_v38, %v7167_v38  ;;  %v7183_v0 = vrot.slane %v7167_v38, %v9680_v48  ;;  %v7547_v3 = vrot.slane %v7537_v9, %v9680_v48  ;;  %v7554_v44 = vrot.slane %v7538_v27, %v9680_v48 }
 0x444   :  { %v7428_v23 = vmax.f32 %v7406_v50, 0.0  ;;  %v7529_v31 = vcombine.low %v7521_v10, %v7528_v59  ;;  %v7176_v57 = vcombine.high %v7174_v4, %v7174_v4  ;;  %v7190_v26 = vrot.slane %v7174_v4, %v9680_v48 }
 0x445   :  { %v7197_v22 = vrot.slane %v7175_v61, %v9680_v48  ;;  %v7569_v13 = vcombine.low %v7547_v3, %v7554_v44  ;;  %v7205_v33 = vcombine.high %v7183_v0, %v7183_v0  ;;  %v7245_v51 = vadd.f32 %v7183_v0, %v11825_v24 }
 0x446   :  { %v7468_v1 = vcombine.low %v7427_v20, %v7428_v23  ;;  %v7204_v63 = vrot.slane %v7176_v57, %v9680_v48  ;;  %v7436_v39 = vmax.f32 %v7414_v49, 0.0  ;;  %v7249_v58 = vadd.f32 %v7190_v26, %v6774_v16 }
 0x447   :  { %v7206_v41 = vcombine.high %v7197_v22, %v7197_v22  ;;  %v7246_v56 = vadd.f32 %v7197_v22, %v11837_v7  ;;  %v7247_v46 = vadd.f32 %v7205_v33, %v6789_v5  ;;  %v7330_v43 = vmul.f32 %v11772_v35, %v7245_v51 }
 0x448   :  { %v7496_v52 = vrot.slane %v7468_v1, %v9680_v48  ;;  %v7536_v20 = vrot.slane %v7529_v31, %v9680_v48  ;;  %v7250_v28 = vadd.f32 %v7204_v63, %v11855_v19  ;;  %v7334_v5 = vmul.f32 %v11754_v15, %v7249_v58 }
 0x449   :  { %v7248_v36 = vadd.f32 %v7206_v41, %v6790_v54  ;;  %v7331_v29 = vmul.f32 %v11777_v60, %v7246_v56  ;;  %v7332_v24 = vmul.f32 %v11813_v30, %v7247_v46  ;;  %v7415_v53 = vadd.f32 %v11780_v47, %v7330_v43 }
 0x44a   :  { %v7498_v16 = vcombine.low %v7489_v34, %v7496_v52  ;;  %v7505_v35 = vrot.slane %v11904_v45, %v9680_v48  ;;  %v7335_v37 = vmul.f32 %v11758_v17, %v7250_v28  ;;  %v7419_v60 = vadd.f32 %v11764_v18, %v7334_v5 }
 0x44b   :  { %v7333_v21 = vmul.f32 %v11743_v62, %v7248_v36  ;;  %v7416_v7 = vadd.f32 %v11799_v40, %v7331_v29  ;;  %v7417_v19 = vadd.f32 %v11820_v8, %v7332_v24  ;;  %v7437_v54 = vmax.f32 %v7415_v53, 0.0 }
 0x44c   :  { %v7512_v30 = vrot.slane %v7498_v16, %v9680_v48  ;;  %v7420_v47 = vadd.f32 %v11768_v55, %v7335_v37  ;;  %v7614_v45 = vsel %vm7613_vm10, %v7536_v20, 0.0  ;;  %v7441_v42 = vmax.f32 %v7419_v60, 0.0 }
 0x44d   :  { %v7418_v15 = vadd.f32 %v11746_v11, %v7333_v21  ;;  %v7438_v6 = vmax.f32 %v7416_v7, 0.0  ;;  %v7439_v14 = vmax.f32 %v7417_v19, 0.0  ;;  %v7539_v62 = vcombine.low %v7436_v39, %v7437_v54  ;;  %v7897_v39 = vld [vmem:[%s12004_s13] ss:$0 sm:$0xff] }
 0x44e   :  { %v7513_v32 = vcombine.low %v7505_v35, %v7512_v30  ;;  %v7442_v40 = vmax.f32 %v7420_v47, 0.0  ;;  %v7577_v49 = vrot.slane %v7569_v13, %v9680_v48 }
 0x44f   :  { %v7440_v17 = vmax.f32 %v7418_v15, 0.0  ;;  %v7540_v12 = vcombine.low %v7438_v6, %v7439_v14  ;;  %v7561_v8 = vrot.slane %v7539_v62, %v9680_v48 }
 0x450   :  { %v7615_v18 = vadd.f32 %v7614_v45, %v7513_v32  ;;  %v7600_v55 = vrot.slane %v7442_v40, %v9680_v48 }
 0x451   :  { %v7586_v25 = vcombine.low %v7440_v17, %v7441_v42  ;;  %v7568_v59 = vrot.slane %v7540_v12, %v9680_v48 }
 0x452   :  { %v7616_v2 = vrot.slane %v7615_v18, 4 }
 0x453   :  { %v7593_v11 = vrot.slane %v7586_v25, %v9680_v48  ;;  %v7570_v38 = vcombine.low %v7561_v8, %v7568_v59 }
 0x454   :  { %v7617_v9 = vadd.f32 %v7616_v2, %v7615_v18 }
 0x455   :  { %v7601_v27 = vcombine.low %v7593_v11, %v7600_v55  ;;  %v7584_v50 = vrot.slane %v7570_v38, %v9680_v48 }
 0x456   :  { %v7618_v61 = vrot.slane %v7617_v9, 2 }
 0x457   :  { %v7608_v10 = vrot.slane %v7601_v27, %v9680_v48  ;;  %v7585_v4 = vcombine.low %v7577_v49, %v7584_v50  ;;  %v7806_v48 = vpop.f32.mrb[68].mxu1 }
 0x458   :  { %v7619_v3 = vadd.f32 %v7618_v61, %v7617_v9  ;;  %v8308_v41 = vpop.f32.mrb[69].mxu1 }
 0x459   :  { %v7622_v0 = vsel %vm7613_vm10, %v7608_v10, 0.0 }
 0x45a   :  { %v7623_v34 = vadd.f32 %v7622_v0, %v7585_v4  ;;  %v7620_v31 = vrot.slane %v7619_v3, 1 }
 0x45c   :  { %v7624_v44 = vrot.slane %v7623_v34, 4  ;;  %v7621_v22 = vadd.f32 %v7620_v31, %v7619_v3 }
 0x45e   :  { %v7625_v23 = vadd.f32 %v7624_v44, %v7623_v34  ;;  %v7631_v1 = vmul.f32 0.09090909, %v7621_v22 }
 0x460   :  { %v7626_v57 = vrot.slane %v7625_v23, 2 }
 0x462   :  { %v7627_v26 = vadd.f32 %v7626_v57, %v7625_v23 }
 0x464   :  { %v7628_v33 = vrot.slane %v7627_v26, 1 }
 0x466   :  { %v7629_v51 = vadd.f32 %v7628_v33, %v7627_v26 }
 0x468   :  { %v7632_v63 = vmul.f32 0.09090909, %v7629_v51 }
 0x46a   :  { %v7668_v13 = vsel %vm152_vm2, %v7632_v63, %v7631_v1 }
 0x46b   :  { %8272 = vmatmul.mubr.f32.vlgmr.msra.gmra.mrb[52].mxu0 %v7668_v13 }
 0x53e   :  { %v7736_v56 = vpop.f32.mrb[52].mxu0 }
 0x53f   :  { %v7807_v46 = vadd.f32 %v7806_v48, %v7736_v56  ;;  %v8273_v58 = vpop.f32.mrb[53].mxu0 }
 0x541   :  { %v7817_v43 = vadd.f32 %v7897_v39, %v7807_v46 }
 0x543   :  { %7819 = vst.msk [vmem:[#allocation7] sm:$0x3] %vm7818_vm11, %v7817_v43 }
 0x544   :  { %8697 = shalt.err (!%p8694_p6)
}
 0x545   :  { %s8698_s6 = scalar_lea.hbm %s12005_s14, 32 }
 0x546   :  { %p8699_p7 = scmp.ne.s32.totalorder %s12005_s14, %s8698_s6  ;;  %p8702_p8 = scmp.lt.u32.totalorder %s8698_s6, %s12005_s14 }
 0x548   :  { %p8704_p9 = pnand %p8702_p8, %p8699_p7 }
 0x54a   :  { %8707 = shalt.err (!%p8704_p9)
}
 0x54b   :  { %7829 = dma.vmem_to_hbm [thread:$0]  %s7827_s3, 32, %s12005_s14, [#allocation4]  }
 0x54c   :  { %8712 = dma.done.wait [#allocation4], 32  }
 0x54d   :  { %8713 = vsyncadd [#allocation4], 4294967264 }
 0x54e   :  { %7833 = vsyncpa [#allocation3], 1 }
 0x54f   :  { %7834 = vsyncpa [#allocation6], 1 }
 0x550   :  { %7835 = vsyncpa [#allocation4], 1 }

</bundles_post_ra>
